<compile_context>
chip_gen: v6e
topology: v6e:2x2x1
jax: 0.10.0
libtpu: 0.0.40
codegen_flags: <defaults>
</compile_context>

<pallas_src>
import math
import jax
import jax.numpy as jnp
from jax.experimental import pallas as pl
from jax.experimental.pallas import tpu as pltpu

EMB_VOCABS  = (4, 11, 11, 9, 2, 2)        # self/left/right/traffic/interp/stop
EMB_OFFSETS = (0, 4, 15, 26, 35, 37)      # row offsets into the stacked table
V_TOTAL     = sum(EMB_VOCABS)             # 39
MH_LANES    = 48                          # multi-hot lanes (39 used, lane 47 = constant 1)
D_MODEL     = 256
MAX_LEN     = 100                         # PositionalEncoding max_len
PE_ROWS     = 200                         # lcm(8-sublane rule, L=100) -> one PE block


# ----------------------------- Pallas kernel ------------------------------- #
def lane_encoder_kernel(x_ref, pe_ref, wx_ref, wmh_ref, w1_ref, b1_ref, w2_ref, o_ref):
    f32, bf16 = jnp.float32, jnp.bfloat16
    x = x_ref[...]                                          # (T, 16), f32 or bf16
    T = x.shape[0]

    # Multi-hot over 48 lanes: OR of six disjoint one-hot masks (offsets are
    # disjoint, so OR == sum) plus a constant "bias" lane at index 47, cast once.
    iota = jax.lax.broadcasted_iota(jnp.int32, (T, MH_LANES), 1)
    idx6 = x[:, 10:16].astype(jnp.int32)                    # (T, 6) truncation == torch .int()
    mh_b = iota == (MH_LANES - 1)                           # always-on lane -> folded biases
    for j, off in enumerate(EMB_OFFSETS):
        mh_b = jnp.logical_or(mh_b, idx6[:, j:j + 1] + off == iota)
    mh = mh_b.astype(bf16)                                  # (T, 48) bf16

    # Fused first stage (no lane concat): two accumulated MXU matmuls.
    #   emb = x @ Wx(16,512) + mh @ Wmh(48,512)
    # Wmh row 47 carries the concatenated linear biases, so no bias add pass.
    emb = (jnp.dot(x.astype(bf16), wx_ref[...], preferred_element_type=f32)
           + jnp.dot(mh, wmh_ref[...], preferred_element_type=f32)).astype(bf16)

    # pointnet MLP 512 -> 384 (ReLU) -> 256; bf16 operands, f32 accumulation.
    h = jnp.maximum(
        jnp.dot(emb, w1_ref[...], preferred_element_type=f32) + b1_ref[...],
        0.0).astype(bf16)
    out = jnp.dot(h, w2_ref[...], preferred_element_type=f32)      # (T, 256) f32

    # Positional encoding + b2 (pre-folded into pe_ref, shape (200, 256)).
    # row_tile is a multiple of 200 and every tile starts at a multiple of L,
    # so a leading-dim reshape + broadcast add applies the PE period exactly.
    # Dropout(p=0.1) == identity (eval mode).
    out = out.reshape(T // PE_ROWS, PE_ROWS, D_MODEL) + pe_ref[...]
    o_ref[...] = out.reshape(T, D_MODEL).astype(o_ref.dtype)


# ----------------------------- parameter packing ---------------------------- #
def pack_fused_params(p):
    """Pack the four tiny linears + six embedding tables into two block
    matrices for the fused first stage; cast matmul weights to bf16."""
    wx = jnp.zeros((16, 512), jnp.float32)                  # continuous-feature weights
    wx = wx.at[0:3,    0:128].set(p["w_self"])
    wx = wx.at[3:6,  128:256].set(p["w_left"])
    wx = wx.at[6:9,  256:384].set(p["w_right"])
    wx = wx.at[9:10, 384:448].set(p["w_speed"])             # rows 10..15 stay zero

    wmh = jnp.zeros((MH_LANES, 512), jnp.float32)           # multi-hot weights
    wmh = wmh.at[0:V_TOTAL, 448:512].set(p["attr_table"])   # stacked embedding tables
    bcat = jnp.concatenate(
        [p["b_self"], p["b_left"], p["b_right"], p["b_speed"],
         jnp.zeros((1, 64), jnp.float32)], axis=-1)         # (1, 512); attr sum has no bias
    wmh = wmh.at[MH_LANES - 1:MH_LANES, :].set(bcat)        # biases ride the constant-1 lane

    return (wx.astype(jnp.bfloat16), wmh.astype(jnp.bfloat16),
            p["w1"].astype(jnp.bfloat16), p["b1"],
            p["w2"].astype(jnp.bfloat16))


# ----------------------------- tiling helper -------------------------------- #
def _pick_row_tile(n_rows, row_tile_max):
    """Largest multiple of 200 (= lcm(8-sublane rule, L=100 PE period)) that
    divides n_rows and is <= row_tile_max, preferring an even tile count so the
    'parallel' grid axis splits evenly across v7x's two TensorCores.  Falls back
    to padding only if no such divisor exists."""
    assert row_tile_max >= 200 and row_tile_max % 200 == 0
    divs = [t for t in range(200, min(n_rows, row_tile_max) + 1, 200)
            if n_rows % t == 0]
    even = [t for t in divs if (n_rows // t) % 2 == 0]
    if even:
        return max(even)
    if divs:
        return max(divs)
    return min(row_tile_max, 200 * pl.cdiv(n_rows, 200))    # pad path (rare)


# ----------------------------- wrapper ------------------------------------- #
def lane_encoder(x, params, *, row_tile_max=3200, out_dtype=jnp.bfloat16):
    B, M, L, C = x.shape
    assert C == 16 and L == MAX_LEN
    N = B * M * L

    row_tile = _pick_row_tile(N, row_tile_max)
    n_tiles = pl.cdiv(N, row_tile)
    n_pad = n_tiles * row_tile

    # Accept x in its native dtype (f32 or bf16); no wrapper-side cast/copy.
    x2 = x.reshape(N, C)
    if n_pad != N:                                          # only when N has no mult-of-200 divisor
        x2 = jnp.concatenate([x2, jnp.zeros((n_pad - N, C), x2.dtype)], axis=0)

    # One PE period (200 rows) with the pointnet output bias b2 pre-folded in.
    # Only (200, 256) f32 -> tiny constant VMEM residency regardless of row_tile.
    pe_b2 = jnp.tile(make_positional_encoding(L), (PE_ROWS // L, 1)) + params["b2"]

    wx, wmh, w1, b1, w2 = pack_fused_params(params)
    consts = (pe_b2, wx, wmh, w1, b1, w2)                   # constant block index -> fetched once

    def row_spec(width):
        return pl.BlockSpec((row_tile, width), lambda i: (i, 0))

    def const_spec(a):
        nd = a.ndim
        return pl.BlockSpec(a.shape, lambda i: (0,) * nd)

    out2 = pl.pallas_call(
        lane_encoder_kernel,
        out_shape=jax.ShapeDtypeStruct((n_pad, D_MODEL), out_dtype),
        grid=(n_tiles,),
        in_specs=[row_spec(C)] + [const_spec(a) for a in consts],
        out_specs=row_spec(D_MODEL),
        compiler_params=pltpu.CompilerParams(
            dimension_semantics=("parallel",),
            vmem_limit_bytes=48 * 1024 * 1024),
    )(x2, *consts)
    return out2[:N].reshape(B, M, L, D_MODEL)


# ----------------------------- parameters / pe ------------------------------ #
def make_positional_encoding(seq_len):
    position = jnp.arange(MAX_LEN, dtype=jnp.float32)[:, None]
    div_term = jnp.exp(jnp.arange(0, D_MODEL, 2, dtype=jnp.float32)
                       * (-math.log(10000.0) / D_MODEL))
    pe = jnp.zeros((MAX_LEN, D_MODEL), jnp.float32)
    pe = pe.at[:, 0::2].set(jnp.sin(position * div_term))
    pe = pe.at[:, 1::2].set(jnp.cos(position * div_term))
    return pe[:seq_len]                                     # (L, 256)


def init_params(key):
    ks = jax.random.split(key, 16)

    def linear(k, fan_in, fan_out):
        kw, kb = jax.random.split(k)
        lim = 1.0 / math.sqrt(fan_in)
        w = jax.random.uniform(kw, (fan_in, fan_out), jnp.float32, -lim, lim)
        b = jax.random.uniform(kb, (1, fan_out), jnp.float32, -lim, lim)
        return w, b

    def embedding(k, vocab, pad0):
        t = jax.random.normal(k, (vocab, 64), jnp.float32)
        if pad0:
            t = t.at[0].set(0.0)                            # padding_idx=0
        return t

    p = {}
    p["w_self"],  p["b_self"]  = linear(ks[0], 3, 128)
    p["w_left"],  p["b_left"]  = linear(ks[1], 3, 128)
    p["w_right"], p["b_right"] = linear(ks[2], 3, 128)
    p["w_speed"], p["b_speed"] = linear(ks[3], 1, 64)

    tables = [embedding(ks[4], 4, True),  embedding(ks[5], 11, True),
              embedding(ks[6], 11, True), embedding(ks[7], 9, True),
              embedding(ks[8], 2, False), embedding(ks[9], 2, False)]
    p["attr_table"] = jnp.concatenate(tables, axis=0)       # (39, 64)

    p["w1"], p["b1"] = linear(ks[10], 512, 384)
    p["w2"], p["b2"] = linear(ks[11], 384, 256)
    return p


# ----------------------------- pure-JAX reference --------------------------- #
def reference_forward(x, p, pe):
    self_line  = x[..., 0:3] @ p["w_self"]  + p["b_self"][0]
    left_line  = x[..., 3:6] @ p["w_left"]  + p["b_left"][0]
    right_line = x[..., 6:9] @ p["w_right"] + p["b_right"][0]
    speed      = x[..., 9:10] @ p["w_speed"] + p["b_speed"][0]
    lane_attr = jnp.zeros(x.shape[:-1] + (64,), jnp.float32)
    for j, off in enumerate(EMB_OFFSETS):
        idx = x[..., 10 + j].astype(jnp.int32) + off
        lane_attr = lane_attr + p["attr_table"][idx]
    emb = jnp.concatenate([self_line, left_line, right_line, speed, lane_attr], axis=-1)
    h = jnp.maximum(emb @ p["w1"] + p["b1"][0], 0.0)
    out = h @ p["w2"] + p["b2"][0]
    return out + pe                                          # (B, M, L, 256)


# ----------------------------- main ----------------------------------------- #
if __name__ == "__main__":
    key = jax.random.PRNGKey(0)
    k_in, k_par = jax.random.split(key)

    B, M, L, C = 2, 4, MAX_LEN, 16                           # (batch, lanes, points, feats)
    kc, k0, k1, k2, k3, k4, k5 = jax.random.split(k_in, 7)
    cont = jax.random.normal(kc, (B, M, L, 10), dtype=jnp.float32)
    idx_cols = [jax.random.randint(kk, (B, M, L, 1), 0, v).astype(jnp.float32)
                for kk, v in zip([k0, k1, k2, k3, k4, k5], EMB_VOCABS)]
    x = jnp.concatenate([cont] + idx_cols, axis=-1)          # (2, 4, 100, 16)

    params = init_params(k_par)
    pe = make_positional_encoding(L)

    out = jax.block_until_ready(lane_encoder(x, params))
    assert out.shape == (B, M, L, D_MODEL)

    ref = reference_forward(x, params, pe)
    diff = jnp.abs(out.astype(jnp.float32) - ref)
    rel_err = float(jnp.max(diff) / (jnp.max(jnp.abs(ref)) + 1e-6))
    assert rel_err < 2e-2, f"mismatch vs reference: rel_err={rel_err}"

    print("KERNEL_OK")
</pallas_src>

<mosaic_0001>
module attributes {stable_mosaic.version = 11 : i64} {
  func.func @lane_encoder_kernel(%arg0: i32, %arg1: memref<400x16xf32, #tpu.memory_space<vmem>>, %arg2: memref<200x256xf32, #tpu.memory_space<vmem>>, %arg3: memref<16x512xbf16, #tpu.memory_space<vmem>>, %arg4: memref<48x512xbf16, #tpu.memory_space<vmem>>, %arg5: memref<512x384xbf16, #tpu.memory_space<vmem>>, %arg6: memref<1x384xf32, #tpu.memory_space<vmem>>, %arg7: memref<384x256xbf16, #tpu.memory_space<vmem>>, %arg8: memref<400x256xbf16, #tpu.memory_space<vmem>>) attributes {dimension_semantics = [#tpu.dimension_semantics<parallel>], iteration_bounds = array<i64: 2>, scalar_prefetch = 0 : i64, scratch_operands = 0 : i64, tpu.core_type = #tpu.core_type<tc>, window_params = [{transform_indices = @transform_0, window_bounds = array<i64: 400, 16>}, {pipeline_mode = #tpu.pipeline_mode<synchronous>, transform_indices = @transform_1, window_bounds = array<i64: 200, 256>}, {pipeline_mode = #tpu.pipeline_mode<synchronous>, transform_indices = @transform_2, window_bounds = array<i64: 16, 512>}, {pipeline_mode = #tpu.pipeline_mode<synchronous>, transform_indices = @transform_3, window_bounds = array<i64: 48, 512>}, {pipeline_mode = #tpu.pipeline_mode<synchronous>, transform_indices = @transform_4, window_bounds = array<i64: 512, 384>}, {pipeline_mode = #tpu.pipeline_mode<synchronous>, transform_indices = @transform_5, window_bounds = array<i64: 1, 384>}, {pipeline_mode = #tpu.pipeline_mode<synchronous>, transform_indices = @transform_6, window_bounds = array<i64: 384, 256>}, {transform_indices = @transform_7, window_bounds = array<i64: 400, 256>}]} {
    %c0 = arith.constant 0 : index
    %c0_0 = arith.constant 0 : index
    %0 = vector.load %arg1[%c0, %c0_0] : memref<400x16xf32, #tpu.memory_space<vmem>>, vector<400x16xf32>
    %1 = tpu.iota {dimensions = array<i32: 1>} : vector<400x48xi32>
    %2 = vector.extract_strided_slice %0 {offsets = [0, 10], sizes = [400, 6], strides = [1, 1]} : vector<400x16xf32> to vector<400x6xf32>
    %3 = arith.fptosi %2 : vector<400x6xf32> to vector<400x6xi32>
    %c47_i32 = arith.constant 47 : i32
    %4 = vector.broadcast %c47_i32 : i32 to vector<400x48xi32>
    %5 = arith.cmpi eq, %1, %4 : vector<400x48xi32>
    %6 = vector.extract_strided_slice %3 {offsets = [0, 0], sizes = [400, 1], strides = [1, 1]} : vector<400x6xi32> to vector<400x1xi32>
    %c0_i32 = arith.constant 0 : i32
    %7 = vector.broadcast %c0_i32 : i32 to vector<400x1xi32>
    %8 = arith.addi %6, %7 : vector<400x1xi32>
    %9 = vector.broadcast %8 : vector<400x1xi32> to vector<400x48xi32>
    %10 = arith.cmpi eq, %9, %1 : vector<400x48xi32>
    %11 = arith.ori %5, %10 : vector<400x48xi1>
    %12 = vector.extract_strided_slice %3 {offsets = [0, 1], sizes = [400, 1], strides = [1, 1]} : vector<400x6xi32> to vector<400x1xi32>
    %c4_i32 = arith.constant 4 : i32
    %13 = vector.broadcast %c4_i32 : i32 to vector<400x1xi32>
    %14 = arith.addi %12, %13 : vector<400x1xi32>
    %15 = vector.broadcast %14 : vector<400x1xi32> to vector<400x48xi32>
    %16 = arith.cmpi eq, %15, %1 : vector<400x48xi32>
    %17 = arith.ori %11, %16 : vector<400x48xi1>
    %18 = vector.extract_strided_slice %3 {offsets = [0, 2], sizes = [400, 1], strides = [1, 1]} : vector<400x6xi32> to vector<400x1xi32>
    %c15_i32 = arith.constant 15 : i32
    %19 = vector.broadcast %c15_i32 : i32 to vector<400x1xi32>
    %20 = arith.addi %18, %19 : vector<400x1xi32>
    %21 = vector.broadcast %20 : vector<400x1xi32> to vector<400x48xi32>
    %22 = arith.cmpi eq, %21, %1 : vector<400x48xi32>
    %23 = arith.ori %17, %22 : vector<400x48xi1>
    %24 = vector.extract_strided_slice %3 {offsets = [0, 3], sizes = [400, 1], strides = [1, 1]} : vector<400x6xi32> to vector<400x1xi32>
    %c26_i32 = arith.constant 26 : i32
    %25 = vector.broadcast %c26_i32 : i32 to vector<400x1xi32>
    %26 = arith.addi %24, %25 : vector<400x1xi32>
    %27 = vector.broadcast %26 : vector<400x1xi32> to vector<400x48xi32>
    %28 = arith.cmpi eq, %27, %1 : vector<400x48xi32>
    %29 = arith.ori %23, %28 : vector<400x48xi1>
    %30 = vector.extract_strided_slice %3 {offsets = [0, 4], sizes = [400, 1], strides = [1, 1]} : vector<400x6xi32> to vector<400x1xi32>
    %c35_i32 = arith.constant 35 : i32
    %31 = vector.broadcast %c35_i32 : i32 to vector<400x1xi32>
    %32 = arith.addi %30, %31 : vector<400x1xi32>
    %33 = vector.broadcast %32 : vector<400x1xi32> to vector<400x48xi32>
    %34 = arith.cmpi eq, %33, %1 : vector<400x48xi32>
    %35 = arith.ori %29, %34 : vector<400x48xi1>
    %36 = vector.extract_strided_slice %3 {offsets = [0, 5], sizes = [400, 1], strides = [1, 1]} : vector<400x6xi32> to vector<400x1xi32>
    %c37_i32 = arith.constant 37 : i32
    %37 = vector.broadcast %c37_i32 : i32 to vector<400x1xi32>
    %38 = arith.addi %36, %37 : vector<400x1xi32>
    %39 = vector.broadcast %38 : vector<400x1xi32> to vector<400x48xi32>
    %40 = arith.cmpi eq, %39, %1 : vector<400x48xi32>
    %41 = arith.ori %35, %40 : vector<400x48xi1>
    %42 = arith.extui %41 : vector<400x48xi1> to vector<400x48xi32>
    %43 = arith.sitofp %42 : vector<400x48xi32> to vector<400x48xf32>
    %44 = arith.truncf %43 : vector<400x48xf32> to vector<400x48xbf16>
    %45 = arith.truncf %0 : vector<400x16xf32> to vector<400x16xbf16>
    %c0_1 = arith.constant 0 : index
    %c0_2 = arith.constant 0 : index
    %46 = vector.load %arg3[%c0_1, %c0_2] : memref<16x512xbf16, #tpu.memory_space<vmem>>, vector<16x512xbf16>
    %cst = arith.constant dense<0.000000e+00> : vector<400x512xf32>
    %47 = tpu.matmul %45, %46, %cst {dimension_numbers = #tpu.dot_dimension_numbers<[1], [0], [0], [1], [0, 0, 1, 1], [], []>} : vector<400x16xbf16>, vector<16x512xbf16>, vector<400x512xf32> -> vector<400x512xf32>
    %c0_3 = arith.constant 0 : index
    %c0_4 = arith.constant 0 : index
    %48 = vector.load %arg4[%c0_3, %c0_4] : memref<48x512xbf16, #tpu.memory_space<vmem>>, vector<48x512xbf16>
    %cst_5 = arith.constant dense<0.000000e+00> : vector<400x512xf32>
    %49 = tpu.matmul %44, %48, %cst_5 {dimension_numbers = #tpu.dot_dimension_numbers<[1], [0], [0], [1], [0, 0, 1, 1], [], []>} : vector<400x48xbf16>, vector<48x512xbf16>, vector<400x512xf32> -> vector<400x512xf32>
    %50 = arith.addf %47, %49 : vector<400x512xf32>
    %51 = arith.truncf %50 : vector<400x512xf32> to vector<400x512xbf16>
    %c0_6 = arith.constant 0 : index
    %c0_7 = arith.constant 0 : index
    %52 = vector.load %arg5[%c0_6, %c0_7] : memref<512x384xbf16, #tpu.memory_space<vmem>>, vector<512x384xbf16>
    %cst_8 = arith.constant dense<0.000000e+00> : vector<400x384xf32>
    %53 = tpu.matmul %51, %52, %cst_8 {dimension_numbers = #tpu.dot_dimension_numbers<[1], [0], [0], [1], [0, 0, 1, 1], [], []>} : vector<400x512xbf16>, vector<512x384xbf16>, vector<400x384xf32> -> vector<400x384xf32>
    %c0_9 = arith.constant 0 : index
    %c0_10 = arith.constant 0 : index
    %54 = vector.load %arg6[%c0_9, %c0_10] : memref<1x384xf32, #tpu.memory_space<vmem>>, vector<1x384xf32>
    %55 = vector.broadcast %54 : vector<1x384xf32> to vector<400x384xf32>
    %56 = arith.addf %53, %55 : vector<400x384xf32>
    %cst_11 = arith.constant 0.000000e+00 : f32
    %57 = vector.broadcast %cst_11 : f32 to vector<400x384xf32>
    %58 = arith.maximumf %56, %57 : vector<400x384xf32>
    %59 = arith.truncf %58 : vector<400x384xf32> to vector<400x384xbf16>
    %c0_12 = arith.constant 0 : index
    %c0_13 = arith.constant 0 : index
    %60 = vector.load %arg7[%c0_12, %c0_13] : memref<384x256xbf16, #tpu.memory_space<vmem>>, vector<384x256xbf16>
    %cst_14 = arith.constant dense<0.000000e+00> : vector<400x256xf32>
    %61 = tpu.matmul %59, %60, %cst_14 {dimension_numbers = #tpu.dot_dimension_numbers<[1], [0], [0], [1], [0, 0, 1, 1], [], []>} : vector<400x384xbf16>, vector<384x256xbf16>, vector<400x256xf32> -> vector<400x256xf32>
    %62 = vector.shape_cast %61 : vector<400x256xf32> to vector<2x200x256xf32>
    %c0_15 = arith.constant 0 : index
    %c0_16 = arith.constant 0 : index
    %63 = vector.load %arg2[%c0_15, %c0_16] : memref<200x256xf32, #tpu.memory_space<vmem>>, vector<200x256xf32>
    %64 = vector.shape_cast %63 : vector<200x256xf32> to vector<1x200x256xf32>
    %65 = vector.broadcast %64 : vector<1x200x256xf32> to vector<2x200x256xf32>
    %66 = arith.addf %62, %65 : vector<2x200x256xf32>
    %67 = vector.shape_cast %66 : vector<2x200x256xf32> to vector<400x256xf32>
    %68 = arith.truncf %67 : vector<400x256xf32> to vector<400x256xbf16>
    %c0_17 = arith.constant 0 : index
    %c0_18 = arith.constant 0 : index
    %69 = vector.load %arg8[%c0_17, %c0_18] : memref<400x256xbf16, #tpu.memory_space<vmem>>, vector<400x256xbf16>
    tpu.vector_store %arg8[%c0_17, %c0_18], %68 {strides = array<i32>} : memref<400x256xbf16, #tpu.memory_space<vmem>>, vector<400x256xbf16>,
    return
  }
  func.func @transform_0(%arg0: i32) -> (i32, i32) {
    %c0_i32 = arith.constant 0 : i32
    %c0_i32_0 = arith.constant 0 : i32
    return %arg0, %c0_i32 : i32, i32
  }
  func.func @transform_1(%arg0: i32) -> (i32, i32) {
    %c0_i32 = arith.constant 0 : i32
    %c0_i32_0 = arith.constant 0 : i32
    %c0_i32_1 = arith.constant 0 : i32
    return %c0_i32, %c0_i32_0 : i32, i32
  }
  func.func @transform_2(%arg0: i32) -> (i32, i32) {
    %c0_i32 = arith.constant 0 : i32
    %c0_i32_0 = arith.constant 0 : i32
    %c0_i32_1 = arith.constant 0 : i32
    return %c0_i32, %c0_i32_0 : i32, i32
  }
  func.func @transform_3(%arg0: i32) -> (i32, i32) {
    %c0_i32 = arith.constant 0 : i32
    %c0_i32_0 = arith.constant 0 : i32
    %c0_i32_1 = arith.constant 0 : i32
    return %c0_i32, %c0_i32_0 : i32, i32
  }
  func.func @transform_4(%arg0: i32) -> (i32, i32) {
    %c0_i32 = arith.constant 0 : i32
    %c0_i32_0 = arith.constant 0 : i32
    %c0_i32_1 = arith.constant 0 : i32
    return %c0_i32, %c0_i32_0 : i32, i32
  }
  func.func @transform_5(%arg0: i32) -> (i32, i32) {
    %c0_i32 = arith.constant 0 : i32
    %c0_i32_0 = arith.constant 0 : i32
    %c0_i32_1 = arith.constant 0 : i32
    return %c0_i32, %c0_i32_0 : i32, i32
  }
  func.func @transform_6(%arg0: i32) -> (i32, i32) {
    %c0_i32 = arith.constant 0 : i32
    %c0_i32_0 = arith.constant 0 : i32
    %c0_i32_1 = arith.constant 0 : i32
    return %c0_i32, %c0_i32_0 : i32, i32
  }
  func.func @transform_7(%arg0: i32) -> (i32, i32) {
    %c0_i32 = arith.constant 0 : i32
    %c0_i32_0 = arith.constant 0 : i32
    return %arg0, %c0_i32 : i32, i32
  }
}

</mosaic_0001>

<bundles_post_ra>
// kernel: tpu_custom_call.1
= control target key start
LH: loop header
LB: loop body
LE: loop exit
PB: predicated region body
PF: predicated region fallthrough
CT: control target
= control target key end

     0   :  { %12 = vsyncpa [#allocation3], 0  ;;  %s12350_s0 = inlined_call_operand.vmem [shape: f32[800,16], index: 0, kind: input, shape index: {}]   ;;  %s12351_s1 = inlined_call_operand.hbm [shape: f32[200,256], index: 1, kind: input, shape index: {}]   ;;  %s12352_s2 = inlined_call_operand.vmem [shape: bf16[16,512], index: 2, kind: input, shape index: {}]   ;;  %s12353_s3 = inlined_call_operand.vmem [shape: bf16[48,512], index: 3, kind: input, shape index: {}]   ;;  %s12354_s4 = inlined_call_operand.vmem [shape: bf16[512,384], index: 4, kind: input, shape index: {}]   ;;  %s12355_s5 = inlined_call_operand.vmem [shape: f32[1,384], index: 5, kind: input, shape index: {}]   ;;  %s12356_s6 = inlined_call_operand.hbm [shape: bf16[384,256], index: 6, kind: input, shape index: {}]   ;;  %s12357_s7 = inlined_call_operand.hbm [shape: bf16[800,256], index: 7, kind: output, shape index: {}]  }
   0x1   :  { %13 = vsyncpa [#allocation6], 0 }
   0x2   :  { %14 = vsyncpa [#allocation4], 0 }
   0x3   :  { %16 = vsyncpa [#allocation4 + $0x1], 0  ;;  %s8374_s24 = smov 0   ;;  %s8376_s25 = smov 0  }
   0x4   :  { %s8378_s26 = smov 0   ;;  %s8380_s27 = smov 0  }
   0x5 LB: > { %s8395_s28 = sadd.s32 4294967295, %s8315_s27   ;;  %s7161_s29 = sadd.s32 4294967294, %s8315_s27   ;;  %s8315_s27 = sphi %s8380_s27, %s13177_s27   ;;  %s8311_s26 = sphi %s8378_s26, %s13176_s26   ;;  %s8307_s25 = sphi %s8376_s25, %s13175_s25   ;;  %s8303_s24 = sphi %s8374_s24, %s13174_s24  }
   0x6   : > { %s8399_s30 = sadd.s32 1, %s8315_s27   ;;  %s181_s8 = sadd.s32 1, %s8311_s26 }
   0x7   : > { %s178_s9 = ssub.s32 %s8315_s27, %s8399_s30  ;;  %p191_p0 = scmp.ne.s32.totalorder %s8311_s26, %s8307_s25 }
   0x8   : > { %p179_p1 = scmp.eq.s32.totalorder %s178_s9, 0  ;;  %p192_p2 = scmp.eq.s32.totalorder %s8395_s28, 1 }
   0x9   : > { %p197_p3 = scmp.ne.s32.totalorder %s8307_s25, %s8303_s24  ;;  %p198_p4 = scmp.eq.s32.totalorder %s7161_s29, 1 }
   0xa   : > { %s8410_s10 = scalar_select %p179_p1, %s8311_s26, %s181_s8  }
   0xb   : > { %p8412_p5 = por %p192_p2, %p191_p0  ;;  %p8416_p6 = por %p198_p4, %p197_p3 }
   0xc   : > { %p7162_p7 = scmp.ge.s32.totalorder %s8315_s27, 1  ;;  %p205_p8 = scmp.lt.s32.totalorder %s8315_s27, 3 }
   0xd   : > { %s12493_s12 = scalar_select %p8416_p6, 1, 0 }
   0xe   : > { %p12358_p9 = scmp.eq.s32.totalorder %s8395_s28, 0  ;;  %p8423_p10 = pnand %p7162_p7, %p205_p8 }
   0xf   : > { %s8317_s14 = smov [#allocation2]   ;;  %s8318_s17 = smov [#allocation5]  }
  0x10   : > { %s217_s15 = sshll.u32 %s8317_s14, 4  ;;  %p7698_p11 = pneg %p8423_p10  ;;  %s218_s15 = int_to_ptr.vmem [resolvable:$true] %s217_s15 }
  0x11   : > { %s242_s18 = sshll.u32 %s8318_s17, 4  ;;  %s8206_s19 = scalar_lea.vmem %s218_s15, 6400  ;;  %s243_s18 = int_to_ptr.vmem [resolvable:$true] %s242_s18 }
  0x12   : > { %p8431_p12 = pnand %p12358_p9, %p7698_p11  ;;  %p8207_p0 = scmp.ne.s32.totalorder %s218_s15, %s8206_s19 }
  0x13   : > { %p8214_p3 = scmp.lt.s32.totalorder %s218_s15, %s218_s15  ;;  %p8215_p4 = scmp.lt.s32.totalorder %s8206_s19, %s8206_s19 }
  0x14   : > { %p8197_p13 = pneg %p8431_p12 }
  0x15   : > { %p8216_p7 = por %p8215_p4, %p8214_p3 }
  0x16   : > { %p8209_p1 = pnand %p8207_p0, %p8197_p13 }
  0x18   : > { %p8210_p2 = pneg %p8209_p1 }
  0x1a   : > { %p8217_p8 = pnand %p8216_p7, %p8210_p2 }
  0x1c   : > { %8220 = shalt.err (!%p8217_p8)
}
  0x1d   : > { %s8319_s20 = smov 256   ;;  %s8320_s21 = smov 16  }
  0x1e   : > { %7701 = dma.hbm_to_vmem [thread:$0]  (!%p8431_p12), %s12351_s1, 6400, %s218_s15, [#allocation3], %s8319_s20, %s8319_s20, %s8320_s21  }
  0x1f   : > { %s8232_s29 = scalar_lea.vmem %s243_s18, 6144  ;;  %p8240_p9 = scmp.lt.s32.totalorder %s243_s18, %s243_s18 }
  0x20   : > { %p8233_p11 = scmp.ne.s32.totalorder %s243_s18, %s8232_s29  ;;  %p8241_p6 = scmp.lt.s32.totalorder %s8232_s29, %s8232_s29 }
  0x22   : > { %p8235_p0 = pnand %p8233_p11, %p8197_p13  ;;  %p8242_p3 = por %p8241_p6, %p8240_p9 }
  0x24   : > { %p8236_p1 = pneg %p8235_p0 }
  0x26   : > { %p8243_p2 = pnand %p8242_p3, %p8236_p1 }
  0x28   : > { %8246 = shalt.err (!%p8243_p2)
}
  0x29   : > { %s8321_s8 = smov 128   ;;  %s8322_s9 = smov 8  }
  0x2a   : > { %7704 = dma.hbm_to_vmem [thread:$0]  (!%p8431_p12), %s12356_s6, 6144, %s243_s18, [#allocation6], %s8321_s8, %s8321_s8, %s8322_s9  }
  0x2b   : > { %267 = sbr.rel (%p8423_p10) target bundleno = 2165 (0x875), region = 48 }
  0x30   : > { %p12496_p4 = scmp.eq.s32.totalorder %s8395_s28, 0 }
  0x32   : > { %8290 = dma.done.wait (%p12496_p4), [#allocation3], 6400   ;;  %p12497_p13 = pmov %p12496_p4 }
  0x33   : > { %p12498_p6 = pmov %p12496_p4 }
  0x34   : > { %8292 = vsyncadd (%p12497_p13), [#allocation3], 4294960896 }
  0x35   : > { %8294 = dma.done.wait (%p12498_p6), [#allocation6], 6144   ;;  %p12499_p9 = pmov %p12496_p4 }
  0x36   : > { %s303_s15 = smul.u32 50, %s8395_s28  ;;  %v12369_v0 = vmov 15   ;;  %v12359_v1 = vmov 11   ;;  %v12367_v20 = vmov 12   ;;  %v12371_v23 = vmov 10   ;;  %s300_s22 = sand.u32 1, %s8307_s25  }
  0x37   : > { %8296 = vsyncadd (%p12499_p9), [#allocation6], 4294961152  ;;  %7766 = vset.pattern.permute.xlu0 %v12369_v0  ;;  %7762 = vset.pattern.permute.xlu1 %v12359_v1  ;;  %v12365_v25 = vmov 13   ;;  %v12363_v31 = vmov 14   ;;  %s7587_s23 = smul.u32 400, %s300_s22 }
  0x38   : > { %p304_p10 = scmp.lt.s32.totalorder %s303_s15, 99  ;;  %s7586_s29 = smul.u32 6400, %s8395_s28 }
  0x39   : > { %s12310_s28 = scalar_lea.sflag [#allocation4], %s300_s22 }
  0x3a   : > { %s13179_s15 = smov (!%p304_p10, %s303_s15), 99  ;;  %s12303_s17 = scalar_lea.hbm %s12357_s7, %s7586_s29 }
  0x3b   : > { %s7169_s13 = sshll.u32 %s13179_s15, 3 }
  0x3c   : > { %s8469_s19 = scalar_lea.vmem %s12350_s0, %s7169_s13  ;;  %s8331_s13 = smov [#allocation7]  }
  0x3d   : > { %v311_v2 = vld [vmem:[%s8469_s19] sm:$0xff]  ;;  %v313_v3 = vld [vmem:[%s8469_s19 + $0x10] sm:$0xff]  ;;  %v312_v4 = vld [vmem:[%s8469_s19 + $0x8] sm:$0xff]  ;;  %s8251_s16 = sshll.u32 %s8331_s13, 4  ;;  %s8252_s16 = int_to_ptr.vmem [resolvable:$false] %s8251_s16 }
  0x3e   : > { %v7588_v5 = vtrunc.f32 %v311_v2  ;;  %v7592_v6 = vtrunc.f32 %v313_v3  ;;  %v7590_v7 = vtrunc.f32 %v312_v4  ;;  %v315_v8 = vld [vmem:[%s8469_s19 + $0x20] sm:$0xff]  ;;  %v314_v21 = vld [vmem:[%s8469_s19 + $0x18] sm:$0xff]  ;;  %v316_v24 = vld [vmem:[%s8469_s19 + $0x28] sm:$0xff]  ;;  %s8253_s18 = scalar_lea.vmem %s8252_s16, 12800 }
  0x3f   : > { %v7596_v12 = vtrunc.f32 %v315_v8  ;;  %v7594_v26 = vtrunc.f32 %v314_v21  ;;  %v318_v28 = vld [vmem:[%s8469_s19 + $0x38] sm:$0xff]  ;;  %v7598_v30 = vtrunc.f32 %v316_v24  ;;  %v320_v33 = vld [vmem:[%s8469_s19 + $0x48] sm:$0xff] }
  0x40   : > { %v8475_v9 = vcvt.f32.s32 %v7588_v5  ;;  %v8477_v10 = vcvt.f32.s32 %v7592_v6  ;;  %v8479_v11 = vcvt.f32.s32 %v7590_v7  ;;  %v7602_v35 = vtrunc.f32 %v318_v28  ;;  %v322_v37 = vld [vmem:[%s8469_s19 + $0x58] sm:$0xff]  ;;  %v324_v40 = vld [vmem:[%s8469_s19 + $0x68] sm:$0xff]  ;;  %v319_v28 = vld [vmem:[%s8469_s19 + $0x40] sm:$0xff] }
  0x41   : > { %v8485_v17 = vcvt.f32.s32 %v7596_v12  ;;  %v8499_v29 = vcvt.f32.s32 %v7594_v26  ;;  %v8505_v34 = vcvt.f32.s32 %v7598_v30  ;;  %v7606_v39 = vtrunc.f32 %v320_v33  ;;  %v326_v43 = vld [vmem:[%s8469_s19 + $0x78] sm:$0xff]  ;;  %v328_v47 = vld [vmem:[%s8469_s19 + $0x88] sm:$0xff] }
  0x42   : > { %v1864_v13 = vadd.s32 37, %v8475_v9  ;;  %v664_v14 = vadd.s32 4, %v8475_v9  ;;  %v1866_v15 = vadd.s32 37, %v8477_v10  ;;  %v665_v16 = vadd.s32 4, %v8479_v11  ;;  %v330_v54 = vld [vmem:[%s8469_s19 + $0x98] sm:$0xff]  ;;  %v332_v58 = vld [vmem:[%s8469_s19 + $0xa8] sm:$0xff] }
  0x43   : > { %v1868_v18 = vadd.s32 37, %v8485_v17  ;;  %v965_v19 = vadd.s32 15, %v8479_v11  ;;  %v1264_v22 = vadd.s32 26, %v8475_v9  ;;  %v1564_v27 = vadd.s32 35, %v8475_v9  ;;  %v334_v59 = vld [vmem:[%s8469_s19 + $0xb8] sm:$0xff]  ;;  %v336_v62 = vld [vmem:[%s8469_s19 + $0xc8] sm:$0xff] }
  0x44   : > { %1915 = vperm.xlu0 %7766, %v1864_v13   ;;  %715 = vperm.xlu1 %7762, %v664_v14   ;;  %v1565_v32 = vadd.s32 35, %v8479_v11  ;;  %v1865_v36 = vadd.s32 37, %v8479_v11  ;;  %v8510_v38 = vcvt.f32.s32 %v7602_v35  ;;  %v8515_v41 = vcvt.f32.s32 %v7606_v39  ;;  %v338_v4 = vld [vmem:[%s8469_s19 + $0xd8] sm:$0xff]  ;;  %v340_v8 = vld [vmem:[%s8469_s19 + $0xe8] sm:$0xff]  ;;  %v321_v35 = vld [vmem:[%s8469_s19 + $0x50] sm:$0xff] }
  0x45   : > { %v7610_v42 = vtrunc.f32 %v322_v37  ;;  %v666_v45 = vadd.s32 4, %v8477_v10  ;;  %v7614_v46 = vtrunc.f32 %v324_v40  ;;  %v667_v49 = vadd.s32 4, %v8499_v29  ;;  %v323_v40 = vld [vmem:[%s8469_s19 + $0x60] sm:$0xff] }
  0x46   : > { %v7618_v50 = vtrunc.f32 %v326_v43  ;;  %v967_v52 = vadd.s32 15, %v8499_v29  ;;  %v7622_v53 = vtrunc.f32 %v328_v47  ;;  %v1266_v56 = vadd.s32 26, %v8477_v10  ;;  %v325_v47 = vld [vmem:[%s8469_s19 + $0x70] sm:$0xff] }
  0x47   : > { %v8521_v44 = vcvt.f32.s32 %v7610_v42  ;;  %v8527_v48 = vcvt.f32.s32 %v7614_v46  ;;  %v7626_v57 = vtrunc.f32 %v330_v54  ;;  %v7630_v61 = vtrunc.f32 %v332_v58  ;;  %v327_v54 = vld [vmem:[%s8469_s19 + $0x80] sm:$0xff]  ;;  %v329_v58 = vld [vmem:[%s8469_s19 + $0x90] sm:$0xff] }
  0x48   : > { %1921 = vperm.xlu0 %7766, %v1866_v15   ;;  %718 = vperm.xlu1 %7762, %v665_v16   ;;  %v8531_v51 = vcvt.f32.s32 %v7618_v50  ;;  %v8536_v55 = vcvt.f32.s32 %v7622_v53  ;;  %v1566_v2 = vadd.s32 35, %v8477_v10  ;;  %v7634_v3 = vtrunc.f32 %v334_v59 }
  0x49   : > { %v8543_v60 = vcvt.f32.s32 %v7626_v57  ;;  %v8548_v63 = vcvt.f32.s32 %v7630_v61  ;;  %v1567_v6 = vadd.s32 35, %v8499_v29  ;;  %v7638_v7 = vtrunc.f32 %v336_v62 }
  0x4a   : > { %12500 = vst [vmem:[#allocation11_spill] sm:$0xff] %v8536_v55  ;;  %v8554_v5 = vcvt.f32.s32 %v7634_v3  ;;  %v7642_v13 = vtrunc.f32 %v338_v4  ;;  %v1867_v14 = vadd.s32 37, %v8499_v29  ;;  %v7646_v16 = vtrunc.f32 %v340_v8  ;;  %v331_v3 = vld [vmem:[%s8469_s19 + $0xa0] sm:$0xff]  ;;  %v333_v8 = vld [vmem:[%s8469_s19 + $0xb0] sm:$0xff] }
  0x4b   : > { %12501 = vst [vmem:[#allocation12_spill] sm:$0xff] %v8543_v60  ;;  %12502 = vst [vmem:[#allocation13_spill] sm:$0xff] %v8548_v63  ;;  %v8559_v12 = vcvt.f32.s32 %v7638_v7  ;;  %v964_v21 = vadd.s32 15, %v8475_v9  ;;  %v669_v24 = vadd.s32 4, %v8505_v34  ;;  %v966_v26 = vadd.s32 15, %v8477_v10 }
  0x4c   : > { %1927 = vperm.xlu0 %7766, %v1868_v18   ;;  %7763 = vset.pattern.permute.xlu1 %v12367_v20  ;;  %12503 = vst [vmem:[#allocation14_spill] sm:$0xff] %v8554_v5  ;;  %v8564_v15 = vcvt.f32.s32 %v7642_v13  ;;  %v8567_v18 = vcvt.f32.s32 %v7646_v16  ;;  %v969_v30 = vadd.s32 15, %v8505_v34  ;;  %v7604_v33 = vtrunc.f32 %v319_v28  ;;  %v337_v28 = vld [vmem:[%s8469_s19 + $0xd0] sm:$0xff] }
  0x4d   : > { %1018 = vperm.xlu1 %7763, %v965_v19   ;;  %12504 = vst [vmem:[#allocation15_spill] sm:$0xff] %v8559_v12  ;;  %v668_v19 = vadd.s32 4, %v8485_v17  ;;  %v7608_v39 = vtrunc.f32 %v321_v35  ;;  %v1568_v46 = vadd.s32 35, %v8485_v17  ;;  %v1569_v53 = vadd.s32 35, %v8505_v34 }
  0x4e   : > { %12505 = vst [vmem:[#allocation16_spill] sm:$0xff] %v8564_v15  ;;  %12506 = vst [vmem:[#allocation17_spill] sm:$0xff] %v8567_v18  ;;  %v8588_v37 = vcvt.f32.s32 %v7604_v33  ;;  %v1869_v59 = vadd.s32 37, %v8505_v34  ;;  %v7628_v7 = vtrunc.f32 %v331_v3  ;;  %v7640_v33 = vtrunc.f32 %v337_v28 }
  0x4f   : > { %v8593_v43 = vcvt.f32.s32 %v7608_v39  ;;  %v971_v35 = vadd.s32 15, %v8510_v38  ;;  %v1871_v28 = vadd.s32 37, %v8510_v38 }
  0x50   : > { %7779 = vset.pattern.permute.xlu0 %v12371_v23  ;;  %v972_v42 = vadd.s32 15, %v8588_v37  ;;  %v8621_v16 = vcvt.f32.s32 %v7628_v7  ;;  %v8637_v39 = vcvt.f32.s32 %v7640_v33 }
  0x51   : > { %415 = vperm.xlu0 %7779, %v8475_v9   ;;  %7764 = vset.pattern.permute.xlu1 %v12365_v25  ;;  %v968_v9 = vadd.s32 15, %v8485_v17 }
  0x52   : > { %1315 = vperm.xlu1 %7764, %v1264_v22   ;;  %v317_v22 = vld [vmem:[%s8469_s19 + $0x30] sm:$0xff]  ;;  %12509 = vst [vmem:[#allocation20_spill] sm:$0xff] %v8637_v39 }
  0x55   : > { %418 = vperm.xlu0 %7779, %v8479_v11  }
  0x56   : > { %7765 = vset.pattern.permute.xlu1 %v12363_v31 }
  0x57   : > { %1615 = vperm.xlu1 %7765, %v1564_v27   ;;  %v7600_v27 = vtrunc.f32 %v317_v22  ;;  %v984_v22 = vadd.s32 15, %v8621_v16 }
  0x59   : > { %424 = vperm.xlu0 %7779, %v8499_v29  }
  0x5b   : > { %1618 = vperm.xlu1 %7765, %v1565_v32   ;;  %v8582_v32 = vcvt.f32.s32 %v7600_v27 }
  0x5d   : > { %430 = vperm.xlu0 %7779, %v8505_v34  }
  0x5f   : > { %7767 = vset.pattern.permute.xlu1 %v12369_v0 }
  0x60   : > { %1918 = vperm.xlu1 %7767, %v1865_v36   ;;  %v1268_v36 = vadd.s32 26, %v8485_v17 }
  0x61   : > { %436 = vperm.xlu0 %7779, %v8510_v38  }
  0x64   : > { %7768 = vset.pattern.permute.xlu1 %v12371_v23 }
  0x65   : > { %442 = vperm.xlu0 %7779, %v8515_v41   ;;  %421 = vperm.xlu1 %7768, %v8477_v10   ;;  %v970_v10 = vadd.s32 15, %v8582_v32 }
  0x69   : > { %448 = vperm.xlu0 %7779, %v8521_v44   ;;  %7769 = vset.pattern.permute.xlu1 %v12359_v1 }
  0x6a   : > { %721 = vperm.xlu1 %7769, %v666_v45   ;;  %v7612_v45 = vtrunc.f32 %v323_v40 }
  0x6c   : > { %v8599_v50 = vcvt.f32.s32 %v7612_v45 }
  0x6d   : > { %454 = vperm.xlu0 %7779, %v8527_v48  }
  0x6e   : > { %724 = vperm.xlu1 %7769, %v667_v49   ;;  %v974_v49 = vadd.s32 15, %v8593_v43 }
  0x71   : > { %460 = vperm.xlu0 %7779, %v8531_v51  }
  0x72   : > { %7770 = vset.pattern.permute.xlu1 %v12367_v20 }
  0x73   : > { %1024 = vperm.xlu1 %7770, %v967_v52   ;;  %v7616_v52 = vtrunc.f32 %v325_v47  ;;  %v1270_v47 = vadd.s32 26, %v8582_v32 }
  0x75   : > { %466 = vperm.xlu0 %7779, %v8536_v55   ;;  %v8604_v57 = vcvt.f32.s32 %v7616_v52 }
  0x77   : > { %7771 = vset.pattern.permute.xlu1 %v12365_v25  ;;  %v978_v61 = vadd.s32 15, %v8604_v57 }
  0x78   : > { %1321 = vperm.xlu1 %7771, %v1266_v56   ;;  %v976_v56 = vadd.s32 15, %v8599_v50 }
  0x79   : > { %472 = vperm.xlu0 %7779, %v8543_v60  }
  0x7c   : > { %7772 = vset.pattern.permute.xlu1 %v12363_v31 }
  0x7d   : > { %478 = vperm.xlu0 %7779, %v8548_v63   ;;  %1621 = vperm.xlu1 %7772, %v1566_v2   ;;  %v7624_v2 = vtrunc.f32 %v329_v58  ;;  %v1570_v58 = vadd.s32 35, %v8582_v32 }
  0x81   : > { %484 = vperm.xlu0 %7779, %v8554_v5   ;;  %1624 = vperm.xlu1 %7772, %v1567_v6   ;;  %v8614_v6 = vcvt.f32.s32 %v7624_v2 }
  0x83   : > { %v982_v13 = vadd.s32 15, %v8614_v6 }
  0x85   : > { %490 = vperm.xlu0 %7779, %v8559_v12   ;;  %7773 = vset.pattern.permute.xlu1 %v12369_v0 }
  0x86   : > { %1924 = vperm.xlu1 %7773, %v1867_v14   ;;  %v670_v14 = vadd.s32 4, %v8582_v32 }
  0x89   : > { %496 = vperm.xlu0 %7779, %v8564_v15  }
  0x8a   : > { %7774 = vset.pattern.permute.xlu1 %v12371_v23 }
  0x8b   : > { %427 = vperm.xlu1 %7774, %v8485_v17   ;;  %v7620_v17 = vtrunc.f32 %v327_v54 }
  0x8d   : > { %502 = vperm.xlu0 %7779, %v8567_v18   ;;  %v8609_v62 = vcvt.f32.s32 %v7620_v17  ;;  %v343_v17 = vld [vmem:[%s8469_s19 + $0x100] sm:$0xff] }
  0x8e   : > { %v7652_v2 = vtrunc.f32 %v343_v17 }
  0x8f   : > { %7775 = vset.pattern.permute.xlu1 %v12359_v1  ;;  %v980_v4 = vadd.s32 15, %v8609_v62 }
  0x90   : > { %727 = vperm.xlu1 %7775, %v668_v19   ;;  %v7632_v19 = vtrunc.f32 %v333_v8  ;;  %v1571_v8 = vadd.s32 35, %v8510_v38 }
  0x91   : > { %7848 = vset.pattern.permute.xlu0 %v12367_v20 }
  0x92   : > { %1015 = vperm.xlu0 %7848, %v964_v21   ;;  %v335_v21 = vld [vmem:[%s8469_s19 + $0xc0] sm:$0xff] }
  0x93   : > { %v7636_v27 = vtrunc.f32 %v335_v21  ;;  %v347_v21 = vld [vmem:[%s8469_s19 + $0x120] sm:$0xff] }
  0x94   : > { %730 = vperm.xlu1 %7775, %v669_v24   ;;  %v671_v24 = vadd.s32 4, %v8510_v38  ;;  %v7660_v33 = vtrunc.f32 %v347_v21  ;;  %v7925_v21 = vld [vmem:[%s12353_s3 + $0x48] ss:$16 sps:$4 sm:$0xff]  }
  0x96   : > { %1021 = vperm.xlu0 %7848, %v966_v26   ;;  %v8627_v26 = vcvt.f32.s32 %v7632_v19 }
  0x98   : > { %7776 = vset.pattern.permute.xlu1 %v12367_v20  ;;  %12507 = vst [vmem:[#allocation18_spill] sm:$0xff] %v8627_v26 }
  0x99   : > { %1030 = vperm.xlu1 %7776, %v969_v30   ;;  %v986_v30 = vadd.s32 15, %v8627_v26 }
  0x9a   : > { %1027 = vperm.xlu0 %7848, %v968_v9   ;;  %v8631_v9 = vcvt.f32.s32 %v7636_v27 }
  0x9c   : > { %12508 = vst [vmem:[#allocation19_spill] sm:$0xff] %v8631_v9 }
  0x9d   : > { %7777 = vset.pattern.permute.xlu1 %v12365_v25 }
  0x9e   : > { %1033 = vperm.xlu0 %7848, %v970_v10   ;;  %1327 = vperm.xlu1 %7777, %v1268_v36   ;;  %v339_v10 = vld [vmem:[%s8469_s19 + $0xe0] sm:$0xff]  ;;  %v988_v36 = vadd.s32 15, %v8631_v9 }
  0x9f   : > { %v7644_v40 = vtrunc.f32 %v339_v10 }
  0xa1   : > { %v8646_v52 = vcvt.f32.s32 %v7644_v40 }
  0xa2   : > { %1039 = vperm.xlu0 %7848, %v972_v42   ;;  %7778 = vset.pattern.permute.xlu1 %v12363_v31 }
  0xa3   : > { %1627 = vperm.xlu1 %7778, %v1568_v46   ;;  %v341_v46 = vld [vmem:[%s8469_s19 + $0xf0] sm:$0xff]  ;;  %12510 = vst [vmem:[#allocation21_spill] sm:$0xff] %v8646_v52 }
  0xa6   : > { %1045 = vperm.xlu0 %7848, %v974_v49   ;;  %v990_v49 = vadd.s32 15, %v8637_v39 }
  0xa7   : > { %1630 = vperm.xlu1 %7778, %v1569_v53   ;;  %v7648_v53 = vtrunc.f32 %v341_v46  ;;  %v8684_v46 = vcvt.f32.s32 %v7660_v33  ;;  %v673_v33 = vadd.s32 4, %v8515_v41 }
  0xa9   : > { %12514 = vst [vmem:[#allocation25_spill] sm:$0xff] %v8684_v46  ;;  %v1000_v17 = vadd.s32 15, %v8684_v46 }
  0xaa   : > { %1051 = vperm.xlu0 %7848, %v976_v56  }
  0xab   : > { %7780 = vset.pattern.permute.xlu1 %v12369_v0 }
  0xac   : > { %1930 = vperm.xlu1 %7780, %v1869_v59   ;;  %v992_v59 = vadd.s32 15, %v8646_v52  ;;  %v344_v52 = vld [vmem:[%s8469_s19 + $0x108] sm:$0xff] }
  0xae   : > { %1057 = vperm.xlu0 %7848, %v978_v61   ;;  %v8656_v61 = vcvt.f32.s32 %v7648_v53 }
  0xb0   : > { %7781 = vset.pattern.permute.xlu1 %v12371_v23  ;;  %12511 = vst [vmem:[#allocation22_spill] sm:$0xff] %v8656_v61 }
  0xb1   : > { %433 = vperm.xlu1 %7781, %v8582_v32  }
  0xb2   : > { %1063 = vperm.xlu0 %7848, %v980_v4   ;;  %v345_v4 = vld [vmem:[%s8469_s19 + $0x110] sm:$0xff] }
  0xb3   : > { %v7656_v19 = vtrunc.f32 %v345_v4  ;;  %v7920_v4 = vld [vmem:[%s12353_s3 + $0x44] ss:$16 sps:$4 sm:$0xff]  }
  0xb4   : > { %2476 = vmatprep.subr.bf16.mxu0 %v7920_v4 }
  0xb5   : > { %7782 = vset.pattern.permute.xlu1 %v12359_v1 }
  0xb6   : > { %1069 = vperm.xlu0 %7848, %v982_v13   ;;  %733 = vperm.xlu1 %7782, %v670_v14   ;;  %v994_v13 = vadd.s32 15, %v8656_v61  ;;  %v8666_v14 = vcvt.f32.s32 %v7652_v2  ;;  %v672_v2 = vadd.s32 4, %v8588_v37  ;;  %v12531_v61 = vmov 14  }
  0xb8   : > { %12512 = vst [vmem:[#allocation23_spill] sm:$0xff] %v8666_v14  ;;  %v996_v27 = vadd.s32 15, %v8666_v14 }
  0xba   : > { %1075 = vperm.xlu0 %7848, %v984_v22   ;;  %736 = vperm.xlu1 %7782, %v671_v24  }
  0xbe   : > { %1081 = vperm.xlu0 %7848, %v986_v30   ;;  %7783 = vset.pattern.permute.xlu1 %v12367_v20  ;;  %v8675_v30 = vcvt.f32.s32 %v7656_v19  ;;  %v7924_v19 = vld [vmem:[%s12353_s3 + $0x40] ss:$16 sps:$4 sm:$0xff]  }
  0xbf   : > { %1036 = vperm.xlu1 %7783, %v971_v35   ;;  %v8639_v42 = vpop.permute.xlu1 %715  ;;  %v8641_v45 = vpop.permute.xlu0 %1915  ;;  %v349_v35 = vld [vmem:[%s8469_s19 + $0x130] sm:$0xff]  ;;  %2477 = vmatpush1.bf16.msra.mxu0 %v7924_v19  ;;  %v973_v19 = vadd.s32 15, %v8515_v41 }
  0xc0   : > { %12513 = vst [vmem:[#allocation24_spill] sm:$0xff] %v8675_v30  ;;  %v998_v40 = vadd.s32 15, %v8675_v30  ;;  %v342_v30 = vld [vmem:[%s8469_s19 + $0xf8] sm:$0xff] }
  0xc1   : > { %v7650_v14 = vtrunc.f32 %v342_v30 }
  0xc2   : > { %1087 = vperm.xlu0 %7848, %v988_v36  }
  0xc3   : > { %7784 = vset.pattern.permute.xlu1 %v12365_v25  ;;  %v8649_v54 = vpop.permute.xlu1 %718  ;;  %v8651_v56 = vpop.permute.xlu0 %1921  ;;  %v8834_v39 = vcvt.f32.s32 %v7650_v14 }
  0xc4   : > { %1333 = vperm.xlu1 %7784, %v1270_v47   ;;  %v7664_v47 = vtrunc.f32 %v349_v35  ;;  %v7926_v35 = vld [vmem:[%s12353_s3 + $0x24] ss:$16 sps:$4 sm:$0xff]  }
  0xc5   : > { %2478 = vmatprep.subr.bf16.mxu0 %v7926_v35  ;;  %v7937_v35 = vld [vmem:[%s12353_s3 + $0x8] ss:$16 sps:$4 sm:$0xff]   ;;  %12532 = vst [vmem:[#allocation39_spill] sm:$0xff] %v8834_v39 }
  0xc6   : > { %1093 = vperm.xlu0 %7848, %v990_v49  }
  0xc7   : > { %v8658_v3 = vpop.permute.xlu0 %1927 }
  0xc8   : > { %7785 = vset.pattern.permute.xlu1 %v12363_v31  ;;  %v8662_v7 = vpop.permute.xlu1 %1018 }
  0xc9   : > { %1633 = vperm.xlu1 %7785, %v1570_v58   ;;  %v8692_v58 = vcvt.f32.s32 %v7664_v47  ;;  %v1265_v47 = vadd.s32 26, %v8479_v11  ;;  %v7932_v11 = vld [vmem:[%s12353_s3 + $0x4] ss:$16 sps:$4 sm:$0xff]  }
  0xca   : > { %1099 = vperm.xlu0 %7848, %v992_v59  }
  0xcb   : > { %12515 = vst [vmem:[#allocation26_spill] sm:$0xff] %v8692_v58 }
  0xcc   : > { %v8669_v22 = vpop.permute.xlu0 %415 }
  0xcd   : > { %1636 = vperm.xlu1 %7785, %v1571_v8   ;;  %v8671_v24 = vpop.permute.xlu1 %1315  ;;  %v7922_v8 = vld [vmem:[%s12353_s3 + $0x4c] ss:$16 sps:$4 sm:$0xff]  }
  0xce   : > { %1105 = vperm.xlu0 %7848, %v994_v13   ;;  %v1002_v13 = vadd.s32 15, %v8692_v58  ;;  %2759 = vmatprep.subr.bf16.mxu1 %v7922_v8  ;;  %v12529_v58 = vmov 12  }
  0xcf   : > { %2760 = vmatpush1.bf16.msra.mxu1 %v7925_v21  ;;  %v1267_v21 = vadd.s32 26, %v8499_v29  ;;  %v1269_v29 = vadd.s32 26, %v8505_v34 }
  0xd0   : > { %v8678_v10 = vpop.permute.xlu0 %418 }
  0xd1   : > { %7786 = vset.pattern.permute.xlu1 %v12369_v0 }
  0xd2   : > { %1111 = vperm.xlu0 %7848, %v996_v27   ;;  %1936 = vperm.xlu1 %7786, %v1871_v28   ;;  %v8681_v36 = vpop.permute.xlu1 %1615 }
  0xd4   : > { %v8686_v49 = vpop.permute.xlu0 %424 }
  0xd6   : > { %1117 = vperm.xlu0 %7848, %v998_v40   ;;  %7787 = vset.pattern.permute.xlu1 %v12371_v23  ;;  %v8689_v53 = vpop.permute.xlu1 %1618  ;;  %v7928_v40 = vld [vmem:[%s12353_s3 + $0x2c] ss:$16 sps:$4 sm:$0xff]  }
  0xd7   : > { %439 = vperm.xlu1 %7787, %v8588_v37   ;;  %2761 = vmatprep.subr.bf16.mxu1 %v7928_v40 }
  0xd8   : > { %v8695_v59 = vpop.permute.xlu0 %430 }
  0xda   : > { %1123 = vperm.xlu0 %7848, %v1000_v17   ;;  %v7930_v17 = vld [vmem:[%s12353_s3 + $0x20] ss:$16 sps:$4 sm:$0xff]  }
  0xdb   : > { %7788 = vset.pattern.permute.xlu1 %v12359_v1  ;;  %v8712_v27 = vpop.permute.xlu1 %1918  ;;  %2479 = vmatpush1.bf16.msra.mxu0 %v7930_v17 }
  0xdc   : > { %739 = vperm.xlu1 %7788, %v672_v2   ;;  %v8714_v28 = vpop.permute.xlu0 %436  ;;  %v7931_v2 = vld [vmem:[%s12353_s3 + $0x28] ss:$16 sps:$4 sm:$0xff]   ;;  %2480 = vmatprep.subr.bf16.mxu0 %v7932_v11  ;;  %v1271_v11 = vadd.s32 26, %v8510_v38  ;;  %v1275_v38 = vadd.s32 26, %v8521_v44 }
  0xdd   : > { %12516 = vst [vmem:[#allocation27_spill] sm:$0xff] %v8714_v28  ;;  %2762 = vmatpush1.bf16.msra.mxu1 %v7931_v2  ;;  %v12361_v2 = vmov 0  }
  0xde   : > { %1129 = vperm.xlu0 %7848, %v1002_v13   ;;  %v7934_v13 = vld [vmem:[%s12353_s3 + $0xc] ss:$16 sps:$4 sm:$0xff]   ;;  %2498 = vmatprep.mubr.bf16.mxu0 %v12361_v2 }
  0xdf   : > { %2763 = vmatprep.subr.bf16.mxu1 %v7934_v13  ;;  %2781 = vmatprep.mubr.bf16.mxu1 %v12361_v2  ;;  %v1572_v13 = vadd.s32 35, %v8588_v37 }
  0xe0   : > { %742 = vperm.xlu1 %7788, %v673_v33   ;;  %v8730_v4 = vpop.permute.xlu1 %421  ;;  %v8732_v8 = vpop.permute.xlu0 %442  ;;  %v7936_v33 = vld [vmem:[%s12353_s3] ss:$16 sps:$4 sm:$0xff]  }
  0xe1   : > { %12517 = vst [vmem:[#allocation28_spill] sm:$0xff] %v8732_v8  ;;  %2481 = vmatpush1.bf16.msra.mxu0 %v7936_v33  ;;  %2764 = vmatpush1.bf16.msra.mxu1 %v7937_v35  ;;  %v1273_v33 = vadd.s32 26, %v8515_v41  ;;  %v1573_v35 = vadd.s32 35, %v8515_v41  ;;  %v348_v8 = vld [vmem:[%s8469_s19 + $0x128] sm:$0xff] }
  0xe2   : > { %7880 = vset.pattern.permute.xlu0 %v12365_v25 }
  0xe3   : > { %1318 = vperm.xlu0 %7880, %v1265_v47   ;;  %v1272_v47 = vadd.s32 26, %v8588_v37 }
  0xe4   : > { %7789 = vset.pattern.permute.xlu1 %v12367_v20  ;;  %v8750_v40 = vpop.permute.xlu0 %448 }
  0xe5   : > { %12518 = vst [vmem:[#allocation29_spill] sm:$0xff] %v8750_v40  ;;  %1042 = vperm.xlu1 %7789, %v973_v19   ;;  %v8752_v17 = vpop.permute.xlu1 %721 }
  0xe7   : > { %1324 = vperm.xlu0 %7880, %v1267_v21  }
  0xe8   : > { %v8757_v1 = vpop.permute.xlu0 %454 }
  0xe9   : > { %12519 = vst [vmem:[#allocation30_spill] sm:$0xff] %v8757_v1  ;;  %7790 = vset.pattern.permute.xlu1 %v12365_v25  ;;  %v8761_v19 = vpop.permute.xlu1 %724  ;;  %v1875_v1 = vadd.s32 37, %v8521_v44 }
  0xea   : > { %1339 = vperm.xlu1 %7790, %v1272_v47  }
  0xeb   : > { %1330 = vperm.xlu0 %7880, %v1269_v29  }
  0xec   : > { %v8765_v21 = vpop.permute.xlu0 %460 }
  0xed   : > { %12520 = vst [vmem:[#allocation31_spill] sm:$0xff] %v8765_v21 }
  0xee   : > { %7791 = vset.pattern.permute.xlu1 %v12363_v31  ;;  %v8768_v34 = vpop.permute.xlu1 %1024  ;;  %v1873_v31 = vadd.s32 37, %v8515_v41  ;;  %v674_v41 = vadd.s32 4, %v8593_v43 }
  0xef   : > { %1336 = vperm.xlu0 %7880, %v1271_v11   ;;  %1639 = vperm.xlu1 %7791, %v1572_v13   ;;  %v1277_v11 = vadd.s32 26, %v8527_v48 }
  0xf0   : > { %v8772_v2 = vpop.permute.xlu0 %466 }
  0xf1   : > { %12521 = vst [vmem:[#allocation32_spill] sm:$0xff] %v8772_v2 }
  0xf3   : > { %1342 = vperm.xlu0 %7880, %v1273_v33   ;;  %1642 = vperm.xlu1 %7791, %v1573_v35   ;;  %v8774_v47 = vpop.permute.xlu1 %1321  ;;  %v1279_v33 = vadd.s32 26, %v8531_v51 }
  0xf4   : > { %v8777_v29 = vpop.permute.xlu0 %472 }
  0xf5   : > { %12522 = vst [vmem:[#allocation33_spill] sm:$0xff] %v8777_v29 }
  0xf7   : > { %1348 = vperm.xlu0 %7880, %v1275_v38   ;;  %7792 = vset.pattern.permute.xlu1 %v12369_v0  ;;  %v12526_v0 = vmov 11  }
  0xf8   : > { %1942 = vperm.xlu1 %7792, %v1873_v31   ;;  %v8782_v13 = vpop.permute.xlu1 %1621  ;;  %v8784_v25 = vpop.permute.xlu0 %478  ;;  %v1281_v31 = vadd.s32 26, %v8536_v55  ;;  %v356_v55 = vld [vmem:[%s8469_s19 + $0x168] sm:$0xff] }
  0xf9   : > { %12523 = vst [vmem:[#allocation34_spill] sm:$0xff] %v8784_v25  ;;  %v1283_v25 = vadd.s32 26, %v8543_v60 }
  0xfb   : > { %1354 = vperm.xlu0 %7880, %v1277_v11  }
  0xfc   : > { %7793 = vset.pattern.permute.xlu1 %v12371_v23  ;;  %v8788_v35 = vpop.permute.xlu1 %1624  ;;  %v8790_v20 = vpop.permute.xlu0 %484  ;;  %v675_v23 = vadd.s32 4, %v8521_v44 }
  0xfd   : > { %12524 = vst [vmem:[#allocation35_spill] sm:$0xff] %v8790_v20  ;;  %445 = vperm.xlu1 %7793, %v8593_v43  }
  0xff   : > { %1360 = vperm.xlu0 %7880, %v1279_v33   ;;  %v1285_v33 = vadd.s32 26, %v8548_v63  ;;  %v346_v63 = vld [vmem:[%s8469_s19 + $0x118] sm:$0xff] }
 0x100   : > { %v8795_v38 = vpop.permute.xlu0 %490 }
 0x101   : > { %12525 = vst [vmem:[#allocation36_spill] sm:$0xff] %v8795_v38  ;;  %7794 = vset.pattern.permute.xlu1 %v12526_v0  ;;  %v8798_v11 = vpop.permute.xlu1 %1924  ;;  %v975_v38 = vadd.s32 15, %v8521_v44 }
 0x102   : > { %745 = vperm.xlu1 %7794, %v674_v41  }
 0x103   : > { %1366 = vperm.xlu0 %7880, %v1281_v31   ;;  %v1287_v31 = vadd.s32 26, %v8554_v5  ;;  %v1291_v5 = vadd.s32 26, %v8564_v15 }
 0x104   : > { %v8802_v20 = vpop.permute.xlu0 %496 }
 0x105   : > { %12527 = vst [vmem:[#allocation37_spill] sm:$0xff] %v8802_v20 }
 0x106   : > { %748 = vperm.xlu1 %7794, %v675_v23   ;;  %v8804_v29 = vpop.permute.xlu1 %427  ;;  %v1274_v23 = vadd.s32 26, %v8593_v43 }
 0x107   : > { %1372 = vperm.xlu0 %7880, %v1283_v25   ;;  %v12530_v25 = vmov 13  }
 0x108   : > { %v8808_v2 = vpop.permute.xlu0 %502 }
 0x109   : > { %12528 = vst [vmem:[#allocation38_spill] sm:$0xff] %v8808_v2  ;;  %v1289_v2 = vadd.s32 26, %v8559_v12  ;;  %v1293_v12 = vadd.s32 26, %v8567_v18  ;;  %v12535_v18 = vmov 15  }
 0x10a   : > { %7795 = vset.pattern.permute.xlu1 %v12529_v58 }
 0x10b   : > { %1378 = vperm.xlu0 %7880, %v1285_v33   ;;  %1048 = vperm.xlu1 %7795, %v975_v38   ;;  %v8811_v41 = vpop.permute.xlu1 %727  ;;  %v1574_v33 = vadd.s32 35, %v8593_v43 }
 0x10d   : > { %v8815_v20 = vpop.permute.xlu0 %1015 }
 0x10f   : > { %1384 = vperm.xlu0 %7880, %v1287_v31   ;;  %7796 = vset.pattern.permute.xlu1 %v12530_v25  ;;  %v8818_v46 = vpop.permute.xlu1 %730 }
 0x110   : > { %1345 = vperm.xlu1 %7796, %v1274_v23   ;;  %v1575_v23 = vadd.s32 35, %v8521_v44  ;;  %v7662_v44 = vtrunc.f32 %v348_v8 }
 0x111   : > { %v8822_v38 = vpop.permute.xlu0 %1021 }
 0x113   : > { %1390 = vperm.xlu0 %7880, %v1289_v2   ;;  %v7654_v2 = vtrunc.f32 %v344_v52 }
 0x114   : > { %7797 = vset.pattern.permute.xlu1 %v12531_v61  ;;  %v8827_v31 = vpop.permute.xlu1 %1030 }
 0x115   : > { %v8830_v21 = vpop.permute.xlu0 %1027  ;;  %1645 = vperm.xlu1 %7797, %v1574_v33   ;;  %v1295_v33 = vadd.s32 26, %v8834_v39  ;;  %v8843_v40 = vcvt.f32.s32 %v7654_v2  ;;  %v12539_v2 = vmov 10  }
 0x117   : > { %1396 = vperm.xlu0 %7880, %v1291_v5   ;;  %12534 = vst [vmem:[#allocation41_spill] sm:$0xff] %v8843_v40  ;;  %v7658_v5 = vtrunc.f32 %v346_v63 }
 0x119   : > { %1648 = vperm.xlu1 %7797, %v1575_v23   ;;  %v8837_v30 = vpop.permute.xlu1 %1327  ;;  %v8839_v15 = vpop.permute.xlu0 %1033  ;;  %v1297_v23 = vadd.s32 26, %v8843_v40  ;;  %v352_v40 = vld [vmem:[%s8469_s19 + $0x148] sm:$0xff] }
 0x11a   : > { %12533 = vst [vmem:[#allocation40_spill] sm:$0xff] %v8839_v15  ;;  %v8852_v15 = vcvt.f32.s32 %v7658_v5  ;;  %v676_v5 = vadd.s32 4, %v8599_v50  ;;  %v7670_v9 = vtrunc.f32 %v352_v40  ;;  %v977_v40 = vadd.s32 15, %v8527_v48 }
 0x11b   : > { %1402 = vperm.xlu0 %7880, %v1293_v12   ;;  %v350_v12 = vld [vmem:[%s8469_s19 + $0x138] sm:$0xff] }
 0x11c   : > { %12537 = vst [vmem:[#allocation43_spill] sm:$0xff] %v8852_v15 }
 0x11d   : > { %7798 = vset.pattern.permute.xlu1 %v12535_v18  ;;  %v8847_v14 = vpop.permute.xlu0 %1039 }
 0x11e   : > { %12536 = vst [vmem:[#allocation42_spill] sm:$0xff] %v8847_v14  ;;  %1948 = vperm.xlu1 %7798, %v1875_v1   ;;  %v8849_v52 = vpop.permute.xlu1 %1627  ;;  %v1299_v1 = vadd.s32 26, %v8852_v15  ;;  %v8862_v14 = vcvt.f32.s32 %v7662_v44  ;;  %v677_v44 = vadd.s32 4, %v8527_v48 }
 0x11f   : > { %1408 = vperm.xlu0 %7880, %v1295_v33   ;;  %v7666_v33 = vtrunc.f32 %v350_v12  ;;  %v354_v12 = vld [vmem:[%s8469_s19 + $0x158] sm:$0xff] }
 0x120   : > { %12540 = vst [vmem:[#allocation45_spill] sm:$0xff] %v8862_v14  ;;  %v7674_v60 = vtrunc.f32 %v354_v12 }
 0x121   : > { %v8855_v39 = vpop.permute.xlu0 %1045  ;;  %v8872_v28 = vcvt.f32.s32 %v7666_v33 }
 0x122   : > { %12538 = vst [vmem:[#allocation44_spill] sm:$0xff] %v8855_v39  ;;  %7799 = vset.pattern.permute.xlu1 %v12539_v2  ;;  %v8858_v63 = vpop.permute.xlu1 %1630 }
 0x123   : > { %1414 = vperm.xlu0 %7880, %v1297_v23   ;;  %451 = vperm.xlu1 %7799, %v8599_v50   ;;  %v1301_v23 = vadd.s32 26, %v8862_v14  ;;  %12542 = vst [vmem:[#allocation47_spill] sm:$0xff] %v8872_v28 }
 0x125   : > { %v8866_v8 = vpop.permute.xlu0 %1051 }
 0x126   : > { %12541 = vst [vmem:[#allocation46_spill] sm:$0xff] %v8866_v8  ;;  %v1303_v8 = vadd.s32 26, %v8872_v28 }
 0x127   : > { %1420 = vperm.xlu0 %7880, %v1299_v1   ;;  %7800 = vset.pattern.permute.xlu1 %v12526_v0  ;;  %v8869_v39 = vpop.permute.xlu1 %1930  ;;  %v8879_v1 = vcvt.f32.s32 %v7670_v9 }
 0x128   : > { %751 = vperm.xlu1 %7800, %v676_v5   ;;  %v8888_v5 = vcvt.f32.s32 %v7674_v60 }
 0x129   : > { %v8876_v15 = vpop.permute.xlu0 %1057  ;;  %12544 = vst [vmem:[#allocation49_spill] sm:$0xff] %v8879_v1  ;;  %v1305_v33 = vadd.s32 26, %v8879_v1 }
 0x12a   : > { %12543 = vst [vmem:[#allocation48_spill] sm:$0xff] %v8876_v15  ;;  %12545 = vst [vmem:[#allocation50_spill] sm:$0xff] %v8888_v5  ;;  %v7678_v15 = vtrunc.f32 %v356_v55  ;;  %v1307_v12 = vadd.s32 26, %v8888_v5  ;;  %v1870_v5 = vadd.s32 37, %v8582_v32 }
 0x12b   : > { %1426 = vperm.xlu0 %7880, %v1301_v23  }
 0x12c   : > { %754 = vperm.xlu1 %7800, %v677_v44   ;;  %v8881_v26 = vpop.permute.xlu1 %433  ;;  %v1276_v44 = vadd.s32 26, %v8599_v50  ;;  %v8897_v28 = vcvt.f32.s32 %v7678_v15  ;;  %v1577_v15 = vadd.s32 35, %v8527_v48 }
 0x12d   : > { %v8884_v14 = vpop.permute.xlu0 %1063 }
 0x12e   : > { %v1309_v55 = vadd.s32 26, %v8897_v28 }
 0x12f   : > { %1432 = vperm.xlu0 %7880, %v1303_v8  }
 0x130   : > { %7801 = vset.pattern.permute.xlu1 %v12529_v58 }
 0x131   : > { %1054 = vperm.xlu1 %7801, %v977_v40   ;;  %v8891_v9 = vpop.permute.xlu1 %733  ;;  %v8893_v23 = vpop.permute.xlu0 %1069  ;;  %v1576_v40 = vadd.s32 35, %v8599_v50 }
 0x132   : > { %12546 = vst [vmem:[#allocation51_spill] sm:$0xff] %v8893_v23 }
 0x133   : > { %1438 = vperm.xlu0 %7880, %v1305_v33  }
 0x135   : > { %7802 = vset.pattern.permute.xlu1 %v12530_v25  ;;  %v8900_v8 = vpop.permute.xlu1 %736  ;;  %v8902_v60 = vpop.permute.xlu0 %1075 }
 0x136   : > { %12547 = vst [vmem:[#allocation52_spill] sm:$0xff] %v8902_v60  ;;  %1351 = vperm.xlu1 %7802, %v1276_v44  }
 0x137   : > { %1444 = vperm.xlu0 %7880, %v1307_v12   ;;  %v1872_v12 = vadd.s32 37, %v8588_v37  ;;  %v1876_v37 = vadd.s32 37, %v8599_v50 }
 0x139   : > { %v8906_v23 = vpop.permute.xlu0 %1081 }
 0x13a   : > { %12548 = vst [vmem:[#allocation53_spill] sm:$0xff] %v8906_v23  ;;  %7803 = vset.pattern.permute.xlu1 %v12531_v61  ;;  %v8909_v33 = vpop.permute.xlu1 %1036  ;;  %v1877_v23 = vadd.s32 37, %v8527_v48 }
 0x13b   : > { %1450 = vperm.xlu0 %7880, %v1309_v55   ;;  %1651 = vperm.xlu1 %7803, %v1576_v40   ;;  %v12419_v55 = vlaneseq  ;;  %v1874_v40 = vadd.s32 37, %v8593_v43  ;;  %v678_v43 = vadd.s32 4, %v8604_v57 }
 0x13d   : > { %v8913_v1 = vpop.permute.xlu0 %1087 }
 0x13e   : > { %12549 = vst [vmem:[#allocation54_spill] sm:$0xff] %v8913_v1 }
 0x13f   : > { %7901 = vset.pattern.permute.xlu0 %v12535_v18  ;;  %1654 = vperm.xlu1 %7803, %v1577_v15   ;;  %v8916_v44 = vpop.permute.xlu1 %1333  ;;  %v8929_v15 = vand.u32 127, %v12419_v55 }
 0x140   : > { %1933 = vperm.xlu0 %7901, %v1870_v5  }
 0x141   : > { %v8920_v60 = vpop.permute.xlu0 %1093  ;;  %vm413_vm0 = vcmp.eq.s32.totalorder %v8929_v15, 47  ;;  %vm564_vm1 = vcmp.eq.s32.totalorder %v8669_v22, %v8929_v15  ;;  %vm565_vm2 = vcmp.eq.s32.totalorder %v8678_v10, %v8929_v15  ;;  %v679_v22 = vadd.s32 4, %v8531_v51 }
 0x142   : > { %vm614_vm3 = vmor %vm413_vm0, %vm564_vm1  ;;  %vm864_vm5 = vcmp.eq.s32.totalorder %v8639_v42, %v8929_v15  ;;  %vm567_vm6 = vcmp.eq.s32.totalorder %v8686_v49, %v8929_v15  ;;  %vm865_vm7 = vcmp.eq.s32.totalorder %v8649_v54, %v8929_v15  ;;  %vm569_vm8 = vcmp.eq.s32.totalorder %v8695_v59, %v8929_v15 }
 0x143   : > { %7804 = vset.pattern.permute.xlu1 %v12535_v18  ;;  %vm615_vm4 = vmor %vm413_vm0, %vm565_vm2  ;;  %v1880_v10 = vadd.s32 37, %v8609_v62  ;;  %vm1164_vm11 = vcmp.eq.s32.totalorder %v8815_v20, %v8929_v15  ;;  %vm566_vm13 = vcmp.eq.s32.totalorder %v8730_v4, %v8929_v15  ;;  %vm866_vm15 = vcmp.eq.s32.totalorder %v8752_v17, %v8929_v15 }
 0x144   : > { %1939 = vperm.xlu0 %7901, %v1872_v12   ;;  %1954 = vperm.xlu1 %7804, %v1877_v23   ;;  %v8923_v32 = vpop.permute.xlu1 %1633  ;;  %v1878_v23 = vadd.s32 37, %v8604_v57  ;;  %vm914_vm9 = vmor %vm614_vm3, %vm864_vm5  ;;  %v979_v20 = vadd.s32 15, %v8531_v51  ;;  %vm867_vm3 = vcmp.eq.s32.totalorder %v8761_v19, %v8929_v15  ;;  %vm1464_vm5 = vcmp.eq.s32.totalorder %v8671_v24, %v8929_v15 }
 0x145   : > { %v8926_v1 = vpop.permute.xlu0 %1099  ;;  %vm8964_vm10 = vmor %vm615_vm4, %vm865_vm7  ;;  %vm1165_vm4 = vcmp.eq.s32.totalorder %v8662_v7, %v8929_v15  ;;  %vm1166_vm7 = vcmp.eq.s32.totalorder %v8822_v38, %v8929_v15  ;;  %v1278_v7 = vadd.s32 26, %v8604_v57  ;;  %v1884_v24 = vadd.s32 37, %v8621_v16 }
 0x146   : > { %vm8974_vm12 = vmor %vm413_vm0, %vm567_vm6 }
 0x147   : > { %vm8984_vm14 = vmor %vm413_vm0, %vm569_vm8 }
 0x148   : > { %1945 = vperm.xlu0 %7901, %v1874_v40   ;;  %7805 = vset.pattern.permute.xlu1 %v12539_v2  ;;  %v8932_v48 = vpop.permute.xlu1 %1636  ;;  %vm1214_vm1 = vmor %vm914_vm9, %vm1164_vm11 }
 0x149   : > { %457 = vperm.xlu1 %7805, %v8604_v57   ;;  %v8936_v5 = vpop.permute.xlu0 %1105  ;;  %vm616_vm2 = vmor %vm413_vm0, %vm566_vm13  ;;  %vm1167_vm13 = vcmp.eq.s32.totalorder %v8768_v34, %v8929_v15  ;;  %v1578_v34 = vadd.s32 35, %v8604_v57 }
 0x14a   : > { %vm916_vm6 = vmor %vm616_vm2, %vm866_vm15  ;;  %vm1764_vm15 = vcmp.eq.s32.totalorder %v8681_v36, %v8929_v15 }
 0x14b   : > { %vm1514_vm8 = vmor %vm1214_vm1, %vm1464_vm5 }
 0x14c   : > { %1951 = vperm.xlu0 %7901, %v1876_v37   ;;  %v1882_v37 = vadd.s32 37, %v8614_v6  ;;  %vm9009_vm9 = vmor %vm8964_vm10, %vm1165_vm4  ;;  %vm2064_vm10 = vcmp.eq.s32.totalorder %v8641_v45, %v8929_v15 }
 0x14d   : > { %7806 = vset.pattern.permute.xlu1 %v12526_v0  ;;  %v8948_v50 = vpop.permute.xlu1 %1936  ;;  %v8950_v12 = vpop.permute.xlu0 %1111  ;;  %vm917_vm11 = vmor %vm8974_vm12, %vm867_vm3  ;;  %vm1466_vm12 = vcmp.eq.s32.totalorder %v8774_v47, %v8929_v15  ;;  %vm869_vm3 = vcmp.eq.s32.totalorder %v8818_v46, %v8929_v15 }
 0x14e   : > { %12550 = vst [vmem:[#allocation55_spill] sm:$0xff] %v8950_v12  ;;  %757 = vperm.xlu1 %7806, %v678_v43   ;;  %vm1216_vm1 = vmor %vm916_vm6, %vm1166_vm7  ;;  %vm568_vm6 = vcmp.eq.s32.totalorder %v8804_v29, %v8929_v15  ;;  %v12581_v12 = vld [vmem:[#allocation28_spill] sm:$0xff] }
 0x14f   : > { %vm1814_vm2 = vmor %vm1514_vm8, %vm1764_vm15  ;;  %vm1766_vm8 = vcmp.eq.s32.totalorder %v8782_v13, %v8929_v15  ;;  %v12420_v13 = vmov 0.0  }
 0x150   : > { %1957 = vperm.xlu0 %7901, %v1878_v23   ;;  %vm9025_vm4 = vmor %vm917_vm11, %vm1167_vm13  ;;  %v12576_v23 = vld [vmem:[#allocation18_spill] sm:$0xff] }
 0x151   : > { %v8970_v42 = vpop.permute.xlu0 %1117  ;;  %vm1516_vm5 = vmor %vm1216_vm1, %vm1466_vm12  ;;  %vm2066_vm1 = vcmp.eq.s32.totalorder %v8651_v56, %v8929_v15  ;;  %vm2065_vm12 = vcmp.eq.s32.totalorder %v8712_v27, %v8929_v15  ;;  %v1579_v56 = vadd.s32 35, %v8531_v51  ;;  %v1886_v57 = vadd.s32 37, %v12576_v23 }
 0x152   : > { %12553 = vst [vmem:[#allocation56_spill] sm:$0xff] %v8970_v42  ;;  %760 = vperm.xlu1 %7806, %v679_v22   ;;  %v8980_v49 = vpop.permute.xlu1 %439  ;;  %vm9038_vm7 = vmor %vm1814_vm2, %vm2064_vm10  ;;  %vm1765_vm10 = vcmp.eq.s32.totalorder %v8689_v53, %v8929_v15  ;;  %v12580_v42 = vld [vmem:[#allocation27_spill] sm:$0xff] }
 0x153   : > { %vm9047_vm11 = vmor %vm8984_vm14, %vm869_vm3  ;;  %v7170_v22 = vsel %vm9038_vm7, 1.0, %v12420_v13 }
 0x154   : > { %1963 = vperm.xlu0 %7901, %v1880_v10   ;;  %vm9051_vm13 = vmor %vm1516_vm5, %vm1766_vm8  ;;  %vm12422_vm8 = vcmask 392192  }
 0x155   : > { %v8996_v4 = vpop.permute.xlu0 %1123  ;;  %vm9062_vm2 = vmor %vm413_vm0, %vm568_vm6 }
 0x156   : > { %12558 = vst [vmem:[#allocation57_spill] sm:$0xff] %v8996_v4  ;;  %7807 = vset.pattern.permute.xlu1 %v12529_v58 }
 0x157   : > { %1060 = vperm.xlu1 %7807, %v979_v20   ;;  %v9005_v17 = vpop.permute.xlu1 %739 }
 0x158   : > { %1969 = vperm.xlu0 %7901, %v1882_v37  }
 0x159   : > { %v9021_v38 = vpop.permute.xlu0 %1129 }
 0x15a   : > { %12561 = vst [vmem:[#allocation58_spill] sm:$0xff] %v9021_v38 }
 0x15b   : > { %7808 = vset.pattern.permute.xlu1 %v12530_v25  ;;  %v9034_v36 = vpop.permute.xlu1 %742 }
 0x15c   : > { %1357 = vperm.xlu1 %7808, %v1278_v7   ;;  %1975 = vperm.xlu0 %7901, %v1884_v24   ;;  %v12575_v24 = vld [vmem:[#allocation11_spill] sm:$0xff] }
 0x15d   : > { %v681_v43 = vadd.s32 4, %v12575_v24  ;;  %v981_v46 = vadd.s32 15, %v12575_v24 }
 0x15e   : > { %v1319_v47 = vpop.permute.xlu0 %1318 }
 0x15f   : > { %vm1465_vm15 = vcmp.eq.s32.totalorder %v1319_v47, %v8929_v15 }
 0x160   : > { %vm1515_vm14 = vmor %vm9009_vm9, %vm1465_vm15  ;;  %7809 = vset.pattern.permute.xlu1 %v12531_v61  ;;  %v9069_v29 = vpop.permute.xlu1 %1042  ;;  %vm1767_vm15 = vcmp.eq.s32.totalorder %v8788_v35, %v8929_v15  ;;  %v1879_v35 = vadd.s32 37, %v8531_v51  ;;  %1981 = vperm.xlu0 %7901, %v1886_v57  }
 0x161   : > { %vm1815_vm3 = vmor %vm1515_vm14, %vm1765_vm10  ;;  %1657 = vperm.xlu1 %7809, %v1578_v34   ;;  %vm1169_vm10 = vcmp.eq.s32.totalorder %v8827_v31, %v8929_v15  ;;  %vm868_vm14 = vcmp.eq.s32.totalorder %v8811_v41, %v8929_v15 }
 0x162   : > { %vm2115_vm5 = vmor %vm1815_vm3, %vm2065_vm12  ;;  %v1325_v53 = vpop.permute.xlu0 %1324  ;;  %vm1168_vm3 = vcmp.eq.s32.totalorder %v8830_v21, %v8929_v15 }
 0x163   : > { %vm9079_vm9 = vmor %vm9051_vm13, %vm2066_vm1  ;;  %v7171_v40 = vsel %vm2115_vm5, 1.0, %v12420_v13  ;;  %vm1467_vm6 = vcmp.eq.s32.totalorder %v1325_v53, %v8929_v15  ;;  %vm2067_vm13 = vcmp.eq.s32.totalorder %v8798_v11, %v8929_v15  ;;  %v12574_v11 = vmov 0  }
 0x164   : > { %v2264_v27 = vpack.c.bf16 %v7171_v40, %v7170_v22  ;;  %vm1517_vm7 = vmor %vm9025_vm4, %vm1467_vm6  ;;  %v7172_v31 = vsel %vm9079_vm9, 1.0, %v12420_v13  ;;  %v1280_v22 = vadd.s32 26, %v8609_v62 }
 0x165   : > { %vm1817_vm1 = vmor %vm1517_vm7, %vm1767_vm15  ;;  %1660 = vperm.xlu1 %7809, %v1579_v56   ;;  %v9093_v54 = vpop.permute.xlu1 %1339  ;;  %vm1468_vm7 = vcmp.eq.s32.totalorder %v8837_v30, %v8929_v15 }
 0x166   : > { %vm2117_vm12 = vmor %vm1817_vm1, %vm2067_vm13  ;;  %v1331_v59 = vpop.permute.xlu0 %1330  ;;  %7232 = vmatmul.mubr.msk.bf16.vlgmr.msra.gmra.mxu0 %vm12422_vm8, %v2264_v27  ;;  %7257 = vmatmul.mubr.msk.bf16.vlgmr.msra.gmra.mxu1 %vm12422_vm8, %v2264_v27  ;;  %vm1769_vm13 = vcmp.eq.s32.totalorder %v8858_v63, %v8929_v15  ;;  %v1580_v27 = vadd.s32 35, %v8609_v62 }
 0x167   : > { %vm1219_vm4 = vmor %vm9047_vm11, %vm1169_vm10  ;;  %vm1469_vm5 = vcmp.eq.s32.totalorder %v1331_v59, %v8929_v15  ;;  %2508 = vmatprep.mubr.bf16.mxu0 %v12574_v11  ;;  %2791 = vmatprep.mubr.bf16.mxu1 %v12574_v11  ;;  %v7173_v51 = vsel %vm2117_vm12, 1.0, %v12420_v13  ;;  %vm1768_vm10 = vcmp.eq.s32.totalorder %v8849_v52, %v8929_v15 }
 0x168   : > { %vm1519_vm6 = vmor %vm1219_vm4, %vm1469_vm5  ;;  %v2265_v30 = vpack.c.bf16 %v7173_v51, %v7172_v31  ;;  %vm2069_vm4 = vcmp.eq.s32.totalorder %v8869_v39, %v8929_v15  ;;  %v1581_v51 = vadd.s32 35, %v12575_v24  ;;  %vm570_vm5 = vcmp.eq.s32.totalorder %v8881_v26, %v8929_v15  ;;  %v12582_v26 = vld [vmem:[#allocation40_spill] sm:$0xff] }
 0x169   : > { %vm918_vm15 = vmor %vm9062_vm2, %vm868_vm14  ;;  %7810 = vset.pattern.permute.xlu1 %v12535_v18  ;;  %vm2068_vm14 = vcmp.eq.s32.totalorder %v8658_v3, %v8929_v15  ;;  %v680_v3 = vadd.s32 4, %v8609_v62 }
 0x16a   : > { %vm1218_vm11 = vmor %vm918_vm15, %vm1168_vm3  ;;  %v9117_v21 = vpop.permute.xlu0 %1336  ;;  %1960 = vperm.xlu1 %7810, %v1879_v35   ;;  %v9119_v41 = vpop.permute.xlu1 %1639  ;;  %vm571_vm15 = vcmp.eq.s32.totalorder %v12580_v42, %v8929_v15 }
 0x16b   : > { %vm1819_vm2 = vmor %vm1519_vm6, %vm1769_vm13  ;;  %vm870_vm6 = vcmp.eq.s32.totalorder %v8891_v9, %v8929_v15  ;;  %v1582_v9 = vadd.s32 35, %v8614_v6 }
 0x16c   : > { %vm1518_vm1 = vmor %vm1218_vm11, %vm1468_vm7  ;;  %vm573_vm7 = vcmp.eq.s32.totalorder %v12581_v12, %v8929_v15 }
 0x16d   : > { %vm1818_vm12 = vmor %vm1518_vm1, %vm1768_vm10  ;;  %vm1170_vm10 = vcmp.eq.s32.totalorder %v12582_v26, %v8929_v15  ;;  %vm871_vm1 = vcmp.eq.s32.totalorder %v8900_v8, %v8929_v15 }
 0x16e   : > { %vm2119_vm3 = vmor %vm1819_vm2, %vm2069_vm4  ;;  %v9128_v52 = vpop.permute.xlu0 %1342  ;;  %7811 = vset.pattern.permute.xlu1 %v12539_v2  ;;  %7233 = vmatmul.mubr.msk.bf16.gmra.mxu0 %vm12422_vm8, %v2265_v30  ;;  %v9132_v63 = vpop.permute.xlu1 %1642 }
 0x16f   : > { %7258 = vmatmul.mubr.msk.bf16.gmra.mxu1 %vm12422_vm8, %v2265_v30  ;;  %463 = vperm.xlu1 %7811, %v8609_v62   ;;  %vm2118_vm9 = vmor %vm1818_vm12, %vm2068_vm14  ;;  %v7175_v39 = vsel %vm2119_vm3, 1.0, %v12420_v13  ;;  %vm572_vm12 = vcmp.eq.s32.totalorder %v8980_v49, %v8929_v15  ;;  %vm872_vm3 = vcmp.eq.s32.totalorder %v9005_v17, %v8929_v15  ;;  %v12587_v49 = vld [vmem:[#allocation42_spill] sm:$0xff] }
 0x170   : > { %2518 = vmatprep.mubr.bf16.mxu0 %v12574_v11  ;;  %2801 = vmatprep.mubr.bf16.mxu1 %v12574_v11  ;;  %v7174_v37 = vsel %vm2118_vm9, 1.0, %v12420_v13  ;;  %v12579_v13 = vld [vmem:[#allocation19_spill] sm:$0xff]  ;;  %vm620_vm11 = vmor %vm413_vm0, %vm570_vm5  ;;  %vm1171_vm5 = vcmp.eq.s32.totalorder %v8909_v33, %v8929_v15  ;;  %v12588_v33 = vld [vmem:[#allocation29_spill] sm:$0xff] }
 0x171   : > { %v2266_v7 = vpack.c.bf16 %v7175_v39, %v7174_v37  ;;  %v1888_v38 = vadd.s32 37, %v12579_v13  ;;  %vm920_vm13 = vmor %vm620_vm11, %vm870_vm6  ;;  %vm1470_vm6 = vcmp.eq.s32.totalorder %v8916_v44, %v8929_v15  ;;  %v12610_v44 = vld [vmem:[#allocation13_spill] sm:$0xff] }
 0x172   : > { %v9140_v20 = vpop.permute.xlu0 %1348  ;;  %vm621_vm2 = vmor %vm413_vm0, %vm571_vm15 }
 0x173   : > { %7812 = vset.pattern.permute.xlu1 %v12526_v0  ;;  %v9144_v19 = vpop.permute.xlu1 %1942  ;;  %1987 = vperm.xlu0 %7901, %v1888_v38   ;;  %vm9238_vm14 = vmor %vm413_vm0, %vm573_vm7  ;;  %vm1172_vm7 = vcmp.eq.s32.totalorder %v12587_v49, %v8929_v15 }
 0x174   : > { %763 = vperm.xlu1 %7812, %v680_v3   ;;  %v1881_v3 = vadd.s32 37, %v12575_v24  ;;  %vm9246_vm4 = vmor %vm920_vm13, %vm1170_vm10  ;;  %vm1471_vm13 = vcmp.eq.s32.totalorder %v9117_v21, %v8929_v15  ;;  %v685_v21 = vadd.s32 4, %v12610_v44 }
 0x175   : > { %vm921_vm9 = vmor %vm621_vm2, %vm871_vm1  ;;  %vm575_vm2 = vcmp.eq.s32.totalorder %v12588_v33, %v8929_v15 }
 0x176   : > { %7234 = vmatmul.mubr.msk.bf16.gmra.mxu0 %vm12422_vm8, %v2266_v7  ;;  %v9148_v45 = vpop.permute.xlu0 %1354  ;;  %vm622_vm15 = vmor %vm413_vm0, %vm572_vm12  ;;  %vm873_vm12 = vcmp.eq.s32.totalorder %v9034_v36, %v8929_v15  ;;  %v12618_v36 = vld [vmem:[#allocation20_spill] sm:$0xff] }
 0x177   : > { %7259 = vmatmul.mubr.msk.bf16.gmra.mxu1 %vm12422_vm8, %v2266_v7  ;;  %2528 = vmatprep.mubr.bf16.mxu0 %v12574_v11  ;;  %vm922_vm11 = vmor %vm622_vm15, %vm872_vm3  ;;  %vm1770_vm3 = vcmp.eq.s32.totalorder %v8923_v32, %v8929_v15  ;;  %v1890_v32 = vadd.s32 37, %v12618_v36 }
 0x178   : > { %766 = vperm.xlu1 %7812, %v681_v43   ;;  %v9152_v34 = vpop.permute.xlu1 %445  ;;  %2811 = vmatprep.mubr.bf16.mxu1 %v12574_v11  ;;  %vm1221_vm10 = vmor %vm921_vm9, %vm1171_vm5  ;;  %vm1173_vm9 = vcmp.eq.s32.totalorder %v9069_v29, %v8929_v15 }
 0x179   : > { %vm9272_vm1 = vmor %vm9246_vm4, %vm1470_vm6  ;;  %1993 = vperm.xlu0 %7901, %v1890_v32  }
 0x17a   : > { %v9156_v47 = vpop.permute.xlu0 %1360  ;;  %vm9282_vm5 = vmor %vm922_vm11, %vm1172_vm7  ;;  %vm1472_vm7 = vcmp.eq.s32.totalorder %v9093_v54, %v8929_v15  ;;  %vm1771_vm11 = vcmp.eq.s32.totalorder %v8932_v48, %v8929_v15 }
 0x17b   : > { %vm1521_vm4 = vmor %vm1221_vm10, %vm1471_vm13  ;;  %vm1473_vm13 = vcmp.eq.s32.totalorder %v9128_v52, %v8929_v15  ;;  %v12601_v52 = vmov 0 }
 0x17c   : > { %7813 = vset.pattern.permute.xlu1 %v12529_v58  ;;  %vm9293_vm6 = vmor %vm413_vm0, %vm575_vm2 }
 0x17d   : > { %1066 = vperm.xlu1 %7813, %v981_v46   ;;  %v9160_v56 = vpop.permute.xlu1 %745  ;;  %v682_v46 = vadd.s32 4, %v8614_v6  ;;  %vm923_vm15 = vmor %vm9238_vm14, %vm873_vm12  ;;  %vm1772_vm12 = vcmp.eq.s32.totalorder %v9119_v41, %v8929_v15 }
 0x17e   : > { %v9162_v53 = vpop.permute.xlu0 %1366  ;;  %vm1223_vm10 = vmor %vm923_vm15, %vm1173_vm9  ;;  %vm1773_vm9 = vcmp.eq.s32.totalorder %v9132_v63, %v8929_v15  ;;  %vm574_vm15 = vcmp.eq.s32.totalorder %v9152_v34, %v8929_v15  ;;  %v1584_v34 = vadd.s32 35, %v8621_v16 }
 0x17f   : > { %vm9307_vm8 = vmor %vm9272_vm1, %vm1770_vm3  ;;  %vm2071_vm1 = vcmp.eq.s32.totalorder %v8948_v50, %v8929_v15 }
 0x180   : > { %vm1821_vm2 = vmor %vm1521_vm4, %vm1771_vm11 }
 0x181   : > { %7814 = vset.pattern.permute.xlu1 %v12530_v25  ;;  %v9166_v10 = vpop.permute.xlu1 %748  ;;  %vm1522_vm14 = vmor %vm9282_vm5, %vm1472_vm7  ;;  %vm2073_vm5 = vcmp.eq.s32.totalorder %v9144_v19, %v8929_v15  ;;  %vm874_vm7 = vcmp.eq.s32.totalorder %v9160_v56, %v8929_v15  ;;  %v12603_v19 = vld [vmem:[#allocation30_spill] sm:$0xff]  ;;  %v684_v56 = vadd.s32 4, %v8621_v16 }
 0x182   : > { %1363 = vperm.xlu1 %7814, %v1280_v22   ;;  %v9168_v40 = vpop.permute.xlu0 %1372  ;;  %v12577_v22 = vld [vmem:[#allocation12_spill] sm:$0xff]  ;;  %vm1523_vm3 = vmor %vm1223_vm10, %vm1473_vm13 }
 0x183   : > { %v983_v55 = vadd.s32 15, %v12577_v22  ;;  %v1583_v8 = vadd.s32 35, %v12577_v22  ;;  %vm9324_vm4 = vmor %vm1821_vm2, %vm2071_vm1  ;;  %vm875_vm1 = vcmp.eq.s32.totalorder %v9166_v10, %v8929_v15  ;;  %v12607_v10 = vmov 0.0  }
 0x184   : > { %vm9334_vm11 = vmor %vm1522_vm14, %vm1772_vm12  ;;  %vm577_vm14 = vcmp.eq.s32.totalorder %v12603_v19, %v8929_v15  ;;  %v7177_v38 = vsel %vm9324_vm4, 1.0, %v12607_v10 }
 0x185   : > { %vm1823_vm10 = vmor %vm1523_vm3, %vm1773_vm9 }
 0x186   : > { %7815 = vset.pattern.permute.xlu1 %v12531_v61  ;;  %v9172_v59 = vpop.permute.xlu1 %1048  ;;  %v9174_v35 = vpop.permute.xlu0 %1378  ;;  %vm9341_vm13 = vmor %vm1823_vm10, %vm2073_vm5 }
 0x187   : > { %1663 = vperm.xlu1 %7815, %v1580_v27   ;;  %v683_v27 = vadd.s32 4, %v12577_v22  ;;  %v12602_v52 = vsel %vm9341_vm13, 4294967295, %v12601_v52  ;;  %vm624_vm2 = vmor %vm413_vm0, %vm574_vm15  ;;  %vm1175_vm3 = vcmp.eq.s32.totalorder %v9172_v59, %v8929_v15  ;;  %v12626_v59 = vld [vmem:[#allocation31_spill] sm:$0xff] }
 0x188   : > { %vm9352_vm12 = vmor %vm624_vm2, %vm874_vm7  ;;  %vm1475_vm2 = vcmp.eq.s32.totalorder %v9140_v20, %v8929_v15 }
 0x189   : > { %vm925_vm10 = vmor %vm9293_vm6, %vm875_vm1 }
 0x18a   : > { %v9177_v31 = vpop.permute.xlu0 %1384  ;;  %vm9372_vm7 = vmor %vm413_vm0, %vm577_vm14 }
 0x18b   : > { %1666 = vperm.xlu1 %7815, %v1581_v51   ;;  %v9179_v30 = vpop.permute.xlu1 %1345  ;;  %vm1225_vm13 = vmor %vm925_vm10, %vm1175_vm3  ;;  %vm12611_vm3 = vcmask 392192  }
 0x18c   : > { %vm1474_vm6 = vcmp.eq.s32.totalorder %v9179_v30, %v8929_v15 }
 0x18e   : > { %v9182_v39 = vpop.permute.xlu0 %1390 }
 0x18f   : > { %7816 = vset.pattern.permute.xlu1 %v12535_v18 }
 0x190   : > { %1966 = vperm.xlu1 %7816, %v1881_v3   ;;  %v9185_v62 = vpop.permute.xlu1 %1645 }
 0x191   : > { %vm1774_vm1 = vcmp.eq.s32.totalorder %v9185_v62, %v8929_v15 }
 0x192   : > { %v9187_v37 = vpop.permute.xlu0 %1396 }
 0x194   : > { %7817 = vset.pattern.permute.xlu1 %v12539_v2  ;;  %v9190_v7 = vpop.permute.xlu1 %1648 }
 0x195   : > { %469 = vperm.xlu1 %7817, %v8614_v6  }
 0x196   : > { %v9193_v43 = vpop.permute.xlu0 %1402 }
 0x199   : > { %7818 = vset.pattern.permute.xlu1 %v12526_v0  ;;  %v9197_v24 = vpop.permute.xlu1 %1948 }
 0x19a   : > { %769 = vperm.xlu1 %7818, %v682_v46   ;;  %v9199_v57 = vpop.permute.xlu0 %1408  ;;  %vm2075_vm10 = vcmp.eq.s32.totalorder %v9197_v24, %v8929_v15 }
 0x19e   : > { %772 = vperm.xlu1 %7818, %v683_v27   ;;  %v9202_v51 = vpop.permute.xlu1 %451  ;;  %v9204_v3 = vpop.permute.xlu0 %1414  ;;  %v1282_v27 = vadd.s32 26, %v8614_v6 }
 0x19f   : > { %12578 = vst [vmem:[#allocation11_spill] sm:$0xff] %v9204_v3 }
 0x1a2   : > { %7819 = vset.pattern.permute.xlu1 %v12529_v58  ;;  %v9209_v4 = vpop.permute.xlu0 %1420 }
 0x1a3   : > { %1072 = vperm.xlu1 %7819, %v983_v55   ;;  %v9211_v46 = vpop.permute.xlu1 %751 }
 0x1a6   : > { %v9220_v3 = vpop.permute.xlu0 %1426 }
 0x1a7   : > { %7820 = vset.pattern.permute.xlu1 %v12530_v25  ;;  %v9227_v55 = vpop.permute.xlu1 %754 }
 0x1a8   : > { %1369 = vperm.xlu1 %7820, %v1282_v27  }
 0x1aa   : > { %v9244_v42 = vpop.permute.xlu0 %1432 }
 0x1ac   : > { %7821 = vset.pattern.permute.xlu1 %v12531_v61  ;;  %v9255_v6 = vpop.permute.xlu1 %1054 }
 0x1ad   : > { %1669 = vperm.xlu1 %7821, %v1582_v9   ;;  %v1883_v9 = vadd.s32 37, %v12577_v22  ;;  %v12606_v22 = vld [vmem:[#allocation44_spill] sm:$0xff] }
 0x1ae   : > { %v9264_v17 = vpop.permute.xlu0 %1438  ;;  %vm1174_vm5 = vcmp.eq.s32.totalorder %v12606_v22, %v8929_v15 }
 0x1b1   : > { %1672 = vperm.xlu1 %7821, %v1583_v8   ;;  %v9286_v27 = vpop.permute.xlu1 %1351 }
 0x1b2   : > { %v9288_v26 = vpop.permute.xlu0 %1444 }
 0x1b5   : > { %7822 = vset.pattern.permute.xlu1 %v12535_v18 }
 0x1b6   : > { %1972 = vperm.xlu1 %7822, %v1883_v9   ;;  %v9316_v48 = vpop.permute.xlu1 %1651  ;;  %v9318_v29 = vpop.permute.xlu0 %1450  ;;  %v985_v9 = vadd.s32 15, %v12610_v44 }
 0x1ba   : > { %7823 = vset.pattern.permute.xlu1 %v12539_v2  ;;  %v9339_v50 = vpop.permute.xlu1 %1654 }
 0x1bb   : > { %v1934_v63 = vpop.permute.xlu0 %1933  ;;  %475 = vperm.xlu1 %7823, %v8621_v16  }
 0x1bc   : > { %vm2070_vm9 = vcmp.eq.s32.totalorder %v1934_v63, %v8929_v15 }
 0x1bd   : > { %vm2120_vm15 = vmor %vm9307_vm8, %vm2070_vm9 }
 0x1be   : > { %v7176_v12 = vsel %vm2120_vm15, 1.0, %v12607_v10  ;;  %vm1224_vm8 = vmor %vm9352_vm12, %vm1174_vm5  ;;  %vm1775_vm5 = vcmp.eq.s32.totalorder %v9190_v7, %v8929_v15 }
 0x1bf   : > { %v2267_v8 = vpack.c.bf16 %v7177_v38, %v7176_v12  ;;  %v1940_v49 = vpop.permute.xlu0 %1939  ;;  %7824 = vset.pattern.permute.xlu1 %v12526_v0  ;;  %v9379_v33 = vpop.permute.xlu1 %1954  ;;  %vm12612_vm9 = vmmov %vm12611_vm3  ;;  %v1885_v38 = vadd.s32 37, %v12610_v44 }
 0x1c0   : > { %vm2072_vm4 = vcmp.eq.s32.totalorder %v1940_v49, %v8929_v15  ;;  %775 = vperm.xlu1 %7824, %v684_v56   ;;  %vm1525_vm12 = vmor %vm1225_vm13, %vm1475_vm2  ;;  %vm876_vm2 = vcmp.eq.s32.totalorder %v9211_v46, %v8929_v15 }
 0x1c1   : > { %vm2122_vm14 = vmor %vm9334_vm11, %vm2072_vm4  ;;  %7235 = vmatmul.mubr.msk.bf16.gmra.mxu0 %vm12611_vm3, %v2267_v8  ;;  %7260 = vmatmul.mubr.msk.bf16.gmra.mxu1 %vm12612_vm9, %v2267_v8  ;;  %vm576_vm11 = vcmp.eq.s32.totalorder %v9202_v51, %v8929_v15  ;;  %vm877_vm3 = vcmp.eq.s32.totalorder %v9227_v55, %v8929_v15  ;;  %v12622_v55 = vld [vmem:[#allocation46_spill] sm:$0xff]  ;;  %v12628_v8 = vld [vmem:[#allocation21_spill] sm:$0xff] }
 0x1c2   : > { %2538 = vmatprep.mubr.bf16.mxu0 %v12574_v11  ;;  %2821 = vmatprep.mubr.bf16.mxu1 %v12574_v11  ;;  %vm1524_vm15 = vmor %vm1224_vm8, %vm1474_vm6  ;;  %v7178_v62 = vsel %vm2122_vm14, 1.0, %v12607_v10  ;;  %vm12615_vm8 = vnez %v12602_v52  ;;  %v1892_v49 = vadd.s32 37, %v12628_v8  ;;  %v12633_v51 = vld [vmem:[#allocation24_spill] sm:$0xff] }
 0x1c3   : > { %v1946_v30 = vpop.permute.xlu0 %1945  ;;  %vm9405_vm4 = vmor %vm1524_vm15, %vm1774_vm1  ;;  %v7179_v24 = vsel %vm12615_vm8, 1.0, %v12607_v10  ;;  %vm12621_vm15 = vcmask 392192   ;;  %vm1476_vm8 = vcmp.eq.s32.totalorder %v9286_v27, %v8929_v15  ;;  %v1898_v32 = vadd.s32 37, %v12633_v51 }
 0x1c4   : > { %778 = vperm.xlu1 %7824, %v685_v21   ;;  %v9409_v7 = vpop.permute.xlu1 %457  ;;  %vm1825_vm13 = vmor %vm1525_vm12, %vm1775_vm5  ;;  %vm2074_vm1 = vcmp.eq.s32.totalorder %v1946_v30, %v8929_v15  ;;  %v2268_v46 = vpack.c.bf16 %v7179_v24, %v7178_v62  ;;  %vm1177_vm12 = vcmp.eq.s32.totalorder %v9255_v6, %v8929_v15  ;;  %v1284_v6 = vadd.s32 26, %v8621_v16  ;;  %1999 = vperm.xlu0 %7901, %v1892_v49   ;;  %v12631_v21 = vld [vmem:[#allocation22_spill] sm:$0xff] }
 0x1c5   : > { %vm9417_vm6 = vmor %vm1825_vm13, %vm2075_vm10  ;;  %vm1176_vm10 = vcmp.eq.s32.totalorder %v12622_v55, %v8929_v15  ;;  %v1894_v30 = vadd.s32 37, %v12631_v21  ;;  %v686_v24 = vadd.s32 4, %v12576_v23 }
 0x1c6   : > { %vm626_vm14 = vmor %vm413_vm0, %vm576_vm11 }
 0x1c7   : > { %vm9427_vm9 = vmor %vm626_vm14, %vm876_vm2  ;;  %vm1477_vm2 = vcmp.eq.s32.totalorder %v9148_v45, %v8929_v15  ;;  %v1952_v52 = vpop.permute.xlu0 %1951  ;;  %v7181_v45 = vsel %vm9417_vm6, 1.0, %v12607_v10 }
 0x1c8   : > { %7825 = vset.pattern.permute.xlu1 %v12529_v58  ;;  %vm2124_vm5 = vmor %vm9405_vm4, %vm2074_vm1  ;;  %vm1776_vm1 = vcmp.eq.s32.totalorder %v9316_v48, %v8929_v15  ;;  %2005 = vperm.xlu0 %7901, %v1894_v30   ;;  %v1586_v30 = vadd.s32 35, %v12576_v23 }
 0x1c9   : > { %1078 = vperm.xlu1 %7825, %v985_v9   ;;  %7236 = vmatmul.mubr.msk.bf16.gmra.mxu0 %vm12621_vm15, %v2268_v46  ;;  %v758_v41 = vpop.permute.xlu1 %757  ;;  %vm927_vm11 = vmor %vm9372_vm7, %vm877_vm3  ;;  %v7180_v63 = vsel %vm2124_vm5, 1.0, %v12607_v10  ;;  %vm2076_vm3 = vcmp.eq.s32.totalorder %v1952_v52, %v8929_v15  ;;  %vm1777_vm5 = vcmp.eq.s32.totalorder %v9339_v50, %v8929_v15  ;;  %v1585_v50 = vadd.s32 35, %v12610_v44  ;;  %v12635_v52 = vld [vmem:[#allocation25_spill] sm:$0xff] }
 0x1ca   : > { %vm12623_vm13 = vmmov %vm12621_vm15  ;;  %2548 = vmatprep.mubr.bf16.mxu0 %v12574_v11  ;;  %v2269_v27 = vpack.c.bf16 %v7181_v45, %v7180_v63  ;;  %v1900_v63 = vadd.s32 37, %v12635_v52 }
 0x1cb   : > { %7261 = vmatmul.mubr.msk.bf16.gmra.mxu1 %vm12623_vm13, %v2268_v46  ;;  %vm1227_vm4 = vmor %vm927_vm11, %vm1177_vm12  ;;  %v1958_v62 = vpop.permute.xlu0 %1957 }
 0x1cc   : > { %2831 = vmatprep.mubr.bf16.mxu1 %v12574_v11  ;;  %vm1226_vm7 = vmor %vm9427_vm9, %vm1176_vm10  ;;  %vm2077_vm9 = vcmp.eq.s32.totalorder %v9379_v33, %v8929_v15  ;;  %v12630_v33 = vld [vmem:[#allocation48_spill] sm:$0xff] }
 0x1cd   : > { %7826 = vset.pattern.permute.xlu1 %v12530_v25  ;;  %v761_v19 = vpop.permute.xlu1 %760  ;;  %vm1527_vm14 = vmor %vm1227_vm4, %vm1477_vm2  ;;  %vm578_vm4 = vcmp.eq.s32.totalorder %v9409_v7, %v8929_v15  ;;  %v12632_v7 = vld [vmem:[#allocation23_spill] sm:$0xff] }
 0x1ce   : > { %1375 = vperm.xlu1 %7826, %v1284_v6   ;;  %vm1526_vm12 = vmor %vm1226_vm7, %vm1476_vm8  ;;  %vm878_vm8 = vcmp.eq.s32.totalorder %v758_v41, %v8929_v15  ;;  %vm579_vm7 = vcmp.eq.s32.totalorder %v12626_v59, %v8929_v15  ;;  %v1896_v9 = vadd.s32 37, %v12632_v7 }
 0x1cf   : > { %vm1826_vm15 = vmor %vm1526_vm12, %vm1776_vm1  ;;  %vm1178_vm12 = vcmp.eq.s32.totalorder %v12630_v33, %v8929_v15 }
 0x1d0   : > { %vm2126_vm10 = vmor %vm1826_vm15, %vm2076_vm3  ;;  %vm879_vm15 = vcmp.eq.s32.totalorder %v761_v19, %v8929_v15  ;;  %2011 = vperm.xlu0 %7901, %v1896_v9  }
 0x1d1   : > { %vm12624_vm11 = vmmov %vm12623_vm13  ;;  %v7182_v16 = vsel %vm2126_vm10, 1.0, %v12607_v10 }
 0x1d2   : > { %7237 = vmatmul.mubr.msk.bf16.gmra.mxu0 %vm12624_vm11, %v2269_v27  ;;  %vm1827_vm13 = vmor %vm1527_vm14, %vm1777_vm5  ;;  %7827 = vset.pattern.permute.xlu1 %v12531_v61  ;;  %v1061_v48 = vpop.permute.xlu1 %1060 }
 0x1d3   : > { %vm12625_vm6 = vmmov %vm12624_vm11  ;;  %1675 = vperm.xlu1 %7827, %v1584_v34   ;;  %2558 = vmatprep.mubr.bf16.mxu0 %v12574_v11  ;;  %vm1179_vm10 = vcmp.eq.s32.totalorder %v1061_v48, %v8929_v15  ;;  %v12638_v34 = vld [vmem:[#allocation26_spill] sm:$0xff] }
 0x1d4   : > { %7262 = vmatmul.mubr.msk.bf16.gmra.mxu1 %vm12625_vm6, %v2269_v27  ;;  %vm2127_vm2 = vmor %vm1827_vm13, %vm2077_vm9  ;;  %2017 = vperm.xlu0 %7901, %v1898_v32   ;;  %v351_v27 = vld [vmem:[%s8469_s19 + $0x140] sm:$0xff]  ;;  %v1902_v48 = vadd.s32 37, %v12638_v34  ;;  %v357_v32 = vld [vmem:[%s8469_s19 + $0x170] sm:$0xff] }
 0x1d5   : > { %2841 = vmatprep.mubr.bf16.mxu1 %v12574_v11  ;;  %v7183_v56 = vsel %vm2127_vm2, 1.0, %v12607_v10  ;;  %vm12627_vm1 = vmmov %vm12625_vm6 }
 0x1d6   : > { %v2270_v22 = vpack.c.bf16 %v7183_v56, %v7182_v16  ;;  %vm628_vm14 = vmor %vm413_vm0, %vm578_vm4 }
 0x1d7   : > { %1678 = vperm.xlu1 %7827, %v1585_v50   ;;  %v1358_v12 = vpop.permute.xlu1 %1357  ;;  %vm12629_vm3 = vmmov %vm12627_vm1  ;;  %v7668_v50 = vtrunc.f32 %v351_v27  ;;  %v12640_v27 = vld [vmem:[#allocation39_spill] sm:$0xff] }
 0x1d8   : > { %vm928_vm5 = vmor %vm628_vm14, %vm878_vm8  ;;  %vm1478_vm13 = vcmp.eq.s32.totalorder %v1358_v12, %v8929_v15  ;;  %vm1479_vm8 = vcmp.eq.s32.totalorder %v9156_v47, %v8929_v15  ;;  %vm2078_vm14 = vcmp.eq.s32.totalorder %v1958_v62, %v8929_v15  ;;  %v12634_v47 = vld [vmem:[#allocation14_spill] sm:$0xff]  ;;  %2023 = vperm.xlu0 %7901, %v1900_v63   ;;  %v353_v12 = vld [vmem:[%s8469_s19 + $0x150] sm:$0xff] }
 0x1d9   : > { %vm629_vm9 = vmor %vm413_vm0, %vm579_vm7  ;;  %v687_v54 = vadd.s32 4, %v12634_v47  ;;  %v987_v45 = vadd.s32 15, %v12634_v47  ;;  %v9518_v56 = vcvt.f32.s32 %v7668_v50  ;;  %v7672_v59 = vtrunc.f32 %v353_v12  ;;  %v12641_v50 = vld [vmem:[#allocation41_spill] sm:$0xff] }
 0x1da   : > { %7238 = vmatmul.mubr.msk.bf16.gmra.mxu0 %vm12627_vm1, %v2270_v22  ;;  %vm1228_vm11 = vmor %vm928_vm5, %vm1178_vm12  ;;  %v1887_v63 = vadd.s32 37, %v12634_v47 }
 0x1db   : > { %2568 = vmatprep.mubr.bf16.mxu0 %v12574_v11  ;;  %7828 = vset.pattern.permute.xlu1 %v12535_v18  ;;  %vm929_vm6 = vmor %vm629_vm9, %vm879_vm15  ;;  %v9524_v33 = vcvt.f32.s32 %v7672_v59  ;;  %v12643_v59 = vld [vmem:[#allocation43_spill] sm:$0xff] }
 0x1dc   : > { %7263 = vmatmul.mubr.msk.bf16.gmra.mxu1 %vm12629_vm3, %v2270_v22  ;;  %1978 = vperm.xlu1 %7828, %v1885_v38   ;;  %v1658_v44 = vpop.permute.xlu1 %1657  ;;  %vm1229_vm4 = vmor %vm929_vm6, %vm1179_vm10  ;;  %v1286_v22 = vadd.s32 26, %v12576_v23  ;;  %v1904_v38 = vadd.s32 37, %v9518_v56 }
 0x1dd   : > { %2851 = vmatprep.mubr.bf16.mxu1 %v12574_v11  ;;  %vm1778_vm2 = vcmp.eq.s32.totalorder %v1658_v44, %v8929_v15  ;;  %vm1528_vm7 = vmor %vm1228_vm11, %vm1478_vm13  ;;  %vm12636_vm11 = vcmask 392192   ;;  %2029 = vperm.xlu0 %7901, %v1902_v48   ;;  %v355_v44 = vld [vmem:[%s8469_s19 + $0x160] sm:$0xff]  ;;  %v1906_v62 = vadd.s32 37, %v9524_v33  ;;  %v688_v48 = vadd.s32 4, %v12579_v13 }
 0x1de   : > { %vm1828_vm1 = vmor %vm1528_vm7, %vm1778_vm2  ;;  %vm1180_vm7 = vcmp.eq.s32.totalorder %v8884_v14, %v8929_v15  ;;  %v1964_v14 = vpop.permute.xlu0 %1963 }
 0x1df   : > { %vm1529_vm12 = vmor %vm1229_vm4, %vm1479_vm8 }
 0x1e0   : > { %7829 = vset.pattern.permute.xlu1 %v12539_v2  ;;  %v1661_v20 = vpop.permute.xlu1 %1660  ;;  %vm2128_vm5 = vmor %vm1828_vm1, %vm2078_vm14 }
 0x1e1   : > { %481 = vperm.xlu1 %7829, %v12576_v23   ;;  %vm1779_vm3 = vcmp.eq.s32.totalorder %v1661_v20, %v8929_v15  ;;  %v7184_v41 = vsel %vm2128_vm5, 1.0, %v12607_v10  ;;  %vm12637_vm13 = vmmov %vm12636_vm11  ;;  %2035 = vperm.xlu0 %7901, %v1904_v38   ;;  %v7676_v20 = vtrunc.f32 %v355_v44 }
 0x1e2   : > { %vm1829_vm9 = vmor %vm1529_vm12, %vm1779_vm3 }
 0x1e3   : > { %v9529_v9 = vcvt.f32.s32 %v7676_v20 }
 0x1e5   : > { %7830 = vset.pattern.permute.xlu1 %v12526_v0  ;;  %v1961_v46 = vpop.permute.xlu1 %1960  ;;  %2041 = vperm.xlu0 %7901, %v1906_v62   ;;  %v12646_v62 = vld [vmem:[#allocation45_spill] sm:$0xff] }
 0x1e6   : > { %vm2079_vm15 = vcmp.eq.s32.totalorder %v1961_v46, %v8929_v15  ;;  %781 = vperm.xlu1 %7830, %v686_v24   ;;  %v1587_v46 = vadd.s32 35, %v12634_v47 }
 0x1e7   : > { %vm2129_vm10 = vmor %vm1829_vm9, %vm2079_vm15 }
 0x1e8   : > { %v7185_v55 = vsel %vm2129_vm10, 1.0, %v12607_v10 }
 0x1e9   : > { %v2271_v6 = vpack.c.bf16 %v7185_v55, %v7184_v41  ;;  %v7680_v41 = vtrunc.f32 %v357_v32  ;;  %v12647_v32 = vld [vmem:[#allocation47_spill] sm:$0xff] }
 0x1ea   : > { %784 = vperm.xlu1 %7830, %v687_v54   ;;  %v464_v19 = vpop.permute.xlu1 %463  ;;  %v1908_v54 = vadd.s32 37, %v9529_v9 }
 0x1eb   : > { %7239 = vmatmul.mubr.msk.bf16.gmra.mxu0 %vm12636_vm11, %v2271_v6  ;;  %7264 = vmatmul.mubr.msk.bf16.gmra.mxu1 %vm12637_vm13, %v2271_v6  ;;  %v9535_v55 = vcvt.f32.s32 %v7680_v41  ;;  %vm580_vm6 = vcmp.eq.s32.totalorder %v464_v19, %v8929_v15  ;;  %vm1481_vm13 = vcmp.eq.s32.totalorder %v9162_v53, %v8929_v15  ;;  %v12642_v53 = vld [vmem:[#allocation15_spill] sm:$0xff]  ;;  %v12648_v41 = vld [vmem:[#allocation49_spill] sm:$0xff] }
 0x1ec   : > { %2578 = vmatprep.mubr.bf16.mxu0 %v12574_v11  ;;  %2861 = vmatprep.mubr.bf16.mxu1 %v12574_v11  ;;  %vm630_vm8 = vmor %vm413_vm0, %vm580_vm6 }
 0x1ed   : > { %2047 = vperm.xlu0 %7901, %v1908_v54   ;;  %v1910_v6 = vadd.s32 37, %v9535_v55  ;;  %v1588_v54 = vadd.s32 35, %v12579_v13 }
 0x1ee   : > { %7831 = vset.pattern.permute.xlu1 %v12529_v58 }
 0x1ef   : > { %1084 = vperm.xlu1 %7831, %v987_v45   ;;  %v764_v16 = vpop.permute.xlu1 %763  ;;  %v12639_v45 = vld [vmem:[#allocation32_spill] sm:$0xff] }
 0x1f0   : > { %vm880_vm2 = vcmp.eq.s32.totalorder %v764_v16, %v8929_v15  ;;  %vm581_vm4 = vcmp.eq.s32.totalorder %v12639_v45, %v8929_v15 }
 0x1f1   : > { %vm930_vm1 = vmor %vm630_vm8, %vm880_vm2  ;;  %2053 = vperm.xlu0 %7901, %v1910_v6   ;;  %v1589_v6 = vadd.s32 35, %v12642_v53 }
 0x1f2   : > { %vm631_vm14 = vmor %vm413_vm0, %vm581_vm4  ;;  %vm2080_vm4 = vcmp.eq.s32.totalorder %v1964_v14, %v8929_v15  ;;  %v12651_v14 = vld [vmem:[#allocation51_spill] sm:$0xff] }
 0x1f3   : > { %7832 = vset.pattern.permute.xlu1 %v12530_v25  ;;  %v767_v49 = vpop.permute.xlu1 %766  ;;  %vm1230_vm5 = vmor %vm930_vm1, %vm1180_vm7 }
 0x1f4   : > { %1381 = vperm.xlu1 %7832, %v1286_v22   ;;  %vm881_vm3 = vcmp.eq.s32.totalorder %v767_v49, %v8929_v15  ;;  %v689_v22 = vadd.s32 4, %v12642_v53 }
 0x1f5   : > { %vm931_vm15 = vmor %vm631_vm14, %vm881_vm3  ;;  %7909 = vset.pattern.permute.xlu0 %v12539_v2 }
 0x1f6   : > { %508 = vperm.xlu0 %7909, %v12640_v27  }
 0x1f8   : > { %7833 = vset.pattern.permute.xlu1 %v12531_v61  ;;  %v1067_v24 = vpop.permute.xlu1 %1066 }
 0x1f9   : > { %1681 = vperm.xlu1 %7833, %v1586_v30   ;;  %vm1181_vm12 = vcmp.eq.s32.totalorder %v1067_v24, %v8929_v15  ;;  %v989_v30 = vadd.s32 15, %v12642_v53  ;;  %v1288_v24 = vadd.s32 26, %v12579_v13 }
 0x1fa   : > { %vm1231_vm11 = vmor %vm931_vm15, %vm1181_vm12  ;;  %514 = vperm.xlu0 %7909, %v12641_v50  }
 0x1fb   : > { %vm1531_vm7 = vmor %vm1231_vm11, %vm1481_vm13 }
 0x1fd   : > { %1684 = vperm.xlu1 %7833, %v1587_v46   ;;  %v1364_v23 = vpop.permute.xlu1 %1363 }
 0x1fe   : > { %vm1480_vm9 = vcmp.eq.s32.totalorder %v1364_v23, %v8929_v15  ;;  %520 = vperm.xlu0 %7909, %v12643_v59  }
 0x1ff   : > { %vm1530_vm6 = vmor %vm1230_vm5, %vm1480_vm9  ;;  %vm12644_vm5 = vcmask 392192  }
 0x200   : > { %vm12645_vm9 = vmmov %vm12644_vm5 }
 0x201   : > { %7834 = vset.pattern.permute.xlu1 %v12535_v18 }
 0x202   : > { %1984 = vperm.xlu1 %7834, %v1887_v63   ;;  %v1664_v47 = vpop.permute.xlu1 %1663  ;;  %526 = vperm.xlu0 %7909, %v12646_v62   ;;  %v12649_v63 = vld [vmem:[#allocation50_spill] sm:$0xff] }
 0x203   : > { %vm1780_vm10 = vcmp.eq.s32.totalorder %v1664_v47, %v8929_v15  ;;  %v12650_v47 = vld [vmem:[#allocation33_spill] sm:$0xff] }
 0x204   : > { %vm1830_vm2 = vmor %vm1530_vm6, %vm1780_vm10  ;;  %vm583_vm11 = vcmp.eq.s32.totalorder %v12650_v47, %v8929_v15  ;;  %vm1182_vm6 = vcmp.eq.s32.totalorder %v12651_v14, %v8929_v15  ;;  %v12655_v14 = vld [vmem:[#allocation34_spill] sm:$0xff] }
 0x205   : > { %vm2130_vm1 = vmor %vm1830_vm2, %vm2080_vm4 }
 0x206   : > { %7835 = vset.pattern.permute.xlu1 %v12539_v2  ;;  %v1667_v19 = vpop.permute.xlu1 %1666  ;;  %v7186_v12 = vsel %vm2130_vm1, 1.0, %v12607_v10  ;;  %532 = vperm.xlu0 %7909, %v12647_v32   ;;  %vm633_vm4 = vmor %vm413_vm0, %vm583_vm11 }
 0x207   : > { %487 = vperm.xlu1 %7835, %v12579_v13   ;;  %vm1781_vm8 = vcmp.eq.s32.totalorder %v1667_v19, %v8929_v15  ;;  %v1889_v13 = vadd.s32 37, %v12642_v53  ;;  %v690_v53 = vadd.s32 4, %v12618_v36 }
 0x208   : > { %vm1831_vm14 = vmor %vm1531_vm7, %vm1781_vm8 }
 0x20a   : > { %538 = vperm.xlu0 %7909, %v12648_v41  }
 0x20b   : > { %7836 = vset.pattern.permute.xlu1 %v12526_v0  ;;  %v1967_v16 = vpop.permute.xlu1 %1966 }
 0x20c   : > { %vm2081_vm3 = vcmp.eq.s32.totalorder %v1967_v16, %v8929_v15  ;;  %787 = vperm.xlu1 %7836, %v688_v48   ;;  %v1970_v48 = vpop.permute.xlu0 %1969 }
 0x20d   : > { %vm2131_vm12 = vmor %vm1831_vm14, %vm2081_vm3  ;;  %vm2082_vm11 = vcmp.eq.s32.totalorder %v1970_v48, %v8929_v15 }
 0x20e   : > { %v7187_v38 = vsel %vm2131_vm12, 1.0, %v12607_v10  ;;  %544 = vperm.xlu0 %7909, %v12649_v63  }
 0x20f   : > { %v2272_v49 = vpack.c.bf16 %v7187_v38, %v7186_v12 }
 0x210   : > { %790 = vperm.xlu1 %7836, %v689_v22   ;;  %v470_v44 = vpop.permute.xlu1 %469  ;;  %v1976_v48 = vpop.permute.xlu0 %1975 }
 0x211   : > { %7240 = vmatmul.mubr.msk.bf16.gmra.mxu0 %vm12644_vm5, %v2272_v49  ;;  %7265 = vmatmul.mubr.msk.bf16.gmra.mxu1 %vm12645_vm9, %v2272_v49  ;;  %vm582_vm15 = vcmp.eq.s32.totalorder %v470_v44, %v8929_v15  ;;  %vm1483_vm9 = vcmp.eq.s32.totalorder %v9168_v40, %v8929_v15  ;;  %v12652_v40 = vld [vmem:[#allocation16_spill] sm:$0xff] }
 0x212   : > { %2588 = vmatprep.mubr.bf16.mxu0 %v12574_v11  ;;  %2871 = vmatprep.mubr.bf16.mxu1 %v12574_v11  ;;  %vm632_vm13 = vmor %vm413_vm0, %vm582_vm15  ;;  %v691_v12 = vadd.s32 4, %v12652_v40  ;;  %v1891_v47 = vadd.s32 37, %v12652_v40 }
 0x213   : > { %550 = vperm.xlu0 %7909, %v8897_v28  }
 0x214   : > { %7837 = vset.pattern.permute.xlu1 %v12529_v58 }
 0x215   : > { %1090 = vperm.xlu1 %7837, %v989_v30   ;;  %v770_v20 = vpop.permute.xlu1 %769 }
 0x216   : > { %vm882_vm10 = vcmp.eq.s32.totalorder %v770_v20, %v8929_v15  ;;  %v991_v20 = vadd.s32 15, %v12652_v40 }
 0x217   : > { %vm932_vm2 = vmor %vm632_vm13, %vm882_vm10 }
 0x218   : > { %vm1232_vm1 = vmor %vm932_vm2, %vm1182_vm6 }
 0x219   : > { %7838 = vset.pattern.permute.xlu1 %v12530_v25  ;;  %v773_v46 = vpop.permute.xlu1 %772 }
 0x21a   : > { %1387 = vperm.xlu1 %7838, %v1288_v24   ;;  %vm883_vm8 = vcmp.eq.s32.totalorder %v773_v46, %v8929_v15  ;;  %v1290_v46 = vadd.s32 26, %v12618_v36 }
 0x21b   : > { %vm933_vm3 = vmor %vm633_vm4, %vm883_vm8 }
 0x21e   : > { %7839 = vset.pattern.permute.xlu1 %v12531_v61  ;;  %v1073_v23 = vpop.permute.xlu1 %1072 }
 0x21f   : > { %1687 = vperm.xlu1 %7839, %v1588_v54   ;;  %vm1183_vm7 = vcmp.eq.s32.totalorder %v1073_v23, %v8929_v15  ;;  %v1590_v23 = vadd.s32 35, %v12618_v36 }
 0x220   : > { %vm1233_vm5 = vmor %vm933_vm3, %vm1183_vm7 }
 0x221   : > { %vm1533_vm6 = vmor %vm1233_vm5, %vm1483_vm9  ;;  %vm585_vm5 = vcmp.eq.s32.totalorder %v12655_v14, %v8929_v15 }
 0x223   : > { %1690 = vperm.xlu1 %7839, %v1589_v6   ;;  %v1370_v45 = vpop.permute.xlu1 %1369 }
 0x224   : > { %vm1482_vm14 = vcmp.eq.s32.totalorder %v1370_v45, %v8929_v15  ;;  %v1591_v45 = vadd.s32 35, %v12652_v40 }
 0x225   : > { %vm1532_vm15 = vmor %vm1232_vm1, %vm1482_vm14  ;;  %vm12653_vm1 = vcmask 392192  }
 0x226   : > { %vm12654_vm14 = vmmov %vm12653_vm1 }
 0x227   : > { %7840 = vset.pattern.permute.xlu1 %v12535_v18 }
 0x228   : > { %1990 = vperm.xlu1 %7840, %v1889_v13   ;;  %v1670_v19 = vpop.permute.xlu1 %1669 }
 0x229   : > { %vm1782_vm12 = vcmp.eq.s32.totalorder %v1670_v19, %v8929_v15 }
 0x22a   : > { %vm1832_vm10 = vmor %vm1532_vm15, %vm1782_vm12 }
 0x22b   : > { %vm2132_vm2 = vmor %vm1832_vm10, %vm2082_vm11 }
 0x22c   : > { %7841 = vset.pattern.permute.xlu1 %v12539_v2  ;;  %v1673_v16 = vpop.permute.xlu1 %1672  ;;  %v7188_v38 = vsel %vm2132_vm2, 1.0, %v12607_v10  ;;  %vm635_vm11 = vmor %vm413_vm0, %vm585_vm5  ;;  %vm2084_vm5 = vcmp.eq.s32.totalorder %v1976_v48, %v8929_v15  ;;  %v694_v48 = vadd.s32 4, %v12631_v21 }
 0x22d   : > { %493 = vperm.xlu1 %7841, %v12618_v36   ;;  %vm1783_vm13 = vcmp.eq.s32.totalorder %v1673_v16, %v8929_v15  ;;  %v12656_v36 = vld [vmem:[#allocation52_spill] sm:$0xff] }
 0x22e   : > { %vm1833_vm4 = vmor %vm1533_vm6, %vm1783_vm13  ;;  %vm1184_vm15 = vcmp.eq.s32.totalorder %v12656_v36, %v8929_v15  ;;  %v1982_v36 = vpop.permute.xlu0 %1981 }
 0x231   : > { %7842 = vset.pattern.permute.xlu1 %v12526_v0  ;;  %v1973_v22 = vpop.permute.xlu1 %1972 }
 0x232   : > { %vm2083_vm8 = vcmp.eq.s32.totalorder %v1973_v22, %v8929_v15  ;;  %793 = vperm.xlu1 %7842, %v690_v53   ;;  %v692_v53 = vadd.s32 4, %v12628_v8 }
 0x233   : > { %vm2133_vm7 = vmor %vm1833_vm4, %vm2083_vm8 }
 0x234   : > { %v7189_v49 = vsel %vm2133_vm7, 1.0, %v12607_v10 }
 0x235   : > { %v2273_v44 = vpack.c.bf16 %v7189_v49, %v7188_v38 }
 0x236   : > { %796 = vperm.xlu1 %7842, %v691_v12   ;;  %v476_v30 = vpop.permute.xlu1 %475 }
 0x237   : > { %7241 = vmatmul.mubr.msk.bf16.gmra.mxu0 %vm12653_vm1, %v2273_v44  ;;  %7266 = vmatmul.mubr.msk.bf16.gmra.mxu1 %vm12654_vm14, %v2273_v44  ;;  %vm584_vm3 = vcmp.eq.s32.totalorder %v476_v30, %v8929_v15  ;;  %vm1485_vm14 = vcmp.eq.s32.totalorder %v9174_v35, %v8929_v15  ;;  %v12657_v35 = vld [vmem:[#allocation17_spill] sm:$0xff] }
 0x238   : > { %2598 = vmatprep.mubr.bf16.mxu0 %v12574_v11  ;;  %2881 = vmatprep.mubr.bf16.mxu1 %v12574_v11  ;;  %vm634_vm9 = vmor %vm413_vm0, %vm584_vm3  ;;  %v693_v40 = vadd.s32 4, %v12657_v35  ;;  %v993_v30 = vadd.s32 15, %v12657_v35 }
 0x23a   : > { %7843 = vset.pattern.permute.xlu1 %v12529_v58 }
 0x23b   : > { %1096 = vperm.xlu1 %7843, %v991_v20   ;;  %v776_v24 = vpop.permute.xlu1 %775 }
 0x23c   : > { %vm884_vm12 = vcmp.eq.s32.totalorder %v776_v24, %v8929_v15  ;;  %v1292_v24 = vadd.s32 26, %v12628_v8 }
 0x23d   : > { %vm934_vm10 = vmor %vm634_vm9, %vm884_vm12 }
 0x23e   : > { %vm1234_vm2 = vmor %vm934_vm10, %vm1184_vm15 }
 0x23f   : > { %7844 = vset.pattern.permute.xlu1 %v12530_v25  ;;  %v779_v54 = vpop.permute.xlu1 %778 }
 0x240   : > { %1393 = vperm.xlu1 %7844, %v1290_v46   ;;  %vm885_vm13 = vcmp.eq.s32.totalorder %v779_v54, %v8929_v15  ;;  %v1592_v54 = vadd.s32 35, %v12628_v8 }
 0x241   : > { %vm935_vm8 = vmor %vm635_vm11, %vm885_vm13 }
 0x244   : > { %7845 = vset.pattern.permute.xlu1 %v12531_v61  ;;  %v1079_v6 = vpop.permute.xlu1 %1078 }
 0x245   : > { %1693 = vperm.xlu1 %7845, %v1590_v23   ;;  %vm1185_vm6 = vcmp.eq.s32.totalorder %v1079_v6, %v8929_v15  ;;  %v1593_v6 = vadd.s32 35, %v12657_v35 }
 0x246   : > { %vm1235_vm1 = vmor %vm935_vm8, %vm1185_vm6 }
 0x247   : > { %vm1535_vm15 = vmor %vm1235_vm1, %vm1485_vm14 }
 0x249   : > { %1696 = vperm.xlu1 %7845, %v1591_v45   ;;  %v1376_v13 = vpop.permute.xlu1 %1375 }
 0x24a   : > { %vm1484_vm4 = vcmp.eq.s32.totalorder %v1376_v13, %v8929_v15  ;;  %v1893_v13 = vadd.s32 37, %v12657_v35 }
 0x24b   : > { %vm1534_vm3 = vmor %vm1234_vm2, %vm1484_vm4  ;;  %vm12658_vm2 = vcmask 392192  }
 0x24c   : > { %vm12659_vm4 = vmmov %vm12658_vm2 }
 0x24d   : > { %7846 = vset.pattern.permute.xlu1 %v12535_v18 }
 0x24e   : > { %1996 = vperm.xlu1 %7846, %v1891_v47   ;;  %v1676_v19 = vpop.permute.xlu1 %1675  ;;  %v12660_v47 = vld [vmem:[#allocation35_spill] sm:$0xff] }
 0x24f   : > { %vm1784_vm7 = vcmp.eq.s32.totalorder %v1676_v19, %v8929_v15  ;;  %vm587_vm1 = vcmp.eq.s32.totalorder %v12660_v47, %v8929_v15 }
 0x250   : > { %vm1834_vm12 = vmor %vm1534_vm3, %vm1784_vm7 }
 0x251   : > { %vm2134_vm10 = vmor %vm1834_vm12, %vm2084_vm5 }
 0x252   : > { %7847 = vset.pattern.permute.xlu1 %v12539_v2  ;;  %v1679_v16 = vpop.permute.xlu1 %1678  ;;  %v7190_v12 = vsel %vm2134_vm10, 1.0, %v12607_v10  ;;  %vm637_vm5 = vmor %vm413_vm0, %vm587_vm1  ;;  %vm2086_vm1 = vcmp.eq.s32.totalorder %v1982_v36, %v8929_v15 }
 0x253   : > { %499 = vperm.xlu1 %7847, %v12628_v8   ;;  %vm1785_vm9 = vcmp.eq.s32.totalorder %v1679_v16, %v8929_v15  ;;  %v12661_v8 = vld [vmem:[#allocation53_spill] sm:$0xff] }
 0x254   : > { %vm1835_vm11 = vmor %vm1535_vm15, %vm1785_vm9  ;;  %vm1186_vm3 = vcmp.eq.s32.totalorder %v12661_v8, %v8929_v15 }
 0x257   : > { %7849 = vset.pattern.permute.xlu1 %v12526_v0  ;;  %v1979_v22 = vpop.permute.xlu1 %1978 }
 0x258   : > { %vm2085_vm13 = vcmp.eq.s32.totalorder %v1979_v22, %v8929_v15  ;;  %799 = vperm.xlu1 %7849, %v692_v53  }
 0x259   : > { %vm2135_vm6 = vmor %vm1835_vm11, %vm2085_vm13 }
 0x25a   : > { %v7191_v38 = vsel %vm2135_vm6, 1.0, %v12607_v10 }
 0x25b   : > { %v2274_v49 = vpack.c.bf16 %v7191_v38, %v7190_v12  ;;  %v995_v12 = vadd.s32 15, %v12640_v27 }
 0x25c   : > { %802 = vperm.xlu1 %7849, %v693_v40   ;;  %v482_v44 = vpop.permute.xlu1 %481 }
 0x25d   : > { %7242 = vmatmul.mubr.msk.bf16.gmra.mxu0 %vm12658_vm2, %v2274_v49  ;;  %7267 = vmatmul.mubr.msk.bf16.gmra.mxu1 %vm12659_vm4, %v2274_v49  ;;  %vm586_vm8 = vcmp.eq.s32.totalorder %v482_v44, %v8929_v15  ;;  %vm1487_vm4 = vcmp.eq.s32.totalorder %v9177_v31, %v8929_v15  ;;  %v695_v31 = vadd.s32 4, %v12640_v27  ;;  %v1294_v49 = vadd.s32 26, %v12631_v21 }
 0x25e   : > { %2608 = vmatprep.mubr.bf16.mxu0 %v12574_v11  ;;  %2891 = vmatprep.mubr.bf16.mxu1 %v12574_v11  ;;  %vm636_vm14 = vmor %vm413_vm0, %vm586_vm8 }
 0x260   : > { %7850 = vset.pattern.permute.xlu1 %v12529_v58 }
 0x261   : > { %1102 = vperm.xlu1 %7850, %v993_v30   ;;  %v782_v20 = vpop.permute.xlu1 %781  ;;  %v1594_v30 = vadd.s32 35, %v12631_v21 }
 0x262   : > { %vm886_vm7 = vcmp.eq.s32.totalorder %v782_v20, %v8929_v15 }
 0x263   : > { %vm936_vm12 = vmor %vm636_vm14, %vm886_vm7 }
 0x264   : > { %vm1236_vm10 = vmor %vm936_vm12, %vm1186_vm3 }
 0x265   : > { %7851 = vset.pattern.permute.xlu1 %v12530_v25  ;;  %v785_v46 = vpop.permute.xlu1 %784 }
 0x266   : > { %1399 = vperm.xlu1 %7851, %v1292_v24   ;;  %vm887_vm9 = vcmp.eq.s32.totalorder %v785_v46, %v8929_v15  ;;  %v1595_v24 = vadd.s32 35, %v12640_v27 }
 0x267   : > { %vm937_vm13 = vmor %vm637_vm5, %vm887_vm9 }
 0x26a   : > { %7852 = vset.pattern.permute.xlu1 %v12531_v61  ;;  %v1085_v23 = vpop.permute.xlu1 %1084 }
 0x26b   : > { %1699 = vperm.xlu1 %7852, %v1592_v54   ;;  %vm1187_vm15 = vcmp.eq.s32.totalorder %v1085_v23, %v8929_v15  ;;  %v1895_v54 = vadd.s32 37, %v12640_v27  ;;  %v12664_v23 = vld [vmem:[#allocation36_spill] sm:$0xff]  ;;  %v1988_v27 = vpop.permute.xlu0 %1987 }
 0x26c   : > { %vm1237_vm2 = vmor %vm937_vm13, %vm1187_vm15 }
 0x26d   : > { %vm1537_vm3 = vmor %vm1237_vm2, %vm1487_vm4  ;;  %vm589_vm2 = vcmp.eq.s32.totalorder %v12664_v23, %v8929_v15 }
 0x26f   : > { %1702 = vperm.xlu1 %7852, %v1593_v6   ;;  %v1382_v45 = vpop.permute.xlu1 %1381 }
 0x270   : > { %vm1486_vm11 = vcmp.eq.s32.totalorder %v1382_v45, %v8929_v15 }
 0x271   : > { %vm1536_vm8 = vmor %vm1236_vm10, %vm1486_vm11  ;;  %vm12662_vm10 = vcmask 392192  }
 0x272   : > { %vm12663_vm11 = vmmov %vm12662_vm10 }
 0x273   : > { %7853 = vset.pattern.permute.xlu1 %v12535_v18 }
 0x274   : > { %2002 = vperm.xlu1 %7853, %v1893_v13   ;;  %v1682_v14 = vpop.permute.xlu1 %1681  ;;  %v696_v13 = vadd.s32 4, %v12632_v7 }
 0x275   : > { %vm1786_vm6 = vcmp.eq.s32.totalorder %v1682_v14, %v8929_v15 }
 0x276   : > { %vm1836_vm7 = vmor %vm1536_vm8, %vm1786_vm6 }
 0x277   : > { %vm2136_vm12 = vmor %vm1836_vm7, %vm2086_vm1 }
 0x278   : > { %7854 = vset.pattern.permute.xlu1 %v12539_v2  ;;  %v1685_v19 = vpop.permute.xlu1 %1684  ;;  %v7192_v53 = vsel %vm2136_vm12, 1.0, %v12607_v10  ;;  %vm639_vm1 = vmor %vm413_vm0, %vm589_vm2  ;;  %vm2088_vm2 = vcmp.eq.s32.totalorder %v1988_v27, %v8929_v15 }
 0x279   : > { %505 = vperm.xlu1 %7854, %v12631_v21   ;;  %vm1787_vm14 = vcmp.eq.s32.totalorder %v1685_v19, %v8929_v15  ;;  %v12665_v21 = vld [vmem:[#allocation54_spill] sm:$0xff] }
 0x27a   : > { %vm1837_vm5 = vmor %vm1537_vm3, %vm1787_vm14  ;;  %vm1188_vm8 = vcmp.eq.s32.totalorder %v12665_v21, %v8929_v15  ;;  %v698_v21 = vadd.s32 4, %v12633_v51 }
 0x27d   : > { %7855 = vset.pattern.permute.xlu1 %v12526_v0  ;;  %v1985_v16 = vpop.permute.xlu1 %1984 }
 0x27e   : > { %vm2087_vm9 = vcmp.eq.s32.totalorder %v1985_v16, %v8929_v15  ;;  %805 = vperm.xlu1 %7855, %v694_v48   ;;  %v997_v48 = vadd.s32 15, %v12641_v50 }
 0x27f   : > { %vm2137_vm15 = vmor %vm1837_vm5, %vm2087_vm9 }
 0x280   : > { %v7193_v22 = vsel %vm2137_vm15, 1.0, %v12607_v10 }
 0x281   : > { %v2275_v35 = vpack.c.bf16 %v7193_v22, %v7192_v53  ;;  %v358_v22 = vld [vmem:[%s8469_s19 + $0x178] sm:$0xff] }
 0x282   : > { %808 = vperm.xlu1 %7855, %v695_v31   ;;  %v488_v40 = vpop.permute.xlu1 %487  ;;  %v1296_v31 = vadd.s32 26, %v12632_v7 }
 0x283   : > { %7243 = vmatmul.mubr.msk.bf16.gmra.mxu0 %vm12662_vm10, %v2275_v35  ;;  %7268 = vmatmul.mubr.msk.bf16.gmra.mxu1 %vm12663_vm11, %v2275_v35  ;;  %vm588_vm13 = vcmp.eq.s32.totalorder %v488_v40, %v8929_v15  ;;  %vm1489_vm11 = vcmp.eq.s32.totalorder %v9182_v39, %v8929_v15  ;;  %v697_v39 = vadd.s32 4, %v12641_v50  ;;  %v1596_v35 = vadd.s32 35, %v12632_v7 }
 0x284   : > { %2618 = vmatprep.mubr.bf16.mxu0 %v12574_v11  ;;  %2901 = vmatprep.mubr.bf16.mxu1 %v12574_v11  ;;  %vm638_vm4 = vmor %vm413_vm0, %vm588_vm13  ;;  %v7682_v40 = vtrunc.f32 %v358_v22 }
 0x286   : > { %7856 = vset.pattern.permute.xlu1 %v12529_v58 }
 0x287   : > { %1108 = vperm.xlu1 %7856, %v995_v12   ;;  %v788_v38 = vpop.permute.xlu1 %787  ;;  %v9741_v12 = vcvt.f32.s32 %v7682_v40 }
 0x288   : > { %vm888_vm6 = vcmp.eq.s32.totalorder %v788_v38, %v8929_v15 }
 0x289   : > { %vm938_vm7 = vmor %vm638_vm4, %vm888_vm6  ;;  %556 = vperm.xlu0 %7909, %v9741_v12  }
 0x28a   : > { %vm1238_vm12 = vmor %vm938_vm7, %vm1188_vm8 }
 0x28b   : > { %7857 = vset.pattern.permute.xlu1 %v12530_v25  ;;  %v791_v44 = vpop.permute.xlu1 %790 }
 0x28c   : > { %1405 = vperm.xlu1 %7857, %v1294_v49   ;;  %vm889_vm14 = vcmp.eq.s32.totalorder %v791_v44, %v8929_v15  ;;  %v360_v49 = vld [vmem:[%s8469_s19 + $0x188] sm:$0xff]  ;;  %v1597_v44 = vadd.s32 35, %v12641_v50 }
 0x28d   : > { %vm939_vm9 = vmor %vm639_vm1, %vm889_vm14 }
 0x290   : > { %7858 = vset.pattern.permute.xlu1 %v12531_v61  ;;  %v1091_v20 = vpop.permute.xlu1 %1090 }
 0x291   : > { %1705 = vperm.xlu1 %7858, %v1594_v30   ;;  %vm1189_vm3 = vcmp.eq.s32.totalorder %v1091_v20, %v8929_v15  ;;  %v7686_v30 = vtrunc.f32 %v360_v49  ;;  %v1899_v49 = vadd.s32 37, %v12643_v59 }
 0x292   : > { %vm1239_vm10 = vmor %vm939_vm9, %vm1189_vm3 }
 0x293   : > { %vm1539_vm8 = vmor %vm1239_vm10, %vm1489_vm11  ;;  %v9747_v20 = vcvt.f32.s32 %v7686_v30 }
 0x295   : > { %1708 = vperm.xlu1 %7858, %v1595_v24   ;;  %v1388_v46 = vpop.permute.xlu1 %1387  ;;  %562 = vperm.xlu0 %7909, %v9747_v20  }
 0x296   : > { %vm1488_vm5 = vcmp.eq.s32.totalorder %v1388_v46, %v8929_v15  ;;  %v12668_v46 = vld [vmem:[#allocation37_spill] sm:$0xff] }
 0x297   : > { %vm1538_vm13 = vmor %vm1238_vm12, %vm1488_vm5  ;;  %vm12666_vm12 = vcmask 392192   ;;  %vm591_vm10 = vcmp.eq.s32.totalorder %v12668_v46, %v8929_v15 }
 0x298   : > { %vm12667_vm5 = vmmov %vm12666_vm12 }
 0x299   : > { %7859 = vset.pattern.permute.xlu1 %v12535_v18  ;;  %7912 = vset.pattern.permute.xlu0 %v12529_v58 }
 0x29a   : > { %2008 = vperm.xlu1 %7859, %v1895_v54   ;;  %v1688_v6 = vpop.permute.xlu1 %1687  ;;  %v1004_v54 = vadd.s32 15, %v9518_v56 }
 0x29b   : > { %vm1788_vm15 = vcmp.eq.s32.totalorder %v1688_v6, %v8929_v15 }
 0x29c   : > { %vm1838_vm6 = vmor %vm1538_vm13, %vm1788_vm15  ;;  %vm1190_vm13 = vcmp.eq.s32.totalorder %v8920_v60, %v8929_v15  ;;  %1135 = vperm.xlu0 %7912, %v1004_v54   ;;  %v1994_v60 = vpop.permute.xlu0 %1993 }
 0x29d   : > { %vm2138_vm7 = vmor %vm1838_vm6, %vm2088_vm2 }
 0x29e   : > { %7860 = vset.pattern.permute.xlu1 %v12539_v2  ;;  %v1691_v45 = vpop.permute.xlu1 %1690  ;;  %v7194_v8 = vsel %vm2138_vm7, 1.0, %v12607_v10  ;;  %vm641_vm2 = vmor %vm413_vm0, %vm591_vm10  ;;  %vm2090_vm10 = vcmp.eq.s32.totalorder %v1994_v60, %v8929_v15 }
 0x29f   : > { %511 = vperm.xlu1 %7860, %v12632_v7   ;;  %vm1789_vm4 = vcmp.eq.s32.totalorder %v1691_v45, %v8929_v15  ;;  %v1897_v7 = vadd.s32 37, %v12641_v50 }
 0x2a0   : > { %vm1839_vm1 = vmor %vm1539_vm8, %vm1789_vm4  ;;  %v2000_v27 = vpop.permute.xlu0 %1999 }
 0x2a3   : > { %7861 = vset.pattern.permute.xlu1 %v12526_v0  ;;  %v1991_v47 = vpop.permute.xlu1 %1990 }
 0x2a4   : > { %vm2089_vm14 = vcmp.eq.s32.totalorder %v1991_v47, %v8929_v15  ;;  %811 = vperm.xlu1 %7861, %v696_v13  }
 0x2a5   : > { %vm2139_vm3 = vmor %vm1839_vm1, %vm2089_vm14 }
 0x2a6   : > { %v7195_v14 = vsel %vm2139_vm3, 1.0, %v12607_v10 }
 0x2a7   : > { %v2276_v36 = vpack.c.bf16 %v7195_v14, %v7194_v8  ;;  %v999_v8 = vadd.s32 15, %v12643_v59  ;;  %v9783_v14 = vpop.permute.xlu0 %2005 }
 0x2a8   : > { %814 = vperm.xlu1 %7861, %v697_v39   ;;  %v494_v19 = vpop.permute.xlu1 %493 }
 0x2a9   : > { %7244 = vmatmul.mubr.msk.bf16.gmra.mxu0 %vm12666_vm12, %v2276_v36  ;;  %7269 = vmatmul.mubr.msk.bf16.gmra.mxu1 %vm12667_vm5, %v2276_v36  ;;  %vm590_vm9 = vcmp.eq.s32.totalorder %v494_v19, %v8929_v15  ;;  %vm1491_vm5 = vcmp.eq.s32.totalorder %v9187_v37, %v8929_v15  ;;  %v699_v37 = vadd.s32 4, %v12643_v59  ;;  %v1298_v19 = vadd.s32 26, %v12633_v51 }
 0x2aa   : > { %2628 = vmatprep.mubr.bf16.mxu0 %v12574_v11  ;;  %2911 = vmatprep.mubr.bf16.mxu1 %v12574_v11  ;;  %vm640_vm11 = vmor %vm413_vm0, %vm590_vm9 }
 0x2ac   : > { %7862 = vset.pattern.permute.xlu1 %v12529_v58 }
 0x2ad   : > { %1114 = vperm.xlu1 %7862, %v997_v48   ;;  %v794_v16 = vpop.permute.xlu1 %793  ;;  %v9789_v48 = vpop.permute.xlu0 %2011 }
 0x2ae   : > { %vm890_vm15 = vcmp.eq.s32.totalorder %v794_v16, %v8929_v15 }
 0x2af   : > { %vm940_vm6 = vmor %vm640_vm11, %vm890_vm15 }
 0x2b0   : > { %vm1240_vm7 = vmor %vm940_vm6, %vm1190_vm13 }
 0x2b1   : > { %7863 = vset.pattern.permute.xlu1 %v12530_v25  ;;  %v797_v53 = vpop.permute.xlu1 %796  ;;  %v9794_v22 = vpop.permute.xlu0 %2017 }
 0x2b2   : > { %1411 = vperm.xlu1 %7863, %v1296_v31   ;;  %vm891_vm4 = vcmp.eq.s32.totalorder %v797_v53, %v8929_v15  ;;  %v1598_v31 = vadd.s32 35, %v12633_v51 }
 0x2b3   : > { %vm941_vm14 = vmor %vm641_vm2, %vm891_vm4 }
 0x2b6   : > { %7864 = vset.pattern.permute.xlu1 %v12531_v61  ;;  %v1097_v38 = vpop.permute.xlu1 %1096 }
 0x2b7   : > { %1711 = vperm.xlu1 %7864, %v1596_v35   ;;  %vm1191_vm8 = vcmp.eq.s32.totalorder %v1097_v38, %v8929_v15  ;;  %v1599_v35 = vadd.s32 35, %v12643_v59  ;;  %v9799_v38 = vpop.permute.xlu0 %2023 }
 0x2b8   : > { %vm1241_vm12 = vmor %vm941_vm14, %vm1191_vm8 }
 0x2b9   : > { %vm1541_vm13 = vmor %vm1241_vm12, %vm1491_vm5 }
 0x2bb   : > { %1714 = vperm.xlu1 %7864, %v1597_v44   ;;  %v1394_v24 = vpop.permute.xlu1 %1393  ;;  %v1006_v44 = vadd.s32 15, %v9524_v33  ;;  %v9815_v59 = vpop.permute.xlu0 %2029 }
 0x2bc   : > { %vm1490_vm1 = vcmp.eq.s32.totalorder %v1394_v24, %v8929_v15  ;;  %v700_v24 = vadd.s32 4, %v12635_v52 }
 0x2bd   : > { %vm1540_vm9 = vmor %vm1240_vm7, %vm1490_vm1  ;;  %vm12669_vm7 = vcmask 392192   ;;  %1141 = vperm.xlu0 %7912, %v1006_v44   ;;  %v1003_v44 = vadd.s32 15, %v12647_v32 }
 0x2be   : > { %vm12670_vm1 = vmmov %vm12669_vm7 }
 0x2bf   : > { %7865 = vset.pattern.permute.xlu1 %v12535_v18 }
 0x2c0   : > { %2014 = vperm.xlu1 %7865, %v1897_v7   ;;  %v1694_v50 = vpop.permute.xlu1 %1693  ;;  %v9825_v7 = vpop.permute.xlu0 %2035 }
 0x2c1   : > { %vm1790_vm3 = vcmp.eq.s32.totalorder %v1694_v50, %v8929_v15 }
 0x2c2   : > { %vm1840_vm15 = vmor %vm1540_vm9, %vm1790_vm3  ;;  %vm1192_vm9 = vcmp.eq.s32.totalorder %v8926_v1, %v8929_v15 }
 0x2c3   : > { %vm2140_vm6 = vmor %vm1840_vm15, %vm2090_vm10 }
 0x2c4   : > { %7866 = vset.pattern.permute.xlu1 %v12539_v2  ;;  %v1697_v23 = vpop.permute.xlu1 %1696  ;;  %v7196_v45 = vsel %vm2140_vm6, 1.0, %v12607_v10 }
 0x2c5   : > { %517 = vperm.xlu1 %7866, %v12633_v51   ;;  %vm1791_vm11 = vcmp.eq.s32.totalorder %v1697_v23, %v8929_v15  ;;  %v12671_v51 = vld [vmem:[#allocation38_spill] sm:$0xff]  ;;  %v9832_v23 = vpop.permute.xlu0 %2041 }
 0x2c6   : > { %vm1841_vm2 = vmor %vm1541_vm13, %vm1791_vm11  ;;  %vm593_vm12 = vcmp.eq.s32.totalorder %v12671_v51, %v8929_v15 }
 0x2c7   : > { %vm643_vm11 = vmor %vm413_vm0, %vm593_vm12 }
 0x2c9   : > { %7867 = vset.pattern.permute.xlu1 %v12526_v0  ;;  %v1997_v6 = vpop.permute.xlu1 %1996 }
 0x2ca   : > { %vm2091_vm4 = vcmp.eq.s32.totalorder %v1997_v6, %v8929_v15  ;;  %817 = vperm.xlu1 %7867, %v698_v21   ;;  %v1001_v6 = vadd.s32 15, %v12646_v62 }
 0x2cb   : > { %vm2141_vm8 = vmor %vm1841_vm2, %vm2091_vm4 }
 0x2cc   : > { %v7197_v13 = vsel %vm2141_vm8, 1.0, %v12607_v10 }
 0x2cd   : > { %v2277_v47 = vpack.c.bf16 %v7197_v13, %v7196_v45  ;;  %v1300_v45 = vadd.s32 26, %v12635_v52 }
 0x2ce   : > { %820 = vperm.xlu1 %7867, %v699_v37   ;;  %v500_v39 = vpop.permute.xlu1 %499  ;;  %v9840_v37 = vpop.permute.xlu0 %2047 }
 0x2cf   : > { %7245 = vmatmul.mubr.msk.bf16.gmra.mxu0 %vm12669_vm7, %v2277_v47  ;;  %7270 = vmatmul.mubr.msk.bf16.gmra.mxu1 %vm12670_vm1, %v2277_v47  ;;  %vm592_vm14 = vcmp.eq.s32.totalorder %v500_v39, %v8929_v15  ;;  %vm1493_vm1 = vcmp.eq.s32.totalorder %v9193_v43, %v8929_v15  ;;  %v701_v43 = vadd.s32 4, %v12646_v62  ;;  %v1600_v47 = vadd.s32 35, %v12635_v52 }
 0x2d0   : > { %2638 = vmatprep.mubr.bf16.mxu0 %v12574_v11  ;;  %2921 = vmatprep.mubr.bf16.mxu1 %v12574_v11  ;;  %vm642_vm5 = vmor %vm413_vm0, %vm592_vm14 }
 0x2d2   : > { %7868 = vset.pattern.permute.xlu1 %v12529_v58  ;;  %v9845_v39 = vpop.permute.xlu0 %2053 }
 0x2d3   : > { %1120 = vperm.xlu1 %7868, %v999_v8   ;;  %v800_v36 = vpop.permute.xlu1 %799 }
 0x2d4   : > { %vm892_vm3 = vcmp.eq.s32.totalorder %v800_v36, %v8929_v15  ;;  %v1601_v36 = vadd.s32 35, %v12646_v62 }
 0x2d5   : > { %vm942_vm15 = vmor %vm642_vm5, %vm892_vm3  ;;  %vm2092_vm3 = vcmp.eq.s32.totalorder %v2000_v27, %v8929_v15 }
 0x2d6   : > { %vm1242_vm6 = vmor %vm942_vm15, %vm1192_vm9 }
 0x2d7   : > { %7869 = vset.pattern.permute.xlu1 %v12530_v25  ;;  %v803_v16 = vpop.permute.xlu1 %802 }
 0x2d8   : > { %1417 = vperm.xlu1 %7869, %v1298_v19   ;;  %vm893_vm10 = vcmp.eq.s32.totalorder %v803_v16, %v8929_v15  ;;  %v509_v19 = vpop.permute.xlu0 %508 }
 0x2d9   : > { %vm943_vm4 = vmor %vm643_vm11, %vm893_vm10 }
 0x2dc   : > { %7870 = vset.pattern.permute.xlu1 %v12531_v61  ;;  %v1103_v53 = vpop.permute.xlu1 %1102 }
 0x2dd   : > { %1717 = vperm.xlu1 %7870, %v1598_v31   ;;  %vm1193_vm13 = vcmp.eq.s32.totalorder %v1103_v53, %v8929_v15  ;;  %v1901_v31 = vadd.s32 37, %v12646_v62  ;;  %v702_v53 = vadd.s32 4, %v12638_v34 }
 0x2de   : > { %vm1243_vm7 = vmor %vm943_vm4, %vm1193_vm13 }
 0x2df   : > { %vm1543_vm9 = vmor %vm1243_vm7, %vm1493_vm1  ;;  %vm595_vm7 = vcmp.eq.s32.totalorder %v509_v19, %v8929_v15  ;;  %v7943_v19 = vld [vmem:[%s12352_s2 + $0xc] ss:$16 sps:$4 sm:$0xff]  }
 0x2e0   : > { %3425 = vmatprep.subr.bf16.mxu1 %v7943_v19 }
 0x2e1   : > { %1720 = vperm.xlu1 %7870, %v1599_v35   ;;  %v1400_v40 = vpop.permute.xlu1 %1399 }
 0x2e2   : > { %vm1492_vm2 = vcmp.eq.s32.totalorder %v1400_v40, %v8929_v15 }
 0x2e3   : > { %vm1542_vm14 = vmor %vm1242_vm6, %vm1492_vm2  ;;  %vm12672_vm6 = vcmask 392192  }
 0x2e4   : > { %vm12673_vm2 = vmmov %vm12672_vm6 }
 0x2e5   : > { %7871 = vset.pattern.permute.xlu1 %v12535_v18 }
 0x2e6   : > { %2020 = vperm.xlu1 %7871, %v1899_v49   ;;  %v1700_v30 = vpop.permute.xlu1 %1699 }
 0x2e7   : > { %vm1792_vm8 = vcmp.eq.s32.totalorder %v1700_v30, %v8929_v15 }
 0x2e8   : > { %vm1842_vm12 = vmor %vm1542_vm14, %vm1792_vm8  ;;  %vm1194_vm14 = vcmp.eq.s32.totalorder %v8936_v5, %v8929_v15 }
 0x2e9   : > { %vm2142_vm15 = vmor %vm1842_vm12, %vm2092_vm3 }
 0x2ea   : > { %7872 = vset.pattern.permute.xlu1 %v12539_v2  ;;  %v1703_v1 = vpop.permute.xlu1 %1702  ;;  %v7198_v54 = vsel %vm2142_vm15, 1.0, %v12607_v10  ;;  %vm645_vm12 = vmor %vm413_vm0, %vm595_vm7 }
 0x2eb   : > { %523 = vperm.xlu1 %7872, %v12635_v52   ;;  %vm1793_vm5 = vcmp.eq.s32.totalorder %v1703_v1, %v8929_v15  ;;  %v1008_v52 = vadd.s32 15, %v9529_v9  ;;  %v1302_v1 = vadd.s32 26, %v12638_v34 }
 0x2ec   : > { %vm1843_vm10 = vmor %vm1543_vm9, %vm1793_vm5 }
 0x2ed   : > { %1147 = vperm.xlu0 %7912, %v1008_v52  }
 0x2ef   : > { %7873 = vset.pattern.permute.xlu1 %v12526_v0  ;;  %v2003_v46 = vpop.permute.xlu1 %2002 }
 0x2f0   : > { %vm2093_vm11 = vcmp.eq.s32.totalorder %v2003_v46, %v8929_v15  ;;  %823 = vperm.xlu1 %7873, %v700_v24   ;;  %v1602_v46 = vadd.s32 35, %v12638_v34 }
 0x2f1   : > { %vm2143_vm13 = vmor %vm1843_vm10, %vm2093_vm11 }
 0x2f2   : > { %v7199_v50 = vsel %vm2143_vm13, 1.0, %v12607_v10 }
 0x2f3   : > { %v2278_v60 = vpack.c.bf16 %v7199_v50, %v7198_v54  ;;  %v1603_v54 = vadd.s32 35, %v12647_v32  ;;  %v515_v50 = vpop.permute.xlu0 %514 }
 0x2f4   : > { %826 = vperm.xlu1 %7873, %v701_v43   ;;  %v506_v21 = vpop.permute.xlu1 %505 }
 0x2f5   : > { %7246 = vmatmul.mubr.msk.bf16.gmra.mxu0 %vm12672_vm6, %v2278_v60  ;;  %7271 = vmatmul.mubr.msk.bf16.gmra.mxu1 %vm12673_vm2, %v2278_v60  ;;  %vm594_vm4 = vcmp.eq.s32.totalorder %v506_v21, %v8929_v15  ;;  %vm1495_vm2 = vcmp.eq.s32.totalorder %v9199_v57, %v8929_v15  ;;  %v703_v57 = vadd.s32 4, %v12647_v32  ;;  %v1903_v21 = vadd.s32 37, %v12647_v32  ;;  %v7940_v32 = vld [vmem:[%s12352_s2 + $0x4] ss:$16 sps:$4 sm:$0xff]  }
 0x2f6   : > { %2648 = vmatprep.mubr.bf16.mxu0 %v12574_v11  ;;  %2931 = vmatprep.mubr.bf16.mxu1 %v12574_v11  ;;  %vm644_vm1 = vmor %vm413_vm0, %vm594_vm4 }
 0x2f7   : > { %3142 = vmatprep.subr.bf16.mxu0 %v7940_v32 }
 0x2f8   : > { %7874 = vset.pattern.permute.xlu1 %v12529_v58 }
 0x2f9   : > { %1126 = vperm.xlu1 %7874, %v1001_v6   ;;  %v806_v27 = vpop.permute.xlu1 %805  ;;  %v706_v6 = vadd.s32 4, %v9524_v33 }
 0x2fa   : > { %vm894_vm8 = vcmp.eq.s32.totalorder %v806_v27, %v8929_v15  ;;  %v1010_v27 = vadd.s32 15, %v9535_v55 }
 0x2fb   : > { %vm944_vm3 = vmor %vm644_vm1, %vm894_vm8  ;;  %vm2094_vm8 = vcmp.eq.s32.totalorder %v9783_v14, %v8929_v15 }
 0x2fc   : > { %vm1244_vm15 = vmor %vm944_vm3, %vm1194_vm14  ;;  %1153 = vperm.xlu0 %7912, %v1010_v27   ;;  %v1313_v27 = vadd.s32 26, %v9747_v20 }
 0x2fd   : > { %7875 = vset.pattern.permute.xlu1 %v12530_v25  ;;  %v809_v13 = vpop.permute.xlu1 %808 }
 0x2fe   : > { %1423 = vperm.xlu1 %7875, %v1300_v45   ;;  %vm895_vm5 = vcmp.eq.s32.totalorder %v809_v13, %v8929_v15  ;;  %v7938_v13 = vld [vmem:[%s12352_s2] ss:$16 sps:$4 sm:$0xff]  }
 0x2ff   : > { %vm945_vm11 = vmor %vm645_vm12, %vm895_vm5  ;;  %3143 = vmatpush1.bf16.msra.mxu0 %v7938_v13 }
 0x302   : > { %7876 = vset.pattern.permute.xlu1 %v12531_v61  ;;  %v1109_v8 = vpop.permute.xlu1 %1108 }
 0x303   : > { %1723 = vperm.xlu1 %7876, %v1600_v47   ;;  %vm1195_vm9 = vcmp.eq.s32.totalorder %v1109_v8, %v8929_v15  ;;  %v7941_v47 = vld [vmem:[%s12352_s2 + $0x8] ss:$16 sps:$4 sm:$0xff]   ;;  %v1007_v8 = vadd.s32 15, %v12649_v63 }
 0x304   : > { %vm1245_vm6 = vmor %vm945_vm11, %vm1195_vm9  ;;  %3426 = vmatpush1.bf16.msra.mxu1 %v7941_v47 }
 0x305   : > { %vm1545_vm14 = vmor %vm1245_vm6, %vm1495_vm2  ;;  %vm597_vm2 = vcmp.eq.s32.totalorder %v515_v50, %v8929_v15  ;;  %v521_v50 = vpop.permute.xlu0 %520 }
 0x307   : > { %1726 = vperm.xlu1 %7876, %v1601_v36   ;;  %v1406_v16 = vpop.permute.xlu1 %1405 }
 0x308   : > { %vm1494_vm10 = vcmp.eq.s32.totalorder %v1406_v16, %v8929_v15 }
 0x309   : > { %vm1544_vm4 = vmor %vm1244_vm15, %vm1494_vm10  ;;  %vm12674_vm15 = vcmask 392192  }
 0x30a   : > { %vm12675_vm10 = vmmov %vm12674_vm15 }
 0x30b   : > { %7877 = vset.pattern.permute.xlu1 %v12535_v18 }
 0x30c   : > { %2026 = vperm.xlu1 %7877, %v1901_v31   ;;  %v1706_v62 = vpop.permute.xlu1 %1705  ;;  %v12680_v31 = vld [vmem:[#allocation55_spill] sm:$0xff] }
 0x30d   : > { %vm1794_vm13 = vcmp.eq.s32.totalorder %v1706_v62, %v8929_v15 }
 0x30e   : > { %vm1844_vm7 = vmor %vm1544_vm4, %vm1794_vm13 }
 0x30f   : > { %vm2144_vm3 = vmor %vm1844_vm7, %vm2094_vm8 }
 0x310   : > { %7878 = vset.pattern.permute.xlu1 %v12539_v2  ;;  %v1709_v5 = vpop.permute.xlu1 %1708  ;;  %v7200_v40 = vsel %vm2144_vm3, 1.0, %v12607_v10  ;;  %vm9913_vm8 = vmor %vm413_vm0, %vm597_vm2 }
 0x311   : > { %529 = vperm.xlu1 %7878, %v12638_v34   ;;  %vm1795_vm1 = vcmp.eq.s32.totalorder %v1709_v5, %v8929_v15  ;;  %v359_v34 = vld [vmem:[%s8469_s19 + $0x180] sm:$0xff]  ;;  %v12681_v5 = vld [vmem:[#allocation11_spill] sm:$0xff] }
 0x312   : > { %vm1845_vm12 = vmor %vm1545_vm14, %vm1795_vm1  ;;  %v7684_v45 = vtrunc.f32 %v359_v34  ;;  %vm1196_vm1 = vcmp.eq.s32.totalorder %v12680_v31, %v8929_v15  ;;  %v12684_v34 = vld [vmem:[#allocation56_spill] sm:$0xff]  ;;  %v1306_v31 = vadd.s32 26, %v9524_v33 }
 0x314   : > { %v9921_v16 = vcvt.f32.s32 %v7684_v45 }
 0x315   : > { %7879 = vset.pattern.permute.xlu1 %v12526_v0  ;;  %v2009_v35 = vpop.permute.xlu1 %2008 }
 0x316   : > { %vm2095_vm5 = vcmp.eq.s32.totalorder %v2009_v35, %v8929_v15  ;;  %829 = vperm.xlu1 %7879, %v702_v53   ;;  %v1012_v52 = vadd.s32 15, %v9921_v16  ;;  %v704_v53 = vadd.s32 4, %v9518_v56  ;;  %v1311_v35 = vadd.s32 26, %v9741_v12 }
 0x317   : > { %vm2145_vm9 = vmor %vm1845_vm12, %vm2095_vm5 }
 0x318   : > { %v7201_v14 = vsel %vm2145_vm9, 1.0, %v12607_v10  ;;  %1159 = vperm.xlu0 %7912, %v1012_v52  }
 0x319   : > { %v2279_v49 = vpack.c.bf16 %v7201_v14, %v7200_v40 }
 0x31a   : > { %832 = vperm.xlu1 %7879, %v703_v57   ;;  %v512_v51 = vpop.permute.xlu1 %511 }
 0x31b   : > { %7247 = vmatmul.mubr.msk.bf16.gmra.mxu0 %vm12674_vm15, %v2279_v49  ;;  %7272 = vmatmul.mubr.msk.bf16.gmra.mxu1 %vm12675_vm10, %v2279_v49  ;;  %vm596_vm11 = vcmp.eq.s32.totalorder %v512_v51, %v8929_v15  ;;  %vm1497_vm10 = vcmp.eq.s32.totalorder %v12681_v5, %v8929_v15 }
 0x31c   : > { %2658 = vmatprep.mubr.bf16.mxu0 %v12574_v11  ;;  %2941 = vmatprep.mubr.bf16.mxu1 %v12574_v11  ;;  %vm646_vm6 = vmor %vm413_vm0, %vm596_vm11 }
 0x31d   : > { %7914 = vset.pattern.permute.xlu0 %v12530_v25 }
 0x31e   : > { %7881 = vset.pattern.permute.xlu1 %v12529_v58  ;;  %1456 = vperm.xlu0 %7914, %v1311_v35   ;;  %v527_v35 = vpop.permute.xlu0 %526 }
 0x31f   : > { %1132 = vperm.xlu1 %7881, %v1003_v44   ;;  %v812_v30 = vpop.permute.xlu1 %811  ;;  %v1005_v44 = vadd.s32 15, %v12648_v41 }
 0x320   : > { %vm896_vm13 = vcmp.eq.s32.totalorder %v812_v30, %v8929_v15 }
 0x321   : > { %vm9896_vm4 = vmor %vm646_vm6, %vm896_vm13  ;;  %vm2096_vm13 = vcmp.eq.s32.totalorder %v9789_v48, %v8929_v15  ;;  %v705_v48 = vadd.s32 4, %v12648_v41 }
 0x322   : > { %vm1246_vm3 = vmor %vm9896_vm4, %vm1196_vm1  ;;  %1462 = vperm.xlu0 %7914, %v1313_v27   ;;  %v710_v27 = vadd.s32 4, %v9535_v55 }
 0x323   : > { %7882 = vset.pattern.permute.xlu1 %v12530_v25  ;;  %v815_v24 = vpop.permute.xlu1 %814 }
 0x324   : > { %1429 = vperm.xlu1 %7882, %v1302_v1   ;;  %vm897_vm7 = vcmp.eq.s32.totalorder %v815_v24, %v8929_v15  ;;  %v1304_v1 = vadd.s32 26, %v9518_v56 }
 0x325   : > { %vm947_vm5 = vmor %vm9913_vm8, %vm897_vm7 }
 0x326   : > { %7918 = vset.pattern.permute.xlu0 %v12535_v18 }
 0x328   : > { %7883 = vset.pattern.permute.xlu1 %v12531_v61  ;;  %v1115_v43 = vpop.permute.xlu1 %1114 }
 0x329   : > { %1729 = vperm.xlu1 %7883, %v1602_v46   ;;  %vm1197_vm14 = vcmp.eq.s32.totalorder %v1115_v43, %v8929_v15  ;;  %v1604_v46 = vadd.s32 35, %v9518_v56 }
 0x32a   : > { %vm1247_vm15 = vmor %vm947_vm5, %vm1197_vm14 }
 0x32b   : > { %vm1547_vm4 = vmor %vm1247_vm15, %vm1497_vm10  ;;  %vm599_vm15 = vcmp.eq.s32.totalorder %v521_v50, %v8929_v15 }
 0x32d   : > { %1732 = vperm.xlu1 %7883, %v1603_v54   ;;  %v1412_v60 = vpop.permute.xlu1 %1411  ;;  %v1605_v54 = vadd.s32 35, %v12648_v41 }
 0x32e   : > { %vm1496_vm12 = vcmp.eq.s32.totalorder %v1412_v60, %v8929_v15 }
 0x32f   : > { %vm1546_vm11 = vmor %vm1246_vm3, %vm1496_vm12  ;;  %vm12682_vm3 = vcmask 392192  }
 0x330   : > { %vm12683_vm12 = vmmov %vm12682_vm3 }
 0x331   : > { %7884 = vset.pattern.permute.xlu1 %v12535_v18 }
 0x332   : > { %2032 = vperm.xlu1 %7884, %v1903_v21   ;;  %v1712_v36 = vpop.permute.xlu1 %1711  ;;  %v1905_v21 = vadd.s32 37, %v12648_v41 }
 0x333   : > { %vm1796_vm9 = vcmp.eq.s32.totalorder %v1712_v36, %v8929_v15  ;;  %v1912_v36 = vadd.s32 37, %v9921_v16 }
 0x334   : > { %vm1846_vm6 = vmor %vm1546_vm11, %vm1796_vm9 }
 0x335   : > { %vm2146_vm8 = vmor %vm1846_vm6, %vm2096_vm13  ;;  %2059 = vperm.xlu0 %7918, %v1912_v36  }
 0x336   : > { %7885 = vset.pattern.permute.xlu1 %v12539_v2  ;;  %v1715_v62 = vpop.permute.xlu1 %1714  ;;  %v7202_v40 = vsel %vm2146_vm8, 1.0, %v12607_v10  ;;  %vm649_vm13 = vmor %vm413_vm0, %vm599_vm15 }
 0x337   : > { %535 = vperm.xlu1 %7885, %v9518_v56   ;;  %vm1797_vm2 = vcmp.eq.s32.totalorder %v1715_v62, %v8929_v15  ;;  %v1606_v62 = vadd.s32 35, %v9524_v33 }
 0x338   : > { %vm1847_vm7 = vmor %vm1547_vm4, %vm1797_vm2  ;;  %vm1198_vm2 = vcmp.eq.s32.totalorder %v12684_v34, %v8929_v15  ;;  %v1909_v34 = vadd.s32 37, %v8897_v28 }
 0x33b   : > { %7886 = vset.pattern.permute.xlu1 %v12526_v0  ;;  %v2015_v57 = vpop.permute.xlu1 %2014 }
 0x33c   : > { %vm2097_vm1 = vcmp.eq.s32.totalorder %v2015_v57, %v8929_v15  ;;  %835 = vperm.xlu1 %7886, %v704_v53   ;;  %v1607_v53 = vadd.s32 35, %v12649_v63 }
 0x33d   : > { %vm2147_vm14 = vmor %vm1847_vm7, %vm2097_vm1 }
 0x33e   : > { %v7203_v14 = vsel %vm2147_vm14, 1.0, %v12607_v10 }
 0x33f   : > { %v2280_v49 = vpack.c.bf16 %v7203_v14, %v7202_v40  ;;  %v12687_v40 = vld [vmem:[#allocation57_spill] sm:$0xff]  ;;  %v708_v14 = vadd.s32 4, %v9529_v9 }
 0x340   : > { %838 = vperm.xlu1 %7886, %v705_v48   ;;  %v518_v51 = vpop.permute.xlu1 %517  ;;  %v1907_v48 = vadd.s32 37, %v12649_v63 }
 0x341   : > { %7248 = vmatmul.mubr.msk.bf16.gmra.mxu0 %vm12682_vm3, %v2280_v49  ;;  %7273 = vmatmul.mubr.msk.bf16.gmra.mxu1 %vm12683_vm12, %v2280_v49  ;;  %vm598_vm5 = vcmp.eq.s32.totalorder %v518_v51, %v8929_v15  ;;  %vm1499_vm12 = vcmp.eq.s32.totalorder %v9209_v4, %v8929_v15  ;;  %v707_v4 = vadd.s32 4, %v12649_v63  ;;  %v709_v51 = vadd.s32 4, %v8897_v28 }
 0x342   : > { %2668 = vmatprep.mubr.bf16.mxu0 %v12574_v11  ;;  %2951 = vmatprep.mubr.bf16.mxu1 %v12574_v11  ;;  %vm648_vm10 = vmor %vm413_vm0, %vm598_vm5 }
 0x344   : > { %7887 = vset.pattern.permute.xlu1 %v12529_v58 }
 0x345   : > { %1138 = vperm.xlu1 %7887, %v1005_v44   ;;  %v818_v30 = vpop.permute.xlu1 %817 }
 0x346   : > { %vm898_vm9 = vcmp.eq.s32.totalorder %v818_v30, %v8929_v15 }
 0x347   : > { %vm948_vm11 = vmor %vm648_vm10, %vm898_vm9  ;;  %vm2098_vm9 = vcmp.eq.s32.totalorder %v9794_v22, %v8929_v15 }
 0x348   : > { %vm1248_vm8 = vmor %vm948_vm11, %vm1198_vm2 }
 0x349   : > { %7888 = vset.pattern.permute.xlu1 %v12530_v25  ;;  %v821_v24 = vpop.permute.xlu1 %820 }
 0x34a   : > { %1435 = vperm.xlu1 %7888, %v1304_v1   ;;  %vm899_vm6 = vcmp.eq.s32.totalorder %v821_v24, %v8929_v15  ;;  %v1009_v1 = vadd.s32 15, %v8897_v28 }
 0x34b   : > { %vm949_vm1 = vmor %vm649_vm13, %vm899_vm6 }
 0x34e   : > { %7889 = vset.pattern.permute.xlu1 %v12531_v61  ;;  %v1121_v43 = vpop.permute.xlu1 %1120 }
 0x34f   : > { %1735 = vperm.xlu1 %7889, %v1604_v46   ;;  %vm1199_vm4 = vcmp.eq.s32.totalorder %v1121_v43, %v8929_v15  ;;  %v1308_v46 = vadd.s32 26, %v9529_v9 }
 0x350   : > { %vm1249_vm3 = vmor %vm949_vm1, %vm1199_vm4 }
 0x351   : > { %vm1549_vm11 = vmor %vm1249_vm3, %vm1499_vm12  ;;  %vm601_vm3 = vcmp.eq.s32.totalorder %v527_v35, %v8929_v15  ;;  %v1611_v35 = vadd.s32 35, %v9741_v12 }
 0x353   : > { %1738 = vperm.xlu1 %7889, %v1605_v54   ;;  %v1418_v60 = vpop.permute.xlu1 %1417  ;;  %v1608_v54 = vadd.s32 35, %v9529_v9 }
 0x354   : > { %vm1498_vm7 = vcmp.eq.s32.totalorder %v1418_v60, %v8929_v15  ;;  %v1609_v60 = vadd.s32 35, %v8897_v28 }
 0x355   : > { %vm1548_vm5 = vmor %vm1248_vm8, %vm1498_vm7  ;;  %vm12685_vm8 = vcmask 392192  }
 0x356   : > { %vm12686_vm7 = vmmov %vm12685_vm8 }
 0x357   : > { %7890 = vset.pattern.permute.xlu1 %v12535_v18 }
 0x358   : > { %2038 = vperm.xlu1 %7890, %v1905_v21   ;;  %v1718_v56 = vpop.permute.xlu1 %1717  ;;  %v533_v21 = vpop.permute.xlu0 %532 }
 0x359   : > { %vm1798_vm14 = vcmp.eq.s32.totalorder %v1718_v56, %v8929_v15 }
 0x35a   : > { %vm1848_vm15 = vmor %vm1548_vm5, %vm1798_vm14 }
 0x35b   : > { %vm2148_vm13 = vmor %vm1848_vm15, %vm2098_vm9 }
 0x35c   : > { %7891 = vset.pattern.permute.xlu1 %v12539_v2  ;;  %v1721_v41 = vpop.permute.xlu1 %1720  ;;  %v7204_v22 = vsel %vm2148_vm13, 1.0, %v12607_v10  ;;  %vm651_vm9 = vmor %vm413_vm0, %vm601_vm3  ;;  %vm1501_vm3 = vcmp.eq.s32.totalorder %v9220_v3, %v8929_v15  ;;  %v539_v28 = vpop.permute.xlu0 %538 }
 0x35d   : > { %541 = vperm.xlu1 %7891, %v9524_v33   ;;  %vm1799_vm10 = vcmp.eq.s32.totalorder %v1721_v41, %v8929_v15  ;;  %v12690_v41 = vld [vmem:[#allocation58_spill] sm:$0xff] }
 0x35e   : > { %vm1849_vm6 = vmor %vm1549_vm11, %vm1799_vm10  ;;  %vm1200_vm10 = vcmp.eq.s32.totalorder %v12687_v40, %v8929_v15  ;;  %v712_v40 = vadd.s32 4, %v9921_v16 }
 0x361   : > { %7892 = vset.pattern.permute.xlu1 %v12526_v0  ;;  %v2021_v45 = vpop.permute.xlu1 %2020 }
 0x362   : > { %vm2099_vm2 = vcmp.eq.s32.totalorder %v2021_v45, %v8929_v15  ;;  %841 = vperm.xlu1 %7892, %v706_v6  }
 0x363   : > { %vm2149_vm4 = vmor %vm1849_vm6, %vm2099_vm2 }
 0x364   : > { %v7205_v13 = vsel %vm2149_vm4, 1.0, %v12607_v10 }
 0x365   : > { %v2281_v32 = vpack.c.bf16 %v7205_v13, %v7204_v22 }
 0x366   : > { %844 = vperm.xlu1 %7892, %v707_v4   ;;  %v524_v47 = vpop.permute.xlu1 %523  ;;  %v10064_v4 = vpop.permute.xlu0 %544 }
 0x367   : > { %7249 = vmatmul.mubr.msk.bf16.gmra.mxu0 %vm12685_vm8, %v2281_v32  ;;  %7274 = vmatmul.mubr.msk.bf16.gmra.mxu1 %vm12686_vm7, %v2281_v32  ;;  %vm600_vm1 = vcmp.eq.s32.totalorder %v524_v47, %v8929_v15  ;;  %v1011_v47 = vadd.s32 15, %v9741_v12 }
 0x368   : > { %2678 = vmatprep.mubr.bf16.mxu0 %v12574_v11  ;;  %2961 = vmatprep.mubr.bf16.mxu1 %v12574_v11  ;;  %vm650_vm12 = vmor %vm413_vm0, %vm600_vm1  ;;  %vm2100_vm1 = vcmp.eq.s32.totalorder %v9799_v38, %v8929_v15 }
 0x36a   : > { %7893 = vset.pattern.permute.xlu1 %v12529_v58 }
 0x36b   : > { %1144 = vperm.xlu1 %7893, %v1007_v8   ;;  %v824_v19 = vpop.permute.xlu1 %823  ;;  %v10073_v8 = vpop.permute.xlu0 %550 }
 0x36c   : > { %vm900_vm14 = vcmp.eq.s32.totalorder %v824_v19, %v8929_v15  ;;  %v1310_v19 = vadd.s32 26, %v9535_v55 }
 0x36d   : > { %vm950_vm5 = vmor %vm650_vm12, %vm900_vm14 }
 0x36e   : > { %vm1250_vm13 = vmor %vm950_vm5, %vm1200_vm10 }
 0x36f   : > { %7894 = vset.pattern.permute.xlu1 %v12530_v25  ;;  %v827_v52 = vpop.permute.xlu1 %826 }
 0x370   : > { %1441 = vperm.xlu1 %7894, %v1306_v31   ;;  %vm901_vm15 = vcmp.eq.s32.totalorder %v827_v52, %v8929_v15  ;;  %v10079_v31 = vpop.permute.xlu0 %556 }
 0x371   : > { %vm951_vm2 = vmor %vm651_vm9, %vm901_vm15 }
 0x374   : > { %7895 = vset.pattern.permute.xlu1 %v12531_v61  ;;  %v1127_v5 = vpop.permute.xlu1 %1126 }
 0x375   : > { %1741 = vperm.xlu1 %7895, %v1606_v62   ;;  %vm1201_vm11 = vcmp.eq.s32.totalorder %v1127_v5, %v8929_v15  ;;  %v1610_v62 = vadd.s32 35, %v9535_v55  ;;  %v10083_v5 = vpop.permute.xlu0 %562 }
 0x376   : > { %vm1251_vm8 = vmor %vm951_vm2, %vm1201_vm11 }
 0x377   : > { %vm1551_vm5 = vmor %vm1251_vm8, %vm1501_vm3  ;;  %vm603_vm8 = vcmp.eq.s32.totalorder %v533_v21, %v8929_v15 }
 0x379   : > { %1744 = vperm.xlu1 %7895, %v1607_v53   ;;  %v1424_v57 = vpop.permute.xlu1 %1423 }
 0x37a   : > { %vm1500_vm6 = vcmp.eq.s32.totalorder %v1424_v57, %v8929_v15 }
 0x37b   : > { %vm1550_vm7 = vmor %vm1250_vm13, %vm1500_vm6  ;;  %vm12688_vm13 = vcmask 392192  }
 0x37c   : > { %vm12689_vm6 = vmmov %vm12688_vm13 }
 0x37d   : > { %7896 = vset.pattern.permute.xlu1 %v12535_v18 }
 0x37e   : > { %2044 = vperm.xlu1 %7896, %v1907_v48   ;;  %v1724_v33 = vpop.permute.xlu1 %1723  ;;  %v1136_v48 = vpop.permute.xlu0 %1135 }
 0x37f   : > { %vm1800_vm4 = vcmp.eq.s32.totalorder %v1724_v33, %v8929_v15  ;;  %v1911_v33 = vadd.s32 37, %v9741_v12 }
 0x380   : > { %vm1850_vm14 = vmor %vm1550_vm7, %vm1800_vm4 }
 0x381   : > { %vm2150_vm9 = vmor %vm1850_vm14, %vm2100_vm1 }
 0x382   : > { %7897 = vset.pattern.permute.xlu1 %v12539_v2  ;;  %v1727_v63 = vpop.permute.xlu1 %1726  ;;  %v7206_v38 = vsel %vm2150_vm9, 1.0, %v12607_v10  ;;  %vm653_vm14 = vmor %vm413_vm0, %vm603_vm8  ;;  %vm1503_vm8 = vcmp.eq.s32.totalorder %v9244_v42, %v8929_v15 }
 0x383   : > { %547 = vperm.xlu1 %7897, %v9529_v9   ;;  %vm1801_vm12 = vcmp.eq.s32.totalorder %v1727_v63, %v8929_v15  ;;  %v713_v63 = vadd.s32 4, %v9747_v20 }
 0x384   : > { %vm1851_vm15 = vmor %vm1551_vm5, %vm1801_vm12  ;;  %vm1202_vm12 = vcmp.eq.s32.totalorder %v12690_v41, %v8929_v15 }
 0x387   : > { %7898 = vset.pattern.permute.xlu1 %v12526_v0  ;;  %v2027_v49 = vpop.permute.xlu1 %2026 }
 0x388   : > { %vm2101_vm10 = vcmp.eq.s32.totalorder %v2027_v49, %v8929_v15  ;;  %847 = vperm.xlu1 %7898, %v708_v14   ;;  %v10112_v14 = vpop.f32.mrf.mxu0 }
 0x389   : > { %vm2151_vm11 = vmor %vm1851_vm15, %vm2101_vm10 }
 0x38a   : > { %v7207_v44 = vsel %vm2151_vm11, 1.0, %v12607_v10 }
 0x38b   : > { %v2282_v30 = vpack.c.bf16 %v7207_v44, %v7206_v38  ;;  %v10121_v44 = vpop.f32.mrf.mxu0 }
 0x38c   : > { %850 = vperm.xlu1 %7898, %v709_v51   ;;  %v530_v3 = vpop.permute.xlu1 %529  ;;  %v10116_v51 = vpop.f32.mrf.mxu1 }
 0x38d   : > { %7250 = vmatmul.mubr.msk.bf16.gmra.mxu0 %vm12688_vm13, %v2282_v30  ;;  %7275 = vmatmul.mubr.msk.bf16.gmra.mxu1 %vm12689_vm6, %v2282_v30  ;;  %vm602_vm2 = vcmp.eq.s32.totalorder %v530_v3, %v8929_v15  ;;  %v10128_v3 = vpop.f32.mrf.mxu0 }
 0x38e   : > { %2688 = vmatprep.mubr.bf16.mxu0 %v12574_v11  ;;  %2971 = vmatprep.mubr.bf16.mxu1 %v12574_v11  ;;  %vm652_vm7 = vmor %vm413_vm0, %vm602_vm2  ;;  %vm2102_vm2 = vcmp.eq.s32.totalorder %v9815_v59, %v8929_v15  ;;  %v711_v59 = vadd.s32 4, %v9741_v12  ;;  %v10125_v30 = vpop.f32.mrf.mxu1 }
 0x390   : > { %7899 = vset.pattern.permute.xlu1 %v12529_v58 }
 0x391   : > { %1150 = vperm.xlu1 %7899, %v1009_v1   ;;  %v830_v24 = vpop.permute.xlu1 %829 }
 0x392   : > { %vm902_vm4 = vcmp.eq.s32.totalorder %v830_v24, %v8929_v15  ;;  %v1312_v24 = vadd.s32 26, %v9921_v16 }
 0x393   : > { %vm952_vm1 = vmor %vm652_vm7, %vm902_vm4 }
 0x394   : > { %vm1252_vm9 = vmor %vm952_vm1, %vm1202_vm12 }
 0x395   : > { %7900 = vset.pattern.permute.xlu1 %v12530_v25  ;;  %v833_v43 = vpop.permute.xlu1 %832 }
 0x396   : > { %1447 = vperm.xlu1 %7900, %v1308_v46   ;;  %vm903_vm3 = vcmp.eq.s32.totalorder %v833_v43, %v8929_v15  ;;  %v10131_v46 = vpop.f32.mrf.mxu1  ;;  %v10134_v43 = vpop.f32.mrf.mxu0 }
 0x397   : > { %vm953_vm10 = vmor %vm653_vm14, %vm903_vm3 }
 0x398   : > { %v10139_v21 = vpop.f32.mrf.mxu0 }
 0x39a   : > { %7902 = vset.pattern.permute.xlu1 %v12531_v61  ;;  %v1133_v50 = vpop.permute.xlu1 %1132 }
 0x39b   : > { %1747 = vperm.xlu1 %7902, %v1608_v54   ;;  %vm1203_vm5 = vcmp.eq.s32.totalorder %v1133_v50, %v8929_v15  ;;  %v10136_v50 = vpop.f32.mrf.mxu1 }
 0x39c   : > { %vm1253_vm13 = vmor %vm953_vm10, %vm1203_vm5 }
 0x39d   : > { %vm1553_vm1 = vmor %vm1253_vm13, %vm1503_vm8  ;;  %vm605_vm13 = vcmp.eq.s32.totalorder %v539_v28, %v8929_v15  ;;  %v1913_v28 = vadd.s32 37, %v9747_v20 }
 0x39e   : > { %vm655_vm8 = vmor %vm413_vm0, %vm605_vm13 }
 0x39f   : > { %1750 = vperm.xlu1 %7902, %v1609_v60   ;;  %v1430_v56 = vpop.permute.xlu1 %1429  ;;  %v1612_v60 = vadd.s32 35, %v9921_v16 }
 0x3a0   : > { %vm1502_vm15 = vcmp.eq.s32.totalorder %v1430_v56, %v8929_v15  ;;  %v10142_v56 = vpop.f32.mrf.mxu1 }
 0x3a1   : > { %vm1552_vm6 = vmor %vm1252_vm9, %vm1502_vm15  ;;  %vm12691_vm9 = vcmask 392192  }
 0x3a2   : > { %vm12692_vm15 = vmmov %vm12691_vm9 }
 0x3a3   : > { %7903 = vset.pattern.permute.xlu1 %v12535_v18 }
 0x3a4   : > { %2050 = vperm.xlu1 %7903, %v1909_v34   ;;  %v1730_v9 = vpop.permute.xlu1 %1729  ;;  %v1613_v34 = vadd.s32 35, %v9747_v20 }
 0x3a5   : > { %vm1802_vm11 = vcmp.eq.s32.totalorder %v1730_v9, %v8929_v15  ;;  %v10145_v9 = vpop.f32.mrf.mxu0 }
 0x3a6   : > { %vm1852_vm4 = vmor %vm1552_vm6, %vm1802_vm11 }
 0x3a7   : > { %vm2152_vm14 = vmor %vm1852_vm4, %vm2102_vm2  ;;  %vm1204_vm4 = vcmp.eq.s32.totalorder %v1136_v48, %v8929_v15 }
 0x3a8   : > { %7904 = vset.pattern.permute.xlu1 %v12539_v2  ;;  %v1733_v6 = vpop.permute.xlu1 %1732  ;;  %v7208_v22 = vsel %vm2152_vm14, 1.0, %v12607_v10 }
 0x3a9   : > { %553 = vperm.xlu1 %7904, %v9535_v55   ;;  %vm1803_vm7 = vcmp.eq.s32.totalorder %v1733_v6, %v8929_v15 }
 0x3aa   : > { %vm1853_vm3 = vmor %vm1553_vm1, %vm1803_vm7 }
 0x3ad   : > { %7905 = vset.pattern.permute.xlu1 %v12526_v0  ;;  %v2033_v45 = vpop.permute.xlu1 %2032 }
 0x3ae   : > { %vm2103_vm12 = vcmp.eq.s32.totalorder %v2033_v45, %v8929_v15  ;;  %853 = vperm.xlu1 %7905, %v710_v27  }
 0x3af   : > { %vm2153_vm5 = vmor %vm1853_vm3, %vm2103_vm12 }
 0x3b0   : > { %v7209_v42 = vsel %vm2153_vm5, 1.0, %v12607_v10 }
 0x3b1   : > { %v2283_v13 = vpack.c.bf16 %v7209_v42, %v7208_v22  ;;  %v7946_v42 = vld [vmem:[%s12354_s4 + $0xac] ss:$12 sps:$4 sm:$0xff]  }
 0x3b2   : > { %856 = vperm.xlu1 %7905, %v711_v59   ;;  %v536_v32 = vpop.permute.xlu1 %535  ;;  %4451 = vmatprep.subr.bf16.mxu0 %v7946_v42 }
 0x3b3   : > { %7251 = vmatmul.mubr.msk.bf16.gmra.mxu0 %vm12691_vm9, %v2283_v13  ;;  %7276 = vmatmul.mubr.msk.bf16.gmra.mxu1 %vm12692_vm15, %v2283_v13  ;;  %vm604_vm10 = vcmp.eq.s32.totalorder %v536_v32, %v8929_v15 }
 0x3b4   : > { %2698 = vmatprep.mubr.bf16.mxu0 %v12574_v11  ;;  %2981 = vmatprep.mubr.bf16.mxu1 %v12574_v11  ;;  %vm654_vm6 = vmor %vm413_vm0, %vm604_vm10 }
 0x3b6   : > { %7906 = vset.pattern.permute.xlu1 %v12529_v58 }
 0x3b7   : > { %1156 = vperm.xlu1 %7906, %v1011_v47   ;;  %v836_v36 = vpop.permute.xlu1 %835 }
 0x3b8   : > { %vm904_vm11 = vcmp.eq.s32.totalorder %v836_v36, %v8929_v15 }
 0x3b9   : > { %vm954_vm2 = vmor %vm654_vm6, %vm904_vm11  ;;  %vm1505_vm11 = vcmp.eq.s32.totalorder %v9264_v17, %v8929_v15  ;;  %vm2104_vm6 = vcmp.eq.s32.totalorder %v9825_v7, %v8929_v15 }
 0x3ba   : > { %vm1254_vm14 = vmor %vm954_vm2, %vm1204_vm4 }
 0x3bb   : > { %7907 = vset.pattern.permute.xlu1 %v12530_v25  ;;  %v839_v52 = vpop.permute.xlu1 %838 }
 0x3bc   : > { %1453 = vperm.xlu1 %7907, %v1310_v19   ;;  %vm905_vm7 = vcmp.eq.s32.totalorder %v839_v52, %v8929_v15 }
 0x3bd   : > { %vm955_vm12 = vmor %vm655_vm8, %vm905_vm7 }
 0x3c0   : > { %7908 = vset.pattern.permute.xlu1 %v12531_v61  ;;  %v1139_v53 = vpop.permute.xlu1 %1138 }
 0x3c1   : > { %1753 = vperm.xlu1 %7908, %v1610_v62   ;;  %vm1205_vm1 = vcmp.eq.s32.totalorder %v1139_v53, %v8929_v15 }
 0x3c2   : > { %vm1255_vm9 = vmor %vm955_vm12, %vm1205_vm1 }
 0x3c3   : > { %vm1555_vm2 = vmor %vm1255_vm9, %vm1505_vm11  ;;  %vm607_vm9 = vcmp.eq.s32.totalorder %v10064_v4, %v8929_v15 }
 0x3c5   : > { %1756 = vperm.xlu1 %7908, %v1611_v35   ;;  %v1436_v57 = vpop.permute.xlu1 %1435 }
 0x3c6   : > { %vm1504_vm3 = vcmp.eq.s32.totalorder %v1436_v57, %v8929_v15 }
 0x3c7   : > { %vm1554_vm15 = vmor %vm1254_vm14, %vm1504_vm3  ;;  %vm12693_vm14 = vcmask 392192  }
 0x3c8   : > { %vm12694_vm3 = vmmov %vm12693_vm14 }
 0x3c9   : > { %7910 = vset.pattern.permute.xlu1 %v12535_v18 }
 0x3ca   : > { %2056 = vperm.xlu1 %7910, %v1911_v33   ;;  %v1736_v55 = vpop.permute.xlu1 %1735 }
 0x3cb   : > { %vm1804_vm5 = vcmp.eq.s32.totalorder %v1736_v55, %v8929_v15 }
 0x3cc   : > { %vm1854_vm10 = vmor %vm1554_vm15, %vm1804_vm5 }
 0x3cd   : > { %vm2154_vm4 = vmor %vm1854_vm10, %vm2104_vm6 }
 0x3ce   : > { %7911 = vset.pattern.permute.xlu1 %v12539_v2  ;;  %v1739_v12 = vpop.permute.xlu1 %1738  ;;  %v7210_v17 = vsel %vm2154_vm4, 1.0, %v12607_v10 }
 0x3cf   : > { %559 = vperm.xlu1 %7911, %v9921_v16   ;;  %vm1805_vm13 = vcmp.eq.s32.totalorder %v1739_v12, %v8929_v15  ;;  %v1142_v16 = vpop.permute.xlu0 %1141 }
 0x3d0   : > { %vm1855_vm8 = vmor %vm1555_vm2, %vm1805_vm13  ;;  %vm1206_vm11 = vcmp.eq.s32.totalorder %v1142_v16, %v8929_v15 }
 0x3d1   : > { %vm657_vm13 = vmor %vm413_vm0, %vm607_vm9 }
 0x3d3   : > { %7913 = vset.pattern.permute.xlu1 %v12526_v0  ;;  %v2039_v2 = vpop.permute.xlu1 %2038  ;;  %v1013_v0 = vadd.s32 15, %v9747_v20 }
 0x3d4   : > { %vm2105_vm7 = vcmp.eq.s32.totalorder %v2039_v2, %v8929_v15  ;;  %859 = vperm.xlu1 %7913, %v712_v40  }
 0x3d5   : > { %vm2155_vm1 = vmor %vm1855_vm8, %vm2105_vm7 }
 0x3d6   : > { %v7211_v49 = vsel %vm2155_vm1, 1.0, %v12607_v10 }
 0x3d7   : > { %v2284_v7 = vpack.c.bf16 %v7211_v49, %v7210_v17 }
 0x3d8   : > { %862 = vperm.xlu1 %7913, %v713_v63   ;;  %v542_v38 = vpop.permute.xlu1 %541 }
 0x3d9   : > { %7252 = vmatmul.mubr.msk.bf16.gmra.mxu0 %vm12693_vm14, %v2284_v7  ;;  %7277 = vmatmul.mubr.msk.bf16.gmra.mxu1 %vm12694_vm3, %v2284_v7  ;;  %vm606_vm12 = vcmp.eq.s32.totalorder %v542_v38, %v8929_v15 }
 0x3da   : > { %2708 = vmatprep.mubr.bf16.mxu0 %v12574_v11  ;;  %2991 = vmatprep.mubr.bf16.mxu1 %v12574_v11  ;;  %vm656_vm15 = vmor %vm413_vm0, %vm606_vm12 }
 0x3dc   : > { %7915 = vset.pattern.permute.xlu1 %v12529_v58 }
 0x3dd   : > { %1162 = vperm.xlu1 %7915, %v1013_v0   ;;  %v842_v1 = vpop.permute.xlu1 %841 }
 0x3de   : > { %vm906_vm5 = vcmp.eq.s32.totalorder %v842_v1, %v8929_v15  ;;  %v1148_v1 = vpop.permute.xlu0 %1147 }
 0x3df   : > { %vm956_vm10 = vmor %vm656_vm15, %vm906_vm5  ;;  %vm1507_vm5 = vcmp.eq.s32.totalorder %v9288_v26, %v8929_v15  ;;  %vm2106_vm15 = vcmp.eq.s32.totalorder %v9832_v23, %v8929_v15  ;;  %v7949_v26 = vld [vmem:[%s12354_s4 + $0x22c] ss:$12 sps:$4 sm:$0xff]  }
 0x3e0   : > { %vm1256_vm4 = vmor %vm956_vm10, %vm1206_vm11  ;;  %4734 = vmatprep.subr.bf16.mxu1 %v7949_v26 }
 0x3e1   : > { %7916 = vset.pattern.permute.xlu1 %v12530_v25  ;;  %v845_v54 = vpop.permute.xlu1 %844  ;;  %v10147_v25 = vpop.f32.mrf.mxu1 }
 0x3e2   : > { %1459 = vperm.xlu1 %7916, %v1312_v24   ;;  %vm907_vm6 = vcmp.eq.s32.totalorder %v845_v54, %v8929_v15 }
 0x3e3   : > { %v10158_v6 = vpop.f32.mrf.mxu1  ;;  %vm957_vm7 = vmor %vm657_vm13, %vm907_vm6 }
 0x3e5   : > { %v10169_v45 = vpop.f32.mrf.mxu1 }
 0x3e6   : > { %7917 = vset.pattern.permute.xlu1 %v12531_v61  ;;  %v1145_v58 = vpop.permute.xlu1 %1144  ;;  %v10154_v61 = vpop.f32.mrf.mxu0 }
 0x3e7   : > { %1759 = vperm.xlu1 %7917, %v1612_v60   ;;  %vm1207_vm2 = vcmp.eq.s32.totalorder %v1145_v58, %v8929_v15  ;;  %v10176_v59 = vpop.f32.mrf.mxu1 }
 0x3e8   : > { %v10166_v27 = vpop.f32.mrf.mxu0  ;;  %vm1257_vm14 = vmor %vm957_vm7, %vm1207_vm2  ;;  %vm609_vm7 = vcmp.eq.s32.totalorder %v10073_v8, %v8929_v15 }
 0x3e9   : > { %vm1557_vm10 = vmor %vm1257_vm14, %vm1507_vm5  ;;  %v10190_v32 = vpop.f32.mrf.mxu1  ;;  %vm1509_vm5 = vcmp.eq.s32.totalorder %v9318_v29, %v8929_v15 }
 0x3ea   : > { %v10172_v4 = vpop.f32.mrf.mxu0 }
 0x3eb   : > { %1762 = vperm.xlu1 %7917, %v1613_v34   ;;  %v1442_v41 = vpop.permute.xlu1 %1441  ;;  %v10196_v62 = vpop.f32.mrf.mxu1 }
 0x3ec   : > { %vm1506_vm8 = vcmp.eq.s32.totalorder %v1442_v41, %v8929_v15  ;;  %v10184_v13 = vpop.f32.mrf.mxu0 }
 0x3ed   : > { %vm1556_vm3 = vmor %vm1256_vm4, %vm1506_vm8  ;;  %vm12695_vm4 = vcmask 392192   ;;  %v10204_v35 = vpop.f32.mrf.mxu1 }
 0x3ee   : > { %v10194_v19 = vpop.f32.mrf.mxu0  ;;  %vm12696_vm8 = vmmov %vm12695_vm4 }
 0x3ef   : > { %7919 = vset.pattern.permute.xlu1 %v12535_v18  ;;  %v10208_v33 = vpop.f32.mrf.mxu1 }
 0x3f0   : > { %2062 = vperm.xlu1 %7919, %v1913_v28   ;;  %v1742_v20 = vpop.permute.xlu1 %1741  ;;  %v10202_v53 = vpop.f32.mrf.mxu0 }
 0x3f1   : > { %vm1806_vm1 = vcmp.eq.s32.totalorder %v1742_v20, %v8929_v15  ;;  %v10214_v40 = vpop.f32.mrf.mxu1 }
 0x3f2   : > { %vm1856_vm12 = vmor %vm1556_vm3, %vm1806_vm1  ;;  %v10206_v57 = vpop.f32.mrf.mxu0 }
 0x3f3   : > { %vm2156_vm11 = vmor %vm1856_vm12, %vm2106_vm15  ;;  %v10221_v17 = vpop.f32.mrf.mxu1 }
 0x3f4   : > { %v1745_v18 = vpop.permute.xlu1 %1744  ;;  %v7212_v23 = vsel %vm2156_vm11, 1.0, %v12607_v10  ;;  %v10212_v55 = vpop.f32.mrf.mxu0  ;;  %vm659_vm1 = vmor %vm413_vm0, %vm609_vm7 }
 0x3f5   : > { %vm1807_vm9 = vcmp.eq.s32.totalorder %v1745_v18, %v8929_v15  ;;  %v10232_v7 = vpop.f32.mrf.mxu1 }
 0x3f6   : > { %vm1857_vm13 = vmor %vm1557_vm10, %vm1807_vm9  ;;  %v10219_v2 = vpop.f32.mrf.mxu0 }
 0x3f7   : > { %v10238_v24 = vpop.f32.mrf.mxu1 }
 0x3f8   : > { %v10230_v49 = vpop.f32.mrf.mxu0 }
 0x3f9   : > { %v2045_v22 = vpop.permute.xlu1 %2044  ;;  %v10246_v60 = vpop.f32.mrf.mxu1 }
 0x3fa   : > { %vm2107_vm6 = vcmp.eq.s32.totalorder %v2045_v22, %v8929_v15  ;;  %v10235_v0 = vpop.f32.mrf.mxu0 }
 0x3fb   : > { %vm2157_vm2 = vmor %vm1857_vm13, %vm2107_vm6  ;;  %v10251_v41 = vpop.f32.mrf.mxu1 }
 0x3fc   : > { %v7213_v47 = vsel %vm2157_vm2, 1.0, %v12607_v10  ;;  %vm1208_vm2 = vcmp.eq.s32.totalorder %v1148_v1, %v8929_v15  ;;  %v10243_v54 = vpop.f32.mrf.mxu0  ;;  %v1154_v1 = vpop.permute.xlu0 %1153 }
 0x3fd   : > { %v2285_v36 = vpack.c.bf16 %v7213_v47, %v7212_v23  ;;  %v10261_v20 = vpop.f32.mrf.mxu1 }
 0x3fe   : > { %v548_v52 = vpop.permute.xlu1 %547  ;;  %v10249_v34 = vpop.f32.mrf.mxu0 }
 0x3ff   : > { %7253 = vmatmul.mubr.msk.bf16.gmra.mxu0 %vm12695_vm4, %v2285_v36  ;;  %7278 = vmatmul.mubr.msk.bf16.gmra.mxu1 %vm12696_vm8, %v2285_v36  ;;  %vm608_vm10 = vcmp.eq.s32.totalorder %v548_v52, %v8929_v15  ;;  %v10267_v23 = vpop.f32.mrf.mxu1 }
 0x400   : > { %2718 = vmatprep.mubr.bf16.mxu0 %v12574_v11  ;;  %3001 = vmatprep.mubr.bf16.mxu1 %v12574_v11  ;;  %vm658_vm13 = vmor %vm413_vm0, %vm608_vm10  ;;  %v10256_v28 = vpop.f32.mrf.mxu0  ;;  %12700 = vst [vmem:[#allocation12_spill] sm:$0xff] %v10267_v23 }
 0x401   : > { %v10275_v36 = vpop.f32.mrf.mxu1 }
 0x402   : > { %v10265_v26 = vpop.f32.mrf.mxu0 }
 0x403   : > { %v848_v48 = vpop.permute.xlu1 %847  ;;  %12699 = vst [vmem:[#allocation18_spill] sm:$0xff] %v10265_v26 }
 0x404   : > { %vm908_vm11 = vcmp.eq.s32.totalorder %v848_v48, %v8929_v15  ;;  %v10273_v47 = vpop.f32.mrf.mxu0 }
 0x405   : > { %vm958_vm6 = vmor %vm658_vm13, %vm908_vm11  ;;  %vm12701_vm13 = vcmask 392192  }
 0x406   : > { %vm1258_vm7 = vmor %vm958_vm6, %vm1208_vm2  ;;  %v10277_v48 = vpop.f32.mrf.mxu0 }
 0x407   : > { %v851_v12 = vpop.permute.xlu1 %850  ;;  %vm12702_vm6 = vmmov %vm12701_vm13 }
 0x408   : > { %vm909_vm14 = vcmp.eq.s32.totalorder %v851_v12, %v8929_v15  ;;  %v10279_v12 = vpop.f32.mrf.mxu1  ;;  %v10281_v8 = vpop.f32.mrf.mxu0 }
 0x409   : > { %vm959_vm3 = vmor %vm659_vm1, %vm909_vm14  ;;  %12703 = vst [vmem:[#allocation19_spill] sm:$0xff] %v10281_v8 }
 0x40c   : > { %v1151_v63 = vpop.permute.xlu1 %1150 }
 0x40d   : > { %vm1209_vm12 = vcmp.eq.s32.totalorder %v1151_v63, %v8929_v15 }
 0x40e   : > { %vm1259_vm9 = vmor %vm959_vm3, %vm1209_vm12  ;;  %vm2108_vm12 = vcmp.eq.s32.totalorder %v9840_v37, %v8929_v15 }
 0x40f   : > { %vm10226_vm15 = vmor %vm1259_vm9, %vm1509_vm5 }
 0x411   : > { %v1448_v38 = vpop.permute.xlu1 %1447 }
 0x412   : > { %vm1508_vm4 = vcmp.eq.s32.totalorder %v1448_v38, %v8929_v15  ;;  %v10283_v38 = vpop.f32.mrf.mxu1 }
 0x413   : > { %vm1558_vm1 = vmor %vm1258_vm7, %vm1508_vm4  ;;  %12704 = vst [vmem:[#allocation27_spill] sm:$0xff] %v10283_v38  ;;  %vm611_vm4 = vcmp.eq.s32.totalorder %v10079_v31, %v8929_v15 }
 0x416   : > { %v1748_v29 = vpop.permute.xlu1 %1747 }
 0x417   : > { %vm1808_vm8 = vcmp.eq.s32.totalorder %v1748_v29, %v8929_v15 }
 0x418   : > { %vm1858_vm14 = vmor %vm1558_vm1, %vm1808_vm8  ;;  %vm1210_vm1 = vcmp.eq.s32.totalorder %v1154_v1, %v8929_v15 }
 0x419   : > { %vm2158_vm5 = vmor %vm1858_vm14, %vm2108_vm12 }
 0x41a   : > { %v1751_v58 = vpop.permute.xlu1 %1750  ;;  %v7214_v18 = vsel %vm2158_vm5, 1.0, %v12607_v10 }
 0x41b   : > { %vm1809_vm3 = vcmp.eq.s32.totalorder %v1751_v58, %v8929_v15  ;;  %v10285_v58 = vpop.f32.mrf.mxu0 }
 0x41c   : > { %vm1859_vm9 = vmor %vm10226_vm15, %vm1809_vm3  ;;  %12705 = vst [vmem:[#allocation28_spill] sm:$0xff] %v10285_v58 }
 0x41d   : > { %vm661_vm3 = vmor %vm413_vm0, %vm611_vm4 }
 0x41f   : > { %v2051_v16 = vpop.permute.xlu1 %2050 }
 0x420   : > { %vm2109_vm10 = vcmp.eq.s32.totalorder %v2051_v16, %v8929_v15  ;;  %v10287_v16 = vpop.f32.mrf.mxu1 }
 0x421   : > { %vm2159_vm11 = vmor %vm1859_vm9, %vm2109_vm10  ;;  %12706 = vst [vmem:[#allocation40_spill] sm:$0xff] %v10287_v16 }
 0x422   : > { %v7215_v22 = vsel %vm2159_vm11, 1.0, %v12607_v10  ;;  %v10295_v23 = vpop.f32.mrf.mxu1 }
 0x423   : > { %v2286_v42 = vpack.c.bf16 %v7215_v22, %v7214_v18  ;;  %v10290_v22 = vpop.f32.mrf.mxu0  ;;  %12708 = vst [vmem:[#allocation29_spill] sm:$0xff] %v10295_v23 }
 0x424   : > { %v554_v37 = vpop.permute.xlu1 %553  ;;  %12707 = vst [vmem:[#allocation42_spill] sm:$0xff] %v10290_v22  ;;  %v10305_v58 = vpop.f32.mrf.mxu1 }
 0x425   : > { %7254 = vmatmul.mubr.msk.bf16.gmra.mxu0 %vm12701_vm13, %v2286_v42  ;;  %7279 = vmatmul.mubr.msk.bf16.gmra.mxu1 %vm12702_vm6, %v2286_v42  ;;  %vm610_vm15 = vcmp.eq.s32.totalorder %v554_v37, %v8929_v15  ;;  %v10293_v42 = vpop.permute.xlu0 %1159  ;;  %v10302_v16 = vpop.f32.mrf.mxu0  ;;  %12710 = vst [vmem:[#allocation44_spill] sm:$0xff] %v10305_v58 }
 0x426   : > { %2728 = vmatprep.mubr.bf16.mxu0 %v12574_v11  ;;  %3011 = vmatprep.mubr.bf16.mxu1 %v12574_v11  ;;  %vm660_vm8 = vmor %vm413_vm0, %vm610_vm15  ;;  %12709 = vst [vmem:[#allocation30_spill] sm:$0xff] %v10302_v16 }
 0x429   : > { %v854_v52 = vpop.permute.xlu1 %853  ;;  %v1457_v31 = vpop.permute.xlu0 %1456 }
 0x42a   : > { %vm910_vm2 = vcmp.eq.s32.totalorder %v854_v52, %v8929_v15  ;;  %v10312_v52 = vpop.f32.mrf.mxu0  ;;  %vm1511_vm6 = vcmp.eq.s32.totalorder %v1457_v31, %v8929_v15 }
 0x42b   : > { %vm960_vm7 = vmor %vm660_vm8, %vm910_vm2  ;;  %12711 = vst [vmem:[#allocation13_spill] sm:$0xff] %v10312_v52  ;;  %vm2110_vm8 = vcmp.eq.s32.totalorder %v9845_v39, %v8929_v15 }
 0x42c   : > { %vm1260_vm5 = vmor %vm960_vm7, %vm1210_vm1  ;;  %v10317_v23 = vpop.f32.mrf.mxu0 }
 0x42d   : > { %v857_v63 = vpop.permute.xlu1 %856  ;;  %12713 = vst [vmem:[#allocation46_spill] sm:$0xff] %v10317_v23 }
 0x42e   : > { %vm911_vm14 = vcmp.eq.s32.totalorder %v857_v63, %v8929_v15  ;;  %v10314_v63 = vpop.f32.mrf.mxu1 }
 0x42f   : > { %vm961_vm10 = vmor %vm661_vm3, %vm911_vm14  ;;  %12712 = vst [vmem:[#allocation20_spill] sm:$0xff] %v10314_v63 }
 0x432   : > { %v1157_v29 = vpop.permute.xlu1 %1156 }
 0x433   : > { %vm1211_vm12 = vcmp.eq.s32.totalorder %v1157_v29, %v8929_v15  ;;  %v10319_v29 = vpop.f32.mrf.mxu1 }
 0x434   : > { %vm1261_vm13 = vmor %vm961_vm10, %vm1211_vm12  ;;  %12714 = vst [vmem:[#allocation31_spill] sm:$0xff] %v10319_v29 }
 0x435   : > { %vm1561_vm7 = vmor %vm1261_vm13, %vm1511_vm6  ;;  %v10327_v31 = vpop.f32.mrf.mxu1  ;;  %vm613_vm13 = vcmp.eq.s32.totalorder %v10083_v5, %v8929_v15 }
 0x436   : > { %12716 = vst [vmem:[#allocation48_spill] sm:$0xff] %v10327_v31 }
 0x437   : > { %v1454_v18 = vpop.permute.xlu1 %1453  ;;  %v10333_v39 = vpop.f32.mrf.mxu1 }
 0x438   : > { %vm1510_vm9 = vcmp.eq.s32.totalorder %v1454_v18, %v8929_v15  ;;  %12718 = vst [vmem:[#allocation23_spill] sm:$0xff] %v10333_v39 }
 0x439   : > { %vm1560_vm15 = vmor %vm1260_vm5, %vm1510_vm9  ;;  %vm12719_vm5 = vcmask 392192   ;;  %v10341_v31 = vpop.f32.mrf.mxu1 }
 0x43a   : > { %vm12720_vm9 = vmmov %vm12719_vm5  ;;  %12722 = vst [vmem:[#allocation14_spill] sm:$0xff] %v10341_v31 }
 0x43c   : > { %v1754_v37 = vpop.permute.xlu1 %1753 }
 0x43d   : > { %vm1810_vm11 = vcmp.eq.s32.totalorder %v1754_v37, %v8929_v15  ;;  %v10324_v37 = vpop.f32.mrf.mxu0 }
 0x43e   : > { %vm1860_vm2 = vmor %vm1560_vm15, %vm1810_vm11  ;;  %12715 = vst [vmem:[#allocation21_spill] sm:$0xff] %v10324_v37 }
 0x43f   : > { %vm2160_vm1 = vmor %vm1860_vm2, %vm2110_vm8  ;;  %vm1212_vm8 = vcmp.eq.s32.totalorder %v10293_v42, %v8929_v15 }
 0x440   : > { %v1757_v1 = vpop.permute.xlu1 %1756  ;;  %v7216_v23 = vsel %vm2160_vm1, 1.0, %v12607_v10 }
 0x441   : > { %vm1811_vm4 = vcmp.eq.s32.totalorder %v1757_v1, %v8929_v15  ;;  %v10331_v1 = vpop.f32.mrf.mxu0 }
 0x442   : > { %vm1861_vm14 = vmor %vm1561_vm7, %vm1811_vm4  ;;  %12717 = vst [vmem:[#allocation22_spill] sm:$0xff] %v10331_v1 }
 0x443   : > { %vm663_vm4 = vmor %vm413_vm0, %vm613_vm13 }
 0x445   : > { %v2057_v18 = vpop.permute.xlu1 %2056 }
 0x446   : > { %vm2111_vm3 = vcmp.eq.s32.totalorder %v2057_v18, %v8929_v15  ;;  %v10339_v18 = vpop.f32.mrf.mxu0 }
 0x447   : > { %vm2161_vm12 = vmor %vm1861_vm14, %vm2111_vm3  ;;  %12721 = vst [vmem:[#allocation24_spill] sm:$0xff] %v10339_v18 }
 0x448   : > { %v7217_v29 = vsel %vm2161_vm12, 1.0, %v12607_v10  ;;  %v10343_v37 = vpop.f32.mrf.mxu0 }
 0x449   : > { %v2287_v63 = vpack.c.bf16 %v7217_v29, %v7216_v23  ;;  %12723 = vst [vmem:[#allocation25_spill] sm:$0xff] %v10343_v37  ;;  %v10345_v29 = vpop.f32.mrf.mxu1 }
 0x44a   : > { %v560_v52 = vpop.permute.xlu1 %559  ;;  %12724 = vst [vmem:[#allocation26_spill] sm:$0xff] %v10345_v29  ;;  %v10347_v1 = vpop.f32.mrf.mxu0 }
 0x44b   : > { %7255 = vmatmul.mubr.msk.bf16.gmra.mxu0 %vm12719_vm5, %v2287_v63  ;;  %7280 = vmatmul.mubr.msk.bf16.gmra.mxu1 %vm12720_vm9, %v2287_v63  ;;  %12725 = vst [vmem:[#allocation32_spill] sm:$0xff] %v10347_v1  ;;  %v10349_v22 = vpop.f32.mrf.mxu1  ;;  %vm612_vm10 = vcmp.eq.s32.totalorder %v560_v52, %v8929_v15 }
 0x44c   : > { %2738 = vmatprep.mubr.bf16.mxu0 %v12574_v11  ;;  %3021 = vmatprep.mubr.bf16.mxu1 %v12574_v11  ;;  %12726 = vst [vmem:[#allocation39_spill] sm:$0xff] %v10349_v22  ;;  %v10351_v58 = vpop.f32.mrf.mxu0  ;;  %vm662_vm6 = vmor %vm413_vm0, %vm612_vm10  ;;  %v1463_v22 = vpop.permute.xlu0 %1462 }
 0x44d   : > { %12727 = vst [vmem:[#allocation41_spill] sm:$0xff] %v10351_v58  ;;  %v10353_v16 = vpop.f32.mrf.mxu1  ;;  %vm1513_vm0 = vcmp.eq.s32.totalorder %v1463_v22, %v8929_v15 }
 0x44e   : > { %12728 = vst [vmem:[#allocation15_spill] sm:$0xff] %v10353_v16  ;;  %v10355_v26 = vpop.f32.mrf.mxu0 }
 0x44f   : > { %v860_v23 = vpop.permute.xlu1 %859  ;;  %12729 = vst [vmem:[#allocation43_spill] sm:$0xff] %v10355_v26  ;;  %v10357_v18 = vpop.f32.mrf.mxu1 }
 0x450   : > { %12730 = vst [vmem:[#allocation45_spill] sm:$0xff] %v10357_v18  ;;  %v10360_v31 = vpop.f32.mrf.mxu0  ;;  %vm912_vm11 = vcmp.eq.s32.totalorder %v860_v23, %v8929_v15  ;;  %v2060_v5 = vpop.permute.xlu0 %2059 }
 0x451   : > { %12731 = vst [vmem:[#allocation47_spill] sm:$0xff] %v10360_v31  ;;  %v10363_v29 = vpop.f32.mrf.mxu1  ;;  %vm962_vm15 = vmor %vm662_vm6, %vm912_vm11  ;;  %vm2112_vm11 = vcmp.eq.s32.totalorder %v2060_v5, %v8929_v15 }
 0x452   : > { %12732 = vst [vmem:[#allocation49_spill] sm:$0xff] %v10363_v29  ;;  %v10369_v26 = vpop.f32.mrf.mxu0  ;;  %vm1262_vm1 = vmor %vm962_vm15, %vm1212_vm8 }
 0x453   : > { %v863_v39 = vpop.permute.xlu1 %862  ;;  %12733 = vst [vmem:[#allocation50_spill] sm:$0xff] %v10369_v26  ;;  %v10372_v18 = vpop.f32.mrf.mxu1  ;;  %v7956_v26 = vld [vmem:[%s12354_s4 + $0x78] ss:$12 sps:$4 sm:$0xff]  }
 0x454   : > { %vm913_vm2 = vcmp.eq.s32.totalorder %v863_v39, %v8929_v15  ;;  %12734 = vst [vmem:[#allocation33_spill] sm:$0xff] %v10372_v18  ;;  %v10381_v23 = vpop.f32.mrf.mxu0 }
 0x455   : > { %vm963_vm3 = vmor %vm663_vm4, %vm913_vm2  ;;  %12735 = vst [vmem:[#allocation51_spill] sm:$0xff] %v10381_v23  ;;  %v10383_v29 = vpop.f32.mrf.mxu1 }
 0x456   : > { %12736 = vst [vmem:[#allocation16_spill] sm:$0xff] %v10383_v29  ;;  %v10388_v42 = vpop.f32.mrf.mxu0  ;;  %v7959_v29 = vld [vmem:[%s12354_s4 + $0x1f8] ss:$12 sps:$4 sm:$0xff]  }
 0x457   : > { %12737 = vst [vmem:[#allocation34_spill] sm:$0xff] %v10388_v42 }
 0x458   : > { %v1163_v63 = vpop.permute.xlu1 %1162 }
 0x459   : > { %vm1213_vm7 = vcmp.eq.s32.totalorder %v1163_v63, %v8929_v15 }
 0x45a   : > { %vm1263_vm5 = vmor %vm963_vm3, %vm1213_vm7  ;;  %vm12743_vm7 = vcmask 392192  }
 0x45b   : > { %vm1563_vm6 = vmor %vm1263_vm5, %vm1513_vm0 }
 0x45d   : > { %v1460_v37 = vpop.permute.xlu1 %1459 }
 0x45e   : > { %vm1512_vm14 = vcmp.eq.s32.totalorder %v1460_v37, %v8929_v15  ;;  %v10390_v37 = vpop.f32.mrf.mxu1 }
 0x45f   : > { %vm1562_vm9 = vmor %vm1262_vm1, %vm1512_vm14  ;;  %12738 = vst [vmem:[#allocation52_spill] sm:$0xff] %v10390_v37  ;;  %vm3052_vm14 = vcmask 130048  }
 0x460   : > { %v10395_v22 = vpop.f32.mrf.mxu1  ;;  %vm12744_vm1 = vmmov %vm12743_vm7 }
 0x461   : > { %12740 = vst [vmem:[#allocation35_spill] sm:$0xff] %v10395_v22  ;;  %v8144_v22 = vld [vmem:[%s8469_s19] sm:$0xff] }
 0x462   : > { %v1760_v52 = vpop.permute.xlu1 %1759  ;;  %v10401_v37 = vpop.f32.mrf.mxu1 }
 0x463   : > { %vm1812_vm12 = vcmp.eq.s32.totalorder %v1760_v52, %v8929_v15  ;;  %v10393_v52 = vpop.f32.mrf.mxu0  ;;  %12742 = vst [vmem:[#allocation36_spill] sm:$0xff] %v10401_v37  ;;  %v7955_v37 = vld [vmem:[%s12354_s4 + $0x214] ss:$12 sps:$4 sm:$0xff]  }
 0x464   : > { %vm1862_vm10 = vmor %vm1562_vm9, %vm1812_vm12  ;;  %12739 = vst [vmem:[#allocation17_spill] sm:$0xff] %v10393_v52  ;;  %v8145_v52 = vld [vmem:[%s8469_s19 + $0x8] sm:$0xff] }
 0x465   : > { %vm2162_vm15 = vmor %vm1862_vm10, %vm2112_vm11  ;;  %v10399_v42 = vpop.f32.mrf.mxu0 }
 0x466   : > { %v1763_v39 = vpop.permute.xlu1 %1762  ;;  %v7218_v5 = vsel %vm2162_vm15, 1.0, %v12607_v10  ;;  %12741 = vst [vmem:[#allocation53_spill] sm:$0xff] %v10399_v42 }
 0x467   : > { %vm1813_vm13 = vcmp.eq.s32.totalorder %v1763_v39, %v8929_v15 }
 0x468   : > { %vm1863_vm2 = vmor %vm1563_vm6, %vm1813_vm13 }
 0x46b   : > { %v2063_v63 = vpop.permute.xlu1 %2062 }
 0x46c   : > { %vm2113_vm4 = vcmp.eq.s32.totalorder %v2063_v63, %v8929_v15  ;;  %v10407_v15 = vpop.f32.mrf.mxu0  ;;  %v10409_v63 = vpop.f32.mrf.mxu1 }
 0x46d   : > { %vm2163_vm8 = vmor %vm1863_vm2, %vm2113_vm4  ;;  %12745 = vst [vmem:[#allocation54_spill] sm:$0xff] %v10407_v15 }
 0x46e   : > { %v7219_v39 = vsel %vm2163_vm8, 1.0, %v12607_v10  ;;  %12746 = vst [vmem:[#allocation37_spill] sm:$0xff] %v10409_v63  ;;  %v2289_v10 = vpack.c.bf16 %v8145_v52, %v8144_v22  ;;  %v10425_v42 = vpop.f32.mrf.mxu0  ;;  %v10427_v52 = vpop.f32.mrf.mxu1  ;;  %v7950_v22 = vld [vmem:[%s12354_s4 + $0x90] ss:$12 sps:$4 sm:$0xff]  }
 0x46f   : > { %v2288_v31 = vpack.c.bf16 %v7219_v39, %v7218_v5  ;;  %v7944_v5 = vld [vmem:[%s12354_s4 + $0xa8] ss:$12 sps:$4 sm:$0xff]   ;;  %12747 = vst [vmem:[#allocation38_spill] sm:$0xff] %v10425_v42  ;;  %12748 = vst [vmem:[#allocation55_spill] sm:$0xff] %v10427_v52  ;;  %v7953_v63 = vld [vmem:[%s12354_s4 + $0x210] ss:$12 sps:$4 sm:$0xff]  }
 0x470   : > { %v7952_v39 = vld [vmem:[%s12354_s4 + $0x94] ss:$12 sps:$4 sm:$0xff]   ;;  %v10437_v15 = vpop.f32.mrf.mxu0  ;;  %v10439_v42 = vpop.f32.mrf.mxu1  ;;  %v8147_v52 = vld [vmem:[%s8469_s19 + $0x18] sm:$0xff] }
 0x471   : > { %7256 = vmatmul.mubr.msk.bf16.gmra.mxu0 %vm12743_vm7, %v2288_v31  ;;  %7281 = vmatmul.mubr.msk.bf16.gmra.mxu1 %vm12744_vm1, %v2288_v31  ;;  %v7947_v31 = vld [vmem:[%s12354_s4 + $0x228] ss:$12 sps:$4 sm:$0xff]   ;;  %12749 = vst [vmem:[#allocation11_spill] sm:$0xff] %v10437_v15  ;;  %12750 = vst [vmem:[#allocation56_spill] sm:$0xff] %v10439_v42 }
 0x472   : > { %3160 = vmatprep.mubr.bf16.mxu0 %v12574_v11  ;;  %3443 = vmatprep.mubr.bf16.mxu1 %v12574_v11  ;;  %v10451_v42 = vpop.f32.mrf.mxu0  ;;  %v10453_v15 = vpop.f32.mrf.mxu1 }
 0x473   : > { %12751 = vst [vmem:[#allocation57_spill] sm:$0xff] %v10451_v42  ;;  %12752 = vst [vmem:[#allocation58_spill] sm:$0xff] %v10453_v15 }
 0x479   : > { %7286 = vmatmul.mubr.msk.bf16.vlgmr.msra.gmra.mxu0 %vm3052_vm14, %v2289_v10  ;;  %7311 = vmatmul.mubr.msk.bf16.vlgmr.msra.gmra.mxu1 %vm3052_vm14, %v2289_v10  ;;  %v7958_v10 = vld [vmem:[%s12354_s4 + $0x7c] ss:$12 sps:$4 sm:$0xff]  }
 0x47a   : > { %4452 = vmatpush1.bf16.msra.mxu0 %v7944_v5  ;;  %4735 = vmatpush1.bf16.msra.mxu1 %v7947_v31  ;;  %v7961_v5 = vld [vmem:[%s12354_s4 + $0x1fc] ss:$12 sps:$4 sm:$0xff]   ;;  %v8146_v31 = vld [vmem:[%s8469_s19 + $0x10] sm:$0xff] }
 0x47b   : > { %3170 = vmatprep.mubr.bf16.mxu0 %v12574_v11  ;;  %3453 = vmatprep.mubr.bf16.mxu1 %v12574_v11  ;;  %v2290_v18 = vpack.c.bf16 %v8147_v52, %v8146_v31  ;;  %v10473_v52 = vpop.f32.mrf.mxu1 }
 0x47c   : > { %4453 = vmatprep.subr.bf16.mxu0 %v7952_v39  ;;  %4736 = vmatprep.subr.bf16.mxu1 %v7955_v37  ;;  %v7964_v37 = vld [vmem:[%s12354_s4 + $0x64] ss:$12 sps:$4 sm:$0xff]   ;;  %v10471_v39 = vpop.f32.mrf.mxu0  ;;  %12754 = vst [vmem:[#allocation60_spill] sm:$0xff] %v10473_v52 }
 0x47d   : > { %12753 = vst [vmem:[#allocation59_spill] sm:$0xff] %v10471_v39  ;;  %v10491_v42 = vpop.f32.mrf.mxu1 }
 0x47e   : > { %4454 = vmatpush1.bf16.msra.mxu0 %v7950_v22  ;;  %4737 = vmatpush1.bf16.msra.mxu1 %v7953_v63  ;;  %v7967_v63 = vld [vmem:[%s12354_s4 + $0x1e4] ss:$12 sps:$4 sm:$0xff]   ;;  %v7962_v22 = vld [vmem:[%s12354_s4 + $0x60] ss:$12 sps:$4 sm:$0xff]   ;;  %v10489_v15 = vpop.f32.mrf.mxu0  ;;  %12756 = vst [vmem:[#allocation62_spill] sm:$0xff] %v10491_v42 }
 0x47f   : > { %4455 = vmatprep.subr.bf16.mxu0 %v7958_v10  ;;  %4738 = vmatprep.subr.bf16.mxu1 %v7961_v5  ;;  %v7965_v10 = vld [vmem:[%s12354_s4 + $0x1e0] ss:$12 sps:$4 sm:$0xff]   ;;  %12755 = vst [vmem:[#allocation61_spill] sm:$0xff] %v10489_v15  ;;  %v8151_v42 = vld [vmem:[%s8469_s19 + $0x30] sm:$0xff] }
 0x480   : > { %v7973_v5 = vld [vmem:[%s12354_s4 + $0x1cc] ss:$12 sps:$4 sm:$0xff]  }
 0x481   : > { %7287 = vmatmul.mubr.msk.bf16.gmra.mxu0 %vm3052_vm14, %v2290_v18  ;;  %7312 = vmatmul.mubr.msk.bf16.gmra.mxu1 %vm3052_vm14, %v2290_v18  ;;  %v7970_v18 = vld [vmem:[%s12354_s4 + $0x4c] ss:$12 sps:$4 sm:$0xff]  }
 0x482   : > { %3180 = vmatprep.mubr.bf16.mxu0 %v12574_v11  ;;  %3463 = vmatprep.mubr.bf16.mxu1 %v12574_v11 }
 0x483   : > { %4456 = vmatpush1.bf16.msra.mxu0 %v7956_v26  ;;  %4739 = vmatpush1.bf16.msra.mxu1 %v7959_v29  ;;  %v8148_v26 = vld [vmem:[%s8469_s19 + $0x20] sm:$0xff]  ;;  %v8149_v29 = vld [vmem:[%s8469_s19 + $0x28] sm:$0xff] }
 0x484   : > { %4457 = vmatprep.subr.bf16.mxu0 %v7964_v37  ;;  %4740 = vmatprep.subr.bf16.mxu1 %v7967_v63  ;;  %v2291_v31 = vpack.c.bf16 %v8149_v29, %v8148_v26  ;;  %v7968_v37 = vld [vmem:[%s12354_s4 + $0x48] ss:$12 sps:$4 sm:$0xff]  }
 0x485   : > { %v7971_v63 = vld [vmem:[%s12354_s4 + $0x1c8] ss:$12 sps:$4 sm:$0xff]  }
 0x486   : > { %v7976_v26 = vld [vmem:[%s12354_s4 + $0x34] ss:$12 sps:$4 sm:$0xff]  }
 0x487   : > { %4458 = vmatpush1.bf16.msra.mxu0 %v7962_v22  ;;  %4741 = vmatpush1.bf16.msra.mxu1 %v7965_v10  ;;  %v7979_v29 = vld [vmem:[%s12354_s4 + $0x1b4] ss:$12 sps:$4 sm:$0xff]   ;;  %v10505_v22 = vpop.f32.mrf.mxu0  ;;  %v10507_v10 = vpop.f32.mrf.mxu1 }
 0x488   : > { %4459 = vmatprep.subr.bf16.mxu0 %v7970_v18  ;;  %4742 = vmatprep.subr.bf16.mxu1 %v7973_v5  ;;  %12757 = vst [vmem:[#allocation63_spill] sm:$0xff] %v10505_v22  ;;  %12758 = vst [vmem:[#allocation64_spill] sm:$0xff] %v10507_v10  ;;  %v7974_v18 = vld [vmem:[%s12354_s4 + $0x30] ss:$12 sps:$4 sm:$0xff]  }
 0x489   : > { %7288 = vmatmul.mubr.msk.bf16.gmra.mxu0 %vm3052_vm14, %v2291_v31  ;;  %7313 = vmatmul.mubr.msk.bf16.gmra.mxu1 %vm3052_vm14, %v2291_v31  ;;  %v7977_v5 = vld [vmem:[%s12354_s4 + $0x1b0] ss:$12 sps:$4 sm:$0xff]  }
 0x48a   : > { %3190 = vmatprep.mubr.bf16.mxu0 %v12574_v11  ;;  %3473 = vmatprep.mubr.bf16.mxu1 %v12574_v11  ;;  %v7982_v31 = vld [vmem:[%s12354_s4 + $0x1c] ss:$12 sps:$4 sm:$0xff]  }
 0x48b   : > { %4460 = vmatpush1.bf16.msra.mxu0 %v7968_v37  ;;  %4743 = vmatpush1.bf16.msra.mxu1 %v7971_v63  ;;  %v7985_v10 = vld [vmem:[%s12354_s4 + $0x19c] ss:$12 sps:$4 sm:$0xff]   ;;  %v10525_v37 = vpop.f32.mrf.mxu0  ;;  %v10527_v63 = vpop.f32.mrf.mxu1 }
 0x48c   : > { %4461 = vmatprep.subr.bf16.mxu0 %v7976_v26  ;;  %4744 = vmatprep.subr.bf16.mxu1 %v7979_v29  ;;  %12759 = vst [vmem:[#allocation65_spill] sm:$0xff] %v10525_v37  ;;  %12760 = vst [vmem:[#allocation66_spill] sm:$0xff] %v10527_v63  ;;  %v8150_v22 = vld [vmem:[%s8469_s19 + $0x38] sm:$0xff]  ;;  %v7988_v37 = vld [vmem:[%s12354_s4 + $0x4] ss:$12 sps:$4 sm:$0xff]  }
 0x48d   : > { %v2292_v15 = vpack.c.bf16 %v8150_v22, %v8151_v42  ;;  %v7980_v26 = vld [vmem:[%s12354_s4 + $0x18] ss:$12 sps:$4 sm:$0xff]   ;;  %v10543_v22 = vpop.f32.mrf.mxu0  ;;  %v8152_v63 = vld [vmem:[%s8469_s19 + $0x48] sm:$0xff] }
 0x48e   : > { %v7983_v29 = vld [vmem:[%s12354_s4 + $0x198] ss:$12 sps:$4 sm:$0xff]   ;;  %12761 = vst [vmem:[#allocation67_spill] sm:$0xff] %v10543_v22 }
 0x48f   : > { %4462 = vmatpush1.bf16.msra.mxu0 %v7974_v18  ;;  %4745 = vmatpush1.bf16.msra.mxu1 %v7977_v5  ;;  %v7991_v42 = vld [vmem:[%s12354_s4 + $0x184] ss:$12 sps:$4 sm:$0xff]   ;;  %v10545_v18 = vpop.f32.mrf.mxu1  ;;  %v7989_v5 = vld [vmem:[%s12354_s4 + $0x180] ss:$12 sps:$4 sm:$0xff]  }
 0x490   : > { %4463 = vmatprep.subr.bf16.mxu0 %v7982_v31  ;;  %4746 = vmatprep.subr.bf16.mxu1 %v7985_v10  ;;  %12762 = vst [vmem:[#allocation68_spill] sm:$0xff] %v10545_v18  ;;  %v7986_v10 = vld [vmem:[%s12354_s4] ss:$12 sps:$4 sm:$0xff]  }
 0x491   : > { %7289 = vmatmul.mubr.msk.bf16.gmra.mxu0 %vm3052_vm14, %v2292_v15  ;;  %7314 = vmatmul.mubr.msk.bf16.gmra.mxu1 %vm3052_vm14, %v2292_v15  ;;  %v7994_v15 = vld [vmem:[%s12354_s4 + $0x16c] ss:$12 sps:$4 sm:$0xff]   ;;  %v8153_v18 = vld [vmem:[%s8469_s19 + $0x40] sm:$0xff] }
 0x492   : > { %3200 = vmatprep.mubr.bf16.mxu0 %v12574_v11  ;;  %3483 = vmatprep.mubr.bf16.mxu1 %v12574_v11  ;;  %v7997_v31 = vld [vmem:[%s12354_s4 + $0x2ec] ss:$12 sps:$4 sm:$0xff]   ;;  %v2293_v22 = vpack.c.bf16 %v8152_v63, %v8153_v18  ;;  %v8000_v63 = vld [vmem:[%s12354_s4 + $0x154] ss:$12 sps:$4 sm:$0xff]  }
 0x493   : > { %4464 = vmatpush1.bf16.msra.mxu0 %v7980_v26  ;;  %4747 = vmatpush1.bf16.msra.mxu1 %v7983_v29  ;;  %v10563_v26 = vpop.f32.mrf.mxu0  ;;  %v10565_v29 = vpop.f32.mrf.mxu1  ;;  %v8003_v18 = vld [vmem:[%s12354_s4 + $0x2d4] ss:$12 sps:$4 sm:$0xff]  }
 0x494   : > { %4465 = vmatprep.subr.bf16.mxu0 %v7988_v37  ;;  %4748 = vmatprep.subr.bf16.mxu1 %v7991_v42  ;;  %12763 = vst [vmem:[#allocation69_spill] sm:$0xff] %v10563_v26  ;;  %12764 = vst [vmem:[#allocation70_spill] sm:$0xff] %v10565_v29  ;;  %v7992_v37 = vld [vmem:[%s12354_s4 + $0x168] ss:$12 sps:$4 sm:$0xff]  }
 0x495   : > { %v10569_v52 = vpop.f32.mrf.mxu0  ;;  %v10571_v39 = vpop.f32.mrf.mxu1  ;;  %v7995_v42 = vld [vmem:[%s12354_s4 + $0x2e8] ss:$12 sps:$4 sm:$0xff]  }
 0x496   : > { %12765 = vst [vmem:[#allocation71_spill] sm:$0xff] %v10569_v52  ;;  %12766 = vst [vmem:[#allocation72_spill] sm:$0xff] %v10571_v39  ;;  %v8009_v39 = vld [vmem:[%s12354_s4 + $0x2bc] ss:$12 sps:$4 sm:$0xff]  }
 0x497   : > { %4466 = vmatpush1.bf16.msra.mxu0 %v7986_v10  ;;  %4749 = vmatpush1.bf16.msra.mxu1 %v7989_v5  ;;  %v10589_v10 = vpop.f32.mrf.mxu0  ;;  %v10591_v5 = vpop.f32.mrf.mxu1 }
 0x498   : > { %4467 = vmatprep.subr.bf16.mxu0 %v7994_v15  ;;  %4750 = vmatprep.subr.bf16.mxu1 %v7997_v31  ;;  %12767 = vst [vmem:[#allocation73_spill] sm:$0xff] %v10589_v10  ;;  %12768 = vst [vmem:[#allocation74_spill] sm:$0xff] %v10591_v5  ;;  %v7998_v15 = vld [vmem:[%s12354_s4 + $0x150] ss:$12 sps:$4 sm:$0xff]  }
 0x499   : > { %7290 = vmatmul.mubr.msk.bf16.gmra.mxu0 %vm3052_vm14, %v2293_v22  ;;  %7315 = vmatmul.mubr.msk.bf16.gmra.mxu1 %vm3052_vm14, %v2293_v22  ;;  %v8001_v31 = vld [vmem:[%s12354_s4 + $0x2d0] ss:$12 sps:$4 sm:$0xff]   ;;  %v10607_v5 = vpop.f32.mrf.mxu0  ;;  %v10609_v10 = vpop.f32.mrf.mxu1 }
 0x49a   : > { %3210 = vmatprep.mubr.bf16.mxu0 %v12574_v11  ;;  %3493 = vmatprep.mubr.bf16.mxu1 %v12574_v11  ;;  %v8006_v22 = vld [vmem:[%s12354_s4 + $0x13c] ss:$12 sps:$4 sm:$0xff]   ;;  %12769 = vst [vmem:[#allocation75_spill] sm:$0xff] %v10607_v5  ;;  %12770 = vst [vmem:[#allocation76_spill] sm:$0xff] %v10609_v10  ;;  %v8157_v10 = vld [vmem:[%s8469_s19 + $0x60] sm:$0xff] }
 0x49b   : > { %4468 = vmatpush2.bf16.msra.mxu0 %v7992_v37  ;;  %4751 = vmatpush2.bf16.msra.mxu1 %v7995_v42  ;;  %v8154_v37 = vld [vmem:[%s8469_s19 + $0x58] sm:$0xff]  ;;  %v8155_v42 = vld [vmem:[%s8469_s19 + $0x50] sm:$0xff] }
 0x49c   : > { %4469 = vmatprep.subr.bf16.mxu0 %v8000_v63  ;;  %4752 = vmatprep.subr.bf16.mxu1 %v8003_v18  ;;  %v2294_v52 = vpack.c.bf16 %v8154_v37, %v8155_v42  ;;  %v8004_v63 = vld [vmem:[%s12354_s4 + $0x138] ss:$12 sps:$4 sm:$0xff]  }
 0x49d   : > { %v8007_v18 = vld [vmem:[%s12354_s4 + $0x2b8] ss:$12 sps:$4 sm:$0xff]  }
 0x49e   : > { %v8012_v37 = vld [vmem:[%s12354_s4 + $0x124] ss:$12 sps:$4 sm:$0xff]  }
 0x49f   : > { %4470 = vmatpush2.bf16.msra.mxu0 %v7998_v15  ;;  %4753 = vmatpush2.bf16.msra.mxu1 %v8001_v31  ;;  %v8015_v42 = vld [vmem:[%s12354_s4 + $0x2a4] ss:$12 sps:$4 sm:$0xff]   ;;  %v10627_v15 = vpop.f32.mrf.mxu0  ;;  %v8010_v31 = vld [vmem:[%s12354_s4 + $0x120] ss:$12 sps:$4 sm:$0xff]  }
 0x4a0   : > { %4471 = vmatprep.subr.bf16.mxu0 %v8006_v22  ;;  %4754 = vmatprep.subr.bf16.mxu1 %v8009_v39  ;;  %12771 = vst [vmem:[#allocation77_spill] sm:$0xff] %v10627_v15  ;;  %v10629_v39 = vpop.f32.mrf.mxu1  ;;  %v8013_v22 = vld [vmem:[%s12354_s4 + $0x2a0] ss:$12 sps:$4 sm:$0xff]  }
 0x4a1   : > { %7291 = vmatmul.mubr.msk.bf16.gmra.mxu0 %vm3052_vm14, %v2294_v52  ;;  %7316 = vmatmul.mubr.msk.bf16.gmra.mxu1 %vm3052_vm14, %v2294_v52  ;;  %12772 = vst [vmem:[#allocation78_spill] sm:$0xff] %v10629_v39  ;;  %v8018_v52 = vld [vmem:[%s12354_s4 + $0x10c] ss:$12 sps:$4 sm:$0xff]  }
 0x4a2   : > { %3220 = vmatprep.mubr.bf16.mxu0 %v12574_v11  ;;  %3503 = vmatprep.mubr.bf16.mxu1 %v12574_v11  ;;  %v8021_v39 = vld [vmem:[%s12354_s4 + $0x28c] ss:$12 sps:$4 sm:$0xff]  }
 0x4a3   : > { %4472 = vmatpush2.bf16.msra.mxu0 %v8004_v63  ;;  %4755 = vmatpush2.bf16.msra.mxu1 %v8007_v18  ;;  %v10643_v63 = vpop.f32.mrf.mxu0  ;;  %v10645_v18 = vpop.f32.mrf.mxu1  ;;  %v8156_v15 = vld [vmem:[%s8469_s19 + $0x68] sm:$0xff] }
 0x4a4   : > { %4473 = vmatprep.subr.bf16.mxu0 %v8012_v37  ;;  %4756 = vmatprep.subr.bf16.mxu1 %v8015_v42  ;;  %12773 = vst [vmem:[#allocation79_spill] sm:$0xff] %v10643_v63  ;;  %12774 = vst [vmem:[#allocation80_spill] sm:$0xff] %v10645_v18  ;;  %v2295_v5 = vpack.c.bf16 %v8156_v15, %v8157_v10  ;;  %v8016_v37 = vld [vmem:[%s12354_s4 + $0x108] ss:$12 sps:$4 sm:$0xff]   ;;  %v8158_v18 = vld [vmem:[%s8469_s19 + $0x78] sm:$0xff] }
 0x4a5   : > { %v8019_v42 = vld [vmem:[%s12354_s4 + $0x288] ss:$12 sps:$4 sm:$0xff]   ;;  %v10661_v15 = vpop.f32.mrf.mxu0 }
 0x4a6   : > { %v8024_v63 = vld [vmem:[%s12354_s4 + $0xf4] ss:$12 sps:$4 sm:$0xff]   ;;  %12775 = vst [vmem:[#allocation81_spill] sm:$0xff] %v10661_v15 }
 0x4a7   : > { %4474 = vmatpush2.bf16.msra.mxu0 %v8010_v31  ;;  %4757 = vmatpush2.bf16.msra.mxu1 %v8013_v22  ;;  %v8027_v10 = vld [vmem:[%s12354_s4 + $0x274] ss:$12 sps:$4 sm:$0xff]   ;;  %v10663_v31 = vpop.f32.mrf.mxu1  ;;  %v8025_v22 = vld [vmem:[%s12354_s4 + $0x270] ss:$12 sps:$4 sm:$0xff]  }
 0x4a8   : > { %4475 = vmatprep.subr.bf16.mxu0 %v8018_v52  ;;  %4758 = vmatprep.subr.bf16.mxu1 %v8021_v39  ;;  %12776 = vst [vmem:[#allocation82_spill] sm:$0xff] %v10663_v31  ;;  %v8022_v39 = vld [vmem:[%s12354_s4 + $0xf0] ss:$12 sps:$4 sm:$0xff]  }
 0x4a9   : > { %7292 = vmatmul.mubr.msk.bf16.gmra.mxu0 %vm3052_vm14, %v2295_v5  ;;  %7317 = vmatmul.mubr.msk.bf16.gmra.mxu1 %vm3052_vm14, %v2295_v5  ;;  %v8030_v5 = vld [vmem:[%s12354_s4 + $0xdc] ss:$12 sps:$4 sm:$0xff]   ;;  %v8159_v31 = vld [vmem:[%s8469_s19 + $0x70] sm:$0xff] }
 0x4aa   : > { %3230 = vmatprep.mubr.bf16.mxu0 %v12574_v11  ;;  %3513 = vmatprep.mubr.bf16.mxu1 %v12574_v11  ;;  %v8033_v52 = vld [vmem:[%s12354_s4 + $0x25c] ss:$12 sps:$4 sm:$0xff]   ;;  %v2296_v15 = vpack.c.bf16 %v8158_v18, %v8159_v31 }
 0x4ab   : > { %4476 = vmatpush2.bf16.msra.mxu0 %v8016_v37  ;;  %4759 = vmatpush2.bf16.msra.mxu1 %v8019_v42  ;;  %v10681_v37 = vpop.f32.mrf.mxu0  ;;  %v10683_v42 = vpop.f32.mrf.mxu1 }
 0x4ac   : > { %4477 = vmatprep.subr.bf16.mxu0 %v8024_v63  ;;  %4760 = vmatprep.subr.bf16.mxu1 %v8027_v10  ;;  %12777 = vst [vmem:[#allocation83_spill] sm:$0xff] %v10681_v37  ;;  %12778 = vst [vmem:[#allocation84_spill] sm:$0xff] %v10683_v42  ;;  %v8028_v63 = vld [vmem:[%s12354_s4 + $0xd8] ss:$12 sps:$4 sm:$0xff]  }
 0x4ad   : > { %v8031_v10 = vld [vmem:[%s12354_s4 + $0x258] ss:$12 sps:$4 sm:$0xff]   ;;  %v10693_v37 = vpop.f32.mrf.mxu0  ;;  %v10695_v42 = vpop.f32.mrf.mxu1 }
 0x4ae   : > { %12779 = vst [vmem:[#allocation85_spill] sm:$0xff] %v10693_v37  ;;  %12780 = vst [vmem:[#allocation86_spill] sm:$0xff] %v10695_v42 }
 0x4af   : > { %4478 = vmatpush2.bf16.msra.mxu0 %v8022_v39  ;;  %4761 = vmatpush2.bf16.msra.mxu1 %v8025_v22  ;;  %v10701_v18 = vpop.f32.mrf.mxu0  ;;  %v10703_v31 = vpop.f32.mrf.mxu1  ;;  %v8160_v39 = vld [vmem:[%s8469_s19 + $0x88] sm:$0xff]  ;;  %v8161_v22 = vld [vmem:[%s8469_s19 + $0x80] sm:$0xff] }
 0x4b0   : > { %4479 = vmatprep.subr.bf16.mxu0 %v8030_v5  ;;  %4762 = vmatprep.subr.bf16.mxu1 %v8033_v52  ;;  %12781 = vst [vmem:[#allocation87_spill] sm:$0xff] %v10701_v18  ;;  %12782 = vst [vmem:[#allocation88_spill] sm:$0xff] %v10703_v31  ;;  %v2297_v5 = vpack.c.bf16 %v8160_v39, %v8161_v22  ;;  %v8034_v18 = vld [vmem:[%s12354_s4 + $0xc0] ss:$12 sps:$4 sm:$0xff]   ;;  %v8163_v31 = vld [vmem:[%s8469_s19 + $0x90] sm:$0xff] }
 0x4b1   : > { %7293 = vmatmul.mubr.msk.bf16.gmra.mxu0 %vm3052_vm14, %v2296_v15  ;;  %7318 = vmatmul.mubr.msk.bf16.gmra.mxu1 %vm3052_vm14, %v2296_v15  ;;  %v10707_v52 = vpop.f32.mrf.mxu0  ;;  %v10709_v42 = vpop.f32.mrf.mxu1  ;;  %v8036_v15 = vld [vmem:[%s12354_s4 + $0xc4] ss:$12 sps:$4 sm:$0xff]  }
 0x4b2   : > { %3240 = vmatprep.mubr.bf16.mxu0 %v12574_v11  ;;  %3523 = vmatprep.mubr.bf16.mxu1 %v12574_v11  ;;  %12783 = vst [vmem:[#allocation89_spill] sm:$0xff] %v10707_v52  ;;  %12784 = vst [vmem:[#allocation90_spill] sm:$0xff] %v10709_v42 }
 0x4b3   : > { %4480 = vmatpush2.bf16.msra.mxu0 %v8028_v63  ;;  %4763 = vmatpush2.bf16.msra.mxu1 %v8031_v10  ;;  %v8037_v63 = vld [vmem:[%s12354_s4 + $0x240] ss:$12 sps:$4 sm:$0xff]   ;;  %v8039_v10 = vld [vmem:[%s12354_s4 + $0x244] ss:$12 sps:$4 sm:$0xff]   ;;  %v10727_v39 = vpop.f32.mrf.mxu0  ;;  %v10729_v22 = vpop.f32.mrf.mxu1 }
 0x4b4   : > { %12785 = vst [vmem:[#allocation91_spill] sm:$0xff] %v10727_v39  ;;  %12786 = vst [vmem:[#allocation92_spill] sm:$0xff] %v10729_v22  ;;  %4481 = vmatprep.subr.bf16.mxu0 %v8036_v15  ;;  %4764 = vmatprep.subr.bf16.mxu1 %v8039_v10  ;;  %v8164_v15 = vld [vmem:[%s8469_s19 + $0xa8] sm:$0xff] }
 0x4b5   : > { %v10735_v52 = vpop.f32.mrf.mxu0  ;;  %v10737_v37 = vpop.f32.mrf.mxu1 }
 0x4b6   : > { %12787 = vst [vmem:[#allocation93_spill] sm:$0xff] %v10735_v52  ;;  %12788 = vst [vmem:[#allocation94_spill] sm:$0xff] %v10737_v37 }
 0x4b7   : > { %4482 = vmatpush2.bf16.msra.mxu0 %v8034_v18  ;;  %4765 = vmatpush2.bf16.msra.mxu1 %v8037_v63  ;;  %v10739_v39 = vpop.f32.mrf.mxu0  ;;  %v10741_v22 = vpop.f32.mrf.mxu1  ;;  %v8165_v63 = vld [vmem:[%s8469_s19 + $0xa0] sm:$0xff] }
 0x4b8   : > { %5017 = vmatprep.subr.bf16.mxu0 %v12574_v11  ;;  %5250 = vmatprep.subr.bf16.mxu1 %v12574_v11  ;;  %12789 = vst [vmem:[#allocation95_spill] sm:$0xff] %v10739_v39  ;;  %12790 = vst [vmem:[#allocation96_spill] sm:$0xff] %v10741_v22  ;;  %v2299_v10 = vpack.c.bf16 %v8164_v15, %v8165_v63  ;;  %v8167_v15 = vld [vmem:[%s8469_s19 + $0xb0] sm:$0xff] }
 0x4b9   : > { %7294 = vmatmul.mubr.msk.bf16.gmra.mxu0 %vm3052_vm14, %v2297_v5  ;;  %7319 = vmatmul.mubr.msk.bf16.gmra.mxu1 %vm3052_vm14, %v2297_v5  ;;  %v8162_v5 = vld [vmem:[%s8469_s19 + $0x98] sm:$0xff]  ;;  %v10747_v18 = vpop.f32.mrf.mxu0 }
 0x4ba   : > { %3250 = vmatprep.mubr.bf16.mxu0 %v12574_v11  ;;  %3533 = vmatprep.mubr.bf16.mxu1 %v12574_v11  ;;  %v2298_v42 = vpack.c.bf16 %v8162_v5, %v8163_v31  ;;  %12791 = vst [vmem:[#allocation97_spill] sm:$0xff] %v10747_v18  ;;  %v10749_v31 = vpop.f32.mrf.mxu1 }
 0x4bb   : > { %12792 = vst [vmem:[#allocation98_spill] sm:$0xff] %v10749_v31  ;;  %v10753_v5 = vpop.f32.mrf.mxu0  ;;  %v8166_v31 = vld [vmem:[%s8469_s19 + $0xb8] sm:$0xff] }
 0x4bc   : > { %12793 = vst [vmem:[#allocation99_spill] sm:$0xff] %v10753_v5  ;;  %v10755_v22 = vpop.f32.mrf.mxu1  ;;  %v2300_v63 = vpack.c.bf16 %v8166_v31, %v8167_v15  ;;  %v8169_v31 = vld [vmem:[%s8469_s19 + $0xc0] sm:$0xff] }
 0x4bd   : > { %12794 = vst [vmem:[#allocation100_spill] sm:$0xff] %v10755_v22 }
 0x4be   : > { %v10763_v39 = vpop.f32.mrf.mxu1 }
 0x4bf   : > { %12796 = vst [vmem:[#allocation102_spill] sm:$0xff] %v10763_v39 }
 0x4c0   : > { %v10769_v22 = vpop.f32.mrf.mxu1 }
 0x4c1   : > { %7295 = vmatmul.mubr.msk.bf16.gmra.mxu0 %vm3052_vm14, %v2298_v42  ;;  %7320 = vmatmul.mubr.msk.bf16.gmra.mxu1 %vm3052_vm14, %v2298_v42  ;;  %v10761_v42 = vpop.f32.mrf.mxu0  ;;  %12798 = vst [vmem:[#allocation104_spill] sm:$0xff] %v10769_v22 }
 0x4c2   : > { %3260 = vmatprep.mubr.bf16.mxu0 %v12574_v11  ;;  %3543 = vmatprep.mubr.bf16.mxu1 %v12574_v11  ;;  %12795 = vst [vmem:[#allocation101_spill] sm:$0xff] %v10761_v42  ;;  %v10777_v39 = vpop.f32.mrf.mxu1  ;;  %v8168_v42 = vld [vmem:[%s8469_s19 + $0xc8] sm:$0xff] }
 0x4c3   : > { %v10767_v18 = vpop.f32.mrf.mxu0  ;;  %12800 = vst [vmem:[#allocation106_spill] sm:$0xff] %v10777_v39  ;;  %v2301_v15 = vpack.c.bf16 %v8168_v42, %v8169_v31  ;;  %v8170_v31 = vld [vmem:[%s8469_s19 + $0xd8] sm:$0xff] }
 0x4c4   : > { %12797 = vst [vmem:[#allocation103_spill] sm:$0xff] %v10767_v18  ;;  %v10783_v22 = vpop.f32.mrf.mxu1 }
 0x4c5   : > { %12802 = vst [vmem:[#allocation108_spill] sm:$0xff] %v10783_v22  ;;  %v8171_v22 = vld [vmem:[%s8469_s19 + $0xd0] sm:$0xff] }
 0x4c6   : > { %v10791_v39 = vpop.f32.mrf.mxu1 }
 0x4c7   : > { %12804 = vst [vmem:[#allocation110_spill] sm:$0xff] %v10791_v39  ;;  %v8172_v39 = vld [vmem:[%s8469_s19 + $0xe8] sm:$0xff] }
 0x4c8   : > { %v10795_v42 = vpop.f32.mrf.mxu1 }
 0x4c9   : > { %7296 = vmatmul.mubr.msk.bf16.gmra.mxu0 %vm3052_vm14, %v2299_v10  ;;  %7321 = vmatmul.mubr.msk.bf16.gmra.mxu1 %vm3052_vm14, %v2299_v10  ;;  %v10775_v10 = vpop.f32.mrf.mxu0  ;;  %12806 = vst [vmem:[#allocation112_spill] sm:$0xff] %v10795_v42 }
 0x4ca   : > { %3270 = vmatprep.mubr.bf16.mxu0 %v12574_v11  ;;  %3553 = vmatprep.mubr.bf16.mxu1 %v12574_v11  ;;  %12799 = vst [vmem:[#allocation105_spill] sm:$0xff] %v10775_v10 }
 0x4cb   : > { %v10781_v18 = vpop.f32.mrf.mxu0 }
 0x4cc   : > { %12801 = vst [vmem:[#allocation107_spill] sm:$0xff] %v10781_v18  ;;  %v2302_v18 = vpack.c.bf16 %v8170_v31, %v8171_v22  ;;  %v8173_v22 = vld [vmem:[%s8469_s19 + $0xe0] sm:$0xff] }
 0x4cd   : > { %v2303_v31 = vpack.c.bf16 %v8172_v39, %v8173_v22  ;;  %v8175_v39 = vld [vmem:[%s8469_s19 + $0xf8] sm:$0xff] }
 0x4d1   : > { %7297 = vmatmul.mubr.msk.bf16.gmra.mxu0 %vm3052_vm14, %v2300_v63  ;;  %7322 = vmatmul.mubr.msk.bf16.gmra.mxu1 %vm3052_vm14, %v2300_v63  ;;  %v10789_v63 = vpop.f32.mrf.mxu0 }
 0x4d2   : > { %3280 = vmatprep.mubr.bf16.mxu0 %v12574_v11  ;;  %3563 = vmatprep.mubr.bf16.mxu1 %v12574_v11  ;;  %12803 = vst [vmem:[#allocation109_spill] sm:$0xff] %v10789_v63 }
 0x4d3   : > { %v10793_v10 = vpop.f32.mrf.mxu0 }
 0x4d4   : > { %12805 = vst [vmem:[#allocation111_spill] sm:$0xff] %v10793_v10 }
 0x4d5   : > { %v10799_v5 = vpop.f32.mrf.mxu0 }
 0x4d6   : > { %12807 = vst [vmem:[#allocation113_spill] sm:$0xff] %v10799_v5 }
 0x4d7   : > { %v10807_v10 = vpop.f32.mrf.mxu0 }
 0x4d8   : > { %12809 = vst [vmem:[#allocation115_spill] sm:$0xff] %v10807_v10  ;;  %v8174_v10 = vld [vmem:[%s8469_s19 + $0xf0] sm:$0xff] }
 0x4d9   : > { %7298 = vmatmul.mubr.msk.bf16.gmra.mxu0 %vm3052_vm14, %v2301_v15  ;;  %7323 = vmatmul.mubr.msk.bf16.gmra.mxu1 %vm3052_vm14, %v2301_v15  ;;  %v10801_v15 = vpop.f32.mrf.mxu1  ;;  %v10813_v5 = vpop.f32.mrf.mxu0  ;;  %v2304_v22 = vpack.c.bf16 %v8175_v39, %v8174_v10  ;;  %v8177_v10 = vld [vmem:[%s8469_s19 + $0x108] sm:$0xff] }
 0x4da   : > { %3290 = vmatprep.mubr.bf16.mxu0 %v12574_v11  ;;  %3573 = vmatprep.mubr.bf16.mxu1 %v12574_v11  ;;  %12808 = vst [vmem:[#allocation114_spill] sm:$0xff] %v10801_v15  ;;  %12811 = vst [vmem:[#allocation117_spill] sm:$0xff] %v10813_v5 }
 0x4db   : > { %v10809_v42 = vpop.f32.mrf.mxu1 }
 0x4dc   : > { %12810 = vst [vmem:[#allocation116_spill] sm:$0xff] %v10809_v42 }
 0x4dd   : > { %v10815_v15 = vpop.f32.mrf.mxu1 }
 0x4de   : > { %12812 = vst [vmem:[#allocation118_spill] sm:$0xff] %v10815_v15 }
 0x4df   : > { %v10823_v42 = vpop.f32.mrf.mxu1 }
 0x4e0   : > { %12814 = vst [vmem:[#allocation120_spill] sm:$0xff] %v10823_v42 }
 0x4e1   : > { %7299 = vmatmul.mubr.msk.bf16.gmra.mxu0 %vm3052_vm14, %v2302_v18  ;;  %7324 = vmatmul.mubr.msk.bf16.gmra.mxu1 %vm3052_vm14, %v2302_v18  ;;  %v10821_v18 = vpop.f32.mrf.mxu0  ;;  %v10829_v15 = vpop.f32.mrf.mxu1 }
 0x4e2   : > { %3300 = vmatprep.mubr.bf16.mxu0 %v12574_v11  ;;  %3583 = vmatprep.mubr.bf16.mxu1 %v12574_v11  ;;  %12813 = vst [vmem:[#allocation119_spill] sm:$0xff] %v10821_v18  ;;  %12816 = vst [vmem:[#allocation122_spill] sm:$0xff] %v10829_v15  ;;  %v8176_v18 = vld [vmem:[%s8469_s19 + $0x100] sm:$0xff] }
 0x4e3   : > { %v10827_v5 = vpop.f32.mrf.mxu0  ;;  %v10837_v42 = vpop.f32.mrf.mxu1  ;;  %v2305_v39 = vpack.c.bf16 %v8177_v10, %v8176_v18  ;;  %v8178_v10 = vld [vmem:[%s8469_s19 + $0x110] sm:$0xff] }
 0x4e4   : > { %12815 = vst [vmem:[#allocation121_spill] sm:$0xff] %v10827_v5  ;;  %12818 = vst [vmem:[#allocation124_spill] sm:$0xff] %v10837_v42 }
 0x4e5   : > { %v10843_v15 = vpop.f32.mrf.mxu1 }
 0x4e6   : > { %12820 = vst [vmem:[#allocation126_spill] sm:$0xff] %v10843_v15  ;;  %v8179_v15 = vld [vmem:[%s8469_s19 + $0x118] sm:$0xff] }
 0x4e9   : > { %7300 = vmatmul.mubr.msk.bf16.gmra.mxu0 %vm3052_vm14, %v2303_v31  ;;  %7325 = vmatmul.mubr.msk.bf16.gmra.mxu1 %vm3052_vm14, %v2303_v31  ;;  %v10835_v31 = vpop.f32.mrf.mxu0 }
 0x4ea   : > { %3310 = vmatprep.mubr.bf16.mxu0 %v12574_v11  ;;  %3593 = vmatprep.mubr.bf16.mxu1 %v12574_v11  ;;  %12817 = vst [vmem:[#allocation123_spill] sm:$0xff] %v10835_v31 }
 0x4eb   : > { %v10841_v5 = vpop.f32.mrf.mxu0 }
 0x4ec   : > { %12819 = vst [vmem:[#allocation125_spill] sm:$0xff] %v10841_v5  ;;  %v2306_v5 = vpack.c.bf16 %v8179_v15, %v8178_v10  ;;  %v8181_v15 = vld [vmem:[%s8469_s19 + $0x128] sm:$0xff] }
 0x4ed   : > { %v10845_v63 = vpop.f32.mrf.mxu0 }
 0x4ee   : > { %12821 = vst [vmem:[#allocation127_spill] sm:$0xff] %v10845_v63 }
 0x4ef   : > { %v10853_v42 = vpop.f32.mrf.mxu0 }
 0x4f0   : > { %12823 = vst [vmem:[#allocation129_spill] sm:$0xff] %v10853_v42  ;;  %v8180_v42 = vld [vmem:[%s8469_s19 + $0x120] sm:$0xff] }
 0x4f1   : > { %7301 = vmatmul.mubr.msk.bf16.gmra.mxu0 %vm3052_vm14, %v2304_v22  ;;  %7326 = vmatmul.mubr.msk.bf16.gmra.mxu1 %vm3052_vm14, %v2304_v22  ;;  %v10847_v22 = vpop.f32.mrf.mxu1  ;;  %v10859_v63 = vpop.f32.mrf.mxu0  ;;  %v2307_v10 = vpack.c.bf16 %v8181_v15, %v8180_v42  ;;  %v8183_v42 = vld [vmem:[%s8469_s19 + $0x138] sm:$0xff] }
 0x4f2   : > { %3320 = vmatprep.mubr.bf16.mxu0 %v12574_v11  ;;  %3603 = vmatprep.mubr.bf16.mxu1 %v12574_v11  ;;  %12822 = vst [vmem:[#allocation128_spill] sm:$0xff] %v10847_v22  ;;  %12825 = vst [vmem:[#allocation131_spill] sm:$0xff] %v10859_v63 }
 0x4f3   : > { %v10855_v18 = vpop.f32.mrf.mxu1 }
 0x4f4   : > { %12824 = vst [vmem:[#allocation130_spill] sm:$0xff] %v10855_v18 }
 0x4f5   : > { %v10861_v22 = vpop.f32.mrf.mxu1 }
 0x4f6   : > { %12826 = vst [vmem:[#allocation132_spill] sm:$0xff] %v10861_v22 }
 0x4f7   : > { %v10869_v18 = vpop.f32.mrf.mxu1 }
 0x4f8   : > { %12828 = vst [vmem:[#allocation134_spill] sm:$0xff] %v10869_v18 }
 0x4f9   : > { %7302 = vmatmul.mubr.msk.bf16.gmra.mxu0 %vm3052_vm14, %v2305_v39  ;;  %7327 = vmatmul.mubr.msk.bf16.gmra.mxu1 %vm3052_vm14, %v2305_v39  ;;  %v10867_v39 = vpop.f32.mrf.mxu0  ;;  %v10875_v22 = vpop.f32.mrf.mxu1 }
 0x4fa   : > { %3330 = vmatprep.mubr.bf16.mxu0 %v12574_v11  ;;  %3613 = vmatprep.mubr.bf16.mxu1 %v12574_v11  ;;  %12827 = vst [vmem:[#allocation133_spill] sm:$0xff] %v10867_v39  ;;  %12830 = vst [vmem:[#allocation136_spill] sm:$0xff] %v10875_v22  ;;  %v8182_v39 = vld [vmem:[%s8469_s19 + $0x130] sm:$0xff] }
 0x4fb   : > { %v10873_v63 = vpop.f32.mrf.mxu0  ;;  %v10883_v18 = vpop.f32.mrf.mxu1  ;;  %v2308_v15 = vpack.c.bf16 %v8183_v42, %v8182_v39  ;;  %v8184_v42 = vld [vmem:[%s8469_s19 + $0x148] sm:$0xff] }
 0x4fc   : > { %12829 = vst [vmem:[#allocation135_spill] sm:$0xff] %v10873_v63  ;;  %12832 = vst [vmem:[#allocation138_spill] sm:$0xff] %v10883_v18 }
 0x4fd   : > { %v10889_v22 = vpop.f32.mrf.mxu1 }
 0x4fe   : > { %12834 = vst [vmem:[#allocation140_spill] sm:$0xff] %v10889_v22  ;;  %v8185_v22 = vld [vmem:[%s8469_s19 + $0x140] sm:$0xff] }
 0x4ff   : > { %v10897_v18 = vpop.f32.mrf.mxu1 }
 0x500   : > { %12836 = vst [vmem:[#allocation142_spill] sm:$0xff] %v10897_v18  ;;  %v8186_v18 = vld [vmem:[%s8469_s19 + $0x158] sm:$0xff] }
 0x501   : > { %7303 = vmatmul.mubr.msk.bf16.gmra.mxu0 %vm3052_vm14, %v2306_v5  ;;  %7328 = vmatmul.mubr.msk.bf16.gmra.mxu1 %vm3052_vm14, %v2306_v5  ;;  %v10881_v5 = vpop.f32.mrf.mxu0  ;;  %v10901_v39 = vpop.f32.mrf.mxu1 }
 0x502   : > { %3340 = vmatprep.mubr.bf16.mxu0 %v12574_v11  ;;  %3623 = vmatprep.mubr.bf16.mxu1 %v12574_v11  ;;  %12831 = vst [vmem:[#allocation137_spill] sm:$0xff] %v10881_v5  ;;  %12838 = vst [vmem:[#allocation144_spill] sm:$0xff] %v10901_v39 }
 0x503   : > { %v10887_v63 = vpop.f32.mrf.mxu0 }
 0x504   : > { %12833 = vst [vmem:[#allocation139_spill] sm:$0xff] %v10887_v63  ;;  %v2309_v63 = vpack.c.bf16 %v8184_v42, %v8185_v22  ;;  %v8187_v22 = vld [vmem:[%s8469_s19 + $0x150] sm:$0xff] }
 0x505   : > { %v2310_v42 = vpack.c.bf16 %v8186_v18, %v8187_v22  ;;  %v8189_v18 = vld [vmem:[%s8469_s19 + $0x160] sm:$0xff] }
 0x509   : > { %7304 = vmatmul.mubr.msk.bf16.gmra.mxu0 %vm3052_vm14, %v2307_v10  ;;  %7329 = vmatmul.mubr.msk.bf16.gmra.mxu1 %vm3052_vm14, %v2307_v10  ;;  %v10895_v10 = vpop.f32.mrf.mxu0 }
 0x50a   : > { %3350 = vmatprep.mubr.bf16.mxu0 %v12574_v11  ;;  %3633 = vmatprep.mubr.bf16.mxu1 %v12574_v11  ;;  %12835 = vst [vmem:[#allocation141_spill] sm:$0xff] %v10895_v10 }
 0x50b   : > { %v10899_v5 = vpop.f32.mrf.mxu0 }
 0x50c   : > { %12837 = vst [vmem:[#allocation143_spill] sm:$0xff] %v10899_v5 }
 0x50d   : > { %v10905_v31 = vpop.f32.mrf.mxu0 }
 0x50e   : > { %12839 = vst [vmem:[#allocation145_spill] sm:$0xff] %v10905_v31 }
 0x50f   : > { %v10913_v5 = vpop.f32.mrf.mxu0 }
 0x510   : > { %12841 = vst [vmem:[#allocation147_spill] sm:$0xff] %v10913_v5  ;;  %v8188_v5 = vld [vmem:[%s8469_s19 + $0x168] sm:$0xff] }
 0x511   : > { %7305 = vmatmul.mubr.msk.bf16.gmra.mxu0 %vm3052_vm14, %v2308_v15  ;;  %7330 = vmatmul.mubr.msk.bf16.gmra.mxu1 %vm3052_vm14, %v2308_v15  ;;  %v10907_v15 = vpop.f32.mrf.mxu1  ;;  %v10919_v31 = vpop.f32.mrf.mxu0  ;;  %v2311_v22 = vpack.c.bf16 %v8188_v5, %v8189_v18  ;;  %v8191_v5 = vld [vmem:[%s8469_s19 + $0x178] sm:$0xff] }
 0x512   : > { %3360 = vmatprep.mubr.bf16.mxu0 %v12574_v11  ;;  %3643 = vmatprep.mubr.bf16.mxu1 %v12574_v11  ;;  %12840 = vst [vmem:[#allocation146_spill] sm:$0xff] %v10907_v15  ;;  %12843 = vst [vmem:[#allocation149_spill] sm:$0xff] %v10919_v31 }
 0x513   : > { %v10915_v39 = vpop.f32.mrf.mxu1 }
 0x514   : > { %12842 = vst [vmem:[#allocation148_spill] sm:$0xff] %v10915_v39 }
 0x515   : > { %v10921_v15 = vpop.f32.mrf.mxu1 }
 0x516   : > { %12844 = vst [vmem:[#allocation150_spill] sm:$0xff] %v10921_v15 }
 0x517   : > { %v10929_v39 = vpop.f32.mrf.mxu1 }
 0x518   : > { %12846 = vst [vmem:[#allocation152_spill] sm:$0xff] %v10929_v39  ;;  %v8190_v39 = vld [vmem:[%s8469_s19 + $0x170] sm:$0xff] }
 0x519   : > { %7306 = vmatmul.mubr.msk.bf16.gmra.mxu0 %vm3052_vm14, %v2309_v63  ;;  %7331 = vmatmul.mubr.msk.bf16.gmra.mxu1 %vm3052_vm14, %v2309_v63  ;;  %v10927_v63 = vpop.f32.mrf.mxu0  ;;  %v10935_v15 = vpop.f32.mrf.mxu1  ;;  %v2312_v18 = vpack.c.bf16 %v8191_v5, %v8190_v39 }
 0x51a   : > { %3370 = vmatprep.mubr.bf16.mxu0 %v12574_v11  ;;  %3653 = vmatprep.mubr.bf16.mxu1 %v12574_v11  ;;  %12845 = vst [vmem:[#allocation151_spill] sm:$0xff] %v10927_v63  ;;  %12848 = vst [vmem:[#allocation154_spill] sm:$0xff] %v10935_v15 }
 0x51b   : > { %v10933_v31 = vpop.f32.mrf.mxu0  ;;  %v10943_v63 = vpop.f32.mrf.mxu1 }
 0x51c   : > { %12847 = vst [vmem:[#allocation153_spill] sm:$0xff] %v10933_v31  ;;  %12850 = vst [vmem:[#allocation156_spill] sm:$0xff] %v10943_v63 }
 0x51d   : > { %v10949_v15 = vpop.f32.mrf.mxu1 }
 0x51e   : > { %12852 = vst [vmem:[#allocation158_spill] sm:$0xff] %v10949_v15  ;;  %v8192_v15 = vld [vmem:[%s8469_s19 + $0x188] sm:$0xff] }
 0x521   : > { %7307 = vmatmul.mubr.msk.bf16.gmra.mxu0 %vm3052_vm14, %v2310_v42  ;;  %7332 = vmatmul.mubr.msk.bf16.gmra.mxu1 %vm3052_vm14, %v2310_v42  ;;  %v10941_v42 = vpop.f32.mrf.mxu0 }
 0x522   : > { %3380 = vmatprep.mubr.bf16.mxu0 %v12574_v11  ;;  %3663 = vmatprep.mubr.bf16.mxu1 %v12574_v11  ;;  %12849 = vst [vmem:[#allocation155_spill] sm:$0xff] %v10941_v42 }
 0x523   : > { %v10947_v31 = vpop.f32.mrf.mxu0 }
 0x524   : > { %12851 = vst [vmem:[#allocation157_spill] sm:$0xff] %v10947_v31 }
 0x529   : > { %7308 = vmatmul.mubr.msk.bf16.gmra.mxu0 %vm3052_vm14, %v2311_v22  ;;  %7333 = vmatmul.mubr.msk.bf16.gmra.mxu1 %vm3052_vm14, %v2311_v22 }
 0x52a   : > { %3390 = vmatprep.mubr.bf16.mxu0 %v12574_v11  ;;  %3673 = vmatprep.mubr.bf16.mxu1 %v12574_v11 }
 0x531   : > { %v10951_v10 = vpop.f32.mrf.mxu0  ;;  %v10953_v22 = vpop.f32.mrf.mxu1  ;;  %7309 = vmatmul.mubr.msk.bf16.gmra.mxu0 %vm3052_vm14, %v2312_v18  ;;  %7334 = vmatmul.mubr.msk.bf16.gmra.mxu1 %vm3052_vm14, %v2312_v18 }
 0x532   : > { %12853 = vst [vmem:[#allocation159_spill] sm:$0xff] %v10951_v10  ;;  %12854 = vst [vmem:[#allocation160_spill] sm:$0xff] %v10953_v22  ;;  %3400 = vmatprep.mubr.bf16.mxu0 %v12574_v11  ;;  %3683 = vmatprep.mubr.bf16.mxu1 %v12574_v11  ;;  %v8193_v10 = vld [vmem:[%s8469_s19 + $0x180] sm:$0xff]  ;;  %s12057_s19 = scalar_lea.vmem [#allocation7], %s7587_s23 }
 0x533   : > { %v10959_v63 = vpop.f32.mrf.mxu0  ;;  %v10961_v42 = vpop.f32.mrf.mxu1  ;;  %v2313_v31 = vpack.c.bf16 %v8192_v15, %v8193_v10  ;;  %s7077_s8 = sshll.u32 %s12057_s19, 4  ;;  %s12305_s8 = int_to_ptr.vmem [resolvable:$true] %s7077_s8 }
 0x534   : > { %12855 = vst [vmem:[#allocation161_spill] sm:$0xff] %v10959_v63  ;;  %12856 = vst [vmem:[#allocation162_spill] sm:$0xff] %v10961_v42  ;;  %s8247_s15 = scalar_lea.vmem %s12305_s8, 6400  ;;  %p8254_p11 = scmp.lt.s32.totalorder %s12305_s8, %s8252_s16 }
 0x535   : > { %v10963_v39 = vpop.f32.mrf.mxu0  ;;  %v10965_v5 = vpop.f32.mrf.mxu1  ;;  %p8248_p12 = scmp.ne.s32.totalorder %s12305_s8, %s8247_s15  ;;  %p8255_p0 = scmp.lt.s32.totalorder %s8253_s18, %s8247_s15 }
 0x536   : > { %12857 = vst [vmem:[#allocation163_spill] sm:$0xff] %v10963_v39  ;;  %12858 = vst [vmem:[#allocation164_spill] sm:$0xff] %v10965_v5 }
 0x537   : > { %v10969_v22 = vpop.f32.mrf.mxu0  ;;  %v10971_v37 = vpop.f32.mrf.mxu1  ;;  %p8249_p7 = pnand %p8248_p12, %p8412_p5  ;;  %p8256_p1 = por %p8255_p0, %p8254_p11 }
 0x538   : > { %12859 = vst [vmem:[#allocation165_spill] sm:$0xff] %v10969_v22  ;;  %12860 = vst [vmem:[#allocation166_spill] sm:$0xff] %v10971_v37 }
 0x539   : > { %v3162_v18 = vpop.f32.mrf.mxu0  ;;  %7310 = vmatmul.mubr.msk.bf16.gmra.mxu0 %vm3052_vm14, %v2313_v31  ;;  %v3445_v52 = vpop.f32.mrf.mxu1  ;;  %7335 = vmatmul.mubr.msk.bf16.gmra.mxu1 %vm3052_vm14, %v2313_v31  ;;  %p8250_p8 = pneg %p8249_p7 }
 0x53a   : > { %v3163_v31 = vadd.f32 %v3162_v18, %v10112_v14  ;;  %v3446_v16 = vadd.f32 %v3445_v52, %v10116_v51  ;;  %v8043_v52 = vld [vmem:[%s12354_s4 + $0x218] ss:$12 sps:$4 sm:$0xff]  }
 0x53b   : > { %v3164_v63 = vpop.f32.mrf.mxu0  ;;  %v3447_v29 = vpop.f32.mrf.mxu1  ;;  %p8257_p3 = pnand %p8256_p1, %p8250_p8 }
 0x53c   : > { %v3165_v15 = vadd.f32 %v3164_v63, %v10121_v44  ;;  %v3448_v37 = vadd.f32 %v3447_v29, %v10125_v30  ;;  %v8040_v44 = vld [vmem:[%s12354_s4 + $0xb0] ss:$12 sps:$4 sm:$0xff]  }
 0x53d   : > { %v3166_v42 = vpop.f32.mrf.mxu0  ;;  %v3449_v26 = vpop.f32.mrf.mxu1  ;;  %v8041_v30 = vld [vmem:[%s12354_s4 + $0x230] ss:$12 sps:$4 sm:$0xff]  }
 0x53e   : > { %v3167_v39 = vadd.f32 %v3166_v42, %v10128_v3  ;;  %v3450_v5 = vadd.f32 %v3449_v26, %v10131_v46 }
 0x53f   : > { %v3168_v23 = vpop.f32.mrf.mxu0  ;;  %v3451_v10 = vpop.f32.mrf.mxu1 }
 0x540   : > { %v3169_v22 = vadd.f32 %v3168_v23, %v10134_v43  ;;  %v3452_v1 = vadd.f32 %v3451_v10, %v10136_v50  ;;  %v10993_v46 = vpack.c.bf16 %v3167_v39, %v3163_v31  ;;  %v10995_v43 = vpack.c.bf16 %v3450_v5, %v3446_v16  ;;  %v8042_v23 = vld [vmem:[%s12354_s4 + $0x98] ss:$12 sps:$4 sm:$0xff]  }
 0x541   : > { %v3172_v58 = vpop.f32.mrf.mxu0  ;;  %v3455_v38 = vpop.f32.mrf.mxu1 }
 0x542   : > { %v10983_v8 = vpack.c.bf16 %v3169_v22, %v3165_v15  ;;  %v10985_v3 = vpack.c.bf16 %v3452_v1, %v3448_v37  ;;  %v3456_v39 = vadd.f32 %v3455_v38, %v10142_v56 }
 0x543   : > { %v3174_v14 = vpop.f32.mrf.mxu0  ;;  %v3457_v51 = vpop.f32.mrf.mxu1 }
 0x544   : > { %4483 = vmatprep.mubr.bf16.mxu0 %v10983_v8  ;;  %4766 = vmatprep.mubr.bf16.mxu1 %v10985_v3  ;;  %v3175_v63 = vadd.f32 %v3174_v14, %v10145_v9  ;;  %v3458_v42 = vadd.f32 %v3457_v51, %v10147_v25  ;;  %v8044_v9 = vld [vmem:[%s12354_s4 + $0x80] ss:$12 sps:$4 sm:$0xff]  }
 0x545   : > { %v3176_v50 = vpop.f32.mrf.mxu0  ;;  %v3459_v1 = vpop.f32.mrf.mxu1  ;;  %4484 = vmatmul.mubr.bf16.vlgmr.msra.gmra.mxu0 %v10993_v46  ;;  %4767 = vmatmul.mubr.bf16.vlgmr.msra.gmra.mxu1 %v10995_v43 }
 0x546   : > { %5018 = vmatpush1.bf16.msra.mxu0 %v8040_v44  ;;  %5251 = vmatpush1.bf16.msra.mxu1 %v8041_v30  ;;  %v3177_v16 = vadd.f32 %v3176_v50, %v10154_v61  ;;  %v3460_v26 = vadd.f32 %v3459_v1, %v10158_v6  ;;  %v3173_v6 = vadd.f32 %v3172_v58, %v10139_v21  ;;  %v8045_v21 = vld [vmem:[%s12354_s4 + $0x200] ss:$12 sps:$4 sm:$0xff]   ;;  %v8046_v58 = vld [vmem:[%s12354_s4 + $0x68] ss:$12 sps:$4 sm:$0xff]  }
 0x547   : > { %v3178_v29 = vpop.f32.mrf.mxu0  ;;  %v3461_v37 = vpop.f32.mrf.mxu1  ;;  %5019 = vmatprep.subr.bf16.mxu0 %v12574_v11  ;;  %5252 = vmatprep.subr.bf16.mxu1 %v12574_v11  ;;  %v8047_v50 = vld [vmem:[%s12354_s4 + $0x1e8] ss:$12 sps:$4 sm:$0xff]  }
 0x548   : > { %v3179_v22 = vadd.f32 %v3178_v29, %v10166_v27  ;;  %v3462_v61 = vadd.f32 %v3461_v37, %v10169_v45  ;;  %v11024_v25 = vpack.c.bf16 %v3177_v16, %v3173_v6  ;;  %v11026_v27 = vpack.c.bf16 %v3460_v26, %v3456_v39 }
 0x549   : > { %v3182_v5 = vpop.f32.mrf.mxu0  ;;  %v3465_v18 = vpop.f32.mrf.mxu1 }
 0x54a   : > { %v11017_v10 = vpack.c.bf16 %v3179_v22, %v3175_v63  ;;  %v11019_v15 = vpack.c.bf16 %v3462_v61, %v3458_v42  ;;  %5020 = vmatpush1.bf16.msra.mxu0 %v8042_v23  ;;  %5253 = vmatpush1.bf16.msra.mxu1 %v8043_v52  ;;  %v8050_v61 = vld [vmem:[%s12354_s4 + $0x38] ss:$12 sps:$4 sm:$0xff]  }
 0x54b   : > { %v3184_v45 = vpop.f32.mrf.mxu0  ;;  %v3467_v31 = vpop.f32.mrf.mxu1  ;;  %5021 = vmatprep.subr.bf16.mxu0 %v12574_v11  ;;  %5254 = vmatprep.subr.bf16.mxu1 %v12574_v11 }
 0x54c   : > { %4493 = vmatprep.mubr.bf16.mxu0 %v11017_v10  ;;  %4776 = vmatprep.mubr.bf16.mxu1 %v11019_v15  ;;  %v3185_v1 = vadd.f32 %v3184_v45, %v10184_v13  ;;  %v3468_v23 = vadd.f32 %v3467_v31, %v10190_v32  ;;  %v8048_v13 = vld [vmem:[%s12354_s4 + $0x50] ss:$12 sps:$4 sm:$0xff]  }
 0x54d   : > { %v3186_v56 = vpop.f32.mrf.mxu0  ;;  %v3469_v38 = vpop.f32.mrf.mxu1  ;;  %4494 = vmatmul.mubr.bf16.gmra.mxu0 %v11024_v25  ;;  %4777 = vmatmul.mubr.bf16.gmra.mxu1 %v11026_v27 }
 0x54e   : > { %5022 = vmatpush1.bf16.msra.mxu0 %v8044_v9  ;;  %v3187_v44 = vadd.f32 %v3186_v56, %v10194_v19  ;;  %v3470_v30 = vadd.f32 %v3469_v38, %v10196_v62  ;;  %5255 = vmatpush1.bf16.msra.mxu1 %v8045_v21  ;;  %v3183_v19 = vadd.f32 %v3182_v5, %v10172_v4  ;;  %v8049_v4 = vld [vmem:[%s12354_s4 + $0x1d0] ss:$12 sps:$4 sm:$0xff]   ;;  %v8051_v9 = vld [vmem:[%s12354_s4 + $0x1b8] ss:$12 sps:$4 sm:$0xff]  }
 0x54f   : > { %v3188_v14 = vpop.f32.mrf.mxu0  ;;  %v3471_v51 = vpop.f32.mrf.mxu1  ;;  %5023 = vmatprep.subr.bf16.mxu0 %v12574_v11  ;;  %5256 = vmatprep.subr.bf16.mxu1 %v12574_v11  ;;  %v3466_v62 = vadd.f32 %v3465_v18, %v10176_v59 }
 0x550   : > { %v3189_v16 = vadd.f32 %v3188_v14, %v10202_v53  ;;  %v3472_v26 = vadd.f32 %v3471_v51, %v10204_v35  ;;  %v11060_v32 = vpack.c.bf16 %v3187_v44, %v3183_v19  ;;  %v8055_v19 = vld [vmem:[%s12354_s4 + $0x188] ss:$12 sps:$4 sm:$0xff]  }
 0x551   : > { %v3192_v29 = vpop.f32.mrf.mxu0  ;;  %v3475_v37 = vpop.f32.mrf.mxu1  ;;  %v11062_v53 = vpack.c.bf16 %v3470_v30, %v3466_v62 }
 0x552   : > { %v11053_v52 = vpack.c.bf16 %v3189_v16, %v3185_v1  ;;  %v11055_v63 = vpack.c.bf16 %v3472_v26, %v3468_v23  ;;  %5024 = vmatpush1.bf16.msra.mxu0 %v8046_v58  ;;  %5257 = vmatpush1.bf16.msra.mxu1 %v8047_v50  ;;  %v8054_v50 = vld [vmem:[%s12354_s4 + $0x8] ss:$12 sps:$4 sm:$0xff]  }
 0x553   : > { %v3194_v35 = vpop.f32.mrf.mxu0  ;;  %v3477_v42 = vpop.f32.mrf.mxu1  ;;  %5025 = vmatprep.subr.bf16.mxu0 %v12574_v11  ;;  %5258 = vmatprep.subr.bf16.mxu1 %v12574_v11 }
 0x554   : > { %4503 = vmatprep.mubr.bf16.mxu0 %v11053_v52  ;;  %4786 = vmatprep.mubr.bf16.mxu1 %v11055_v63  ;;  %v3195_v45 = vadd.f32 %v3194_v35, %v10212_v55  ;;  %v3478_v31 = vadd.f32 %v3477_v42, %v10214_v40  ;;  %v8052_v55 = vld [vmem:[%s12354_s4 + $0x20] ss:$12 sps:$4 sm:$0xff]  }
 0x555   : > { %v3196_v59 = vpop.f32.mrf.mxu0  ;;  %v3479_v22 = vpop.f32.mrf.mxu1  ;;  %4504 = vmatmul.mubr.bf16.gmra.mxu0 %v11060_v32  ;;  %4787 = vmatmul.mubr.bf16.gmra.mxu1 %v11062_v53 }
 0x556   : > { %5026 = vmatpush1.bf16.msra.mxu0 %v8048_v13  ;;  %v3197_v6 = vadd.f32 %v3196_v59, %v10219_v2  ;;  %v3480_v39 = vadd.f32 %v3479_v22, %v10221_v17  ;;  %5259 = vmatpush1.bf16.msra.mxu1 %v8049_v4  ;;  %v3193_v2 = vadd.f32 %v3192_v29, %v10206_v57  ;;  %v8053_v57 = vld [vmem:[%s12354_s4 + $0x1a0] ss:$12 sps:$4 sm:$0xff]  }
 0x557   : > { %v3198_v5 = vpop.f32.mrf.mxu0  ;;  %v3481_v18 = vpop.f32.mrf.mxu1  ;;  %5027 = vmatprep.subr.bf16.mxu0 %v12574_v11  ;;  %5260 = vmatprep.subr.bf16.mxu1 %v12574_v11  ;;  %v3476_v17 = vadd.f32 %v3475_v37, %v10208_v33 }
 0x558   : > { %v3199_v21 = vadd.f32 %v3198_v5, %v10230_v49  ;;  %v3482_v56 = vadd.f32 %v3481_v18, %v10232_v7  ;;  %v11096_v40 = vpack.c.bf16 %v3197_v6, %v3193_v2  ;;  %v8058_v6 = vld [vmem:[%s12354_s4 + $0x158] ss:$12 sps:$4 sm:$0xff]  }
 0x559   : > { %v3202_v38 = vpop.f32.mrf.mxu0  ;;  %v3485_v58 = vpop.f32.mrf.mxu1  ;;  %v11098_v49 = vpack.c.bf16 %v3480_v39, %v3476_v17  ;;  %v12862_v17 = vld [vmem:[#allocation27_spill] sm:$0xff] }
 0x55a   : > { %v11089_v44 = vpack.c.bf16 %v3199_v21, %v3195_v45  ;;  %v11091_v30 = vpack.c.bf16 %v3482_v56, %v3478_v31  ;;  %5028 = vmatpush1.bf16.msra.mxu0 %v8050_v61  ;;  %5261 = vmatpush1.bf16.msra.mxu1 %v8051_v9  ;;  %v8059_v45 = vld [vmem:[%s12354_s4 + $0x2d8] ss:$12 sps:$4 sm:$0xff]   ;;  %v12861_v56 = vld [vmem:[#allocation19_spill] sm:$0xff] }
 0x55b   : > { %v3204_v7 = vpop.f32.mrf.mxu0  ;;  %v3487_v14 = vpop.f32.mrf.mxu1  ;;  %5029 = vmatprep.subr.bf16.mxu0 %v12574_v11  ;;  %5262 = vmatprep.subr.bf16.mxu1 %v12574_v11 }
 0x55c   : > { %4513 = vmatprep.mubr.bf16.mxu0 %v11089_v44  ;;  %4796 = vmatprep.mubr.bf16.mxu1 %v11091_v30  ;;  %v3205_v62 = vadd.f32 %v3204_v7, %v10243_v54  ;;  %v3488_v29 = vadd.f32 %v3487_v14, %v10246_v60  ;;  %v8056_v54 = vld [vmem:[%s12354_s4 + $0x170] ss:$12 sps:$4 sm:$0xff]  }
 0x55d   : > { %v3206_v33 = vpop.f32.mrf.mxu0  ;;  %v3489_v51 = vpop.f32.mrf.mxu1  ;;  %4514 = vmatmul.mubr.bf16.gmra.mxu0 %v11096_v40  ;;  %4797 = vmatmul.mubr.bf16.gmra.mxu1 %v11098_v49 }
 0x55e   : > { %5030 = vmatpush1.bf16.msra.mxu0 %v8052_v55  ;;  %v3207_v1 = vadd.f32 %v3206_v33, %v10249_v34  ;;  %v3490_v23 = vadd.f32 %v3489_v51, %v10251_v41  ;;  %5263 = vmatpush1.bf16.msra.mxu1 %v8053_v57  ;;  %v3203_v34 = vadd.f32 %v3202_v38, %v10235_v0  ;;  %v8057_v0 = vld [vmem:[%s12354_s4 + $0x2f0] ss:$12 sps:$4 sm:$0xff]  }
 0x55f   : > { %v3208_v16 = vpop.f32.mrf.mxu0  ;;  %v3491_v26 = vpop.f32.mrf.mxu1  ;;  %5031 = vmatprep.subr.bf16.mxu0 %v12574_v11  ;;  %5264 = vmatprep.subr.bf16.mxu1 %v12574_v11  ;;  %v3486_v41 = vadd.f32 %v3485_v58, %v10238_v24  ;;  %v12864_v58 = vld [vmem:[#allocation12_spill] sm:$0xff] }
 0x560   : > { %v3209_v37 = vadd.f32 %v3208_v16, %v10256_v28  ;;  %v3492_v13 = vadd.f32 %v3491_v26, %v10261_v20  ;;  %v11132_v60 = vpack.c.bf16 %v3207_v1, %v3203_v34 }
 0x561   : > { %v3212_v35 = vpop.f32.mrf.mxu0  ;;  %v3495_v42 = vpop.f32.mrf.mxu1  ;;  %v11134_v28 = vpack.c.bf16 %v3490_v23, %v3486_v41  ;;  %v8061_v23 = vld [vmem:[%s12354_s4 + $0x2c0] ss:$12 sps:$4 sm:$0xff]  }
 0x562   : > { %v11125_v4 = vpack.c.bf16 %v3209_v37, %v3205_v62  ;;  %v11127_v59 = vpack.c.bf16 %v3492_v13, %v3488_v29  ;;  %5032 = vmatpush1.bf16.msra.mxu0 %v8054_v50  ;;  %5265 = vmatpush1.bf16.msra.mxu1 %v8055_v19  ;;  %v3496_v55 = vadd.f32 %v3495_v42, %v12864_v58  ;;  %v8062_v19 = vld [vmem:[%s12354_s4 + $0x128] ss:$12 sps:$4 sm:$0xff]   ;;  %v12866_v37 = vld [vmem:[#allocation44_spill] sm:$0xff] }
 0x563   : > { %v3214_v20 = vpop.f32.mrf.mxu0  ;;  %v3497_v22 = vpop.f32.mrf.mxu1  ;;  %5033 = vmatprep.subr.bf16.mxu0 %v12574_v11  ;;  %5266 = vmatprep.subr.bf16.mxu1 %v12574_v11  ;;  %v12865_v62 = vld [vmem:[#allocation30_spill] sm:$0xff]  ;;  %v8065_v58 = vld [vmem:[%s12354_s4 + $0x290] ss:$12 sps:$4 sm:$0xff]  }
 0x564   : > { %4523 = vmatprep.mubr.bf16.mxu0 %v11125_v4  ;;  %4806 = vmatprep.mubr.bf16.mxu1 %v11127_v59  ;;  %v3215_v31 = vadd.f32 %v3214_v20, %v10273_v47  ;;  %v3498_v21 = vadd.f32 %v3497_v22, %v10275_v36  ;;  %v8060_v47 = vld [vmem:[%s12354_s4 + $0x140] ss:$12 sps:$4 sm:$0xff]  }
 0x565   : > { %v3216_v24 = vpop.f32.mrf.mxu0  ;;  %v3499_v61 = vpop.f32.mrf.mxu1  ;;  %4524 = vmatmul.mubr.bf16.gmra.mxu0 %v11132_v60  ;;  %4807 = vmatmul.mubr.bf16.gmra.mxu1 %v11134_v28  ;;  %v12867_v42 = vld [vmem:[#allocation42_spill] sm:$0xff]  ;;  %v12868_v20 = vld [vmem:[#allocation29_spill] sm:$0xff] }
 0x566   : > { %5034 = vmatpush2.bf16.msra.mxu0 %v8056_v54  ;;  %v3217_v39 = vadd.f32 %v3216_v24, %v10277_v48  ;;  %v3500_v5 = vadd.f32 %v3499_v61, %v10279_v12  ;;  %5267 = vmatpush2.bf16.msra.mxu1 %v8057_v0  ;;  %v12863_v48 = vld [vmem:[#allocation18_spill] sm:$0xff]  ;;  %v12869_v0 = vld [vmem:[#allocation13_spill] sm:$0xff]  ;;  %v12870_v61 = vld [vmem:[#allocation20_spill] sm:$0xff] }
 0x567   : > { %v3218_v18 = vpop.f32.mrf.mxu0  ;;  %v3501_v9 = vpop.f32.mrf.mxu1  ;;  %5035 = vmatprep.subr.bf16.mxu0 %v12574_v11  ;;  %5268 = vmatprep.subr.bf16.mxu1 %v12574_v11  ;;  %v3213_v12 = vadd.f32 %v3212_v35, %v12863_v48  ;;  %v8063_v35 = vld [vmem:[%s12354_s4 + $0x2a8] ss:$12 sps:$4 sm:$0xff]  }
 0x568   : > { %v3219_v2 = vadd.f32 %v3218_v18, %v12861_v56  ;;  %v3502_v38 = vadd.f32 %v3501_v9, %v12862_v17  ;;  %v11170_v51 = vpack.c.bf16 %v3500_v5, %v3496_v55  ;;  %v12872_v18 = vld [vmem:[#allocation40_spill] sm:$0xff] }
 0x569   : > { %v3222_v7 = vpop.f32.mrf.mxu0  ;;  %v3505_v14 = vpop.f32.mrf.mxu1  ;;  %v11168_v36 = vpack.c.bf16 %v3217_v39, %v3213_v12  ;;  %v12871_v39 = vld [vmem:[#allocation28_spill] sm:$0xff] }
 0x56a   : > { %v11161_v57 = vpack.c.bf16 %v3219_v2, %v3215_v31  ;;  %v11163_v33 = vpack.c.bf16 %v3502_v38, %v3498_v21  ;;  %5036 = vmatpush2.bf16.msra.mxu0 %v8058_v6  ;;  %5269 = vmatpush2.bf16.msra.mxu1 %v8059_v45  ;;  %v3223_v5 = vadd.f32 %v3222_v7, %v12871_v39  ;;  %v8064_v2 = vld [vmem:[%s12354_s4 + $0x110] ss:$12 sps:$4 sm:$0xff]  }
 0x56b   : > { %v3224_v50 = vpop.f32.mrf.mxu0  ;;  %v3507_v1 = vpop.f32.mrf.mxu1  ;;  %5037 = vmatprep.subr.bf16.mxu0 %v12574_v11  ;;  %5270 = vmatprep.subr.bf16.mxu1 %v12574_v11  ;;  %v3506_v9 = vadd.f32 %v3505_v14, %v12872_v18  ;;  %v8066_v14 = vld [vmem:[%s12354_s4 + $0xf8] ss:$12 sps:$4 sm:$0xff]  }
 0x56c   : > { %4533 = vmatprep.mubr.bf16.mxu0 %v11161_v57  ;;  %4816 = vmatprep.mubr.bf16.mxu1 %v11163_v33  ;;  %v3225_v54 = vadd.f32 %v3224_v50, %v12867_v42  ;;  %v3508_v22 = vadd.f32 %v3507_v1, %v12868_v20  ;;  %v12874_v1 = vld [vmem:[#allocation23_spill] sm:$0xff] }
 0x56d   : > { %v3226_v16 = vpop.f32.mrf.mxu0  ;;  %v3509_v26 = vpop.f32.mrf.mxu1  ;;  %4534 = vmatmul.mubr.bf16.gmra.mxu0 %v11168_v36  ;;  %4817 = vmatmul.mubr.bf16.gmra.mxu1 %v11170_v51 }
 0x56e   : > { %5038 = vmatpush2.bf16.msra.mxu0 %v8060_v47  ;;  %v3227_v29 = vadd.f32 %v3226_v16, %v12865_v62  ;;  %v3510_v13 = vadd.f32 %v3509_v26, %v12866_v37  ;;  %5271 = vmatpush2.bf16.msra.mxu1 %v8061_v23  ;;  %v12873_v47 = vld [vmem:[#allocation22_spill] sm:$0xff]  ;;  %v12875_v62 = vld [vmem:[#allocation21_spill] sm:$0xff]  ;;  %v12876_v37 = vld [vmem:[#allocation48_spill] sm:$0xff] }
 0x56f   : > { %v3228_v34 = vpop.f32.mrf.mxu0  ;;  %v3511_v41 = vpop.f32.mrf.mxu1  ;;  %5039 = vmatprep.subr.bf16.mxu0 %v12574_v11  ;;  %5272 = vmatprep.subr.bf16.mxu1 %v12574_v11 }
 0x570   : > { %v3229_v24 = vadd.f32 %v3228_v34, %v12869_v0  ;;  %v3512_v6 = vadd.f32 %v3511_v41, %v12870_v61  ;;  %v11204_v17 = vpack.c.bf16 %v3227_v29, %v3223_v5  ;;  %v11206_v38 = vpack.c.bf16 %v3510_v13, %v3506_v9  ;;  %v12877_v34 = vld [vmem:[#allocation24_spill] sm:$0xff]  ;;  %v8068_v5 = vld [vmem:[%s12354_s4 + $0xe0] ss:$12 sps:$4 sm:$0xff]  }
 0x571   : > { %v3232_v45 = vpop.f32.mrf.mxu0  ;;  %v3515_v31 = vpop.f32.mrf.mxu1 }
 0x572   : > { %v11197_v21 = vpack.c.bf16 %v3229_v24, %v3225_v54  ;;  %v11199_v56 = vpack.c.bf16 %v3512_v6, %v3508_v22  ;;  %5040 = vmatpush2.bf16.msra.mxu0 %v8062_v19  ;;  %5273 = vmatpush2.bf16.msra.mxu1 %v8063_v35  ;;  %v8067_v19 = vld [vmem:[%s12354_s4 + $0x278] ss:$12 sps:$4 sm:$0xff]   ;;  %v12878_v35 = vld [vmem:[#allocation14_spill] sm:$0xff]  ;;  %v12880_v22 = vld [vmem:[#allocation31_spill] sm:$0xff] }
 0x573   : > { %v3234_v48 = vpop.f32.mrf.mxu0  ;;  %v3517_v12 = vpop.f32.mrf.mxu1  ;;  %5041 = vmatprep.subr.bf16.mxu0 %v12574_v11  ;;  %5274 = vmatprep.subr.bf16.mxu1 %v12574_v11  ;;  %v12879_v54 = vld [vmem:[#allocation46_spill] sm:$0xff]  ;;  %v3516_v0 = vadd.f32 %v3515_v31, %v12880_v22 }
 0x574   : > { %4543 = vmatprep.mubr.bf16.mxu0 %v11197_v21  ;;  %4826 = vmatprep.mubr.bf16.mxu1 %v11199_v56  ;;  %v3235_v29 = vadd.f32 %v3234_v48, %v12875_v62  ;;  %v3518_v13 = vadd.f32 %v3517_v12, %v12876_v37  ;;  %v3233_v20 = vadd.f32 %v3232_v45, %v12879_v54  ;;  %v8069_v45 = vld [vmem:[%s12354_s4 + $0x260] ss:$12 sps:$4 sm:$0xff]  }
 0x575   : > { %v3236_v55 = vpop.f32.mrf.mxu0  ;;  %v3519_v7 = vpop.f32.mrf.mxu1  ;;  %4544 = vmatmul.mubr.bf16.gmra.mxu0 %v11204_v17  ;;  %4827 = vmatmul.mubr.bf16.gmra.mxu1 %v11206_v38 }
 0x576   : > { %5042 = vmatpush2.bf16.msra.mxu0 %v8064_v2  ;;  %v3237_v50 = vadd.f32 %v3236_v55, %v12873_v47  ;;  %v3520_v23 = vadd.f32 %v3519_v7, %v12874_v1  ;;  %5275 = vmatpush2.bf16.msra.mxu1 %v8065_v58  ;;  %v12881_v58 = vld [vmem:[#allocation41_spill] sm:$0xff]  ;;  %v12882_v7 = vld [vmem:[#allocation15_spill] sm:$0xff]  ;;  %v12883_v1 = vld [vmem:[#allocation32_spill] sm:$0xff] }
 0x577   : > { %v3238_v16 = vpop.f32.mrf.mxu0  ;;  %v3521_v26 = vpop.f32.mrf.mxu1  ;;  %5043 = vmatprep.subr.bf16.mxu0 %v12574_v11  ;;  %5276 = vmatprep.subr.bf16.mxu1 %v12574_v11 }
 0x578   : > { %v3239_v41 = vadd.f32 %v3238_v16, %v12877_v34  ;;  %v3522_v42 = vadd.f32 %v3521_v26, %v12878_v35  ;;  %v11240_v18 = vpack.c.bf16 %v3237_v50, %v3233_v20  ;;  %v11242_v9 = vpack.c.bf16 %v3520_v23, %v3516_v0  ;;  %v12884_v16 = vld [vmem:[#allocation39_spill] sm:$0xff] }
 0x579   : > { %v3242_v24 = vpop.f32.mrf.mxu0  ;;  %v3525_v61 = vpop.f32.mrf.mxu1  ;;  %v8070_v0 = vld [vmem:[%s12354_s4 + $0xc8] ss:$12 sps:$4 sm:$0xff]  }
 0x57a   : > { %v11233_v6 = vpack.c.bf16 %v3239_v41, %v3235_v29  ;;  %v11235_v39 = vpack.c.bf16 %v3522_v42, %v3518_v13  ;;  %5044 = vmatpush2.bf16.msra.mxu0 %v8066_v14  ;;  %5277 = vmatpush2.bf16.msra.mxu1 %v8067_v19  ;;  %v12885_v19 = vld [vmem:[#allocation43_spill] sm:$0xff]  ;;  %v12886_v29 = vld [vmem:[#allocation45_spill] sm:$0xff]  ;;  %v12888_v41 = vld [vmem:[#allocation26_spill] sm:$0xff] }
 0x57b   : > { %v3244_v2 = vpop.f32.mrf.mxu0  ;;  %v3527_v48 = vpop.f32.mrf.mxu1  ;;  %5045 = vmatprep.subr.bf16.mxu0 %v12574_v11  ;;  %5278 = vmatprep.subr.bf16.mxu1 %v12574_v11  ;;  %v12887_v13 = vld [vmem:[#allocation25_spill] sm:$0xff]  ;;  %v3526_v35 = vadd.f32 %v3525_v61, %v12888_v41 }
 0x57c   : > { %4553 = vmatprep.mubr.bf16.mxu0 %v11233_v6  ;;  %4836 = vmatprep.mubr.bf16.mxu1 %v11235_v39  ;;  %v3245_v23 = vadd.f32 %v3244_v2, %v12883_v1  ;;  %v3528_v26 = vadd.f32 %v3527_v48, %v12884_v16  ;;  %v3243_v34 = vadd.f32 %v3242_v24, %v12887_v13 }
 0x57d   : > { %v3246_v31 = vpop.f32.mrf.mxu0  ;;  %v3529_v12 = vpop.f32.mrf.mxu1  ;;  %4554 = vmatmul.mubr.bf16.gmra.mxu0 %v11240_v18  ;;  %4837 = vmatmul.mubr.bf16.gmra.mxu1 %v11242_v9 }
 0x57e   : > { %5046 = vmatpush2.bf16.msra.mxu0 %v8068_v5  ;;  %v3247_v55 = vadd.f32 %v3246_v31, %v12881_v58  ;;  %v3530_v14 = vadd.f32 %v3529_v12, %v12882_v7  ;;  %5279 = vmatpush2.bf16.msra.mxu1 %v8069_v45  ;;  %v8071_v5 = vld [vmem:[%s12354_s4 + $0x248] ss:$12 sps:$4 sm:$0xff]  }
 0x57f   : > { %v3248_v47 = vpop.f32.mrf.mxu0  ;;  %v3531_v50 = vpop.f32.mrf.mxu1  ;;  %5047 = vmatprep.subr.bf16.mxu0 %v12574_v11  ;;  %5280 = vmatprep.subr.bf16.mxu1 %v12574_v11  ;;  %v12889_v12 = vld [vmem:[#allocation51_spill] sm:$0xff] }
 0x580   : > { %v3249_v62 = vadd.f32 %v3248_v47, %v12885_v19  ;;  %v3532_v37 = vadd.f32 %v3531_v50, %v12886_v29  ;;  %v11273_v2 = vpack.c.bf16 %v3247_v55, %v3243_v34  ;;  %v11275_v48 = vpack.c.bf16 %v3530_v14, %v3526_v35  ;;  %v12890_v55 = vld [vmem:[#allocation16_spill] sm:$0xff]  ;;  %v12891_v50 = vld [vmem:[#allocation50_spill] sm:$0xff]  ;;  %v12896_v34 = vld [vmem:[#allocation49_spill] sm:$0xff] }
 0x581   : > { %v3252_v42 = vpop.f32.mrf.mxu0  ;;  %v3535_v54 = vpop.f32.mrf.mxu1 }
 0x582   : > { %v11263_v20 = vpack.c.bf16 %v3249_v62, %v3245_v23  ;;  %v11265_v22 = vpack.c.bf16 %v3532_v37, %v3528_v26  ;;  %5048 = vmatpush2.bf16.msra.mxu0 %v8070_v0  ;;  %5281 = vmatpush2.bf16.msra.mxu1 %v8071_v5  ;;  %v12892_v23 = vld [vmem:[#allocation33_spill] sm:$0xff]  ;;  %v12893_v26 = vld [vmem:[#allocation34_spill] sm:$0xff]  ;;  %v12894_v62 = vld [vmem:[#allocation52_spill] sm:$0xff]  ;;  %v3536_v41 = vadd.f32 %v3535_v54, %v12896_v34 }
 0x583   : > { %v3254_v24 = vpop.f32.mrf.mxu0  ;;  %v3537_v61 = vpop.f32.mrf.mxu1  ;;  %v12895_v37 = vld [vmem:[#allocation47_spill] sm:$0xff]  ;;  %v12901_v54 = vld [vmem:[#allocation54_spill] sm:$0xff] }
 0x584   : > { %4563 = vmatprep.mubr.bf16.mxu0 %v11263_v20  ;;  %4846 = vmatprep.mubr.bf16.mxu1 %v11265_v22  ;;  %v3255_v1 = vadd.f32 %v3254_v24, %v12891_v50  ;;  %v3538_v16 = vadd.f32 %v3537_v61, %v12892_v23  ;;  %v3253_v13 = vadd.f32 %v3252_v42, %v12895_v37 }
 0x585   : > { %v3256_v45 = vpop.f32.mrf.mxu0  ;;  %v3539_v31 = vpop.f32.mrf.mxu1  ;;  %4564 = vmatmul.mubr.bf16.gmra.mxu0 %v11273_v2  ;;  %4847 = vmatmul.mubr.bf16.gmra.mxu1 %v11275_v48 }
 0x586   : > { %v3257_v58 = vadd.f32 %v3256_v45, %v12889_v12  ;;  %v3540_v7 = vadd.f32 %v3539_v31, %v12890_v55 }
 0x587   : > { %v3258_v14 = vpop.f32.mrf.mxu0  ;;  %v3541_v47 = vpop.f32.mrf.mxu1 }
 0x588   : > { %v3259_v19 = vadd.f32 %v3258_v14, %v12893_v26  ;;  %v3542_v29 = vadd.f32 %v3541_v47, %v12894_v62  ;;  %v11293_v31 = vpack.c.bf16 %v3257_v58, %v3253_v13  ;;  %v11295_v12 = vpack.c.bf16 %v3540_v7, %v3536_v41  ;;  %v12902_v47 = vld [vmem:[#allocation37_spill] sm:$0xff]  ;;  %v12908_v41 = vld [vmem:[#allocation35_spill] sm:$0xff] }
 0x589   : > { %v3262_v35 = vpop.f32.mrf.mxu0  ;;  %v3545_v0 = vpop.f32.mrf.mxu1  ;;  %v12903_v7 = vld [vmem:[#allocation53_spill] sm:$0xff] }
 0x58a   : > { %v11289_v5 = vpack.c.bf16 %v3259_v19, %v3255_v1  ;;  %v11291_v45 = vpack.c.bf16 %v3542_v29, %v3538_v16  ;;  %12899 = vst [vmem:[#allocation18_spill] sm:$0xff] %v11293_v31  ;;  %12900 = vst [vmem:[#allocation12_spill] sm:$0xff] %v11295_v12  ;;  %v12904_v16 = vld [vmem:[#allocation36_spill] sm:$0xff]  ;;  %v12905_v19 = vld [vmem:[#allocation38_spill] sm:$0xff]  ;;  %v3546_v11 = vadd.f32 %v3545_v0, %v12908_v41 }
 0x58b   : > { %v3264_v24 = vpop.f32.mrf.mxu0  ;;  %v3547_v61 = vpop.f32.mrf.mxu1  ;;  %v12906_v29 = vld [vmem:[#allocation55_spill] sm:$0xff]  ;;  %v12907_v13 = vld [vmem:[#allocation17_spill] sm:$0xff] }
 0x58c   : > { %12897 = vst [vmem:[#allocation19_spill] sm:$0xff] %v11289_v5  ;;  %12898 = vst [vmem:[#allocation27_spill] sm:$0xff] %v11291_v45  ;;  %4573 = vmatprep.mubr.bf16.mxu0 %v11289_v5  ;;  %4856 = vmatprep.mubr.bf16.mxu1 %v11291_v45  ;;  %v3265_v23 = vadd.f32 %v3264_v24, %v12903_v7  ;;  %v3548_v26 = vadd.f32 %v3547_v61, %v12904_v16  ;;  %v12913_v0 = vld [vmem:[#allocation59_spill] sm:$0xff]  ;;  %v12916_v16 = vld [vmem:[#allocation58_spill] sm:$0xff] }
 0x58d   : > { %v3266_v55 = vpop.f32.mrf.mxu0  ;;  %v3549_v42 = vpop.f32.mrf.mxu1  ;;  %4574 = vmatmul.mubr.bf16.gmra.mxu0 %v11293_v31  ;;  %4857 = vmatmul.mubr.bf16.gmra.mxu1 %v11295_v12  ;;  %v3263_v34 = vadd.f32 %v3262_v35, %v12907_v13  ;;  %v8074_v13 = vld [vmem:[#allocation5 + $0x74] ss:$8 sps:$4 sm:$0xff]  }
 0x58e   : > { %v3267_v14 = vadd.f32 %v3266_v55, %v12901_v54  ;;  %v3550_v50 = vadd.f32 %v3549_v42, %v12902_v47  ;;  %5996 = vmatprep.subr.bf16.mxu0 %v8074_v13 }
 0x58f   : > { %v3268_v58 = vpop.f32.mrf.mxu0  ;;  %v3551_v1 = vpop.f32.mrf.mxu1 }
 0x590   : > { %v3269_v62 = vadd.f32 %v3268_v58, %v12905_v19  ;;  %v3552_v37 = vadd.f32 %v3551_v1, %v12906_v29  ;;  %v11313_v42 = vpack.c.bf16 %v3267_v14, %v3263_v34  ;;  %v11315_v54 = vpack.c.bf16 %v3550_v50, %v3546_v11  ;;  %v12914_v1 = vld [vmem:[#allocation60_spill] sm:$0xff]  ;;  %v12915_v11 = vld [vmem:[#allocation57_spill] sm:$0xff]  ;;  %v12918_v29 = vld [vmem:[#allocation62_spill] sm:$0xff] }
 0x591   : > { %v3272_v31 = vpop.f32.mrf.mxu0  ;;  %v3555_v12 = vpop.f32.mrf.mxu1  ;;  %v12917_v19 = vld [vmem:[#allocation61_spill] sm:$0xff]  ;;  %v12919_v34 = vld [vmem:[#allocation11_spill] sm:$0xff] }
 0x592   : > { %v11309_v45 = vpack.c.bf16 %v3269_v62, %v3265_v23  ;;  %v11311_v55 = vpack.c.bf16 %v3552_v37, %v3548_v26  ;;  %12911 = vst [vmem:[#allocation42_spill] sm:$0xff] %v11313_v42  ;;  %12912 = vst [vmem:[#allocation29_spill] sm:$0xff] %v11315_v54  ;;  %v3273_v41 = vadd.f32 %v3272_v31, %v12919_v34  ;;  %v12931_v34 = vld [vmem:[#allocation63_spill] sm:$0xff] }
 0x593   : > { %v3274_v24 = vpop.f32.mrf.mxu0  ;;  %v3557_v61 = vpop.f32.mrf.mxu1 }
 0x594   : > { %12909 = vst [vmem:[#allocation30_spill] sm:$0xff] %v11309_v45  ;;  %12910 = vst [vmem:[#allocation44_spill] sm:$0xff] %v11311_v55  ;;  %4583 = vmatprep.mubr.bf16.mxu0 %v11309_v45  ;;  %4866 = vmatprep.mubr.bf16.mxu1 %v11311_v55  ;;  %v3275_v50 = vadd.f32 %v3274_v24, %v12915_v11  ;;  %v3558_v26 = vadd.f32 %v3557_v61, %v12916_v16  ;;  %v12926_v11 = vld [vmem:[#allocation68_spill] sm:$0xff] }
 0x595   : > { %v3276_v47 = vpop.f32.mrf.mxu0  ;;  %v3559_v35 = vpop.f32.mrf.mxu1  ;;  %4584 = vmatmul.mubr.bf16.gmra.mxu0 %v11313_v42  ;;  %4867 = vmatmul.mubr.bf16.gmra.mxu1 %v11315_v54  ;;  %v12920_v42 = vld [vmem:[#allocation56_spill] sm:$0xff] }
 0x596   : > { %v3277_v58 = vadd.f32 %v3276_v47, %v12913_v0  ;;  %v3560_v7 = vadd.f32 %v3559_v35, %v12914_v1  ;;  %v3556_v55 = vadd.f32 %v3555_v12, %v12920_v42  ;;  %v8077_v47 = vld [vmem:[#allocation5 + $0x174] ss:$8 sps:$4 sm:$0xff]   ;;  %v12925_v42 = vld [vmem:[#allocation67_spill] sm:$0xff] }
 0x597   : > { %v3278_v14 = vpop.f32.mrf.mxu0  ;;  %v3561_v23 = vpop.f32.mrf.mxu1  ;;  %6279 = vmatprep.subr.bf16.mxu1 %v8077_v47  ;;  %v12932_v47 = vld [vmem:[#allocation64_spill] sm:$0xff] }
 0x598   : > { %v3279_v62 = vadd.f32 %v3278_v14, %v12917_v19  ;;  %v3562_v37 = vadd.f32 %v3561_v23, %v12918_v29  ;;  %v11333_v24 = vpack.c.bf16 %v3277_v58, %v3273_v41  ;;  %v11335_v61 = vpack.c.bf16 %v3560_v7, %v3556_v55  ;;  %v12927_v7 = vld [vmem:[#allocation65_spill] sm:$0xff] }
 0x599   : > { %v3282_v54 = vpop.f32.mrf.mxu0  ;;  %v3565_v45 = vpop.f32.mrf.mxu1 }
 0x59a   : > { %v11329_v0 = vpack.c.bf16 %v3279_v62, %v3275_v50  ;;  %v11331_v35 = vpack.c.bf16 %v3562_v37, %v3558_v26  ;;  %12923 = vst [vmem:[#allocation28_spill] sm:$0xff] %v11333_v24  ;;  %12924 = vst [vmem:[#allocation40_spill] sm:$0xff] %v11335_v61  ;;  %v12928_v26 = vld [vmem:[#allocation66_spill] sm:$0xff]  ;;  %v12929_v62 = vld [vmem:[#allocation69_spill] sm:$0xff]  ;;  %v3283_v41 = vadd.f32 %v3282_v54, %v12931_v34 }
 0x59b   : > { %v3284_v1 = vpop.f32.mrf.mxu0  ;;  %v3567_v14 = vpop.f32.mrf.mxu1  ;;  %v12930_v37 = vld [vmem:[#allocation70_spill] sm:$0xff]  ;;  %v12943_v34 = vld [vmem:[#allocation71_spill] sm:$0xff] }
 0x59c   : > { %12921 = vst [vmem:[#allocation13_spill] sm:$0xff] %v11329_v0  ;;  %12922 = vst [vmem:[#allocation20_spill] sm:$0xff] %v11331_v35  ;;  %4593 = vmatprep.mubr.bf16.mxu0 %v11329_v0  ;;  %4876 = vmatprep.mubr.bf16.mxu1 %v11331_v35  ;;  %v3285_v16 = vadd.f32 %v3284_v1, %v12927_v7  ;;  %v3568_v19 = vadd.f32 %v3567_v14, %v12928_v26  ;;  %v12940_v26 = vld [vmem:[#allocation74_spill] sm:$0xff] }
 0x59d   : > { %v3286_v31 = vpop.f32.mrf.mxu0  ;;  %v3569_v12 = vpop.f32.mrf.mxu1  ;;  %4594 = vmatmul.mubr.bf16.gmra.mxu0 %v11333_v24  ;;  %4877 = vmatmul.mubr.bf16.gmra.mxu1 %v11335_v61  ;;  %v3566_v24 = vadd.f32 %v3565_v45, %v12932_v47  ;;  %v12937_v45 = vld [vmem:[#allocation75_spill] sm:$0xff]  ;;  %v12944_v47 = vld [vmem:[#allocation72_spill] sm:$0xff] }
 0x59e   : > { %v3287_v23 = vadd.f32 %v3286_v31, %v12925_v42  ;;  %v3570_v58 = vadd.f32 %v3569_v12, %v12926_v11 }
 0x59f   : > { %v3288_v50 = vpop.f32.mrf.mxu0  ;;  %v3571_v55 = vpop.f32.mrf.mxu1 }
 0x5a0   : > { %v3289_v29 = vadd.f32 %v3288_v50, %v12929_v62  ;;  %v3572_v13 = vadd.f32 %v3571_v55, %v12930_v37  ;;  %v11353_v12 = vpack.c.bf16 %v3287_v23, %v3283_v41  ;;  %v11355_v42 = vpack.c.bf16 %v3570_v58, %v3566_v24  ;;  %v12938_v55 = vld [vmem:[#allocation76_spill] sm:$0xff]  ;;  %v12939_v24 = vld [vmem:[#allocation73_spill] sm:$0xff]  ;;  %v12942_v37 = vld [vmem:[#allocation78_spill] sm:$0xff] }
 0x5a1   : > { %v3292_v35 = vpop.f32.mrf.mxu0  ;;  %v3575_v61 = vpop.f32.mrf.mxu1  ;;  %v12941_v62 = vld [vmem:[#allocation77_spill] sm:$0xff] }
 0x5a2   : > { %v11349_v0 = vpack.c.bf16 %v3289_v29, %v3285_v16  ;;  %v11351_v31 = vpack.c.bf16 %v3572_v13, %v3568_v19  ;;  %12935 = vst [vmem:[#allocation21_spill] sm:$0xff] %v11353_v12  ;;  %12936 = vst [vmem:[#allocation48_spill] sm:$0xff] %v11355_v42  ;;  %v3293_v41 = vadd.f32 %v3292_v35, %v12943_v34  ;;  %v12955_v34 = vld [vmem:[#allocation79_spill] sm:$0xff] }
 0x5a3   : > { %v3294_v1 = vpop.f32.mrf.mxu0  ;;  %v3577_v14 = vpop.f32.mrf.mxu1 }
 0x5a4   : > { %12933 = vst [vmem:[#allocation22_spill] sm:$0xff] %v11349_v0  ;;  %12934 = vst [vmem:[#allocation23_spill] sm:$0xff] %v11351_v31  ;;  %4603 = vmatprep.mubr.bf16.mxu0 %v11349_v0  ;;  %4886 = vmatprep.mubr.bf16.mxu1 %v11351_v31  ;;  %v3295_v58 = vadd.f32 %v3294_v1, %v12939_v24  ;;  %v3578_v19 = vadd.f32 %v3577_v14, %v12940_v26  ;;  %v12952_v26 = vld [vmem:[#allocation82_spill] sm:$0xff] }
 0x5a5   : > { %v3296_v11 = vpop.f32.mrf.mxu0  ;;  %v3579_v54 = vpop.f32.mrf.mxu1  ;;  %4604 = vmatmul.mubr.bf16.gmra.mxu0 %v11353_v12  ;;  %4887 = vmatmul.mubr.bf16.gmra.mxu1 %v11355_v42  ;;  %v3576_v12 = vadd.f32 %v3575_v61, %v12944_v47  ;;  %v12949_v61 = vld [vmem:[#allocation83_spill] sm:$0xff]  ;;  %v12956_v47 = vld [vmem:[#allocation80_spill] sm:$0xff] }
 0x5a6   : > { %v3297_v50 = vadd.f32 %v3296_v11, %v12937_v45  ;;  %v3580_v7 = vadd.f32 %v3579_v54, %v12938_v55 }
 0x5a7   : > { %v3298_v23 = vpop.f32.mrf.mxu0  ;;  %v3581_v16 = vpop.f32.mrf.mxu1 }
 0x5a8   : > { %v3299_v29 = vadd.f32 %v3298_v23, %v12941_v62  ;;  %v3582_v13 = vadd.f32 %v3581_v16, %v12942_v37  ;;  %v11373_v54 = vpack.c.bf16 %v3297_v50, %v3293_v41  ;;  %v11375_v45 = vpack.c.bf16 %v3580_v7, %v3576_v12  ;;  %v12950_v16 = vld [vmem:[#allocation84_spill] sm:$0xff]  ;;  %v12951_v12 = vld [vmem:[#allocation81_spill] sm:$0xff]  ;;  %v12954_v37 = vld [vmem:[#allocation86_spill] sm:$0xff] }
 0x5a9   : > { %v3302_v31 = vpop.f32.mrf.mxu0  ;;  %v3585_v42 = vpop.f32.mrf.mxu1  ;;  %v12953_v62 = vld [vmem:[#allocation85_spill] sm:$0xff] }
 0x5aa   : > { %v11369_v0 = vpack.c.bf16 %v3299_v29, %v3295_v58  ;;  %v11371_v11 = vpack.c.bf16 %v3582_v13, %v3578_v19  ;;  %12947 = vst [vmem:[#allocation46_spill] sm:$0xff] %v11373_v54  ;;  %12948 = vst [vmem:[#allocation31_spill] sm:$0xff] %v11375_v45  ;;  %v3303_v41 = vadd.f32 %v3302_v31, %v12955_v34  ;;  %v12967_v34 = vld [vmem:[#allocation87_spill] sm:$0xff] }
 0x5ab   : > { %v3304_v1 = vpop.f32.mrf.mxu0  ;;  %v3587_v14 = vpop.f32.mrf.mxu1 }
 0x5ac   : > { %12945 = vst [vmem:[#allocation24_spill] sm:$0xff] %v11369_v0  ;;  %12946 = vst [vmem:[#allocation14_spill] sm:$0xff] %v11371_v11  ;;  %4613 = vmatprep.mubr.bf16.mxu0 %v11369_v0  ;;  %4896 = vmatprep.mubr.bf16.mxu1 %v11371_v11  ;;  %v3305_v7 = vadd.f32 %v3304_v1, %v12951_v12  ;;  %v3588_v19 = vadd.f32 %v3587_v14, %v12952_v26  ;;  %v12964_v26 = vld [vmem:[#allocation90_spill] sm:$0xff] }
 0x5ad   : > { %v3306_v55 = vpop.f32.mrf.mxu0  ;;  %v3589_v35 = vpop.f32.mrf.mxu1  ;;  %4614 = vmatmul.mubr.bf16.gmra.mxu0 %v11373_v54  ;;  %4897 = vmatmul.mubr.bf16.gmra.mxu1 %v11375_v45  ;;  %v3586_v54 = vadd.f32 %v3585_v42, %v12956_v47  ;;  %v12961_v42 = vld [vmem:[#allocation91_spill] sm:$0xff]  ;;  %v12968_v47 = vld [vmem:[#allocation88_spill] sm:$0xff] }
 0x5ae   : > { %v3307_v23 = vadd.f32 %v3306_v55, %v12949_v61  ;;  %v3590_v24 = vadd.f32 %v3589_v35, %v12950_v16 }
 0x5af   : > { %v3308_v50 = vpop.f32.mrf.mxu0  ;;  %v3591_v58 = vpop.f32.mrf.mxu1 }
 0x5b0   : > { %v3309_v29 = vadd.f32 %v3308_v50, %v12953_v62  ;;  %v3592_v13 = vadd.f32 %v3591_v58, %v12954_v37  ;;  %v11393_v35 = vpack.c.bf16 %v3307_v23, %v3303_v41  ;;  %v11395_v61 = vpack.c.bf16 %v3590_v24, %v3586_v54  ;;  %v12962_v58 = vld [vmem:[#allocation92_spill] sm:$0xff]  ;;  %v12963_v54 = vld [vmem:[#allocation89_spill] sm:$0xff]  ;;  %v12966_v37 = vld [vmem:[#allocation94_spill] sm:$0xff] }
 0x5b1   : > { %v3312_v11 = vpop.f32.mrf.mxu0  ;;  %v3595_v45 = vpop.f32.mrf.mxu1  ;;  %v12965_v62 = vld [vmem:[#allocation93_spill] sm:$0xff] }
 0x5b2   : > { %v11389_v0 = vpack.c.bf16 %v3309_v29, %v3305_v7  ;;  %v11391_v55 = vpack.c.bf16 %v3592_v13, %v3588_v19  ;;  %12959 = vst [vmem:[#allocation32_spill] sm:$0xff] %v11393_v35  ;;  %12960 = vst [vmem:[#allocation39_spill] sm:$0xff] %v11395_v61  ;;  %v3313_v41 = vadd.f32 %v3312_v11, %v12967_v34  ;;  %v12979_v34 = vld [vmem:[#allocation95_spill] sm:$0xff] }
 0x5b3   : > { %v3314_v1 = vpop.f32.mrf.mxu0  ;;  %v3597_v14 = vpop.f32.mrf.mxu1 }
 0x5b4   : > { %12957 = vst [vmem:[#allocation41_spill] sm:$0xff] %v11389_v0  ;;  %12958 = vst [vmem:[#allocation15_spill] sm:$0xff] %v11391_v55  ;;  %4623 = vmatprep.mubr.bf16.mxu0 %v11389_v0  ;;  %4906 = vmatprep.mubr.bf16.mxu1 %v11391_v55  ;;  %v3315_v24 = vadd.f32 %v3314_v1, %v12963_v54  ;;  %v3598_v19 = vadd.f32 %v3597_v14, %v12964_v26  ;;  %v12976_v26 = vld [vmem:[#allocation98_spill] sm:$0xff] }
 0x5b5   : > { %v3316_v16 = vpop.f32.mrf.mxu0  ;;  %v3599_v31 = vpop.f32.mrf.mxu1  ;;  %4624 = vmatmul.mubr.bf16.gmra.mxu0 %v11393_v35  ;;  %4907 = vmatmul.mubr.bf16.gmra.mxu1 %v11395_v61  ;;  %v3596_v35 = vadd.f32 %v3595_v45, %v12968_v47  ;;  %v12973_v45 = vld [vmem:[#allocation99_spill] sm:$0xff]  ;;  %v12980_v47 = vld [vmem:[#allocation96_spill] sm:$0xff] }
 0x5b6   : > { %v3317_v50 = vadd.f32 %v3316_v16, %v12961_v42  ;;  %v3600_v12 = vadd.f32 %v3599_v31, %v12962_v58 }
 0x5b7   : > { %v3318_v23 = vpop.f32.mrf.mxu0  ;;  %v3601_v7 = vpop.f32.mrf.mxu1 }
 0x5b8   : > { %v3319_v29 = vadd.f32 %v3318_v23, %v12965_v62  ;;  %v3602_v13 = vadd.f32 %v3601_v7, %v12966_v37  ;;  %v11413_v31 = vpack.c.bf16 %v3317_v50, %v3313_v41  ;;  %v11415_v42 = vpack.c.bf16 %v3600_v12, %v3596_v35  ;;  %v12974_v7 = vld [vmem:[#allocation100_spill] sm:$0xff]  ;;  %v12975_v35 = vld [vmem:[#allocation97_spill] sm:$0xff]  ;;  %v12978_v37 = vld [vmem:[#allocation102_spill] sm:$0xff] }
 0x5b9   : > { %v3322_v55 = vpop.f32.mrf.mxu0  ;;  %v3605_v61 = vpop.f32.mrf.mxu1  ;;  %v12977_v62 = vld [vmem:[#allocation101_spill] sm:$0xff] }
 0x5ba   : > { %v11409_v0 = vpack.c.bf16 %v3319_v29, %v3315_v24  ;;  %v11411_v16 = vpack.c.bf16 %v3602_v13, %v3598_v19  ;;  %12971 = vst [vmem:[#allocation25_spill] sm:$0xff] %v11413_v31  ;;  %12972 = vst [vmem:[#allocation26_spill] sm:$0xff] %v11415_v42  ;;  %v3323_v41 = vadd.f32 %v3322_v55, %v12979_v34  ;;  %v12991_v34 = vld [vmem:[#allocation103_spill] sm:$0xff] }
 0x5bb   : > { %v3324_v1 = vpop.f32.mrf.mxu0  ;;  %v3607_v14 = vpop.f32.mrf.mxu1 }
 0x5bc   : > { %12969 = vst [vmem:[#allocation43_spill] sm:$0xff] %v11409_v0  ;;  %12970 = vst [vmem:[#allocation45_spill] sm:$0xff] %v11411_v16  ;;  %4633 = vmatprep.mubr.bf16.mxu0 %v11409_v0  ;;  %4916 = vmatprep.mubr.bf16.mxu1 %v11411_v16  ;;  %v3325_v12 = vadd.f32 %v3324_v1, %v12975_v35  ;;  %v3608_v19 = vadd.f32 %v3607_v14, %v12976_v26  ;;  %v12988_v26 = vld [vmem:[#allocation106_spill] sm:$0xff] }
 0x5bd   : > { %v3326_v58 = vpop.f32.mrf.mxu0  ;;  %v3609_v11 = vpop.f32.mrf.mxu1  ;;  %4634 = vmatmul.mubr.bf16.gmra.mxu0 %v11413_v31  ;;  %4917 = vmatmul.mubr.bf16.gmra.mxu1 %v11415_v42  ;;  %v3606_v31 = vadd.f32 %v3605_v61, %v12980_v47  ;;  %v12985_v61 = vld [vmem:[#allocation107_spill] sm:$0xff]  ;;  %v12992_v47 = vld [vmem:[#allocation104_spill] sm:$0xff] }
 0x5be   : > { %v3327_v23 = vadd.f32 %v3326_v58, %v12973_v45  ;;  %v3610_v54 = vadd.f32 %v3609_v11, %v12974_v7 }
 0x5bf   : > { %v3328_v50 = vpop.f32.mrf.mxu0  ;;  %v3611_v24 = vpop.f32.mrf.mxu1 }
 0x5c0   : > { %v3329_v29 = vadd.f32 %v3328_v50, %v12977_v62  ;;  %v3612_v13 = vadd.f32 %v3611_v24, %v12978_v37  ;;  %v11433_v11 = vpack.c.bf16 %v3327_v23, %v3323_v41  ;;  %v11435_v45 = vpack.c.bf16 %v3610_v54, %v3606_v31  ;;  %v12986_v24 = vld [vmem:[#allocation108_spill] sm:$0xff]  ;;  %v12987_v31 = vld [vmem:[#allocation105_spill] sm:$0xff]  ;;  %v12990_v37 = vld [vmem:[#allocation110_spill] sm:$0xff] }
 0x5c1   : > { %v3332_v16 = vpop.f32.mrf.mxu0  ;;  %v3615_v42 = vpop.f32.mrf.mxu1  ;;  %v12989_v62 = vld [vmem:[#allocation109_spill] sm:$0xff] }
 0x5c2   : > { %v11429_v0 = vpack.c.bf16 %v3329_v29, %v3325_v12  ;;  %v11431_v58 = vpack.c.bf16 %v3612_v13, %v3608_v19  ;;  %12983 = vst [vmem:[#allocation50_spill] sm:$0xff] %v11433_v11  ;;  %12984 = vst [vmem:[#allocation33_spill] sm:$0xff] %v11435_v45  ;;  %v3333_v41 = vadd.f32 %v3332_v16, %v12991_v34  ;;  %v13003_v34 = vld [vmem:[#allocation111_spill] sm:$0xff] }
 0x5c3   : > { %v3334_v1 = vpop.f32.mrf.mxu0  ;;  %v3617_v14 = vpop.f32.mrf.mxu1 }
 0x5c4   : > { %12981 = vst [vmem:[#allocation51_spill] sm:$0xff] %v11429_v0  ;;  %12982 = vst [vmem:[#allocation16_spill] sm:$0xff] %v11431_v58  ;;  %4643 = vmatprep.mubr.bf16.mxu0 %v11429_v0  ;;  %4926 = vmatprep.mubr.bf16.mxu1 %v11431_v58  ;;  %v3335_v54 = vadd.f32 %v3334_v1, %v12987_v31  ;;  %v3618_v19 = vadd.f32 %v3617_v14, %v12988_v26  ;;  %v13000_v26 = vld [vmem:[#allocation114_spill] sm:$0xff] }
 0x5c5   : > { %v3336_v7 = vpop.f32.mrf.mxu0  ;;  %v3619_v55 = vpop.f32.mrf.mxu1  ;;  %4644 = vmatmul.mubr.bf16.gmra.mxu0 %v11433_v11  ;;  %4927 = vmatmul.mubr.bf16.gmra.mxu1 %v11435_v45  ;;  %v3616_v11 = vadd.f32 %v3615_v42, %v12992_v47  ;;  %v12997_v42 = vld [vmem:[#allocation115_spill] sm:$0xff]  ;;  %v13004_v47 = vld [vmem:[#allocation112_spill] sm:$0xff] }
 0x5c6   : > { %v3337_v50 = vadd.f32 %v3336_v7, %v12985_v61  ;;  %v3620_v35 = vadd.f32 %v3619_v55, %v12986_v24 }
 0x5c7   : > { %v3338_v23 = vpop.f32.mrf.mxu0  ;;  %v3621_v12 = vpop.f32.mrf.mxu1 }
 0x5c8   : > { %v3339_v29 = vadd.f32 %v3338_v23, %v12989_v62  ;;  %v3622_v13 = vadd.f32 %v3621_v12, %v12990_v37  ;;  %v11453_v55 = vpack.c.bf16 %v3337_v50, %v3333_v41  ;;  %v11455_v61 = vpack.c.bf16 %v3620_v35, %v3616_v11  ;;  %v12998_v12 = vld [vmem:[#allocation116_spill] sm:$0xff]  ;;  %v12999_v11 = vld [vmem:[#allocation113_spill] sm:$0xff]  ;;  %v13002_v37 = vld [vmem:[#allocation118_spill] sm:$0xff] }
 0x5c9   : > { %v3342_v58 = vpop.f32.mrf.mxu0  ;;  %v3625_v45 = vpop.f32.mrf.mxu1  ;;  %v13001_v62 = vld [vmem:[#allocation117_spill] sm:$0xff] }
 0x5ca   : > { %v11449_v0 = vpack.c.bf16 %v3339_v29, %v3335_v54  ;;  %v11451_v7 = vpack.c.bf16 %v3622_v13, %v3618_v19  ;;  %12995 = vst [vmem:[#allocation47_spill] sm:$0xff] %v11453_v55  ;;  %12996 = vst [vmem:[#allocation49_spill] sm:$0xff] %v11455_v61  ;;  %v3343_v41 = vadd.f32 %v3342_v58, %v13003_v34  ;;  %v13015_v34 = vld [vmem:[#allocation119_spill] sm:$0xff] }
 0x5cb   : > { %v3344_v1 = vpop.f32.mrf.mxu0  ;;  %v3627_v14 = vpop.f32.mrf.mxu1 }
 0x5cc   : > { %12993 = vst [vmem:[#allocation34_spill] sm:$0xff] %v11449_v0  ;;  %12994 = vst [vmem:[#allocation52_spill] sm:$0xff] %v11451_v7  ;;  %4653 = vmatprep.mubr.bf16.mxu0 %v11449_v0  ;;  %4936 = vmatprep.mubr.bf16.mxu1 %v11451_v7  ;;  %v3345_v35 = vadd.f32 %v3344_v1, %v12999_v11  ;;  %v3628_v19 = vadd.f32 %v3627_v14, %v13000_v26  ;;  %v13012_v26 = vld [vmem:[#allocation122_spill] sm:$0xff] }
 0x5cd   : > { %v3346_v24 = vpop.f32.mrf.mxu0  ;;  %v3629_v16 = vpop.f32.mrf.mxu1  ;;  %4654 = vmatmul.mubr.bf16.gmra.mxu0 %v11453_v55  ;;  %4937 = vmatmul.mubr.bf16.gmra.mxu1 %v11455_v61  ;;  %v3626_v55 = vadd.f32 %v3625_v45, %v13004_v47  ;;  %v13009_v45 = vld [vmem:[#allocation123_spill] sm:$0xff]  ;;  %v13016_v47 = vld [vmem:[#allocation120_spill] sm:$0xff] }
 0x5ce   : > { %v3347_v23 = vadd.f32 %v3346_v24, %v12997_v42  ;;  %v3630_v31 = vadd.f32 %v3629_v16, %v12998_v12 }
 0x5cf   : > { %v3348_v50 = vpop.f32.mrf.mxu0  ;;  %v3631_v54 = vpop.f32.mrf.mxu1 }
 0x5d0   : > { %v3349_v29 = vadd.f32 %v3348_v50, %v13001_v62  ;;  %v3632_v13 = vadd.f32 %v3631_v54, %v13002_v37  ;;  %v11473_v16 = vpack.c.bf16 %v3347_v23, %v3343_v41  ;;  %v11475_v42 = vpack.c.bf16 %v3630_v31, %v3626_v55  ;;  %v13010_v54 = vld [vmem:[#allocation124_spill] sm:$0xff]  ;;  %v13011_v55 = vld [vmem:[#allocation121_spill] sm:$0xff]  ;;  %v13014_v37 = vld [vmem:[#allocation126_spill] sm:$0xff] }
 0x5d1   : > { %v3352_v7 = vpop.f32.mrf.mxu0  ;;  %v3635_v61 = vpop.f32.mrf.mxu1  ;;  %v13013_v62 = vld [vmem:[#allocation125_spill] sm:$0xff] }
 0x5d2   : > { %v11469_v0 = vpack.c.bf16 %v3349_v29, %v3345_v35  ;;  %v11471_v24 = vpack.c.bf16 %v3632_v13, %v3628_v19  ;;  %13007 = vst [vmem:[#allocation53_spill] sm:$0xff] %v11473_v16  ;;  %13008 = vst [vmem:[#allocation36_spill] sm:$0xff] %v11475_v42  ;;  %v3353_v41 = vadd.f32 %v3352_v7, %v13015_v34  ;;  %v13027_v34 = vld [vmem:[#allocation127_spill] sm:$0xff] }
 0x5d3   : > { %v3354_v1 = vpop.f32.mrf.mxu0  ;;  %v3637_v14 = vpop.f32.mrf.mxu1 }
 0x5d4   : > { %13005 = vst [vmem:[#allocation54_spill] sm:$0xff] %v11469_v0  ;;  %13006 = vst [vmem:[#allocation37_spill] sm:$0xff] %v11471_v24  ;;  %4663 = vmatprep.mubr.bf16.mxu0 %v11469_v0  ;;  %4946 = vmatprep.mubr.bf16.mxu1 %v11471_v24  ;;  %v3355_v31 = vadd.f32 %v3354_v1, %v13011_v55  ;;  %v3638_v19 = vadd.f32 %v3637_v14, %v13012_v26  ;;  %v13024_v26 = vld [vmem:[#allocation130_spill] sm:$0xff] }
 0x5d5   : > { %v3356_v12 = vpop.f32.mrf.mxu0  ;;  %v3639_v58 = vpop.f32.mrf.mxu1  ;;  %4664 = vmatmul.mubr.bf16.gmra.mxu0 %v11473_v16  ;;  %4947 = vmatmul.mubr.bf16.gmra.mxu1 %v11475_v42  ;;  %v3636_v16 = vadd.f32 %v3635_v61, %v13016_v47  ;;  %v13021_v61 = vld [vmem:[#allocation131_spill] sm:$0xff]  ;;  %v13028_v47 = vld [vmem:[#allocation128_spill] sm:$0xff] }
 0x5d6   : > { %v3357_v50 = vadd.f32 %v3356_v12, %v13009_v45  ;;  %v3640_v11 = vadd.f32 %v3639_v58, %v13010_v54 }
 0x5d7   : > { %v3358_v23 = vpop.f32.mrf.mxu0  ;;  %v3641_v35 = vpop.f32.mrf.mxu1 }
 0x5d8   : > { %v3359_v29 = vadd.f32 %v3358_v23, %v13013_v62  ;;  %v3642_v13 = vadd.f32 %v3641_v35, %v13014_v37  ;;  %v11493_v58 = vpack.c.bf16 %v3357_v50, %v3353_v41  ;;  %v11495_v45 = vpack.c.bf16 %v3640_v11, %v3636_v16  ;;  %v13022_v35 = vld [vmem:[#allocation132_spill] sm:$0xff]  ;;  %v13023_v16 = vld [vmem:[#allocation129_spill] sm:$0xff]  ;;  %v13026_v37 = vld [vmem:[#allocation134_spill] sm:$0xff] }
 0x5d9   : > { %v3362_v24 = vpop.f32.mrf.mxu0  ;;  %v3645_v42 = vpop.f32.mrf.mxu1  ;;  %v13025_v62 = vld [vmem:[#allocation133_spill] sm:$0xff] }
 0x5da   : > { %v11489_v0 = vpack.c.bf16 %v3359_v29, %v3355_v31  ;;  %v11491_v12 = vpack.c.bf16 %v3642_v13, %v3638_v19  ;;  %13019 = vst [vmem:[#allocation17_spill] sm:$0xff] %v11493_v58  ;;  %13020 = vst [vmem:[#allocation35_spill] sm:$0xff] %v11495_v45  ;;  %v3363_v41 = vadd.f32 %v3362_v24, %v13027_v34  ;;  %v13039_v34 = vld [vmem:[#allocation135_spill] sm:$0xff] }
 0x5db   : > { %v3364_v1 = vpop.f32.mrf.mxu0  ;;  %v3647_v14 = vpop.f32.mrf.mxu1 }
 0x5dc   : > { %13017 = vst [vmem:[#allocation38_spill] sm:$0xff] %v11489_v0  ;;  %13018 = vst [vmem:[#allocation55_spill] sm:$0xff] %v11491_v12  ;;  %4673 = vmatprep.mubr.bf16.mxu0 %v11489_v0  ;;  %4956 = vmatprep.mubr.bf16.mxu1 %v11491_v12  ;;  %v3365_v11 = vadd.f32 %v3364_v1, %v13023_v16  ;;  %v3648_v19 = vadd.f32 %v3647_v14, %v13024_v26  ;;  %v13036_v26 = vld [vmem:[#allocation138_spill] sm:$0xff] }
 0x5dd   : > { %v3366_v54 = vpop.f32.mrf.mxu0  ;;  %v3649_v7 = vpop.f32.mrf.mxu1  ;;  %4674 = vmatmul.mubr.bf16.gmra.mxu0 %v11493_v58  ;;  %4957 = vmatmul.mubr.bf16.gmra.mxu1 %v11495_v45  ;;  %v3646_v58 = vadd.f32 %v3645_v42, %v13028_v47  ;;  %v13033_v42 = vld [vmem:[#allocation139_spill] sm:$0xff]  ;;  %v13040_v47 = vld [vmem:[#allocation136_spill] sm:$0xff] }
 0x5de   : > { %v3367_v23 = vadd.f32 %v3366_v54, %v13021_v61  ;;  %v3650_v55 = vadd.f32 %v3649_v7, %v13022_v35 }
 0x5df   : > { %v3368_v50 = vpop.f32.mrf.mxu0  ;;  %v3651_v31 = vpop.f32.mrf.mxu1 }
 0x5e0   : > { %v3369_v29 = vadd.f32 %v3368_v50, %v13025_v62  ;;  %v3652_v13 = vadd.f32 %v3651_v31, %v13026_v37  ;;  %v11513_v7 = vpack.c.bf16 %v3367_v23, %v3363_v41  ;;  %v11515_v61 = vpack.c.bf16 %v3650_v55, %v3646_v58  ;;  %v13034_v31 = vld [vmem:[#allocation140_spill] sm:$0xff]  ;;  %v13035_v58 = vld [vmem:[#allocation137_spill] sm:$0xff]  ;;  %v13038_v37 = vld [vmem:[#allocation142_spill] sm:$0xff] }
 0x5e1   : > { %v3372_v12 = vpop.f32.mrf.mxu0  ;;  %v3655_v45 = vpop.f32.mrf.mxu1  ;;  %v13037_v62 = vld [vmem:[#allocation141_spill] sm:$0xff] }
 0x5e2   : > { %v11509_v0 = vpack.c.bf16 %v3369_v29, %v3365_v11  ;;  %v11511_v54 = vpack.c.bf16 %v3652_v13, %v3648_v19  ;;  %13031 = vst [vmem:[#allocation57_spill] sm:$0xff] %v11513_v7  ;;  %13032 = vst [vmem:[#allocation58_spill] sm:$0xff] %v11515_v61  ;;  %v3373_v41 = vadd.f32 %v3372_v12, %v13039_v34  ;;  %v13051_v34 = vld [vmem:[#allocation143_spill] sm:$0xff] }
 0x5e3   : > { %v3374_v1 = vpop.f32.mrf.mxu0  ;;  %v3657_v14 = vpop.f32.mrf.mxu1 }
 0x5e4   : > { %13029 = vst [vmem:[#allocation59_spill] sm:$0xff] %v11509_v0  ;;  %13030 = vst [vmem:[#allocation60_spill] sm:$0xff] %v11511_v54  ;;  %4683 = vmatprep.mubr.bf16.mxu0 %v11509_v0  ;;  %4966 = vmatprep.mubr.bf16.mxu1 %v11511_v54  ;;  %v3375_v55 = vadd.f32 %v3374_v1, %v13035_v58  ;;  %v3658_v19 = vadd.f32 %v3657_v14, %v13036_v26  ;;  %v13048_v26 = vld [vmem:[#allocation146_spill] sm:$0xff] }
 0x5e5   : > { %v3376_v35 = vpop.f32.mrf.mxu0  ;;  %v3659_v24 = vpop.f32.mrf.mxu1  ;;  %4684 = vmatmul.mubr.bf16.gmra.mxu0 %v11513_v7  ;;  %4967 = vmatmul.mubr.bf16.gmra.mxu1 %v11515_v61  ;;  %v3656_v7 = vadd.f32 %v3655_v45, %v13040_v47  ;;  %v13045_v45 = vld [vmem:[#allocation147_spill] sm:$0xff]  ;;  %v13052_v47 = vld [vmem:[#allocation144_spill] sm:$0xff] }
 0x5e6   : > { %v3377_v50 = vadd.f32 %v3376_v35, %v13033_v42  ;;  %v3660_v16 = vadd.f32 %v3659_v24, %v13034_v31 }
 0x5e7   : > { %v3378_v23 = vpop.f32.mrf.mxu0  ;;  %v3661_v11 = vpop.f32.mrf.mxu1 }
 0x5e8   : > { %v3379_v29 = vadd.f32 %v3378_v23, %v13037_v62  ;;  %v3662_v13 = vadd.f32 %v3661_v11, %v13038_v37  ;;  %v11533_v24 = vpack.c.bf16 %v3377_v50, %v3373_v41  ;;  %v11535_v42 = vpack.c.bf16 %v3660_v16, %v3656_v7  ;;  %v13046_v11 = vld [vmem:[#allocation148_spill] sm:$0xff]  ;;  %v13047_v7 = vld [vmem:[#allocation145_spill] sm:$0xff]  ;;  %v13050_v37 = vld [vmem:[#allocation150_spill] sm:$0xff] }
 0x5e9   : > { %v3382_v54 = vpop.f32.mrf.mxu0  ;;  %v3665_v61 = vpop.f32.mrf.mxu1  ;;  %v13049_v62 = vld [vmem:[#allocation149_spill] sm:$0xff] }
 0x5ea   : > { %v11529_v0 = vpack.c.bf16 %v3379_v29, %v3375_v55  ;;  %v11531_v35 = vpack.c.bf16 %v3662_v13, %v3658_v19  ;;  %13043 = vst [vmem:[#allocation11_spill] sm:$0xff] %v11533_v24  ;;  %13044 = vst [vmem:[#allocation56_spill] sm:$0xff] %v11535_v42  ;;  %v3383_v41 = vadd.f32 %v3382_v54, %v13051_v34  ;;  %v13063_v34 = vld [vmem:[#allocation151_spill] sm:$0xff] }
 0x5eb   : > { %v3384_v1 = vpop.f32.mrf.mxu0  ;;  %v3667_v14 = vpop.f32.mrf.mxu1 }
 0x5ec   : > { %13041 = vst [vmem:[#allocation61_spill] sm:$0xff] %v11529_v0  ;;  %13042 = vst [vmem:[#allocation62_spill] sm:$0xff] %v11531_v35  ;;  %4693 = vmatprep.mubr.bf16.mxu0 %v11529_v0  ;;  %4976 = vmatprep.mubr.bf16.mxu1 %v11531_v35  ;;  %v3385_v16 = vadd.f32 %v3384_v1, %v13047_v7  ;;  %v3668_v19 = vadd.f32 %v3667_v14, %v13048_v26  ;;  %v13060_v26 = vld [vmem:[#allocation154_spill] sm:$0xff] }
 0x5ed   : > { %v3386_v31 = vpop.f32.mrf.mxu0  ;;  %v3669_v12 = vpop.f32.mrf.mxu1  ;;  %4694 = vmatmul.mubr.bf16.gmra.mxu0 %v11533_v24  ;;  %4977 = vmatmul.mubr.bf16.gmra.mxu1 %v11535_v42  ;;  %v3666_v24 = vadd.f32 %v3665_v61, %v13052_v47  ;;  %v13057_v61 = vld [vmem:[#allocation155_spill] sm:$0xff]  ;;  %v13064_v47 = vld [vmem:[#allocation152_spill] sm:$0xff] }
 0x5ee   : > { %v3387_v23 = vadd.f32 %v3386_v31, %v13045_v45  ;;  %v3670_v58 = vadd.f32 %v3669_v12, %v13046_v11 }
 0x5ef   : > { %v3388_v50 = vpop.f32.mrf.mxu0  ;;  %v3671_v55 = vpop.f32.mrf.mxu1 }
 0x5f0   : > { %v3389_v29 = vadd.f32 %v3388_v50, %v13049_v62  ;;  %v3672_v13 = vadd.f32 %v3671_v55, %v13050_v37  ;;  %v11553_v12 = vpack.c.bf16 %v3387_v23, %v3383_v41  ;;  %v11555_v45 = vpack.c.bf16 %v3670_v58, %v3666_v24  ;;  %v13058_v55 = vld [vmem:[#allocation156_spill] sm:$0xff]  ;;  %v13059_v24 = vld [vmem:[#allocation153_spill] sm:$0xff]  ;;  %v13062_v37 = vld [vmem:[#allocation158_spill] sm:$0xff] }
 0x5f1   : > { %v3392_v35 = vpop.f32.mrf.mxu0  ;;  %v3675_v42 = vpop.f32.mrf.mxu1  ;;  %v13061_v62 = vld [vmem:[#allocation157_spill] sm:$0xff] }
 0x5f2   : > { %v11549_v0 = vpack.c.bf16 %v3389_v29, %v3385_v16  ;;  %v11551_v31 = vpack.c.bf16 %v3672_v13, %v3668_v19  ;;  %13055 = vst [vmem:[#allocation65_spill] sm:$0xff] %v11553_v12  ;;  %13056 = vst [vmem:[#allocation66_spill] sm:$0xff] %v11555_v45  ;;  %v3393_v41 = vadd.f32 %v3392_v35, %v13063_v34 }
 0x5f3   : > { %v3394_v1 = vpop.f32.mrf.mxu0  ;;  %v3677_v14 = vpop.f32.mrf.mxu1 }
 0x5f4   : > { %13053 = vst [vmem:[#allocation67_spill] sm:$0xff] %v11549_v0  ;;  %13054 = vst [vmem:[#allocation68_spill] sm:$0xff] %v11551_v31  ;;  %4703 = vmatprep.mubr.bf16.mxu0 %v11549_v0  ;;  %4986 = vmatprep.mubr.bf16.mxu1 %v11551_v31  ;;  %v3395_v58 = vadd.f32 %v3394_v1, %v13059_v24  ;;  %v3678_v19 = vadd.f32 %v3677_v14, %v13060_v26  ;;  %v13071_v24 = vld [vmem:[#allocation163_spill] sm:$0xff] }
 0x5f5   : > { %v3396_v11 = vpop.f32.mrf.mxu0  ;;  %v3679_v54 = vpop.f32.mrf.mxu1  ;;  %4704 = vmatmul.mubr.bf16.gmra.mxu0 %v11553_v12  ;;  %4987 = vmatmul.mubr.bf16.gmra.mxu1 %v11555_v45  ;;  %v3676_v12 = vadd.f32 %v3675_v42, %v13064_v47 }
 0x5f6   : > { %v3397_v50 = vadd.f32 %v3396_v11, %v13057_v61  ;;  %v3680_v7 = vadd.f32 %v3679_v54, %v13058_v55  ;;  %v13067_v54 = vlaneseq }
 0x5f7   : > { %v3398_v23 = vpop.f32.mrf.mxu0  ;;  %v3681_v16 = vpop.f32.mrf.mxu1 }
 0x5f8   : > { %v3399_v29 = vadd.f32 %v3398_v23, %v13061_v62  ;;  %v3682_v13 = vadd.f32 %v3681_v16, %v13062_v37  ;;  %v11574_v61 = vshrl.u32 %v13067_v54, 7  ;;  %v11576_v1 = vpack.c.bf16 %v3397_v50, %v3393_v41  ;;  %v13072_v50 = vld [vmem:[#allocation164_spill] sm:$0xff]  ;;  %v13075_v41 = vld [vmem:[#allocation165_spill] sm:$0xff]  ;;  %v13076_v54 = vld [vmem:[#allocation166_spill] sm:$0xff] }
 0x5f9   : > { %v3402_v31 = vpop.f32.mrf.mxu0  ;;  %v3685_v45 = vpop.f32.mrf.mxu1  ;;  %v11578_v14 = vpack.c.bf16 %v3680_v7, %v3676_v12 }
 0x5fa   : > { %v11569_v0 = vpack.c.bf16 %v3399_v29, %v3395_v58  ;;  %v11571_v11 = vpack.c.bf16 %v3682_v13, %v3678_v19  ;;  %13068 = vst [vmem:[#allocation63_spill] sm:$0xff] %v11574_v61  ;;  %13069 = vst [vmem:[#allocation64_spill] sm:$0xff] %v11576_v1  ;;  %v3926_v16 = vsub.s32 0, %v11574_v61  ;;  %v3922_v19 = vld [vmem:[%s12355_s5] sm:$0x7]  ;;  %v3930_v62 = vsub.s32 1, %v11574_v61 }
 0x5fb   : > { %13070 = vst [vmem:[#allocation75_spill] sm:$0xff] %v11578_v14  ;;  %v3404_v55 = vpop.f32.mrf.mxu0  ;;  %v3687_v23 = vpop.f32.mrf.mxu1  ;;  %v13073_v29 = vld [vmem:[#allocation161_spill] sm:$0xff]  ;;  %v13074_v13 = vld [vmem:[#allocation162_spill] sm:$0xff] }
 0x5fc   : > { %13065 = vst [vmem:[#allocation69_spill] sm:$0xff] %v11569_v0  ;;  %13066 = vst [vmem:[#allocation70_spill] sm:$0xff] %v11571_v11  ;;  %4713 = vmatprep.mubr.bf16.mxu0 %v11569_v0  ;;  %4996 = vmatprep.mubr.bf16.mxu1 %v11571_v11  ;;  %v3405_v37 = vadd.f32 %v3404_v55, %v13073_v29  ;;  %v3688_v34 = vadd.f32 %v3687_v23, %v13074_v13  ;;  %v8075_v13 = vld [vmem:[#allocation5 + $0x170] ss:$8 sps:$4 sm:$0xff]  }
 0x5fd   : > { %v3406_v35 = vpop.f32.mrf.mxu0  ;;  %v3689_v42 = vpop.f32.mrf.mxu1  ;;  %4714 = vmatmul.mubr.bf16.gmra.mxu0 %v11576_v1  ;;  %4997 = vmatmul.mubr.bf16.gmra.mxu1 %v11578_v14  ;;  %v13077_v1 = vld [vmem:[#allocation159_spill] sm:$0xff]  ;;  %v11601_v0 = vrot.slane %v3922_v19, %v3926_v16  ;;  %v11609_v55 = vrot.slane %v3922_v19, %v3930_v62 }
 0x5fe   : > { %v3407_v58 = vadd.f32 %v3406_v35, %v13071_v24  ;;  %v3690_v26 = vadd.f32 %v3689_v42, %v13072_v50  ;;  %v3403_v35 = vadd.f32 %v3402_v31, %v13077_v1  ;;  %v13078_v24 = vld [vmem:[#allocation160_spill] sm:$0xff] }
 0x5ff   : > { %v3408_v12 = vpop.f32.mrf.mxu0  ;;  %v3691_v7 = vpop.f32.mrf.mxu1  ;;  %v3686_v42 = vadd.f32 %v3685_v45, %v13078_v24 }
 0x600   : > { %v3409_v47 = vadd.f32 %v3408_v12, %v13075_v41  ;;  %v3692_v14 = vadd.f32 %v3691_v7, %v13076_v54  ;;  %v11603_v5 = vpack.c.bf16 %v3407_v58, %v3403_v35 }
 0x601   : > { %v11605_v61 = vpack.c.bf16 %v3690_v26, %v3686_v42 }
 0x602   : > { %v11597_v50 = vpack.c.bf16 %v3409_v47, %v3405_v37  ;;  %v11599_v11 = vpack.c.bf16 %v3692_v14, %v3688_v34  ;;  %v8072_v37 = vld [vmem:[#allocation5 + $0x70] ss:$8 sps:$4 sm:$0xff]   ;;  %v8086_v47 = vld [vmem:[#allocation5 + $0x164] ss:$8 sps:$4 sm:$0xff]  }
 0x604   : > { %4723 = vmatprep.mubr.bf16.mxu0 %v11597_v50  ;;  %5006 = vmatprep.mubr.bf16.mxu1 %v11599_v11 }
 0x605   : > { %v4485_v23 = vpop.f32.mrf.mxu0  ;;  %4724 = vmatmul.mubr.bf16.gmra.mxu0 %v11603_v5  ;;  %v4768_v31 = vpop.f32.mrf.mxu1  ;;  %5007 = vmatmul.mubr.bf16.gmra.mxu1 %v11605_v61 }
 0x606   : > { %v4486_v45 = vadd.f32 %v4485_v23, %v11601_v0  ;;  %5049 = vmatprep.mubr.bf16.mxu0 %v10983_v8  ;;  %5282 = vmatprep.mubr.bf16.mxu1 %v10985_v3  ;;  %v8080_v8 = vld [vmem:[#allocation5 + $0x64] ss:$8 sps:$4 sm:$0xff]  }
 0x607   : > { %v4487_v1 = vpop.f32.mrf.mxu0  ;;  %v4770_v14 = vpop.f32.mrf.mxu1 }
 0x608   : > { %v4769_v16 = vadd.f32 %v4768_v31, %v4486_v45  ;;  %v4488_v58 = vadd.f32 %v4487_v1, %v11609_v55 }
 0x609   : > { %v4489_v26 = vpop.f32.mrf.mxu0  ;;  %v4772_v12 = vpop.f32.mrf.mxu1 }
 0x60a   : > { %v4771_v7 = vadd.f32 %v4770_v14, %v4488_v58  ;;  %v4490_v19 = vadd.f32 %v4489_v26, %v11601_v0  ;;  %v5483_v35 = vmax.f32 %v4769_v16, 0.0  ;;  %v8078_v14 = vld [vmem:[#allocation5 + $0x60] ss:$8 sps:$4 sm:$0xff]  }
 0x60b   : > { %v4491_v62 = vpop.f32.mrf.mxu0  ;;  %v4774_v29 = vpop.f32.mrf.mxu1  ;;  %v8084_v58 = vld [vmem:[#allocation5 + $0x160] ss:$8 sps:$4 sm:$0xff]  }
 0x60c   : > { %v4773_v34 = vadd.f32 %v4772_v12, %v4490_v19  ;;  %v4492_v41 = vadd.f32 %v4491_v62, %v11609_v55  ;;  %v5484_v31 = vmax.f32 %v4771_v7, 0.0  ;;  %v8083_v12 = vld [vmem:[#allocation5 + $0x54] ss:$8 sps:$4 sm:$0xff]  }
 0x60d   : > { %v4495_v3 = vpop.f32.mrf.mxu0  ;;  %v4778_v54 = vpop.f32.mrf.mxu1  ;;  %5050 = vmatmul.mubr.bf16.vlgmr.msra.gmra.mxu0 %v10993_v46  ;;  %5283 = vmatmul.mubr.bf16.vlgmr.msra.gmra.mxu1 %v10995_v43  ;;  %v8095_v19 = vld [vmem:[#allocation5 + $0x154] ss:$8 sps:$4 sm:$0xff]  }
 0x60e   : > { %v5486_v24 = vmax.f32 %v4773_v34, 0.0  ;;  %v4775_v42 = vadd.f32 %v4774_v29, %v4492_v41  ;;  %v4496_v23 = vadd.f32 %v4495_v3, %v11601_v0  ;;  %5057 = vmatprep.mubr.bf16.mxu0 %v11017_v10  ;;  %5290 = vmatprep.mubr.bf16.mxu1 %v11019_v15  ;;  %v8081_v34 = vld [vmem:[#allocation5 + $0x50] ss:$8 sps:$4 sm:$0xff]  }
 0x60f   : > { %v4497_v45 = vpop.f32.mrf.mxu0  ;;  %v4780_v1 = vpop.f32.mrf.mxu1  ;;  %5997 = vmatpush1.bf16.msra.mxu0 %v8072_v37  ;;  %6280 = vmatpush1.bf16.msra.mxu1 %v8075_v13  ;;  %v8093_v41 = vld [vmem:[#allocation5 + $0x150] ss:$8 sps:$4 sm:$0xff]  }
 0x610   : > { %v11624_v26 = vpack.c.bf16 %v5486_v24, %v5483_v35  ;;  %v5487_v46 = vmax.f32 %v4775_v42, 0.0  ;;  %v4779_v43 = vadd.f32 %v4778_v54, %v4496_v23  ;;  %v4498_v16 = vadd.f32 %v4497_v45, %v11609_v55  ;;  %5998 = vmatprep.subr.bf16.mxu0 %v8080_v8  ;;  %6281 = vmatprep.subr.bf16.mxu1 %v8086_v47  ;;  %v8089_v8 = vld [vmem:[#allocation5 + $0x44] ss:$8 sps:$4 sm:$0xff]  }
 0x611   : > { %v4499_v10 = vpop.f32.mrf.mxu0  ;;  %v4782_v62 = vpop.f32.mrf.mxu1  ;;  %v8104_v47 = vld [vmem:[#allocation5 + $0x144] ss:$8 sps:$4 sm:$0xff]  }
 0x612   : > { %v4781_v15 = vadd.f32 %v4780_v1, %v4498_v16  ;;  %v4500_v7 = vadd.f32 %v4499_v10, %v11601_v0  ;;  %v11628_v29 = vpack.c.bf16 %v5487_v46, %v5484_v31  ;;  %v5489_v42 = vmax.f32 %v4779_v43, 0.0  ;;  %v8087_v46 = vld [vmem:[#allocation5 + $0x40] ss:$8 sps:$4 sm:$0xff]   ;;  %v8113_v10 = vld [vmem:[#allocation5 + $0x134] ss:$8 sps:$4 sm:$0xff]  }
 0x613   : > { %v4501_v37 = vpop.f32.mrf.mxu0  ;;  %v4784_v13 = vpop.f32.mrf.mxu1  ;;  %5999 = vmatpush1.bf16.msra.mxu0 %v8078_v14  ;;  %6282 = vmatpush1.bf16.msra.mxu1 %v8084_v58  ;;  %v8102_v16 = vld [vmem:[#allocation5 + $0x140] ss:$8 sps:$4 sm:$0xff]  }
 0x614   : > { %v4783_v3 = vadd.f32 %v4782_v62, %v4500_v7  ;;  %v4502_v54 = vadd.f32 %v4501_v37, %v11609_v55  ;;  %6000 = vmatprep.subr.bf16.mxu0 %v8083_v12  ;;  %6283 = vmatprep.subr.bf16.mxu1 %v8095_v19  ;;  %v5490_v1 = vmax.f32 %v4781_v15, 0.0  ;;  %v8092_v19 = vld [vmem:[#allocation5 + $0x34] ss:$8 sps:$4 sm:$0xff]  }
 0x615   : > { %v4505_v35 = vpop.f32.mrf.mxu0  ;;  %v4788_v24 = vpop.f32.mrf.mxu1  ;;  %5058 = vmatmul.mubr.bf16.gmra.mxu0 %v11024_v25  ;;  %5291 = vmatmul.mubr.bf16.gmra.mxu1 %v11026_v27 }
 0x616   : > { %v5492_v23 = vmax.f32 %v4783_v3, 0.0  ;;  %v4785_v31 = vadd.f32 %v4784_v13, %v4502_v54  ;;  %v4506_v45 = vadd.f32 %v4505_v35, %v11601_v0  ;;  %5065 = vmatprep.mubr.bf16.mxu0 %v11053_v52  ;;  %5298 = vmatprep.mubr.bf16.mxu1 %v11055_v63 }
 0x617   : > { %v4507_v14 = vpop.f32.mrf.mxu0  ;;  %v4790_v58 = vpop.f32.mrf.mxu1  ;;  %6001 = vmatpush1.bf16.msra.mxu0 %v8081_v34  ;;  %6284 = vmatpush1.bf16.msra.mxu1 %v8093_v41  ;;  %v8090_v34 = vld [vmem:[#allocation5 + $0x30] ss:$8 sps:$4 sm:$0xff]  }
 0x618   : > { %v11636_v12 = vpack.c.bf16 %v5492_v23, %v5489_v42  ;;  %v5493_v25 = vmax.f32 %v4785_v31, 0.0  ;;  %v4789_v27 = vadd.f32 %v4788_v24, %v4506_v45  ;;  %v4508_v43 = vadd.f32 %v4507_v14, %v11609_v55  ;;  %6002 = vmatprep.subr.bf16.mxu0 %v8089_v8  ;;  %6285 = vmatprep.subr.bf16.mxu1 %v8104_v47  ;;  %v8111_v41 = vld [vmem:[#allocation5 + $0x130] ss:$8 sps:$4 sm:$0xff]   ;;  %v8098_v8 = vld [vmem:[#allocation5 + $0x24] ss:$8 sps:$4 sm:$0xff]  }
 0x619   : > { %v4509_v52 = vpop.f32.mrf.mxu0  ;;  %v4792_v62 = vpop.f32.mrf.mxu1  ;;  %v8122_v47 = vld [vmem:[#allocation5 + $0x124] ss:$8 sps:$4 sm:$0xff]  }
 0x61a   : > { %v4791_v63 = vadd.f32 %v4790_v58, %v4508_v43  ;;  %v4510_v15 = vadd.f32 %v4509_v52, %v11601_v0  ;;  %v11640_v7 = vpack.c.bf16 %v5493_v25, %v5490_v1  ;;  %v5495_v42 = vmax.f32 %v4789_v27, 0.0  ;;  %v8101_v43 = vld [vmem:[#allocation5 + $0x14] ss:$8 sps:$4 sm:$0xff]  }
 0x61b   : > { %v4511_v37 = vpop.f32.mrf.mxu0  ;;  %v4794_v13 = vpop.f32.mrf.mxu1  ;;  %6003 = vmatpush1.bf16.msra.mxu0 %v8087_v46  ;;  %6286 = vmatpush1.bf16.msra.mxu1 %v8102_v16  ;;  %v8096_v46 = vld [vmem:[#allocation5 + $0x20] ss:$8 sps:$4 sm:$0xff]  }
 0x61c   : > { %v4793_v3 = vadd.f32 %v4792_v62, %v4510_v15  ;;  %v4512_v54 = vadd.f32 %v4511_v37, %v11609_v55  ;;  %6004 = vmatprep.subr.bf16.mxu0 %v8092_v19  ;;  %6287 = vmatprep.subr.bf16.mxu1 %v8113_v10  ;;  %v5496_v1 = vmax.f32 %v4791_v63, 0.0  ;;  %v8120_v16 = vld [vmem:[#allocation5 + $0x120] ss:$8 sps:$4 sm:$0xff]   ;;  %v8099_v15 = vld [vmem:[#allocation5 + $0x10] ss:$8 sps:$4 sm:$0xff]  }
 0x61d   : > { %v4515_v35 = vpop.f32.mrf.mxu0  ;;  %v4798_v24 = vpop.f32.mrf.mxu1  ;;  %5066 = vmatmul.mubr.bf16.gmra.mxu0 %v11060_v32  ;;  %5299 = vmatmul.mubr.bf16.gmra.mxu1 %v11062_v53 }
 0x61e   : > { %v5498_v23 = vmax.f32 %v4793_v3, 0.0  ;;  %v4795_v31 = vadd.f32 %v4794_v13, %v4512_v54  ;;  %v4516_v45 = vadd.f32 %v4515_v35, %v11601_v0  ;;  %5073 = vmatprep.mubr.bf16.mxu0 %v11089_v44  ;;  %5306 = vmatprep.mubr.bf16.mxu1 %v11091_v30 }
 0x61f   : > { %v4517_v14 = vpop.f32.mrf.mxu0  ;;  %v4800_v58 = vpop.f32.mrf.mxu1  ;;  %6005 = vmatpush1.bf16.msra.mxu0 %v8090_v34  ;;  %6288 = vmatpush1.bf16.msra.mxu1 %v8111_v41  ;;  %v8107_v34 = vld [vmem:[#allocation5 + $0x4] ss:$8 sps:$4 sm:$0xff]  }
 0x620   : > { %v11648_v25 = vpack.c.bf16 %v5498_v23, %v5495_v42  ;;  %v5499_v32 = vmax.f32 %v4795_v31, 0.0  ;;  %v4799_v53 = vadd.f32 %v4798_v24, %v4516_v45  ;;  %v4518_v27 = vadd.f32 %v4517_v14, %v11609_v55  ;;  %6006 = vmatprep.subr.bf16.mxu0 %v8098_v8  ;;  %6289 = vmatprep.subr.bf16.mxu1 %v8122_v47  ;;  %v8105_v31 = vld [vmem:[#allocation5] ss:$8 sps:$4 sm:$0xff]   ;;  %v8110_v14 = vld [vmem:[#allocation5 + $0xf4] ss:$8 sps:$4 sm:$0xff]  }
 0x621   : > { %v4519_v19 = vpop.f32.mrf.mxu0  ;;  %v4802_v44 = vpop.f32.mrf.mxu1 }
 0x622   : > { %v4801_v10 = vadd.f32 %v4800_v58, %v4518_v27  ;;  %v4520_v30 = vadd.f32 %v4519_v19, %v11601_v0  ;;  %v11652_v52 = vpack.c.bf16 %v5499_v32, %v5496_v1  ;;  %v5501_v54 = vmax.f32 %v4799_v53, 0.0  ;;  %v8108_v27 = vld [vmem:[#allocation5 + $0xf0] ss:$8 sps:$4 sm:$0xff]  }
 0x623   : > { %v4521_v62 = vpop.f32.mrf.mxu0  ;;  %v4804_v63 = vpop.f32.mrf.mxu1  ;;  %6007 = vmatpush1.bf16.msra.mxu0 %v8096_v46  ;;  %6290 = vmatpush1.bf16.msra.mxu1 %v8120_v16 }
 0x624   : > { %v4803_v37 = vadd.f32 %v4802_v44, %v4520_v30  ;;  %v4522_v13 = vadd.f32 %v4521_v62, %v11609_v55  ;;  %6008 = vmatprep.subr.bf16.mxu0 %v8101_v43  ;;  %v5502_v24 = vmax.f32 %v4801_v10, 0.0  ;;  %v8116_v44 = vld [vmem:[#allocation5 + $0xe4] ss:$8 sps:$4 sm:$0xff]   ;;  %v8129_v62 = vld [vmem:[#allocation5 + $0x110] ss:$8 sps:$4 sm:$0xff]  }
 0x625   : > { %v4525_v41 = vpop.f32.mrf.mxu0  ;;  %v4808_v3 = vpop.f32.mrf.mxu1  ;;  %5074 = vmatmul.mubr.bf16.gmra.mxu0 %v11096_v40  ;;  %5307 = vmatmul.mubr.bf16.gmra.mxu1 %v11098_v49 }
 0x626   : > { %v5504_v8 = vmax.f32 %v4803_v37, 0.0  ;;  %v4805_v47 = vadd.f32 %v4804_v63, %v4522_v13  ;;  %v4526_v35 = vadd.f32 %v4525_v41, %v11601_v0  ;;  %5081 = vmatprep.mubr.bf16.mxu0 %v11125_v4  ;;  %5314 = vmatprep.mubr.bf16.mxu1 %v11127_v59  ;;  %v8131_v63 = vld [vmem:[#allocation5 + $0x114] ss:$8 sps:$4 sm:$0xff]  }
 0x627   : > { %v4527_v42 = vpop.f32.mrf.mxu0  ;;  %v4810_v23 = vpop.f32.mrf.mxu1  ;;  %6009 = vmatpush1.bf16.msra.mxu0 %v8099_v15  ;;  %6291 = vmatprep.subr.bf16.mxu1 %v8131_v63 }
 0x628   : > { %v11660_v45 = vpack.c.bf16 %v5504_v8, %v5501_v54  ;;  %v5505_v1 = vmax.f32 %v4805_v47, 0.0  ;;  %v4809_v40 = vadd.f32 %v4808_v3, %v4526_v35  ;;  %v4528_v49 = vadd.f32 %v4527_v42, %v11609_v55  ;;  %6010 = vmatprep.subr.bf16.mxu0 %v8107_v34  ;;  %v8114_v8 = vld [vmem:[#allocation5 + $0xe0] ss:$8 sps:$4 sm:$0xff]   ;;  %6292 = vmatpush1.bf16.msra.mxu1 %v8129_v62 }
 0x629   : > { %v4529_v58 = vpop.f32.mrf.mxu0  ;;  %v4812_v46 = vpop.f32.mrf.mxu1 }
 0x62a   : > { %v4811_v16 = vadd.f32 %v4810_v23, %v4528_v49  ;;  %v4530_v4 = vadd.f32 %v4529_v58, %v11601_v0  ;;  %v11664_v32 = vpack.c.bf16 %v5505_v1, %v5502_v24  ;;  %v5507_v15 = vmax.f32 %v4809_v40, 0.0  ;;  %v8119_v24 = vld [vmem:[#allocation5 + $0xd4] ss:$8 sps:$4 sm:$0xff]   ;;  %v8117_v49 = vld [vmem:[#allocation5 + $0xd0] ss:$8 sps:$4 sm:$0xff]  }
 0x62b   : > { %v4531_v59 = vpop.f32.mrf.mxu0  ;;  %v4814_v53 = vpop.f32.mrf.mxu1  ;;  %6011 = vmatpush1.bf16.msra.mxu0 %v8105_v31 }
 0x62c   : > { %v4813_v43 = vadd.f32 %v4812_v46, %v4530_v4  ;;  %v4532_v19 = vadd.f32 %v4531_v59, %v11609_v55  ;;  %6012 = vmatprep.subr.bf16.mxu0 %v8110_v14  ;;  %v5508_v41 = vmax.f32 %v4811_v16, 0.0  ;;  %v8125_v46 = vld [vmem:[#allocation5 + $0xc4] ss:$8 sps:$4 sm:$0xff]  }
 0x62d   : > { %v4535_v10 = vpop.f32.mrf.mxu0  ;;  %v4818_v30 = vpop.f32.mrf.mxu1  ;;  %5082 = vmatmul.mubr.bf16.gmra.mxu0 %v11132_v60  ;;  %5315 = vmatmul.mubr.bf16.gmra.mxu1 %v11134_v28 }
 0x62e   : > { %v5510_v37 = vmax.f32 %v4813_v43, 0.0  ;;  %v4815_v13 = vadd.f32 %v4814_v53, %v4532_v19  ;;  %v4536_v34 = vadd.f32 %v4535_v10, %v11601_v0  ;;  %5089 = vmatprep.mubr.bf16.mxu0 %v11161_v57  ;;  %5322 = vmatprep.mubr.bf16.mxu1 %v11163_v33 }
 0x62f   : > { %v4537_v3 = vpop.f32.mrf.mxu0  ;;  %v4820_v54 = vpop.f32.mrf.mxu1  ;;  %6013 = vmatpush2.bf16.msra.mxu0 %v8108_v27 }
 0x630   : > { %v11672_v60 = vpack.c.bf16 %v5510_v37, %v5507_v15  ;;  %v5511_v28 = vmax.f32 %v4815_v13, 0.0  ;;  %v4819_v47 = vadd.f32 %v4818_v30, %v4536_v34  ;;  %v4538_v35 = vadd.f32 %v4537_v3, %v11609_v55  ;;  %6014 = vmatprep.subr.bf16.mxu0 %v8116_v44  ;;  %v8123_v30 = vld [vmem:[#allocation5 + $0xc0] ss:$8 sps:$4 sm:$0xff]   ;;  %v8128_v15 = vld [vmem:[#allocation5 + $0xb4] ss:$8 sps:$4 sm:$0xff]  }
 0x631   : > { %v4539_v42 = vpop.f32.mrf.mxu0  ;;  %v4822_v23 = vpop.f32.mrf.mxu1 }
 0x632   : > { %v4821_v57 = vadd.f32 %v4820_v54, %v4538_v35  ;;  %v4540_v33 = vadd.f32 %v4539_v42, %v11601_v0  ;;  %v11676_v31 = vpack.c.bf16 %v5511_v28, %v5508_v41  ;;  %v5513_v59 = vmax.f32 %v4819_v47, 0.0  ;;  %v8126_v54 = vld [vmem:[#allocation5 + $0xb0] ss:$8 sps:$4 sm:$0xff]   ;;  %v8134_v47 = vld [vmem:[#allocation5 + $0xa4] ss:$8 sps:$4 sm:$0xff]  }
 0x633   : > { %v4541_v1 = vpop.f32.mrf.mxu0  ;;  %v4824_v40 = vpop.f32.mrf.mxu1  ;;  %6015 = vmatpush2.bf16.msra.mxu0 %v8114_v8 }
 0x634   : > { %v4823_v14 = vadd.f32 %v4822_v23, %v4540_v33  ;;  %v4542_v58 = vadd.f32 %v4541_v1, %v11609_v55  ;;  %6016 = vmatprep.subr.bf16.mxu0 %v8119_v24  ;;  %v5514_v19 = vmax.f32 %v4821_v57, 0.0 }
 0x635   : > { %v4545_v16 = vpop.f32.mrf.mxu0  ;;  %v4828_v4 = vpop.f32.mrf.mxu1  ;;  %5090 = vmatmul.mubr.bf16.gmra.mxu0 %v11168_v36  ;;  %5323 = vmatmul.mubr.bf16.gmra.mxu1 %v11170_v51 }
 0x636   : > { %v5516_v53 = vmax.f32 %v4823_v14, 0.0  ;;  %v4825_v27 = vadd.f32 %v4824_v40, %v4542_v58  ;;  %v4546_v43 = vadd.f32 %v4545_v16, %v11601_v0  ;;  %5097 = vmatprep.mubr.bf16.mxu0 %v11197_v21  ;;  %5330 = vmatprep.mubr.bf16.mxu1 %v11199_v56  ;;  %v8132_v14 = vld [vmem:[#allocation5 + $0xa0] ss:$8 sps:$4 sm:$0xff]  }
 0x637   : > { %v4547_v44 = vpop.f32.mrf.mxu0  ;;  %v4830_v10 = vpop.f32.mrf.mxu1  ;;  %6017 = vmatpush2.bf16.msra.mxu0 %v8117_v49 }
 0x638   : > { %v11684_v62 = vpack.c.bf16 %v5516_v53, %v5513_v59  ;;  %v5517_v63 = vmax.f32 %v4825_v27, 0.0  ;;  %v4829_v36 = vadd.f32 %v4828_v4, %v4546_v43  ;;  %v4548_v51 = vadd.f32 %v4547_v44, %v11609_v55  ;;  %6018 = vmatprep.subr.bf16.mxu0 %v8125_v46  ;;  %v8135_v44 = vld [vmem:[#allocation5 + $0x90] ss:$8 sps:$4 sm:$0xff]  }
 0x639   : > { %v4549_v37 = vpop.f32.mrf.mxu0  ;;  %v4832_v13 = vpop.f32.mrf.mxu1 }
 0x63a   : > { %v4831_v34 = vadd.f32 %v4830_v10, %v4548_v51  ;;  %v4550_v21 = vadd.f32 %v4549_v37, %v11601_v0  ;;  %v11688_v41 = vpack.c.bf16 %v5517_v63, %v5514_v19  ;;  %v5519_v42 = vmax.f32 %v4829_v36, 0.0  ;;  %v8137_v10 = vld [vmem:[#allocation5 + $0x94] ss:$8 sps:$4 sm:$0xff]   ;;  %v8138_v36 = vld [vmem:[#allocation5 + $0x100] ss:$8 sps:$4 sm:$0xff]  }
 0x63b   : > { %v4551_v56 = vpop.f32.mrf.mxu0  ;;  %v4834_v3 = vpop.f32.mrf.mxu1  ;;  %6019 = vmatpush2.bf16.msra.mxu0 %v8123_v30  ;;  %v8140_v51 = vld [vmem:[#allocation5 + $0x104] ss:$8 sps:$4 sm:$0xff]  }
 0x63c   : > { %v4833_v8 = vadd.f32 %v4832_v13, %v4550_v21  ;;  %v4552_v28 = vadd.f32 %v4551_v56, %v11609_v55  ;;  %6020 = vmatprep.subr.bf16.mxu0 %v8128_v15  ;;  %v5520_v1 = vmax.f32 %v4831_v34, 0.0  ;;  %6293 = vmatprep.subr.bf16.mxu1 %v8140_v51  ;;  %v8141_v51 = vld [vmem:[#allocation5 + $0x80] ss:$8 sps:$4 sm:$0xff]  }
 0x63d   : > { %v4555_v35 = vpop.f32.mrf.mxu0  ;;  %v4838_v24 = vpop.f32.mrf.mxu1  ;;  %5098 = vmatmul.mubr.bf16.gmra.mxu0 %v11204_v17  ;;  %5331 = vmatmul.mubr.bf16.gmra.mxu1 %v11206_v38 }
 0x63e   : > { %v5522_v23 = vmax.f32 %v4833_v8, 0.0  ;;  %v4835_v57 = vadd.f32 %v4834_v3, %v4552_v28  ;;  %v4556_v33 = vadd.f32 %v4555_v35, %v11601_v0  ;;  %5105 = vmatprep.mubr.bf16.mxu0 %v11233_v6  ;;  %5338 = vmatprep.mubr.bf16.mxu1 %v11235_v39 }
 0x63f   : > { %v4557_v40 = vpop.f32.mrf.mxu0  ;;  %v4840_v49 = vpop.f32.mrf.mxu1  ;;  %6021 = vmatpush2.bf16.msra.mxu0 %v8126_v54  ;;  %6294 = vmatpush1.bf16.msra.mxu1 %v8138_v36 }
 0x640   : > { %v11696_v58 = vpack.c.bf16 %v5522_v23, %v5519_v42  ;;  %v5523_v46 = vmax.f32 %v4835_v57, 0.0  ;;  %v4839_v17 = vadd.f32 %v4838_v24, %v4556_v33  ;;  %v4558_v38 = vadd.f32 %v4557_v40, %v11609_v55  ;;  %6022 = vmatprep.subr.bf16.mxu0 %v8134_v47 }
 0x641   : > { %v4559_v16 = vpop.f32.mrf.mxu0  ;;  %v4842_v4 = vpop.f32.mrf.mxu1 }
 0x642   : > { %v4841_v59 = vadd.f32 %v4840_v49, %v4558_v38  ;;  %v4560_v53 = vadd.f32 %v4559_v16, %v11601_v0  ;;  %v11700_v6 = vpack.c.bf16 %v5523_v46, %v5520_v1  ;;  %v5525_v15 = vmax.f32 %v4839_v17, 0.0  ;;  %v13079_v17 = vld [vmem:[#allocation19_spill] sm:$0xff] }
 0x643   : > { %v4561_v39 = vpop.f32.mrf.mxu0  ;;  %v4844_v27 = vpop.f32.mrf.mxu1  ;;  %6023 = vmatpush2.bf16.msra.mxu0 %v8132_v14  ;;  %v13080_v38 = vld [vmem:[#allocation27_spill] sm:$0xff] }
 0x644   : > { %v4843_v43 = vadd.f32 %v4842_v4, %v4560_v53  ;;  %v4562_v19 = vadd.f32 %v4561_v39, %v11609_v55  ;;  %v5526_v21 = vmax.f32 %v4841_v59, 0.0  ;;  %6024 = vmatprep.subr.bf16.mxu0 %v8137_v10  ;;  %v8143_v10 = vld [vmem:[#allocation5 + $0x84] ss:$8 sps:$4 sm:$0xff]  }
 0x645   : > { %v4565_v30 = vpop.f32.mrf.mxu0  ;;  %v4848_v63 = vpop.f32.mrf.mxu1  ;;  %5106 = vmatmul.mubr.bf16.gmra.mxu0 %v11240_v18  ;;  %5339 = vmatmul.mubr.bf16.gmra.mxu1 %v11242_v9 }
 0x646   : > { %v5528_v37 = vmax.f32 %v4843_v43, 0.0  ;;  %v4845_v13 = vadd.f32 %v4844_v27, %v4562_v19  ;;  %v4566_v34 = vadd.f32 %v4565_v30, %v11601_v0  ;;  %5113 = vmatprep.mubr.bf16.mxu0 %v11263_v20  ;;  %5346 = vmatprep.mubr.bf16.mxu1 %v11265_v22 }
 0x647   : > { %v4567_v56 = vpop.f32.mrf.mxu0  ;;  %v4850_v3 = vpop.f32.mrf.mxu1  ;;  %6025 = vmatpush2.bf16.msra.mxu0 %v8135_v44 }
 0x648   : > { %v11708_v54 = vpack.c.bf16 %v5528_v37, %v5525_v15  ;;  %v5529_v18 = vmax.f32 %v4845_v13, 0.0  ;;  %v4849_v9 = vadd.f32 %v4848_v63, %v4566_v34  ;;  %v4568_v8 = vadd.f32 %v4567_v56, %v11609_v55  ;;  %6026 = vmatprep.subr.bf16.mxu0 %v8143_v10  ;;  %v13082_v56 = vld [vmem:[#allocation12_spill] sm:$0xff]  ;;  %v13087_v10 = vld [vmem:[#allocation13_spill] sm:$0xff] }
 0x649   : > { %v4569_v28 = vpop.f32.mrf.mxu0  ;;  %v4852_v47 = vpop.f32.mrf.mxu1 }
 0x64a   : > { %v4851_v35 = vadd.f32 %v4850_v3, %v4568_v8  ;;  %v4570_v20 = vadd.f32 %v4569_v28, %v11601_v0  ;;  %v11712_v24 = vpack.c.bf16 %v5529_v18, %v5526_v21  ;;  %v5531_v40 = vmax.f32 %v4849_v9, 0.0  ;;  %v13081_v21 = vld [vmem:[#allocation18_spill] sm:$0xff] }
 0x64b   : > { %v4571_v22 = vpop.f32.mrf.mxu0  ;;  %v4854_v42 = vpop.f32.mrf.mxu1  ;;  %v13083_v28 = vld [vmem:[#allocation30_spill] sm:$0xff]  ;;  %6027 = vmatpush2.bf16.msra.mxu0 %v8141_v51 }
 0x64c   : > { %v4853_v23 = vadd.f32 %v4852_v47, %v4570_v20  ;;  %v4572_v57 = vadd.f32 %v4571_v22, %v11609_v55  ;;  %v5532_v16 = vmax.f32 %v4851_v35, 0.0  ;;  %v13084_v47 = vld [vmem:[#allocation44_spill] sm:$0xff] }
 0x64d   : > { %v4575_v33 = vpop.f32.mrf.mxu0  ;;  %v4858_v1 = vpop.f32.mrf.mxu1  ;;  %5114 = vmatmul.mubr.bf16.gmra.mxu0 %v11273_v2  ;;  %5347 = vmatmul.mubr.bf16.gmra.mxu1 %v11275_v48 }
 0x64e   : > { %v5534_v49 = vmax.f32 %v4853_v23, 0.0  ;;  %v4855_v14 = vadd.f32 %v4854_v42, %v4572_v57  ;;  %v4576_v46 = vadd.f32 %v4575_v33, %v11601_v0  ;;  %5121 = vmatprep.mubr.bf16.mxu0 %v13079_v17  ;;  %5354 = vmatprep.mubr.bf16.mxu1 %v13080_v38 }
 0x64f   : > { %v4577_v4 = vpop.f32.mrf.mxu0  ;;  %v4860_v59 = vpop.f32.mrf.mxu1 }
 0x650   : > { %v11720_v53 = vpack.c.bf16 %v5534_v49, %v5531_v40  ;;  %v5535_v39 = vmax.f32 %v4855_v14, 0.0  ;;  %v4859_v27 = vadd.f32 %v4858_v1, %v4576_v46  ;;  %v4578_v2 = vadd.f32 %v4577_v4, %v11609_v55 }
 0x651   : > { %v4579_v43 = vpop.f32.mrf.mxu0  ;;  %v4862_v48 = vpop.f32.mrf.mxu1 }
 0x652   : > { %v4861_v19 = vadd.f32 %v4860_v59, %v4578_v2  ;;  %v4580_v44 = vadd.f32 %v4579_v43, %v11601_v0  ;;  %v11724_v30 = vpack.c.bf16 %v5535_v39, %v5532_v16  ;;  %v5537_v3 = vmax.f32 %v4859_v27, 0.0  ;;  %v13085_v27 = vld [vmem:[#allocation42_spill] sm:$0xff]  ;;  %v13086_v2 = vld [vmem:[#allocation29_spill] sm:$0xff] }
 0x653   : > { %v4581_v63 = vpop.f32.mrf.mxu0  ;;  %v4864_v36 = vpop.f32.mrf.mxu1 }
 0x654   : > { %v4863_v15 = vadd.f32 %v4862_v48, %v4580_v44  ;;  %v4582_v37 = vadd.f32 %v4581_v63, %v11609_v55  ;;  %v5538_v35 = vmax.f32 %v4861_v19, 0.0  ;;  %v13088_v63 = vld [vmem:[#allocation20_spill] sm:$0xff] }
 0x655   : > { %v4585_v13 = vpop.f32.mrf.mxu0  ;;  %v4868_v34 = vpop.f32.mrf.mxu1  ;;  %5122 = vmatmul.mubr.bf16.gmra.mxu0 %v13081_v21  ;;  %5355 = vmatmul.mubr.bf16.gmra.mxu1 %v13082_v56 }
 0x656   : > { %v5540_v18 = vmax.f32 %v4863_v15, 0.0  ;;  %v4865_v9 = vadd.f32 %v4864_v36, %v4582_v37  ;;  %v4586_v8 = vadd.f32 %v4585_v13, %v11601_v0  ;;  %5129 = vmatprep.mubr.bf16.mxu0 %v13083_v28  ;;  %5362 = vmatprep.mubr.bf16.mxu1 %v13084_v47 }
 0x657   : > { %v4587_v20 = vpop.f32.mrf.mxu0  ;;  %v4870_v22 = vpop.f32.mrf.mxu1 }
 0x658   : > { %v11732_v42 = vpack.c.bf16 %v5540_v18, %v5537_v3  ;;  %v5541_v23 = vmax.f32 %v4865_v9, 0.0  ;;  %v4869_v57 = vadd.f32 %v4868_v34, %v4586_v8  ;;  %v4588_v33 = vadd.f32 %v4587_v20, %v11609_v55 }
 0x659   : > { %v4589_v1 = vpop.f32.mrf.mxu0  ;;  %v4872_v40 = vpop.f32.mrf.mxu1 }
 0x65a   : > { %v4871_v49 = vadd.f32 %v4870_v22, %v4588_v33  ;;  %v4590_v14 = vadd.f32 %v4589_v1, %v11601_v0  ;;  %v11736_v46 = vpack.c.bf16 %v5541_v23, %v5538_v35  ;;  %v5543_v43 = vmax.f32 %v4869_v57, 0.0  ;;  %v13089_v57 = vld [vmem:[#allocation28_spill] sm:$0xff] }
 0x65b   : > { %v4591_v17 = vpop.f32.mrf.mxu0  ;;  %v4874_v38 = vpop.f32.mrf.mxu1  ;;  %v13090_v33 = vld [vmem:[#allocation40_spill] sm:$0xff] }
 0x65c   : > { %v4873_v16 = vadd.f32 %v4872_v40, %v4590_v14  ;;  %v4592_v4 = vadd.f32 %v4591_v17, %v11609_v55  ;;  %v5544_v36 = vmax.f32 %v4871_v49, 0.0  ;;  %v13091_v17 = vld [vmem:[#allocation22_spill] sm:$0xff] }
 0x65d   : > { %v4595_v59 = vpop.f32.mrf.mxu0  ;;  %v4878_v39 = vpop.f32.mrf.mxu1  ;;  %5130 = vmatmul.mubr.bf16.gmra.mxu0 %v13085_v27  ;;  %5363 = vmatmul.mubr.bf16.gmra.mxu1 %v13086_v2 }
 0x65e   : > { %v5546_v48 = vmax.f32 %v4873_v16, 0.0  ;;  %v4875_v19 = vadd.f32 %v4874_v38, %v4592_v4  ;;  %v4596_v44 = vadd.f32 %v4595_v59, %v11601_v0  ;;  %5137 = vmatprep.mubr.bf16.mxu0 %v13087_v10  ;;  %5370 = vmatprep.mubr.bf16.mxu1 %v13088_v63  ;;  %v13092_v38 = vld [vmem:[#allocation23_spill] sm:$0xff] }
 0x65f   : > { %v4597_v51 = vpop.f32.mrf.mxu0  ;;  %v4880_v15 = vpop.f32.mrf.mxu1 }
 0x660   : > { %v11744_v37 = vpack.c.bf16 %v5546_v48, %v5543_v43  ;;  %v5547_v13 = vmax.f32 %v4875_v19, 0.0  ;;  %v4879_v34 = vadd.f32 %v4878_v39, %v4596_v44  ;;  %v4598_v21 = vadd.f32 %v4597_v51, %v11609_v55 }
 0x661   : > { %v4599_v56 = vpop.f32.mrf.mxu0  ;;  %v4882_v3 = vpop.f32.mrf.mxu1 }
 0x662   : > { %v4881_v18 = vadd.f32 %v4880_v15, %v4598_v21  ;;  %v4600_v9 = vadd.f32 %v4599_v56, %v11601_v0  ;;  %v11748_v8 = vpack.c.bf16 %v5547_v13, %v5544_v36  ;;  %v5549_v1 = vmax.f32 %v4879_v34, 0.0  ;;  %v13093_v56 = vld [vmem:[#allocation21_spill] sm:$0xff] }
 0x663   : > { %v4601_v28 = vpop.f32.mrf.mxu0  ;;  %v4884_v47 = vpop.f32.mrf.mxu1 }
 0x664   : > { %v4883_v35 = vadd.f32 %v4882_v3, %v4600_v9  ;;  %v4602_v20 = vadd.f32 %v4601_v28, %v11609_v55  ;;  %v5550_v16 = vmax.f32 %v4881_v18, 0.0  ;;  %v13094_v3 = vld [vmem:[#allocation48_spill] sm:$0xff] }
 0x665   : > { %v4605_v22 = vpop.f32.mrf.mxu0  ;;  %v4888_v23 = vpop.f32.mrf.mxu1  ;;  %5138 = vmatmul.mubr.bf16.gmra.mxu0 %v13089_v57  ;;  %5371 = vmatmul.mubr.bf16.gmra.mxu1 %v13090_v33 }
 0x666   : > { %v5552_v40 = vmax.f32 %v4883_v35, 0.0  ;;  %v4885_v49 = vadd.f32 %v4884_v47, %v4602_v20  ;;  %v4606_v14 = vadd.f32 %v4605_v22, %v11601_v0  ;;  %5145 = vmatprep.mubr.bf16.mxu0 %v13091_v17  ;;  %5378 = vmatprep.mubr.bf16.mxu1 %v13092_v38  ;;  %v13095_v35 = vld [vmem:[#allocation24_spill] sm:$0xff]  ;;  %v13096_v20 = vld [vmem:[#allocation14_spill] sm:$0xff] }
 0x667   : > { %v4607_v4 = vpop.f32.mrf.mxu0  ;;  %v4890_v59 = vpop.f32.mrf.mxu1 }
 0x668   : > { %v11756_v39 = vpack.c.bf16 %v5552_v40, %v5549_v1  ;;  %v5553_v27 = vmax.f32 %v4885_v49, 0.0  ;;  %v4889_v2 = vadd.f32 %v4888_v23, %v4606_v14  ;;  %v4608_v43 = vadd.f32 %v4607_v4, %v11609_v55 }
 0x669   : > { %v4609_v48 = vpop.f32.mrf.mxu0  ;;  %v4892_v19 = vpop.f32.mrf.mxu1 }
 0x66a   : > { %v4891_v44 = vadd.f32 %v4890_v59, %v4608_v43  ;;  %v4610_v10 = vadd.f32 %v4609_v48, %v11601_v0  ;;  %v11760_v63 = vpack.c.bf16 %v5553_v27, %v5550_v16  ;;  %v5555_v18 = vmax.f32 %v4889_v2, 0.0 }
 0x66b   : > { %v4611_v36 = vpop.f32.mrf.mxu0  ;;  %v4894_v51 = vpop.f32.mrf.mxu1 }
 0x66c   : > { %v4893_v15 = vadd.f32 %v4892_v19, %v4610_v10  ;;  %v4612_v13 = vadd.f32 %v4611_v36, %v11609_v55  ;;  %v5556_v22 = vmax.f32 %v4891_v44, 0.0  ;;  %v13097_v44 = vld [vmem:[#allocation46_spill] sm:$0xff]  ;;  %v13098_v10 = vld [vmem:[#allocation31_spill] sm:$0xff] }
 0x66d   : > { %v4615_v34 = vpop.f32.mrf.mxu0  ;;  %v4898_v21 = vpop.f32.mrf.mxu1  ;;  %5146 = vmatmul.mubr.bf16.gmra.mxu0 %v13093_v56  ;;  %5379 = vmatmul.mubr.bf16.gmra.mxu1 %v13094_v3 }
 0x66e   : > { %v5558_v9 = vmax.f32 %v4893_v15, 0.0  ;;  %v4895_v28 = vadd.f32 %v4894_v51, %v4612_v13  ;;  %v4616_v47 = vadd.f32 %v4615_v34, %v11601_v0  ;;  %5153 = vmatprep.mubr.bf16.mxu0 %v13095_v35  ;;  %5386 = vmatprep.mubr.bf16.mxu1 %v13096_v20  ;;  %v13099_v34 = vld [vmem:[#allocation41_spill] sm:$0xff] }
 0x66f   : > { %v4617_v23 = vpop.f32.mrf.mxu0  ;;  %v4900_v57 = vpop.f32.mrf.mxu1 }
 0x670   : > { %v11768_v33 = vpack.c.bf16 %v5558_v9, %v5555_v18  ;;  %v5559_v1 = vmax.f32 %v4895_v28, 0.0  ;;  %v4899_v40 = vadd.f32 %v4898_v21, %v4616_v47  ;;  %v4618_v49 = vadd.f32 %v4617_v23, %v11609_v55  ;;  %v13100_v21 = vld [vmem:[#allocation15_spill] sm:$0xff] }
 0x671   : > { %v4619_v14 = vpop.f32.mrf.mxu0  ;;  %v4902_v17 = vpop.f32.mrf.mxu1 }
 0x672   : > { %v4901_v38 = vadd.f32 %v4900_v57, %v4618_v49  ;;  %v4620_v16 = vadd.f32 %v4619_v14, %v11601_v0  ;;  %v11772_v4 = vpack.c.bf16 %v5559_v1, %v5556_v22  ;;  %v5561_v36 = vmax.f32 %v4899_v40, 0.0 }
 0x673   : > { %v4621_v59 = vpop.f32.mrf.mxu0  ;;  %v4904_v27 = vpop.f32.mrf.mxu1 }
 0x674   : > { %v4903_v2 = vadd.f32 %v4902_v17, %v4620_v16  ;;  %v4622_v43 = vadd.f32 %v4621_v59, %v11609_v55  ;;  %v5562_v56 = vmax.f32 %v4901_v38, 0.0  ;;  %v13101_v59 = vld [vmem:[#allocation32_spill] sm:$0xff] }
 0x675   : > { %v4625_v48 = vpop.f32.mrf.mxu0  ;;  %v4908_v19 = vpop.f32.mrf.mxu1  ;;  %5154 = vmatmul.mubr.bf16.gmra.mxu0 %v13097_v44  ;;  %5387 = vmatmul.mubr.bf16.gmra.mxu1 %v13098_v10  ;;  %v13103_v44 = vld [vmem:[#allocation43_spill] sm:$0xff]  ;;  %v13104_v10 = vld [vmem:[#allocation45_spill] sm:$0xff] }
 0x676   : > { %v5564_v51 = vmax.f32 %v4903_v2, 0.0  ;;  %v4905_v15 = vadd.f32 %v4904_v27, %v4622_v43  ;;  %v4626_v13 = vadd.f32 %v4625_v48, %v11601_v0  ;;  %5161 = vmatprep.mubr.bf16.mxu0 %v13099_v34  ;;  %5394 = vmatprep.mubr.bf16.mxu1 %v13100_v21  ;;  %v13102_v27 = vld [vmem:[#allocation39_spill] sm:$0xff] }
 0x677   : > { %v4627_v3 = vpop.f32.mrf.mxu0  ;;  %v4910_v18 = vpop.f32.mrf.mxu1 }
 0x678   : > { %v11780_v9 = vpack.c.bf16 %v5564_v51, %v5561_v36  ;;  %v5565_v28 = vmax.f32 %v4905_v15, 0.0  ;;  %v4909_v47 = vadd.f32 %v4908_v19, %v4626_v13  ;;  %v4628_v35 = vadd.f32 %v4627_v3, %v11609_v55 }
 0x679   : > { %v4629_v20 = vpop.f32.mrf.mxu0  ;;  %v4912_v22 = vpop.f32.mrf.mxu1 }
 0x67a   : > { %v4911_v23 = vadd.f32 %v4910_v18, %v4628_v35  ;;  %v4630_v57 = vadd.f32 %v4629_v20, %v11601_v0  ;;  %v11784_v1 = vpack.c.bf16 %v5565_v28, %v5562_v56  ;;  %v5567_v2 = vmax.f32 %v4909_v47, 0.0 }
 0x67b   : > { %v4631_v40 = vpop.f32.mrf.mxu0  ;;  %v4914_v49 = vpop.f32.mrf.mxu1 }
 0x67c   : > { %v4913_v14 = vadd.f32 %v4912_v22, %v4630_v57  ;;  %v4632_v17 = vadd.f32 %v4631_v40, %v11609_v55  ;;  %v5568_v36 = vmax.f32 %v4911_v23, 0.0 }
 0x67d   : > { %v4635_v38 = vpop.f32.mrf.mxu0  ;;  %v4918_v16 = vpop.f32.mrf.mxu1  ;;  %5162 = vmatmul.mubr.bf16.gmra.mxu0 %v13101_v59  ;;  %5395 = vmatmul.mubr.bf16.gmra.mxu1 %v13102_v27 }
 0x67e   : > { %v5570_v43 = vmax.f32 %v4913_v14, 0.0  ;;  %v4915_v48 = vadd.f32 %v4914_v49, %v4632_v17  ;;  %v4636_v19 = vadd.f32 %v4635_v38, %v11601_v0  ;;  %5169 = vmatprep.mubr.bf16.mxu0 %v13103_v44  ;;  %5402 = vmatprep.mubr.bf16.mxu1 %v13104_v10  ;;  %v13105_v14 = vld [vmem:[#allocation25_spill] sm:$0xff]  ;;  %v13106_v17 = vld [vmem:[#allocation26_spill] sm:$0xff] }
 0x67f   : > { %v4637_v51 = vpop.f32.mrf.mxu0  ;;  %v4920_v15 = vpop.f32.mrf.mxu1 }
 0x680   : > { %v11792_v13 = vpack.c.bf16 %v5570_v43, %v5567_v2  ;;  %v5571_v34 = vmax.f32 %v4915_v48, 0.0  ;;  %v4919_v21 = vadd.f32 %v4918_v16, %v4636_v19  ;;  %v4638_v56 = vadd.f32 %v4637_v51, %v11609_v55  ;;  %v13107_v2 = vld [vmem:[#allocation51_spill] sm:$0xff]  ;;  %v13108_v43 = vld [vmem:[#allocation16_spill] sm:$0xff] }
 0x681   : > { %v4639_v3 = vpop.f32.mrf.mxu0  ;;  %v4922_v18 = vpop.f32.mrf.mxu1 }
 0x682   : > { %v4921_v28 = vadd.f32 %v4920_v15, %v4638_v56  ;;  %v4640_v47 = vadd.f32 %v4639_v3, %v11601_v0  ;;  %v11796_v35 = vpack.c.bf16 %v5571_v34, %v5568_v36  ;;  %v5573_v38 = vmax.f32 %v4919_v21, 0.0 }
 0x683   : > { %v4641_v20 = vpop.f32.mrf.mxu0  ;;  %v4924_v22 = vpop.f32.mrf.mxu1 }
 0x684   : > { %v4923_v57 = vadd.f32 %v4922_v18, %v4640_v47  ;;  %v4642_v23 = vadd.f32 %v4641_v20, %v11609_v55  ;;  %v5574_v48 = vmax.f32 %v4921_v28, 0.0 }
 0x685   : > { %v4645_v40 = vpop.f32.mrf.mxu0  ;;  %v4928_v49 = vpop.f32.mrf.mxu1  ;;  %5170 = vmatmul.mubr.bf16.gmra.mxu0 %v13105_v14  ;;  %5403 = vmatmul.mubr.bf16.gmra.mxu1 %v13106_v17  ;;  %v13110_v14 = vld [vmem:[#allocation33_spill] sm:$0xff] }
 0x686   : > { %v5576_v16 = vmax.f32 %v4923_v57, 0.0  ;;  %v4925_v59 = vadd.f32 %v4924_v22, %v4642_v23  ;;  %v4646_v27 = vadd.f32 %v4645_v40, %v11601_v0  ;;  %5177 = vmatprep.mubr.bf16.mxu0 %v13107_v2  ;;  %5410 = vmatprep.mubr.bf16.mxu1 %v13108_v43  ;;  %v13109_v40 = vld [vmem:[#allocation50_spill] sm:$0xff] }
 0x687   : > { %v4647_v19 = vpop.f32.mrf.mxu0  ;;  %v4930_v44 = vpop.f32.mrf.mxu1 }
 0x688   : > { %v11804_v10 = vpack.c.bf16 %v5576_v16, %v5573_v38  ;;  %v5577_v36 = vmax.f32 %v4925_v59, 0.0  ;;  %v4929_v51 = vadd.f32 %v4928_v49, %v4646_v27  ;;  %v4648_v15 = vadd.f32 %v4647_v19, %v11609_v55  ;;  %v13111_v59 = vld [vmem:[#allocation34_spill] sm:$0xff]  ;;  %v13112_v27 = vld [vmem:[#allocation52_spill] sm:$0xff] }
 0x689   : > { %v4649_v34 = vpop.f32.mrf.mxu0  ;;  %v4932_v56 = vpop.f32.mrf.mxu1 }
 0x68a   : > { %v4931_v21 = vadd.f32 %v4930_v44, %v4648_v15  ;;  %v4650_v3 = vadd.f32 %v4649_v34, %v11601_v0  ;;  %v11808_v18 = vpack.c.bf16 %v5577_v36, %v5574_v48  ;;  %v5579_v49 = vmax.f32 %v4929_v51, 0.0 }
 0x68b   : > { %v4651_v47 = vpop.f32.mrf.mxu0  ;;  %v4934_v20 = vpop.f32.mrf.mxu1 }
 0x68c   : > { %v4933_v22 = vadd.f32 %v4932_v56, %v4650_v3  ;;  %v4652_v28 = vadd.f32 %v4651_v47, %v11609_v55  ;;  %v5580_v2 = vmax.f32 %v4931_v21, 0.0 }
 0x68d   : > { %v4655_v57 = vpop.f32.mrf.mxu0  ;;  %v4938_v23 = vpop.f32.mrf.mxu1  ;;  %5178 = vmatmul.mubr.bf16.gmra.mxu0 %v13109_v40  ;;  %5411 = vmatmul.mubr.bf16.gmra.mxu1 %v13110_v14  ;;  %v13113_v14 = vld [vmem:[#allocation47_spill] sm:$0xff] }
 0x68e   : > { %v5582_v17 = vmax.f32 %v4933_v22, 0.0  ;;  %v4935_v38 = vadd.f32 %v4934_v20, %v4652_v28  ;;  %v4656_v16 = vadd.f32 %v4655_v57, %v11601_v0  ;;  %5185 = vmatprep.mubr.bf16.mxu0 %v13111_v59  ;;  %5418 = vmatprep.mubr.bf16.mxu1 %v13112_v27  ;;  %v13115_v59 = vld [vmem:[#allocation54_spill] sm:$0xff]  ;;  %v13116_v27 = vld [vmem:[#allocation37_spill] sm:$0xff] }
 0x68f   : > { %v4657_v43 = vpop.f32.mrf.mxu0  ;;  %v4940_v48 = vpop.f32.mrf.mxu1 }
 0x690   : > { %v11816_v19 = vpack.c.bf16 %v5582_v17, %v5579_v49  ;;  %v5583_v44 = vmax.f32 %v4935_v38, 0.0  ;;  %v4939_v36 = vadd.f32 %v4938_v23, %v4656_v16  ;;  %v4658_v15 = vadd.f32 %v4657_v43, %v11609_v55  ;;  %v13114_v49 = vld [vmem:[#allocation49_spill] sm:$0xff] }
 0x691   : > { %v4659_v34 = vpop.f32.mrf.mxu0  ;;  %v4942_v56 = vpop.f32.mrf.mxu1 }
 0x692   : > { %v4941_v51 = vadd.f32 %v4940_v48, %v4658_v15  ;;  %v4660_v3 = vadd.f32 %v4659_v34, %v11601_v0  ;;  %v11820_v47 = vpack.c.bf16 %v5583_v44, %v5580_v2  ;;  %v5585_v23 = vmax.f32 %v4939_v36, 0.0 }
 0x693   : > { %v4661_v20 = vpop.f32.mrf.mxu0  ;;  %v4944_v22 = vpop.f32.mrf.mxu1 }
 0x694   : > { %v4943_v28 = vadd.f32 %v4942_v56, %v4660_v3  ;;  %v4662_v21 = vadd.f32 %v4661_v20, %v11609_v55  ;;  %v5586_v2 = vmax.f32 %v4941_v51, 0.0 }
 0x695   : > { %v4665_v57 = vpop.f32.mrf.mxu0  ;;  %v4948_v40 = vpop.f32.mrf.mxu1  ;;  %5186 = vmatmul.mubr.bf16.gmra.mxu0 %v13113_v14  ;;  %5419 = vmatmul.mubr.bf16.gmra.mxu1 %v13114_v49 }
 0x696   : > { %v5588_v17 = vmax.f32 %v4943_v28, 0.0  ;;  %v4945_v38 = vadd.f32 %v4944_v22, %v4662_v21  ;;  %v4666_v16 = vadd.f32 %v4665_v57, %v11601_v0  ;;  %5193 = vmatprep.mubr.bf16.mxu0 %v13115_v59  ;;  %5426 = vmatprep.mubr.bf16.mxu1 %v13116_v27 }
 0x697   : > { %v4667_v43 = vpop.f32.mrf.mxu0  ;;  %v4950_v48 = vpop.f32.mrf.mxu1 }
 0x698   : > { %v11828_v44 = vpack.c.bf16 %v5588_v17, %v5585_v23  ;;  %v5589_v15 = vmax.f32 %v4945_v38, 0.0  ;;  %v4949_v34 = vadd.f32 %v4948_v40, %v4666_v16  ;;  %v4668_v56 = vadd.f32 %v4667_v43, %v11609_v55  ;;  %v13118_v23 = vld [vmem:[#allocation53_spill] sm:$0xff]  ;;  %v13119_v17 = vld [vmem:[#allocation36_spill] sm:$0xff]  ;;  %v13120_v43 = vld [vmem:[#allocation38_spill] sm:$0xff] }
 0x699   : > { %v4669_v3 = vpop.f32.mrf.mxu0  ;;  %v4952_v20 = vpop.f32.mrf.mxu1 }
 0x69a   : > { %13117 = vst [vmem:[#allocation76_spill] sm:$0xff] %v11828_v44  ;;  %v4951_v36 = vadd.f32 %v4950_v48, %v4668_v56  ;;  %v4670_v22 = vadd.f32 %v4669_v3, %v11601_v0  ;;  %v11832_v28 = vpack.c.bf16 %v5589_v15, %v5586_v2  ;;  %v5591_v40 = vmax.f32 %v4949_v34, 0.0  ;;  %v13121_v2 = vld [vmem:[#allocation55_spill] sm:$0xff] }
 0x69b   : > { %v4671_v21 = vpop.f32.mrf.mxu0  ;;  %v4954_v57 = vpop.f32.mrf.mxu1 }
 0x69c   : > { %v4953_v14 = vadd.f32 %v4952_v20, %v4670_v22  ;;  %v4672_v51 = vadd.f32 %v4671_v21, %v11609_v55  ;;  %v5592_v48 = vmax.f32 %v4951_v36, 0.0 }
 0x69d   : > { %v4675_v49 = vpop.f32.mrf.mxu0  ;;  %v4958_v59 = vpop.f32.mrf.mxu1  ;;  %5194 = vmatmul.mubr.bf16.gmra.mxu0 %v13118_v23  ;;  %5427 = vmatmul.mubr.bf16.gmra.mxu1 %v13119_v17 }
 0x69e   : > { %v5594_v38 = vmax.f32 %v4953_v14, 0.0  ;;  %v4955_v16 = vadd.f32 %v4954_v57, %v4672_v51  ;;  %v4676_v27 = vadd.f32 %v4675_v49, %v11601_v0  ;;  %5201 = vmatprep.mubr.bf16.mxu0 %v13120_v43  ;;  %5434 = vmatprep.mubr.bf16.mxu1 %v13121_v2 }
 0x69f   : > { %v4677_v15 = vpop.f32.mrf.mxu0  ;;  %v4960_v56 = vpop.f32.mrf.mxu1 }
 0x6a0   : > { %v11840_v3 = vpack.c.bf16 %v5594_v38, %v5591_v40  ;;  %v5595_v20 = vmax.f32 %v4955_v16, 0.0  ;;  %v4959_v22 = vadd.f32 %v4958_v59, %v4676_v27  ;;  %v4678_v21 = vadd.f32 %v4677_v15, %v11609_v55  ;;  %v13124_v40 = vld [vmem:[#allocation17_spill] sm:$0xff]  ;;  %v13125_v38 = vld [vmem:[#allocation35_spill] sm:$0xff] }
 0x6a1   : > { %v4679_v23 = vpop.f32.mrf.mxu0  ;;  %v4962_v17 = vpop.f32.mrf.mxu1 }
 0x6a2   : > { %13122 = vst [vmem:[#allocation73_spill] sm:$0xff] %v11840_v3  ;;  %v4961_v34 = vadd.f32 %v4960_v56, %v4678_v21  ;;  %v4680_v57 = vadd.f32 %v4679_v23, %v11601_v0  ;;  %v11844_v14 = vpack.c.bf16 %v5595_v20, %v5592_v48  ;;  %v5597_v59 = vmax.f32 %v4959_v22, 0.0  ;;  %v13126_v56 = vld [vmem:[#allocation59_spill] sm:$0xff]  ;;  %v13127_v48 = vld [vmem:[#allocation60_spill] sm:$0xff] }
 0x6a3   : > { %v4681_v51 = vpop.f32.mrf.mxu0  ;;  %v4964_v49 = vpop.f32.mrf.mxu1 }
 0x6a4   : > { %13123 = vst [vmem:[#allocation74_spill] sm:$0xff] %v11844_v14  ;;  %v4963_v43 = vadd.f32 %v4962_v17, %v4680_v57  ;;  %v4682_v36 = vadd.f32 %v4681_v51, %v11609_v55  ;;  %v5598_v20 = vmax.f32 %v4961_v34, 0.0 }
 0x6a5   : > { %v4685_v2 = vpop.f32.mrf.mxu0  ;;  %v4968_v44 = vpop.f32.mrf.mxu1  ;;  %5202 = vmatmul.mubr.bf16.gmra.mxu0 %v13124_v40  ;;  %5435 = vmatmul.mubr.bf16.gmra.mxu1 %v13125_v38 }
 0x6a6   : > { %v5600_v16 = vmax.f32 %v4963_v43, 0.0  ;;  %v4965_v27 = vadd.f32 %v4964_v49, %v4682_v36  ;;  %v4686_v15 = vadd.f32 %v4685_v2, %v11601_v0  ;;  %5209 = vmatprep.mubr.bf16.mxu0 %v13126_v56  ;;  %5442 = vmatprep.mubr.bf16.mxu1 %v13127_v48 }
 0x6a7   : > { %v4687_v21 = vpop.f32.mrf.mxu0  ;;  %v4970_v23 = vpop.f32.mrf.mxu1 }
 0x6a8   : > { %v11852_v17 = vpack.c.bf16 %v5600_v16, %v5597_v59  ;;  %v5601_v57 = vmax.f32 %v4965_v27, 0.0  ;;  %v4969_v51 = vadd.f32 %v4968_v44, %v4686_v15  ;;  %v4688_v40 = vadd.f32 %v4687_v21, %v11609_v55  ;;  %v13130_v59 = vld [vmem:[#allocation57_spill] sm:$0xff]  ;;  %v13131_v16 = vld [vmem:[#allocation58_spill] sm:$0xff] }
 0x6a9   : > { %v4689_v3 = vpop.f32.mrf.mxu0  ;;  %v4972_v38 = vpop.f32.mrf.mxu1 }
 0x6aa   : > { %13128 = vst [vmem:[#allocation77_spill] sm:$0xff] %v11852_v17  ;;  %v4971_v22 = vadd.f32 %v4970_v23, %v4688_v40  ;;  %v4690_v49 = vadd.f32 %v4689_v3, %v11601_v0  ;;  %v11856_v43 = vpack.c.bf16 %v5601_v57, %v5598_v20  ;;  %v5603_v44 = vmax.f32 %v4969_v51, 0.0  ;;  %v13132_v23 = vld [vmem:[#allocation61_spill] sm:$0xff]  ;;  %v13133_v3 = vld [vmem:[#allocation62_spill] sm:$0xff] }
 0x6ab   : > { %v4691_v36 = vpop.f32.mrf.mxu0  ;;  %v4974_v2 = vpop.f32.mrf.mxu1 }
 0x6ac   : > { %13129 = vst [vmem:[#allocation78_spill] sm:$0xff] %v11856_v43  ;;  %v4973_v56 = vadd.f32 %v4972_v38, %v4690_v49  ;;  %v4692_v34 = vadd.f32 %v4691_v36, %v11609_v55  ;;  %v5604_v20 = vmax.f32 %v4971_v22, 0.0 }
 0x6ad   : > { %v4695_v48 = vpop.f32.mrf.mxu0  ;;  %v4978_v14 = vpop.f32.mrf.mxu1  ;;  %5210 = vmatmul.mubr.bf16.gmra.mxu0 %v13130_v59  ;;  %5443 = vmatmul.mubr.bf16.gmra.mxu1 %v13131_v16 }
 0x6ae   : > { %v5606_v27 = vmax.f32 %v4973_v56, 0.0  ;;  %v4975_v15 = vadd.f32 %v4974_v2, %v4692_v34  ;;  %v4696_v21 = vadd.f32 %v4695_v48, %v11601_v0  ;;  %5217 = vmatprep.mubr.bf16.mxu0 %v13132_v23  ;;  %5450 = vmatprep.mubr.bf16.mxu1 %v13133_v3 }
 0x6af   : > { %v4697_v57 = vpop.f32.mrf.mxu0  ;;  %v4980_v40 = vpop.f32.mrf.mxu1 }
 0x6b0   : > { %v11864_v38 = vpack.c.bf16 %v5606_v27, %v5603_v44  ;;  %v5607_v49 = vmax.f32 %v4975_v15, 0.0  ;;  %v4979_v36 = vadd.f32 %v4978_v14, %v4696_v21  ;;  %v4698_v59 = vadd.f32 %v4697_v57, %v11609_v55  ;;  %v13136_v44 = vld [vmem:[#allocation11_spill] sm:$0xff]  ;;  %v13137_v27 = vld [vmem:[#allocation56_spill] sm:$0xff] }
 0x6b1   : > { %v4699_v17 = vpop.f32.mrf.mxu0  ;;  %v4982_v16 = vpop.f32.mrf.mxu1 }
 0x6b2   : > { %13134 = vst [vmem:[#allocation71_spill] sm:$0xff] %v11864_v38  ;;  %v4981_v51 = vadd.f32 %v4980_v40, %v4698_v59  ;;  %v4700_v2 = vadd.f32 %v4699_v17, %v11601_v0  ;;  %v11868_v56 = vpack.c.bf16 %v5607_v49, %v5604_v20  ;;  %v5609_v14 = vmax.f32 %v4979_v36, 0.0  ;;  %v13138_v40 = vld [vmem:[#allocation67_spill] sm:$0xff]  ;;  %v13139_v17 = vld [vmem:[#allocation68_spill] sm:$0xff] }
 0x6b3   : > { %v4701_v34 = vpop.f32.mrf.mxu0  ;;  %v4984_v48 = vpop.f32.mrf.mxu1 }
 0x6b4   : > { %13135 = vst [vmem:[#allocation72_spill] sm:$0xff] %v11868_v56  ;;  %v4983_v23 = vadd.f32 %v4982_v16, %v4700_v2  ;;  %v4702_v22 = vadd.f32 %v4701_v34, %v11609_v55  ;;  %v5610_v20 = vmax.f32 %v4981_v51, 0.0 }
 0x6b5   : > { %v4705_v3 = vpop.f32.mrf.mxu0  ;;  %v4988_v43 = vpop.f32.mrf.mxu1  ;;  %5218 = vmatmul.mubr.bf16.gmra.mxu0 %v13136_v44  ;;  %5451 = vmatmul.mubr.bf16.gmra.mxu1 %v13137_v27 }
 0x6b6   : > { %v5612_v15 = vmax.f32 %v4983_v23, 0.0  ;;  %v4985_v21 = vadd.f32 %v4984_v48, %v4702_v22  ;;  %v4706_v57 = vadd.f32 %v4705_v3, %v11601_v0  ;;  %5225 = vmatprep.mubr.bf16.mxu0 %v13138_v40  ;;  %5458 = vmatprep.mubr.bf16.mxu1 %v13139_v17 }
 0x6b7   : > { %v4707_v49 = vpop.f32.mrf.mxu0  ;;  %v4990_v59 = vpop.f32.mrf.mxu1 }
 0x6b8   : > { %v11876_v16 = vpack.c.bf16 %v5612_v15, %v5609_v14  ;;  %v5613_v2 = vmax.f32 %v4985_v21, 0.0  ;;  %v4989_v34 = vadd.f32 %v4988_v43, %v4706_v57  ;;  %v4708_v44 = vadd.f32 %v4707_v49, %v11609_v55  ;;  %v13142_v14 = vld [vmem:[#allocation65_spill] sm:$0xff]  ;;  %v13143_v15 = vld [vmem:[#allocation66_spill] sm:$0xff] }
 0x6b9   : > { %v4709_v38 = vpop.f32.mrf.mxu0  ;;  %v4992_v27 = vpop.f32.mrf.mxu1 }
 0x6ba   : > { %13140 = vst [vmem:[#allocation83_spill] sm:$0xff] %v11876_v16  ;;  %v4991_v36 = vadd.f32 %v4990_v59, %v4708_v44  ;;  %v4710_v48 = vadd.f32 %v4709_v38, %v11601_v0  ;;  %v11880_v23 = vpack.c.bf16 %v5613_v2, %v5610_v20  ;;  %v5615_v43 = vmax.f32 %v4989_v34, 0.0  ;;  %v13144_v59 = vld [vmem:[#allocation69_spill] sm:$0xff]  ;;  %v13145_v38 = vld [vmem:[#allocation70_spill] sm:$0xff] }
 0x6bb   : > { %v4711_v22 = vpop.f32.mrf.mxu0  ;;  %v4994_v3 = vpop.f32.mrf.mxu1 }
 0x6bc   : > { %13141 = vst [vmem:[#allocation84_spill] sm:$0xff] %v11880_v23  ;;  %v4993_v40 = vadd.f32 %v4992_v27, %v4710_v48  ;;  %v4712_v51 = vadd.f32 %v4711_v22, %v11609_v55  ;;  %v5616_v20 = vmax.f32 %v4991_v36, 0.0 }
 0x6bd   : > { %v4715_v17 = vpop.f32.mrf.mxu0  ;;  %v4998_v56 = vpop.f32.mrf.mxu1  ;;  %5226 = vmatmul.mubr.bf16.gmra.mxu0 %v13142_v14  ;;  %5459 = vmatmul.mubr.bf16.gmra.mxu1 %v13143_v15 }
 0x6be   : > { %v5618_v21 = vmax.f32 %v4993_v40, 0.0  ;;  %v4995_v57 = vadd.f32 %v4994_v3, %v4712_v51  ;;  %v4716_v49 = vadd.f32 %v4715_v17, %v11601_v0  ;;  %5233 = vmatprep.mubr.bf16.mxu0 %v13144_v59  ;;  %5466 = vmatprep.mubr.bf16.mxu1 %v13145_v38 }
 0x6bf   : > { %v4717_v2 = vpop.f32.mrf.mxu0  ;;  %v5000_v44 = vpop.f32.mrf.mxu1 }
 0x6c0   : > { %v11888_v27 = vpack.c.bf16 %v5618_v21, %v5615_v43  ;;  %v5619_v48 = vmax.f32 %v4995_v57, 0.0  ;;  %v4999_v22 = vadd.f32 %v4998_v56, %v4716_v49  ;;  %v4718_v14 = vadd.f32 %v4717_v2, %v11609_v55  ;;  %v13146_v43 = vld [vmem:[#allocation64_spill] sm:$0xff]  ;;  %v13147_v21 = vld [vmem:[#allocation75_spill] sm:$0xff] }
 0x6c1   : > { %v4719_v16 = vpop.f32.mrf.mxu0  ;;  %v5002_v15 = vpop.f32.mrf.mxu1  ;;  %v13148_v56 = vld [vmem:[#allocation63_spill] sm:$0xff] }
 0x6c2   : > { %v5001_v34 = vadd.f32 %v5000_v44, %v4718_v14  ;;  %v4720_v3 = vadd.f32 %v4719_v16, %v11601_v0  ;;  %v11892_v40 = vpack.c.bf16 %v5619_v48, %v5616_v20  ;;  %v3934_v57 = vsub.s32 2, %v13148_v56 }
 0x6c3   : > { %v4721_v51 = vpop.f32.mrf.mxu0  ;;  %v5004_v17 = vpop.f32.mrf.mxu1  ;;  %v5621_v49 = vmax.f32 %v4999_v22, 0.0 }
 0x6c4   : > { %v5003_v59 = vadd.f32 %v5002_v15, %v4720_v3  ;;  %v4722_v36 = vadd.f32 %v4721_v51, %v11609_v55  ;;  %v5622_v20 = vmax.f32 %v5001_v34, 0.0 }
 0x6c5   : > { %v4725_v38 = vpop.f32.mrf.mxu0  ;;  %v5008_v23 = vpop.f32.mrf.mxu1  ;;  %5234 = vmatmul.mubr.bf16.gmra.mxu0 %v13146_v43  ;;  %5467 = vmatmul.mubr.bf16.gmra.mxu1 %v13147_v21 }
 0x6c6   : > { %v5624_v2 = vmax.f32 %v5003_v59, 0.0  ;;  %v5005_v44 = vadd.f32 %v5004_v17, %v4722_v36  ;;  %v4726_v16 = vadd.f32 %v4725_v38, %v11601_v0  ;;  %5241 = vmatprep.mubr.bf16.mxu0 %v11597_v50  ;;  %5474 = vmatprep.mubr.bf16.mxu1 %v11599_v11  ;;  %v8194_v50 = vld [vmem:[%s12355_s5] sm:$0x7] }
 0x6c7   : > { %v4727_v48 = vpop.f32.mrf.mxu0  ;;  %v5010_v14 = vpop.f32.mrf.mxu1  ;;  %v11908_v59 = vrot.slane %v8194_v50, %v3934_v57  ;;  %v13149_v57 = vmov 0  }
 0x6c8   : > { %v11901_v15 = vpack.c.bf16 %v5624_v2, %v5621_v49  ;;  %v5625_v3 = vmax.f32 %v5005_v44, 0.0  ;;  %v5009_v51 = vadd.f32 %v5008_v23, %v4726_v16  ;;  %v4728_v43 = vadd.f32 %v4727_v48, %v11609_v55 }
 0x6c9   : > { %v4729_v21 = vpop.f32.mrf.mxu0  ;;  %v5012_v56 = vpop.f32.mrf.mxu1 }
 0x6ca   : > { %v5011_v22 = vadd.f32 %v5010_v14, %v4728_v43  ;;  %v4730_v17 = vadd.f32 %v4729_v21, %v11601_v0  ;;  %v11910_v11 = vpack.c.bf16 %v5625_v3, %v5622_v20  ;;  %v5627_v0 = vmax.f32 %v5009_v51, 0.0 }
 0x6cb   : > { %v4731_v34 = vpop.f32.mrf.mxu0  ;;  %v5014_v36 = vpop.f32.mrf.mxu1 }
 0x6cc   : > { %v5013_v38 = vadd.f32 %v5012_v56, %v4730_v17  ;;  %v4732_v23 = vadd.f32 %v4731_v34, %v11609_v55  ;;  %v5628_v3 = vmax.f32 %v5011_v22, 0.0 }
 0x6cd   : > { %v5051_v49 = vpop.f32.mrf.mxu0  ;;  %5242 = vmatmul.mubr.bf16.gmra.mxu0 %v11603_v5  ;;  %v5284_v2 = vpop.f32.mrf.mxu1  ;;  %5475 = vmatmul.mubr.bf16.gmra.mxu1 %v11605_v61 }
 0x6ce   : > { %v5630_v44 = vmax.f32 %v5013_v38, 0.0  ;;  %v5015_v16 = vadd.f32 %v5014_v36, %v4732_v23  ;;  %v5052_v48 = vadd.f32 %v5051_v49, %v11908_v59  ;;  %6028 = vmatprep.mubr.bf16.mxu0 %v11628_v29  ;;  %6311 = vmatprep.mubr.bf16.mxu1 %v13149_v57 }
 0x6cf   : > { %v5053_v20 = vpop.f32.mrf.mxu0  ;;  %v5286_v14 = vpop.f32.mrf.mxu1 }
 0x6d0   : > { %v11918_v43 = vpack.c.bf16 %v5630_v44, %v5627_v0  ;;  %v5631_v55 = vmax.f32 %v5015_v16, 0.0  ;;  %v5285_v56 = vadd.f32 %v5284_v2, %v5052_v48 }
 0x6d1   : > { %v5054_v21 = vpop.f32.mrf.mxu0  ;;  %v5287_v5 = vpop.f32.mrf.mxu1 }
 0x6d2   : > { %v5055_v61 = vadd.f32 %v5054_v21, %v11908_v59  ;;  %v11921_v51 = vpack.c.bf16 %v5631_v55, %v5628_v3  ;;  %v5485_v38 = vmax.f32 %v5285_v56, 0.0 }
 0x6d3   : > { %v5056_v17 = vpop.f32.mrf.mxu0  ;;  %v5289_v50 = vpop.f32.mrf.mxu1 }
 0x6d4   : > { %v5288_v34 = vadd.f32 %v5287_v5, %v5055_v61 }
 0x6d5   : > { %v5059_v36 = vpop.f32.mrf.mxu0  ;;  %v5292_v29 = vpop.f32.mrf.mxu1  ;;  %6029 = vmatmul.mubr.bf16.vlgmr.msra.gmra.mxu0 %v11624_v26 }
 0x6d6   : > { %v5488_v23 = vmax.f32 %v5288_v34, 0.0  ;;  %v5060_v22 = vadd.f32 %v5059_v36, %v11908_v59  ;;  %6038 = vmatprep.mubr.bf16.mxu0 %v11640_v7 }
 0x6d7   : > { %v5061_v49 = vpop.f32.mrf.mxu0  ;;  %v5294_v0 = vpop.f32.mrf.mxu1 }
 0x6d8   : > { %v5635_v2 = vpack.c.bf16 %v5488_v23, %v5485_v38  ;;  %v5293_v48 = vadd.f32 %v5292_v29, %v5060_v22 }
 0x6d9   : > { %v5062_v44 = vpop.f32.mrf.mxu0  ;;  %v5295_v16 = vpop.f32.mrf.mxu1 }
 0x6da   : > { %v5063_v20 = vadd.f32 %v5062_v44, %v11908_v59  ;;  %6312 = vmatmul.mubr.bf16.vlgmr.msra.gmra.mxu1 %v5635_v2  ;;  %v5491_v5 = vmax.f32 %v5293_v48, 0.0 }
 0x6db   : > { %v5064_v14 = vpop.f32.mrf.mxu0  ;;  %v5297_v3 = vpop.f32.mrf.mxu1  ;;  %6321 = vmatprep.mubr.bf16.mxu1 %v13149_v57 }
 0x6dc   : > { %v5296_v26 = vadd.f32 %v5295_v16, %v5063_v20 }
 0x6dd   : > { %v5067_v55 = vpop.f32.mrf.mxu0  ;;  %v5300_v21 = vpop.f32.mrf.mxu1  ;;  %6039 = vmatmul.mubr.bf16.gmra.mxu0 %v11636_v12 }
 0x6de   : > { %v5494_v7 = vmax.f32 %v5296_v26, 0.0  ;;  %v5068_v56 = vadd.f32 %v5067_v55, %v11908_v59  ;;  %6048 = vmatprep.mubr.bf16.mxu0 %v11652_v52 }
 0x6df   : > { %v5069_v61 = vpop.f32.mrf.mxu0  ;;  %v5302_v17 = vpop.f32.mrf.mxu1 }
 0x6e0   : > { %v5638_v50 = vpack.c.bf16 %v5494_v7, %v5491_v5  ;;  %v5301_v29 = vadd.f32 %v5300_v21, %v5068_v56 }
 0x6e1   : > { %v5070_v34 = vpop.f32.mrf.mxu0  ;;  %v5303_v36 = vpop.f32.mrf.mxu1 }
 0x6e2   : > { %v5071_v38 = vadd.f32 %v5070_v34, %v11908_v59  ;;  %6322 = vmatmul.mubr.bf16.gmra.mxu1 %v5638_v50  ;;  %v5497_v2 = vmax.f32 %v5301_v29, 0.0 }
 0x6e3   : > { %v5072_v23 = vpop.f32.mrf.mxu0  ;;  %v5305_v22 = vpop.f32.mrf.mxu1  ;;  %6331 = vmatprep.mubr.bf16.mxu1 %v13149_v57 }
 0x6e4   : > { %v5304_v12 = vadd.f32 %v5303_v36, %v5071_v38 }
 0x6e5   : > { %v5075_v49 = vpop.f32.mrf.mxu0  ;;  %v5308_v0 = vpop.f32.mrf.mxu1  ;;  %6049 = vmatmul.mubr.bf16.gmra.mxu0 %v11648_v25 }
 0x6e6   : > { %v5500_v52 = vmax.f32 %v5304_v12, 0.0  ;;  %v5076_v44 = vadd.f32 %v5075_v49, %v11908_v59  ;;  %6058 = vmatprep.mubr.bf16.mxu0 %v11664_v32 }
 0x6e7   : > { %v5077_v16 = vpop.f32.mrf.mxu0  ;;  %v5310_v48 = vpop.f32.mrf.mxu1 }
 0x6e8   : > { %v5641_v20 = vpack.c.bf16 %v5500_v52, %v5497_v2  ;;  %v5309_v26 = vadd.f32 %v5308_v0, %v5076_v44 }
 0x6e9   : > { %v5078_v14 = vpop.f32.mrf.mxu0  ;;  %v5311_v3 = vpop.f32.mrf.mxu1 }
 0x6ea   : > { %v5079_v55 = vadd.f32 %v5078_v14, %v11908_v59  ;;  %6332 = vmatmul.mubr.bf16.gmra.mxu1 %v5641_v20  ;;  %v5503_v61 = vmax.f32 %v5309_v26, 0.0 }
 0x6eb   : > { %v5080_v21 = vpop.f32.mrf.mxu0  ;;  %v5313_v5 = vpop.f32.mrf.mxu1  ;;  %6341 = vmatprep.mubr.bf16.mxu1 %v13149_v57 }
 0x6ec   : > { %v5312_v25 = vadd.f32 %v5311_v3, %v5079_v55 }
 0x6ed   : > { %v5083_v7 = vpop.f32.mrf.mxu0  ;;  %v5316_v56 = vpop.f32.mrf.mxu1  ;;  %6059 = vmatmul.mubr.bf16.gmra.mxu0 %v11660_v45 }
 0x6ee   : > { %v5506_v32 = vmax.f32 %v5312_v25, 0.0  ;;  %v5084_v17 = vadd.f32 %v5083_v7, %v11908_v59  ;;  %6068 = vmatprep.mubr.bf16.mxu0 %v11676_v31 }
 0x6ef   : > { %v5085_v50 = vpop.f32.mrf.mxu0  ;;  %v5318_v34 = vpop.f32.mrf.mxu1 }
 0x6f0   : > { %v5644_v36 = vpack.c.bf16 %v5506_v32, %v5503_v61  ;;  %v5317_v23 = vadd.f32 %v5316_v56, %v5084_v17 }
 0x6f1   : > { %v5086_v29 = vpop.f32.mrf.mxu0  ;;  %v5319_v38 = vpop.f32.mrf.mxu1 }
 0x6f2   : > { %v5087_v22 = vadd.f32 %v5086_v29, %v11908_v59  ;;  %6342 = vmatmul.mubr.bf16.gmra.mxu1 %v5644_v36  ;;  %v5509_v52 = vmax.f32 %v5317_v23, 0.0 }
 0x6f3   : > { %v5088_v12 = vpop.f32.mrf.mxu0  ;;  %v5321_v49 = vpop.f32.mrf.mxu1  ;;  %6351 = vmatprep.mubr.bf16.mxu1 %v13149_v57 }
 0x6f4   : > { %v5320_v45 = vadd.f32 %v5319_v38, %v5087_v22 }
 0x6f5   : > { %v5091_v0 = vpop.f32.mrf.mxu0  ;;  %v5324_v2 = vpop.f32.mrf.mxu1  ;;  %6069 = vmatmul.mubr.bf16.gmra.mxu0 %v11672_v60 }
 0x6f6   : > { %v5512_v31 = vmax.f32 %v5320_v45, 0.0  ;;  %v5092_v44 = vadd.f32 %v5091_v0, %v11908_v59  ;;  %6078 = vmatprep.mubr.bf16.mxu0 %v11688_v41 }
 0x6f7   : > { %v5093_v16 = vpop.f32.mrf.mxu0  ;;  %v5326_v48 = vpop.f32.mrf.mxu1 }
 0x6f8   : > { %v5647_v20 = vpack.c.bf16 %v5512_v31, %v5509_v52  ;;  %v5325_v26 = vadd.f32 %v5324_v2, %v5092_v44 }
 0x6f9   : > { %v5094_v14 = vpop.f32.mrf.mxu0  ;;  %v5327_v3 = vpop.f32.mrf.mxu1 }
 0x6fa   : > { %v5095_v55 = vadd.f32 %v5094_v14, %v11908_v59  ;;  %6352 = vmatmul.mubr.bf16.gmra.mxu1 %v5647_v20  ;;  %v5515_v56 = vmax.f32 %v5325_v26, 0.0 }
 0x6fb   : > { %v5096_v21 = vpop.f32.mrf.mxu0  ;;  %v5329_v5 = vpop.f32.mrf.mxu1  ;;  %6361 = vmatprep.mubr.bf16.mxu1 %v13149_v57 }
 0x6fc   : > { %v5328_v60 = vadd.f32 %v5327_v3, %v5095_v55 }
 0x6fd   : > { %v5099_v25 = vpop.f32.mrf.mxu0  ;;  %v5332_v7 = vpop.f32.mrf.mxu1  ;;  %6079 = vmatmul.mubr.bf16.gmra.mxu0 %v11684_v62 }
 0x6fe   : > { %v5518_v41 = vmax.f32 %v5328_v60, 0.0  ;;  %v5100_v61 = vadd.f32 %v5099_v25, %v11908_v59  ;;  %6088 = vmatprep.mubr.bf16.mxu0 %v11700_v6 }
 0x6ff   : > { %v5101_v32 = vpop.f32.mrf.mxu0  ;;  %v5334_v17 = vpop.f32.mrf.mxu1 }
 0x700   : > { %v5650_v50 = vpack.c.bf16 %v5518_v41, %v5515_v56  ;;  %v5333_v29 = vadd.f32 %v5332_v7, %v5100_v61 }
 0x701   : > { %v5102_v34 = vpop.f32.mrf.mxu0  ;;  %v5335_v36 = vpop.f32.mrf.mxu1 }
 0x702   : > { %v5103_v38 = vadd.f32 %v5102_v34, %v11908_v59  ;;  %6362 = vmatmul.mubr.bf16.gmra.mxu1 %v5650_v50  ;;  %v5521_v45 = vmax.f32 %v5333_v29, 0.0 }
 0x703   : > { %v5104_v23 = vpop.f32.mrf.mxu0  ;;  %v5337_v22 = vpop.f32.mrf.mxu1  ;;  %6371 = vmatprep.mubr.bf16.mxu1 %v13149_v57 }
 0x704   : > { %v5336_v62 = vadd.f32 %v5335_v36, %v5103_v38 }
 0x705   : > { %v5107_v12 = vpop.f32.mrf.mxu0  ;;  %v5340_v49 = vpop.f32.mrf.mxu1  ;;  %6089 = vmatmul.mubr.bf16.gmra.mxu0 %v11696_v58 }
 0x706   : > { %v5524_v6 = vmax.f32 %v5336_v62, 0.0  ;;  %v5108_v0 = vadd.f32 %v5107_v12, %v11908_v59  ;;  %6098 = vmatprep.mubr.bf16.mxu0 %v11712_v24 }
 0x707   : > { %v5109_v2 = vpop.f32.mrf.mxu0  ;;  %v5342_v52 = vpop.f32.mrf.mxu1 }
 0x708   : > { %v5653_v31 = vpack.c.bf16 %v5524_v6, %v5521_v45  ;;  %v5341_v48 = vadd.f32 %v5340_v49, %v5108_v0 }
 0x709   : > { %v5110_v44 = vpop.f32.mrf.mxu0  ;;  %v5343_v16 = vpop.f32.mrf.mxu1 }
 0x70a   : > { %v5111_v20 = vadd.f32 %v5110_v44, %v11908_v59  ;;  %6372 = vmatmul.mubr.bf16.gmra.mxu1 %v5653_v31  ;;  %v5527_v21 = vmax.f32 %v5341_v48, 0.0 }
 0x70b   : > { %v5112_v14 = vpop.f32.mrf.mxu0  ;;  %v5345_v3 = vpop.f32.mrf.mxu1  ;;  %6381 = vmatprep.mubr.bf16.mxu1 %v13149_v57 }
 0x70c   : > { %v5344_v58 = vadd.f32 %v5343_v16, %v5111_v20 }
 0x70d   : > { %v5115_v26 = vpop.f32.mrf.mxu0  ;;  %v5348_v55 = vpop.f32.mrf.mxu1  ;;  %6099 = vmatmul.mubr.bf16.gmra.mxu0 %v11708_v54 }
 0x70e   : > { %v5530_v24 = vmax.f32 %v5344_v58, 0.0  ;;  %v5116_v5 = vadd.f32 %v5115_v26, %v11908_v59  ;;  %6108 = vmatprep.mubr.bf16.mxu0 %v11724_v30 }
 0x70f   : > { %v5117_v60 = vpop.f32.mrf.mxu0  ;;  %v5350_v25 = vpop.f32.mrf.mxu1 }
 0x710   : > { %v5656_v7 = vpack.c.bf16 %v5530_v24, %v5527_v21  ;;  %v5349_v61 = vadd.f32 %v5348_v55, %v5116_v5 }
 0x711   : > { %v5118_v56 = vpop.f32.mrf.mxu0  ;;  %v5351_v41 = vpop.f32.mrf.mxu1 }
 0x712   : > { %v5119_v32 = vadd.f32 %v5118_v56, %v11908_v59  ;;  %6382 = vmatmul.mubr.bf16.gmra.mxu1 %v5656_v7  ;;  %v5533_v29 = vmax.f32 %v5349_v61, 0.0 }
 0x713   : > { %v5120_v17 = vpop.f32.mrf.mxu0  ;;  %v5353_v50 = vpop.f32.mrf.mxu1  ;;  %6391 = vmatprep.mubr.bf16.mxu1 %v13149_v57 }
 0x714   : > { %v5352_v54 = vadd.f32 %v5351_v41, %v5119_v32 }
 0x715   : > { %v5123_v34 = vpop.f32.mrf.mxu0  ;;  %v5356_v36 = vpop.f32.mrf.mxu1  ;;  %6109 = vmatmul.mubr.bf16.gmra.mxu0 %v11720_v53 }
 0x716   : > { %v5536_v30 = vmax.f32 %v5352_v54, 0.0  ;;  %v5124_v38 = vadd.f32 %v5123_v34, %v11908_v59  ;;  %6118 = vmatprep.mubr.bf16.mxu0 %v11736_v46 }
 0x717   : > { %v5125_v23 = vpop.f32.mrf.mxu0  ;;  %v5358_v22 = vpop.f32.mrf.mxu1 }
 0x718   : > { %v5659_v62 = vpack.c.bf16 %v5536_v30, %v5533_v29  ;;  %v5357_v45 = vadd.f32 %v5356_v36, %v5124_v38 }
 0x719   : > { %v5126_v12 = vpop.f32.mrf.mxu0  ;;  %v5359_v49 = vpop.f32.mrf.mxu1 }
 0x71a   : > { %v5127_v6 = vadd.f32 %v5126_v12, %v11908_v59  ;;  %6392 = vmatmul.mubr.bf16.gmra.mxu1 %v5659_v62  ;;  %v5539_v44 = vmax.f32 %v5357_v45, 0.0 }
 0x71b   : > { %v5128_v0 = vpop.f32.mrf.mxu0  ;;  %v5361_v2 = vpop.f32.mrf.mxu1  ;;  %6401 = vmatprep.mubr.bf16.mxu1 %v13149_v57 }
 0x71c   : > { %v5360_v53 = vadd.f32 %v5359_v49, %v5127_v6 }
 0x71d   : > { %v5131_v52 = vpop.f32.mrf.mxu0  ;;  %v5364_v31 = vpop.f32.mrf.mxu1  ;;  %6119 = vmatmul.mubr.bf16.gmra.mxu0 %v11732_v42 }
 0x71e   : > { %v5542_v46 = vmax.f32 %v5360_v53, 0.0  ;;  %v5132_v16 = vadd.f32 %v5131_v52, %v11908_v59  ;;  %6128 = vmatprep.mubr.bf16.mxu0 %v11748_v8 }
 0x71f   : > { %v5133_v48 = vpop.f32.mrf.mxu0  ;;  %v5366_v20 = vpop.f32.mrf.mxu1 }
 0x720   : > { %v5662_v14 = vpack.c.bf16 %v5542_v46, %v5539_v44  ;;  %v5365_v26 = vadd.f32 %v5364_v31, %v5132_v16 }
 0x721   : > { %v5134_v3 = vpop.f32.mrf.mxu0  ;;  %v5367_v58 = vpop.f32.mrf.mxu1 }
 0x722   : > { %v5135_v55 = vadd.f32 %v5134_v3, %v11908_v59  ;;  %6402 = vmatmul.mubr.bf16.gmra.mxu1 %v5662_v14  ;;  %v5545_v25 = vmax.f32 %v5365_v26, 0.0 }
 0x723   : > { %v5136_v21 = vpop.f32.mrf.mxu0  ;;  %v5369_v24 = vpop.f32.mrf.mxu1  ;;  %6411 = vmatprep.mubr.bf16.mxu1 %v13149_v57 }
 0x724   : > { %v5368_v42 = vadd.f32 %v5367_v58, %v5135_v55 }
 0x725   : > { %v5139_v5 = vpop.f32.mrf.mxu0  ;;  %v5372_v60 = vpop.f32.mrf.mxu1  ;;  %6129 = vmatmul.mubr.bf16.gmra.mxu0 %v11744_v37 }
 0x726   : > { %v5548_v8 = vmax.f32 %v5368_v42, 0.0  ;;  %v5140_v7 = vadd.f32 %v5139_v5, %v11908_v59  ;;  %6138 = vmatprep.mubr.bf16.mxu0 %v11760_v63 }
 0x727   : > { %v5141_v56 = vpop.f32.mrf.mxu0  ;;  %v5374_v41 = vpop.f32.mrf.mxu1 }
 0x728   : > { %v5665_v61 = vpack.c.bf16 %v5548_v8, %v5545_v25  ;;  %v5373_v50 = vadd.f32 %v5372_v60, %v5140_v7 }
 0x729   : > { %v5142_v32 = vpop.f32.mrf.mxu0  ;;  %v5375_v17 = vpop.f32.mrf.mxu1 }
 0x72a   : > { %v5143_v54 = vadd.f32 %v5142_v32, %v11908_v59  ;;  %6412 = vmatmul.mubr.bf16.gmra.mxu1 %v5665_v61  ;;  %v5551_v38 = vmax.f32 %v5373_v50, 0.0 }
 0x72b   : > { %v5144_v34 = vpop.f32.mrf.mxu0  ;;  %v5377_v36 = vpop.f32.mrf.mxu1  ;;  %6421 = vmatprep.mubr.bf16.mxu1 %v13149_v57 }
 0x72c   : > { %v5376_v37 = vadd.f32 %v5375_v17, %v5143_v54 }
 0x72d   : > { %v5147_v29 = vpop.f32.mrf.mxu0  ;;  %v5380_v30 = vpop.f32.mrf.mxu1  ;;  %6139 = vmatmul.mubr.bf16.gmra.mxu0 %v11756_v39 }
 0x72e   : > { %v5554_v63 = vmax.f32 %v5376_v37, 0.0  ;;  %v5148_v23 = vadd.f32 %v5147_v29, %v11908_v59  ;;  %6148 = vmatprep.mubr.bf16.mxu0 %v11772_v4 }
 0x72f   : > { %v5149_v22 = vpop.f32.mrf.mxu0  ;;  %v5382_v62 = vpop.f32.mrf.mxu1 }
 0x730   : > { %v5668_v12 = vpack.c.bf16 %v5554_v63, %v5551_v38  ;;  %v5381_v6 = vadd.f32 %v5380_v30, %v5148_v23 }
 0x731   : > { %v5150_v49 = vpop.f32.mrf.mxu0  ;;  %v5383_v45 = vpop.f32.mrf.mxu1 }
 0x732   : > { %v5151_v0 = vadd.f32 %v5150_v49, %v11908_v59  ;;  %6422 = vmatmul.mubr.bf16.gmra.mxu1 %v5668_v12  ;;  %v5557_v44 = vmax.f32 %v5381_v6, 0.0 }
 0x733   : > { %v5152_v2 = vpop.f32.mrf.mxu0  ;;  %v5385_v53 = vpop.f32.mrf.mxu1  ;;  %6431 = vmatprep.mubr.bf16.mxu1 %v13149_v57 }
 0x734   : > { %v5384_v39 = vadd.f32 %v5383_v45, %v5151_v0 }
 0x735   : > { %v5155_v52 = vpop.f32.mrf.mxu0  ;;  %v5388_v31 = vpop.f32.mrf.mxu1  ;;  %6149 = vmatmul.mubr.bf16.gmra.mxu0 %v11768_v33 }
 0x736   : > { %v5560_v4 = vmax.f32 %v5384_v39, 0.0  ;;  %v5156_v46 = vadd.f32 %v5155_v52, %v11908_v59  ;;  %6158 = vmatprep.mubr.bf16.mxu0 %v11784_v1 }
 0x737   : > { %v5157_v16 = vpop.f32.mrf.mxu0  ;;  %v5390_v48 = vpop.f32.mrf.mxu1 }
 0x738   : > { %v5671_v20 = vpack.c.bf16 %v5560_v4, %v5557_v44  ;;  %v5389_v58 = vadd.f32 %v5388_v31, %v5156_v46 }
 0x739   : > { %v5158_v14 = vpop.f32.mrf.mxu0  ;;  %v5391_v3 = vpop.f32.mrf.mxu1 }
 0x73a   : > { %v5159_v26 = vadd.f32 %v5158_v14, %v11908_v59  ;;  %6432 = vmatmul.mubr.bf16.gmra.mxu1 %v5671_v20  ;;  %v5563_v5 = vmax.f32 %v5389_v58, 0.0 }
 0x73b   : > { %v5160_v55 = vpop.f32.mrf.mxu0  ;;  %v5393_v21 = vpop.f32.mrf.mxu1  ;;  %6441 = vmatprep.mubr.bf16.mxu1 %v13149_v57 }
 0x73c   : > { %v5392_v33 = vadd.f32 %v5391_v3, %v5159_v26 }
 0x73d   : > { %v5163_v24 = vpop.f32.mrf.mxu0  ;;  %v5396_v42 = vpop.f32.mrf.mxu1  ;;  %6159 = vmatmul.mubr.bf16.gmra.mxu0 %v11780_v9 }
 0x73e   : > { %v5566_v1 = vmax.f32 %v5392_v33, 0.0  ;;  %v5164_v60 = vadd.f32 %v5163_v24, %v11908_v59  ;;  %6168 = vmatprep.mubr.bf16.mxu0 %v11796_v35 }
 0x73f   : > { %v5165_v25 = vpop.f32.mrf.mxu0  ;;  %v5398_v8 = vpop.f32.mrf.mxu1 }
 0x740   : > { %v5674_v7 = vpack.c.bf16 %v5566_v1, %v5563_v5  ;;  %v5397_v61 = vadd.f32 %v5396_v42, %v5164_v60 }
 0x741   : > { %v5166_v56 = vpop.f32.mrf.mxu0  ;;  %v5399_v41 = vpop.f32.mrf.mxu1 }
 0x742   : > { %v5167_v32 = vadd.f32 %v5166_v56, %v11908_v59  ;;  %6442 = vmatmul.mubr.bf16.gmra.mxu1 %v5674_v7  ;;  %v5569_v36 = vmax.f32 %v5397_v61, 0.0  ;;  %v13150_v7 = vld [vmem:[#allocation76_spill] sm:$0xff]  ;;  %v13151_v61 = vld [vmem:[#allocation74_spill] sm:$0xff] }
 0x743   : > { %v5168_v17 = vpop.f32.mrf.mxu0  ;;  %v5401_v50 = vpop.f32.mrf.mxu1  ;;  %6451 = vmatprep.mubr.bf16.mxu1 %v13149_v57 }
 0x744   : > { %v5400_v9 = vadd.f32 %v5399_v41, %v5167_v32 }
 0x745   : > { %v5171_v54 = vpop.f32.mrf.mxu0  ;;  %v5404_v34 = vpop.f32.mrf.mxu1  ;;  %6169 = vmatmul.mubr.bf16.gmra.mxu0 %v11792_v13 }
 0x746   : > { %v5572_v35 = vmax.f32 %v5400_v9, 0.0  ;;  %v5172_v37 = vadd.f32 %v5171_v54, %v11908_v59  ;;  %6178 = vmatprep.mubr.bf16.mxu0 %v11808_v18 }
 0x747   : > { %v5173_v29 = vpop.f32.mrf.mxu0  ;;  %v5406_v30 = vpop.f32.mrf.mxu1 }
 0x748   : > { %v5677_v38 = vpack.c.bf16 %v5572_v35, %v5569_v36  ;;  %v5405_v22 = vadd.f32 %v5404_v34, %v5172_v37 }
 0x749   : > { %v5174_v63 = vpop.f32.mrf.mxu0  ;;  %v5407_v23 = vpop.f32.mrf.mxu1 }
 0x74a   : > { %v5175_v62 = vadd.f32 %v5174_v63, %v11908_v59  ;;  %6452 = vmatmul.mubr.bf16.gmra.mxu1 %v5677_v38  ;;  %v5575_v0 = vmax.f32 %v5405_v22, 0.0  ;;  %v13152_v63 = vld [vmem:[#allocation73_spill] sm:$0xff] }
 0x74b   : > { %v5176_v12 = vpop.f32.mrf.mxu0  ;;  %v5409_v49 = vpop.f32.mrf.mxu1  ;;  %6461 = vmatprep.mubr.bf16.mxu1 %v13149_v57 }
 0x74c   : > { %v5408_v13 = vadd.f32 %v5407_v23, %v5175_v62  ;;  %v13153_v12 = vld [vmem:[#allocation78_spill] sm:$0xff] }
 0x74d   : > { %v5179_v45 = vpop.f32.mrf.mxu0  ;;  %v5412_v6 = vpop.f32.mrf.mxu1  ;;  %6179 = vmatmul.mubr.bf16.gmra.mxu0 %v11804_v10 }
 0x74e   : > { %v5578_v18 = vmax.f32 %v5408_v13, 0.0  ;;  %v5180_v2 = vadd.f32 %v5179_v45, %v11908_v59  ;;  %6188 = vmatprep.mubr.bf16.mxu0 %v11820_v47 }
 0x74f   : > { %v5181_v53 = vpop.f32.mrf.mxu0  ;;  %v5414_v39 = vpop.f32.mrf.mxu1 }
 0x750   : > { %v5680_v52 = vpack.c.bf16 %v5578_v18, %v5575_v0  ;;  %v5413_v4 = vadd.f32 %v5412_v6, %v5180_v2 }
 0x751   : > { %v5182_v31 = vpop.f32.mrf.mxu0  ;;  %v5415_v44 = vpop.f32.mrf.mxu1 }
 0x752   : > { %v5183_v46 = vadd.f32 %v5182_v31, %v11908_v59  ;;  %6462 = vmatmul.mubr.bf16.gmra.mxu1 %v5680_v52  ;;  %v5581_v3 = vmax.f32 %v5413_v4, 0.0  ;;  %v13154_v4 = vld [vmem:[#allocation77_spill] sm:$0xff] }
 0x753   : > { %v5184_v16 = vpop.f32.mrf.mxu0  ;;  %v5417_v48 = vpop.f32.mrf.mxu1  ;;  %6471 = vmatprep.mubr.bf16.mxu1 %v13149_v57 }
 0x754   : > { %v5416_v10 = vadd.f32 %v5415_v44, %v5183_v46 }
 0x755   : > { %v5187_v20 = vpop.f32.mrf.mxu0  ;;  %v5420_v14 = vpop.f32.mrf.mxu1  ;;  %6189 = vmatmul.mubr.bf16.gmra.mxu0 %v11816_v19 }
 0x756   : > { %v5584_v47 = vmax.f32 %v5416_v10, 0.0  ;;  %v5188_v58 = vadd.f32 %v5187_v20, %v11908_v59  ;;  %6198 = vmatprep.mubr.bf16.mxu0 %v11832_v28  ;;  %v13155_v10 = vld [vmem:[#allocation72_spill] sm:$0xff] }
 0x757   : > { %v5189_v26 = vpop.f32.mrf.mxu0  ;;  %v5422_v55 = vpop.f32.mrf.mxu1 }
 0x758   : > { %v5683_v21 = vpack.c.bf16 %v5584_v47, %v5581_v3  ;;  %v5421_v42 = vadd.f32 %v5420_v14, %v5188_v58 }
 0x759   : > { %v5190_v33 = vpop.f32.mrf.mxu0  ;;  %v5423_v24 = vpop.f32.mrf.mxu1 }
 0x75a   : > { %v5191_v5 = vadd.f32 %v5190_v33, %v11908_v59  ;;  %6472 = vmatmul.mubr.bf16.gmra.mxu1 %v5683_v21  ;;  %v5587_v56 = vmax.f32 %v5421_v42, 0.0 }
 0x75b   : > { %v5192_v1 = vpop.f32.mrf.mxu0  ;;  %v5425_v60 = vpop.f32.mrf.mxu1  ;;  %6481 = vmatprep.mubr.bf16.mxu1 %v13149_v57 }
 0x75c   : > { %v5424_v19 = vadd.f32 %v5423_v24, %v5191_v5  ;;  %v13156_v1 = vld [vmem:[#allocation71_spill] sm:$0xff] }
 0x75d   : > { %v5195_v25 = vpop.f32.mrf.mxu0  ;;  %v5428_v8 = vpop.f32.mrf.mxu1  ;;  %6199 = vmatmul.mubr.bf16.gmra.mxu0 %v13150_v7 }
 0x75e   : > { %v5590_v28 = vmax.f32 %v5424_v19, 0.0  ;;  %v5196_v41 = vadd.f32 %v5195_v25, %v11908_v59  ;;  %6208 = vmatprep.mubr.bf16.mxu0 %v13151_v61 }
 0x75f   : > { %v5197_v32 = vpop.f32.mrf.mxu0  ;;  %v5430_v17 = vpop.f32.mrf.mxu1 }
 0x760   : > { %v5686_v50 = vpack.c.bf16 %v5590_v28, %v5587_v56  ;;  %v5429_v34 = vadd.f32 %v5428_v8, %v5196_v41  ;;  %v13157_v8 = vld [vmem:[#allocation84_spill] sm:$0xff] }
 0x761   : > { %v5198_v9 = vpop.f32.mrf.mxu0  ;;  %v5431_v54 = vpop.f32.mrf.mxu1 }
 0x762   : > { %v5199_v36 = vadd.f32 %v5198_v9, %v11908_v59  ;;  %6482 = vmatmul.mubr.bf16.gmra.mxu1 %v5686_v50  ;;  %v5593_v23 = vmax.f32 %v5429_v34, 0.0 }
 0x763   : > { %v5200_v35 = vpop.f32.mrf.mxu0  ;;  %v5433_v37 = vpop.f32.mrf.mxu1  ;;  %6491 = vmatprep.mubr.bf16.mxu1 %v13149_v57 }
 0x764   : > { %v5432_v29 = vadd.f32 %v5431_v54, %v5199_v36  ;;  %v13158_v35 = vld [vmem:[#allocation83_spill] sm:$0xff] }
 0x765   : > { %v5203_v30 = vpop.f32.mrf.mxu0  ;;  %v5436_v38 = vpop.f32.mrf.mxu1  ;;  %6209 = vmatmul.mubr.bf16.gmra.mxu0 %v13152_v63 }
 0x766   : > { %v5596_v22 = vmax.f32 %v5432_v29, 0.0  ;;  %v5204_v62 = vadd.f32 %v5203_v30, %v11908_v59  ;;  %6218 = vmatprep.mubr.bf16.mxu0 %v13153_v12 }
 0x767   : > { %v5205_v49 = vpop.f32.mrf.mxu0  ;;  %v5438_v13 = vpop.f32.mrf.mxu1 }
 0x768   : > { %v5689_v45 = vpack.c.bf16 %v5596_v22, %v5593_v23  ;;  %v5437_v18 = vadd.f32 %v5436_v38, %v5204_v62 }
 0x769   : > { %v5206_v6 = vpop.f32.mrf.mxu0  ;;  %v5439_v0 = vpop.f32.mrf.mxu1 }
 0x76a   : > { %v5207_v2 = vadd.f32 %v5206_v6, %v11908_v59  ;;  %6492 = vmatmul.mubr.bf16.gmra.mxu1 %v5689_v45  ;;  %v5599_v46 = vmax.f32 %v5437_v18, 0.0 }
 0x76b   : > { %v5208_v53 = vpop.f32.mrf.mxu0  ;;  %v5441_v39 = vpop.f32.mrf.mxu1  ;;  %6501 = vmatprep.mubr.bf16.mxu1 %v13149_v57 }
 0x76c   : > { %v5440_v52 = vadd.f32 %v5439_v0, %v5207_v2 }
 0x76d   : > { %v5211_v31 = vpop.f32.mrf.mxu0  ;;  %v5444_v44 = vpop.f32.mrf.mxu1  ;;  %6219 = vmatmul.mubr.bf16.gmra.mxu0 %v13154_v4 }
 0x76e   : > { %v5602_v16 = vmax.f32 %v5440_v52, 0.0  ;;  %v5212_v48 = vadd.f32 %v5211_v31, %v11908_v59  ;;  %6228 = vmatprep.mubr.bf16.mxu0 %v13155_v10 }
 0x76f   : > { %v5213_v20 = vpop.f32.mrf.mxu0  ;;  %v5446_v14 = vpop.f32.mrf.mxu1 }
 0x770   : > { %v5692_v3 = vpack.c.bf16 %v5602_v16, %v5599_v46  ;;  %v5445_v26 = vadd.f32 %v5444_v44, %v5212_v48 }
 0x771   : > { %v5214_v47 = vpop.f32.mrf.mxu0  ;;  %v5447_v58 = vpop.f32.mrf.mxu1 }
 0x772   : > { %v5215_v55 = vadd.f32 %v5214_v47, %v11908_v59  ;;  %6502 = vmatmul.mubr.bf16.gmra.mxu1 %v5692_v3  ;;  %v5605_v60 = vmax.f32 %v5445_v26, 0.0 }
 0x773   : > { %v5216_v21 = vpop.f32.mrf.mxu0  ;;  %v5449_v33 = vpop.f32.mrf.mxu1  ;;  %6511 = vmatprep.mubr.bf16.mxu1 %v13149_v57 }
 0x774   : > { %v5448_v24 = vadd.f32 %v5447_v58, %v5215_v55 }
 0x775   : > { %v5219_v42 = vpop.f32.mrf.mxu0  ;;  %v5452_v5 = vpop.f32.mrf.mxu1  ;;  %6229 = vmatmul.mubr.bf16.gmra.mxu0 %v13156_v1 }
 0x776   : > { %v5608_v19 = vmax.f32 %v5448_v24, 0.0  ;;  %v5220_v25 = vadd.f32 %v5219_v42, %v11908_v59  ;;  %6238 = vmatprep.mubr.bf16.mxu0 %v13157_v8 }
 0x777   : > { %v5221_v7 = vpop.f32.mrf.mxu0  ;;  %v5454_v56 = vpop.f32.mrf.mxu1 }
 0x778   : > { %v5695_v28 = vpack.c.bf16 %v5608_v19, %v5605_v60  ;;  %v5453_v32 = vadd.f32 %v5452_v5, %v5220_v25 }
 0x779   : > { %v5222_v41 = vpop.f32.mrf.mxu0  ;;  %v5455_v61 = vpop.f32.mrf.mxu1 }
 0x77a   : > { %v5223_v17 = vadd.f32 %v5222_v41, %v11908_v59  ;;  %6512 = vmatmul.mubr.bf16.gmra.mxu1 %v5695_v28  ;;  %v5611_v37 = vmax.f32 %v5453_v32, 0.0  ;;  %v12045_v41 = vld [vmem:[#allocation2] sm:$0xff] }
 0x77b   : > { %v5224_v50 = vpop.f32.mrf.mxu0  ;;  %v5457_v9 = vpop.f32.mrf.mxu1  ;;  %6521 = vmatprep.mubr.bf16.mxu1 %v13149_v57 }
 0x77c   : > { %v5456_v54 = vadd.f32 %v5455_v61, %v5223_v17 }
 0x77d   : > { %v5227_v34 = vpop.f32.mrf.mxu0  ;;  %v5460_v36 = vpop.f32.mrf.mxu1  ;;  %6239 = vmatmul.mubr.bf16.gmra.mxu0 %v13158_v35 }
 0x77e   : > { %v5614_v29 = vmax.f32 %v5456_v54, 0.0  ;;  %v5228_v30 = vadd.f32 %v5227_v34, %v11908_v59  ;;  %6248 = vmatprep.mubr.bf16.mxu0 %v11892_v40 }
 0x77f   : > { %v5229_v38 = vpop.f32.mrf.mxu0  ;;  %v5462_v63 = vpop.f32.mrf.mxu1 }
 0x780   : > { %v5698_v23 = vpack.c.bf16 %v5614_v29, %v5611_v37  ;;  %v5461_v12 = vadd.f32 %v5460_v36, %v5228_v30  ;;  %v12053_v36 = vld [vmem:[#allocation2 + $0x10] sm:$0xff]  ;;  %v12055_v37 = vld [vmem:[#allocation2 + $0x18] sm:$0xff] }
 0x781   : > { %v5230_v22 = vpop.f32.mrf.mxu0  ;;  %v5463_v62 = vpop.f32.mrf.mxu1 }
 0x782   : > { %v5231_v49 = vadd.f32 %v5230_v22, %v11908_v59  ;;  %6522 = vmatmul.mubr.bf16.gmra.mxu1 %v5698_v23  ;;  %v5617_v2 = vmax.f32 %v5461_v12, 0.0 }
 0x783   : > { %v5232_v13 = vpop.f32.mrf.mxu0  ;;  %v5465_v45 = vpop.f32.mrf.mxu1  ;;  %6531 = vmatprep.mubr.bf16.mxu1 %v13149_v57 }
 0x784   : > { %v5464_v6 = vadd.f32 %v5463_v62, %v5231_v49  ;;  %v12062_v49 = vld [vmem:[#allocation2 + $0x20] sm:$0xff]  ;;  %v12064_v45 = vld [vmem:[#allocation2 + $0x28] sm:$0xff] }
 0x785   : > { %v5235_v0 = vpop.f32.mrf.mxu0  ;;  %v5468_v18 = vpop.f32.mrf.mxu1  ;;  %6249 = vmatmul.mubr.bf16.gmra.mxu0 %v11888_v27 }
 0x786   : > { %v5620_v40 = vmax.f32 %v5464_v6, 0.0  ;;  %v5236_v53 = vadd.f32 %v5235_v0, %v11908_v59  ;;  %6258 = vmatprep.mubr.bf16.mxu0 %v11910_v11 }
 0x787   : > { %v5237_v39 = vpop.f32.mrf.mxu0  ;;  %v5470_v52 = vpop.f32.mrf.mxu1 }
 0x788   : > { %v5701_v31 = vpack.c.bf16 %v5620_v40, %v5617_v2  ;;  %v5469_v46 = vadd.f32 %v5468_v18, %v5236_v53 }
 0x789   : > { %v5238_v44 = vpop.f32.mrf.mxu0  ;;  %v5471_v4 = vpop.f32.mrf.mxu1 }
 0x78a   : > { %v5239_v16 = vadd.f32 %v5238_v44, %v11908_v59  ;;  %6532 = vmatmul.mubr.bf16.gmra.mxu1 %v5701_v31  ;;  %v5623_v3 = vmax.f32 %v5469_v46, 0.0  ;;  %v12069_v31 = vld [vmem:[#allocation2 + $0x30] sm:$0xff] }
 0x78b   : > { %v5240_v48 = vpop.f32.mrf.mxu0  ;;  %v5473_v10 = vpop.f32.mrf.mxu1  ;;  %6541 = vmatprep.mubr.bf16.mxu1 %v13149_v57 }
 0x78c   : > { %v5472_v27 = vadd.f32 %v5471_v4, %v5239_v16  ;;  %v12071_v4 = vld [vmem:[#allocation2 + $0x38] sm:$0xff] }
 0x78d   : > { %v5243_v20 = vpop.f32.mrf.mxu0  ;;  %v5476_v14 = vpop.f32.mrf.mxu1  ;;  %6259 = vmatmul.mubr.bf16.gmra.mxu0 %v11901_v15 }
 0x78e   : > { %v5626_v11 = vmax.f32 %v5472_v27, 0.0  ;;  %v5244_v47 = vadd.f32 %v5243_v20, %v11908_v59  ;;  %6268 = vmatprep.mubr.bf16.mxu0 %v11921_v51 }
 0x78f   : > { %v5245_v58 = vpop.f32.mrf.mxu0  ;;  %v5478_v26 = vpop.f32.mrf.mxu1 }
 0x790   : > { %v5704_v55 = vpack.c.bf16 %v5626_v11, %v5623_v3  ;;  %v5477_v24 = vadd.f32 %v5476_v14, %v5244_v47  ;;  %v12076_v11 = vld [vmem:[#allocation2 + $0x40] sm:$0xff]  ;;  %v12078_v58 = vld [vmem:[#allocation2 + $0x48] sm:$0xff] }
 0x791   : > { %v5246_v21 = vpop.f32.mrf.mxu0  ;;  %v5479_v33 = vpop.f32.mrf.mxu1 }
 0x792   : > { %v5247_v42 = vadd.f32 %v5246_v21, %v11908_v59  ;;  %6542 = vmatmul.mubr.bf16.gmra.mxu1 %v5704_v55  ;;  %v5629_v51 = vmax.f32 %v5477_v24, 0.0 }
 0x793   : > { %v5248_v5 = vpop.f32.mrf.mxu0  ;;  %v5481_v1 = vpop.f32.mrf.mxu1  ;;  %6551 = vmatprep.mubr.bf16.mxu1 %v13149_v57  ;;  %v12049_v57 = vld [vmem:[#allocation2 + $0x8] sm:$0xff] }
 0x794   : > { %v5480_v15 = vadd.f32 %v5479_v33, %v5247_v42 }
 0x795   : > { %v6030_v60 = vpop.f32.mrf.mxu0  ;;  %6269 = vmatmul.mubr.bf16.gmra.mxu0 %v11918_v43 }
 0x796   : > { %v5632_v19 = vmax.f32 %v5480_v15, 0.0  ;;  %v12083_v15 = vld [vmem:[#allocation2 + $0x50] sm:$0xff] }
 0x797   : > { %v6032_v25 = vpop.f32.mrf.mxu0 }
 0x798   : > { %v5707_v8 = vpack.c.bf16 %v5632_v19, %v5629_v51  ;;  %v12085_v51 = vld [vmem:[#allocation2 + $0x58] sm:$0xff] }
 0x799   : > { %v6034_v7 = vpop.f32.mrf.mxu0 }
 0x79a   : > { %v6313_v56 = vpop.f32.mrf.mxu1  ;;  %6552 = vmatmul.mubr.bf16.gmra.mxu1 %v5707_v8 }
 0x79b   : > { %v6314_v28 = vadd.f32 %v6313_v56, %v6030_v60  ;;  %v6036_v59 = vpop.f32.mrf.mxu0 }
 0x79c   : > { %v6315_v61 = vpop.f32.mrf.mxu1 }
 0x79d   : > { %v6316_v32 = vadd.f32 %v6315_v61, %v6032_v25  ;;  %v6040_v17 = vpop.f32.mrf.mxu0  ;;  %v6612_v50 = vadd.f32 %v12045_v41, %v6314_v28 }
 0x79e   : > { %v6317_v43 = vpop.f32.mrf.mxu1 }
 0x79f   : > { %v6613_v9 = vadd.f32 %v12049_v57, %v6316_v32  ;;  %v6318_v54 = vadd.f32 %v6317_v43, %v6034_v7  ;;  %v6042_v34 = vpop.f32.mrf.mxu0  ;;  %v12090_v32 = vld [vmem:[#allocation2 + $0x60] sm:$0xff]  ;;  %v12092_v43 = vld [vmem:[#allocation2 + $0x68] sm:$0xff] }
 0x7a0   : > { %v6319_v35 = vpop.f32.mrf.mxu1 }
 0x7a1   : > { %v7534_v29 = vpack.c.bf16 %v6613_v9, %v6612_v50  ;;  %v6320_v30 = vadd.f32 %v6319_v35, %v6036_v59  ;;  %v6044_v38 = vpop.f32.mrf.mxu0  ;;  %v6614_v23 = vadd.f32 %v12053_v36, %v6318_v54 }
 0x7a2   : > { %v6323_v63 = vpop.f32.mrf.mxu1 }
 0x7a3   : > { %7012 = vst [vmem:[%s12057_s19] sm:$0xff] %v7534_v29  ;;  %v6615_v22 = vadd.f32 %v12055_v37, %v6320_v30  ;;  %v6324_v62 = vadd.f32 %v6323_v63, %v6040_v17  ;;  %v6046_v12 = vpop.f32.mrf.mxu0  ;;  %v12097_v63 = vld [vmem:[#allocation2 + $0x70] sm:$0xff] }
 0x7a4   : > { %v6325_v13 = vpop.f32.mrf.mxu1 }
 0x7a5   : > { %v7535_v6 = vpack.c.bf16 %v6615_v22, %v6614_v23  ;;  %v6326_v0 = vadd.f32 %v6325_v13, %v6042_v34  ;;  %v6050_v18 = vpop.f32.mrf.mxu0  ;;  %v6616_v40 = vadd.f32 %v12062_v49, %v6324_v62  ;;  %v12099_v22 = vld [vmem:[#allocation2 + $0x78] sm:$0xff] }
 0x7a6   : > { %v6327_v2 = vpop.f32.mrf.mxu1 }
 0x7a7   : > { %7013 = vst [vmem:[%s12057_s19 + $0x8] sm:$0xff] %v7535_v6  ;;  %v6617_v53 = vadd.f32 %v12064_v45, %v6326_v0  ;;  %v6328_v39 = vadd.f32 %v6327_v2, %v6044_v38  ;;  %v6052_v52 = vpop.f32.mrf.mxu0 }
 0x7a8   : > { %v6329_v44 = vpop.f32.mrf.mxu1 }
 0x7a9   : > { %v7536_v46 = vpack.c.bf16 %v6617_v53, %v6616_v40  ;;  %v6330_v16 = vadd.f32 %v6329_v44, %v6046_v12  ;;  %v6054_v48 = vpop.f32.mrf.mxu0  ;;  %v6618_v27 = vadd.f32 %v12069_v31, %v6328_v39  ;;  %v12104_v53 = vld [vmem:[#allocation2 + $0x80] sm:$0xff] }
 0x7aa   : > { %v6333_v10 = vpop.f32.mrf.mxu1 }
 0x7ab   : > { %7014 = vst [vmem:[%s12057_s19 + $0x10] sm:$0xff] %v7536_v46  ;;  %v6619_v20 = vadd.f32 %v12071_v4, %v6330_v16  ;;  %v6334_v14 = vadd.f32 %v6333_v10, %v6050_v18  ;;  %v6056_v3 = vpop.f32.mrf.mxu0 }
 0x7ac   : > { %v6335_v47 = vpop.f32.mrf.mxu1 }
 0x7ad   : > { %v7537_v26 = vpack.c.bf16 %v6619_v20, %v6618_v27  ;;  %v6336_v55 = vadd.f32 %v6335_v47, %v6052_v52  ;;  %v6060_v21 = vpop.f32.mrf.mxu0  ;;  %v6620_v24 = vadd.f32 %v12076_v11, %v6334_v14  ;;  %v12106_v52 = vld [vmem:[#allocation2 + $0x88] sm:$0xff] }
 0x7ae   : > { %v6337_v33 = vpop.f32.mrf.mxu1 }
 0x7af   : > { %7015 = vst [vmem:[%s12057_s19 + $0x18] sm:$0xff] %v7537_v26  ;;  %v6621_v42 = vadd.f32 %v12078_v58, %v6336_v55  ;;  %v6338_v5 = vadd.f32 %v6337_v33, %v6054_v48  ;;  %v6062_v1 = vpop.f32.mrf.mxu0  ;;  %v12113_v26 = vld [vmem:[#allocation2 + $0x98] sm:$0xff] }
 0x7b0   : > { %v6339_v60 = vpop.f32.mrf.mxu1 }
 0x7b1   : > { %v7538_v19 = vpack.c.bf16 %v6621_v42, %v6620_v24  ;;  %v6340_v25 = vadd.f32 %v6339_v60, %v6056_v3  ;;  %v6064_v8 = vpop.f32.mrf.mxu0  ;;  %v6622_v56 = vadd.f32 %v12083_v15, %v6338_v5  ;;  %v12111_v3 = vld [vmem:[#allocation2 + $0x90] sm:$0xff] }
 0x7b2   : > { %v6343_v7 = vpop.f32.mrf.mxu1 }
 0x7b3   : > { %7016 = vst [vmem:[%s12057_s19 + $0x20] sm:$0xff] %v7538_v19  ;;  %v6623_v28 = vadd.f32 %v12085_v51, %v6340_v25  ;;  %v6344_v59 = vadd.f32 %v6343_v7, %v6060_v21  ;;  %v6066_v61 = vpop.f32.mrf.mxu0  ;;  %v12118_v19 = vld [vmem:[#allocation2 + $0xa0] sm:$0xff] }
 0x7b4   : > { %v6345_v17 = vpop.f32.mrf.mxu1 }
 0x7b5   : > { %v7539_v50 = vpack.c.bf16 %v6623_v28, %v6622_v56  ;;  %v6346_v9 = vadd.f32 %v6345_v17, %v6062_v1  ;;  %v6070_v54 = vpop.f32.mrf.mxu0  ;;  %v6624_v35 = vadd.f32 %v12090_v32, %v6344_v59 }
 0x7b6   : > { %v6347_v34 = vpop.f32.mrf.mxu1 }
 0x7b7   : > { %7017 = vst [vmem:[%s12057_s19 + $0x28] sm:$0xff] %v7539_v50  ;;  %v6625_v29 = vadd.f32 %v12092_v43, %v6346_v9  ;;  %v6348_v30 = vadd.f32 %v6347_v34, %v6064_v8  ;;  %v6072_v38 = vpop.f32.mrf.mxu0  ;;  %v12120_v8 = vld [vmem:[#allocation2 + $0xa8] sm:$0xff] }
 0x7b8   : > { %v6349_v23 = vpop.f32.mrf.mxu1 }
 0x7b9   : > { %v7540_v62 = vpack.c.bf16 %v6625_v29, %v6624_v35  ;;  %v6350_v12 = vadd.f32 %v6349_v23, %v6066_v61  ;;  %v6074_v13 = vpop.f32.mrf.mxu0  ;;  %v6626_v0 = vadd.f32 %v12097_v63, %v6348_v30  ;;  %v12127_v35 = vld [vmem:[#allocation2 + $0xb8] sm:$0xff] }
 0x7ba   : > { %v6353_v6 = vpop.f32.mrf.mxu1 }
 0x7bb   : > { %7018 = vst [vmem:[%s12057_s19 + $0x30] sm:$0xff] %v7540_v62  ;;  %v6627_v18 = vadd.f32 %v12099_v22, %v6350_v12  ;;  %v6354_v2 = vadd.f32 %v6353_v6, %v6070_v54  ;;  %v6076_v40 = vpop.f32.mrf.mxu0  ;;  %v12125_v54 = vld [vmem:[#allocation2 + $0xb0] sm:$0xff] }
 0x7bc   : > { %v6355_v39 = vpop.f32.mrf.mxu1 }
 0x7bd   : > { %v7541_v44 = vpack.c.bf16 %v6627_v18, %v6626_v0  ;;  %v6356_v46 = vadd.f32 %v6355_v39, %v6072_v38  ;;  %v6080_v16 = vpop.f32.mrf.mxu0  ;;  %v6628_v10 = vadd.f32 %v12104_v53, %v6354_v2  ;;  %v12132_v0 = vld [vmem:[#allocation2 + $0xc0] sm:$0xff]  ;;  %v12134_v2 = vld [vmem:[#allocation2 + $0xc8] sm:$0xff] }
 0x7be   : > { %v6357_v48 = vpop.f32.mrf.mxu1 }
 0x7bf   : > { %7019 = vst [vmem:[%s12057_s19 + $0x38] sm:$0xff] %v7541_v44  ;;  %v6629_v27 = vadd.f32 %v12106_v52, %v6356_v46  ;;  %v6358_v20 = vadd.f32 %v6357_v48, %v6074_v13  ;;  %v6082_v14 = vpop.f32.mrf.mxu0 }
 0x7c0   : > { %v6359_v47 = vpop.f32.mrf.mxu1 }
 0x7c1   : > { %v7542_v55 = vpack.c.bf16 %v6629_v27, %v6628_v10  ;;  %v6360_v21 = vadd.f32 %v6359_v47, %v6076_v40  ;;  %v6084_v33 = vpop.f32.mrf.mxu0  ;;  %v6630_v42 = vadd.f32 %v12111_v3, %v6358_v20  ;;  %v12139_v20 = vld [vmem:[#allocation2 + $0xd0] sm:$0xff]  ;;  %v12141_v47 = vld [vmem:[#allocation2 + $0xd8] sm:$0xff] }
 0x7c2   : > { %v6363_v24 = vpop.f32.mrf.mxu1 }
 0x7c3   : > { %7020 = vst [vmem:[%s12057_s19 + $0x40] sm:$0xff] %v7542_v55  ;;  %v6631_v5 = vadd.f32 %v12113_v26, %v6360_v21  ;;  %v6364_v1 = vadd.f32 %v6363_v24, %v6080_v16  ;;  %v6086_v60 = vpop.f32.mrf.mxu0 }
 0x7c4   : > { %v6365_v25 = vpop.f32.mrf.mxu1 }
 0x7c5   : > { %v7543_v7 = vpack.c.bf16 %v6631_v5, %v6630_v42  ;;  %v6366_v56 = vadd.f32 %v6365_v25, %v6082_v14  ;;  %v6090_v28 = vpop.f32.mrf.mxu0  ;;  %v6632_v61 = vadd.f32 %v12118_v19, %v6364_v1  ;;  %v12146_v25 = vld [vmem:[#allocation2 + $0xe0] sm:$0xff] }
 0x7c6   : > { %v6367_v59 = vpop.f32.mrf.mxu1 }
 0x7c7   : > { %7021 = vst [vmem:[%s12057_s19 + $0x48] sm:$0xff] %v7543_v7  ;;  %v6633_v17 = vadd.f32 %v12120_v8, %v6366_v56  ;;  %v6368_v50 = vadd.f32 %v6367_v59, %v6084_v33  ;;  %v6092_v9 = vpop.f32.mrf.mxu0  ;;  %v12148_v56 = vld [vmem:[#allocation2 + $0xe8] sm:$0xff] }
 0x7c8   : > { %v6369_v34 = vpop.f32.mrf.mxu1 }
 0x7c9   : > { %v7544_v29 = vpack.c.bf16 %v6633_v17, %v6632_v61  ;;  %v6370_v30 = vadd.f32 %v6369_v34, %v6086_v60  ;;  %v6094_v38 = vpop.f32.mrf.mxu0  ;;  %v6634_v62 = vadd.f32 %v12125_v54, %v6368_v50 }
 0x7ca   : > { %v6373_v23 = vpop.f32.mrf.mxu1 }
 0x7cb   : > { %7022 = vst [vmem:[%s12057_s19 + $0x50] sm:$0xff] %v7544_v29  ;;  %v6635_v12 = vadd.f32 %v12127_v35, %v6370_v30  ;;  %v6374_v13 = vadd.f32 %v6373_v23, %v6090_v28  ;;  %v6096_v6 = vpop.f32.mrf.mxu0  ;;  %v12153_v30 = vld [vmem:[#allocation2 + $0xf0] sm:$0xff]  ;;  %v12155_v23 = vld [vmem:[#allocation2 + $0xf8] sm:$0xff] }
 0x7cc   : > { %v6375_v18 = vpop.f32.mrf.mxu1 }
 0x7cd   : > { %v7545_v40 = vpack.c.bf16 %v6635_v12, %v6634_v62  ;;  %v6376_v39 = vadd.f32 %v6375_v18, %v6092_v9  ;;  %v6100_v44 = vpop.f32.mrf.mxu0  ;;  %v6636_v16 = vadd.f32 %v12132_v0, %v6374_v13 }
 0x7ce   : > { %v6377_v46 = vpop.f32.mrf.mxu1 }
 0x7cf   : > { %7023 = vst [vmem:[%s12057_s19 + $0x58] sm:$0xff] %v7545_v40  ;;  %v6637_v48 = vadd.f32 %v12134_v2, %v6376_v39  ;;  %v6378_v10 = vadd.f32 %v6377_v46, %v6094_v38  ;;  %v6102_v27 = vpop.f32.mrf.mxu0  ;;  %v12160_v46 = vld [vmem:[#allocation2 + $0x100] sm:$0xff] }
 0x7d0   : > { %v6379_v14 = vpop.f32.mrf.mxu1 }
 0x7d1   : > { %v7546_v55 = vpack.c.bf16 %v6637_v48, %v6636_v16  ;;  %v6380_v21 = vadd.f32 %v6379_v14, %v6096_v6  ;;  %v6104_v33 = vpop.f32.mrf.mxu0  ;;  %v6638_v42 = vadd.f32 %v12139_v20, %v6378_v10  ;;  %v12162_v48 = vld [vmem:[#allocation2 + $0x108] sm:$0xff] }
 0x7d2   : > { %v6383_v24 = vpop.f32.mrf.mxu1 }
 0x7d3   : > { %7024 = vst [vmem:[%s12057_s19 + $0x60] sm:$0xff] %v7546_v55  ;;  %v6639_v5 = vadd.f32 %v12141_v47, %v6380_v21  ;;  %v6384_v1 = vadd.f32 %v6383_v24, %v6100_v44  ;;  %v6106_v60 = vpop.f32.mrf.mxu0 }
 0x7d4   : > { %v6385_v7 = vpop.f32.mrf.mxu1 }
 0x7d5   : > { %v7547_v28 = vpack.c.bf16 %v6639_v5, %v6638_v42  ;;  %v6386_v59 = vadd.f32 %v6385_v7, %v6102_v27  ;;  %v6110_v61 = vpop.f32.mrf.mxu0  ;;  %v6640_v50 = vadd.f32 %v12146_v25, %v6384_v1  ;;  %v12167_v5 = vld [vmem:[#allocation2 + $0x110] sm:$0xff] }
 0x7d6   : > { %v6387_v17 = vpop.f32.mrf.mxu1 }
 0x7d7   : > { %7025 = vst [vmem:[%s12057_s19 + $0x68] sm:$0xff] %v7547_v28  ;;  %v6641_v9 = vadd.f32 %v12148_v56, %v6386_v59  ;;  %v6388_v34 = vadd.f32 %v6387_v17, %v6104_v33  ;;  %v6112_v29 = vpop.f32.mrf.mxu0 }
 0x7d8   : > { %v6389_v38 = vpop.f32.mrf.mxu1 }
 0x7d9   : > { %v7548_v62 = vpack.c.bf16 %v6641_v9, %v6640_v50  ;;  %v6390_v12 = vadd.f32 %v6389_v38, %v6106_v60  ;;  %v6114_v13 = vpop.f32.mrf.mxu0  ;;  %v6642_v18 = vadd.f32 %v12153_v30, %v6388_v34  ;;  %v12169_v60 = vld [vmem:[#allocation2 + $0x118] sm:$0xff] }
 0x7da   : > { %v6393_v6 = vpop.f32.mrf.mxu1 }
 0x7db   : > { %7026 = vst [vmem:[%s12057_s19 + $0x70] sm:$0xff] %v7548_v62  ;;  %v6643_v40 = vadd.f32 %v12155_v23, %v6390_v12  ;;  %v6394_v39 = vadd.f32 %v6393_v6, %v6110_v61  ;;  %v6116_v44 = vpop.f32.mrf.mxu0  ;;  %v12176_v62 = vld [vmem:[#allocation2 + $0x128] sm:$0xff] }
 0x7dc   : > { %v6395_v16 = vpop.f32.mrf.mxu1 }
 0x7dd   : > { %v7549_v10 = vpack.c.bf16 %v6643_v40, %v6642_v18  ;;  %v6396_v27 = vadd.f32 %v6395_v16, %v6112_v29  ;;  %v6120_v14 = vpop.f32.mrf.mxu0  ;;  %v6644_v21 = vadd.f32 %v12160_v46, %v6394_v39  ;;  %v12174_v29 = vld [vmem:[#allocation2 + $0x120] sm:$0xff] }
 0x7de   : > { %v6397_v55 = vpop.f32.mrf.mxu1 }
 0x7df   : > { %7027 = vst [vmem:[%s12057_s19 + $0x78] sm:$0xff] %v7549_v10  ;;  %v6645_v33 = vadd.f32 %v12162_v48, %v6396_v27  ;;  %v6398_v24 = vadd.f32 %v6397_v55, %v6114_v13  ;;  %v6122_v42 = vpop.f32.mrf.mxu0  ;;  %v12181_v10 = vld [vmem:[#allocation2 + $0x130] sm:$0xff] }
 0x7e0   : > { %v6399_v1 = vpop.f32.mrf.mxu1 }
 0x7e1   : > { %v7550_v7 = vpack.c.bf16 %v6645_v33, %v6644_v21  ;;  %v6400_v28 = vadd.f32 %v6399_v1, %v6116_v44  ;;  %v6124_v59 = vpop.f32.mrf.mxu0  ;;  %v6646_v17 = vadd.f32 %v12167_v5, %v6398_v24 }
 0x7e2   : > { %v6403_v61 = vpop.f32.mrf.mxu1 }
 0x7e3   : > { %7028 = vst [vmem:[%s12057_s19 + $0x80] sm:$0xff] %v7550_v7  ;;  %v6647_v50 = vadd.f32 %v12169_v60, %v6400_v28  ;;  %v6404_v9 = vadd.f32 %v6403_v61, %v6120_v14  ;;  %v6126_v34 = vpop.f32.mrf.mxu0  ;;  %v12183_v14 = vld [vmem:[#allocation2 + $0x138] sm:$0xff]  ;;  %v12188_v61 = vld [vmem:[#allocation2 + $0x140] sm:$0xff] }
 0x7e4   : > { %v6405_v38 = vpop.f32.mrf.mxu1 }
 0x7e5   : > { %v7551_v12 = vpack.c.bf16 %v6647_v50, %v6646_v17  ;;  %v6406_v13 = vadd.f32 %v6405_v38, %v6122_v42  ;;  %v6130_v6 = vpop.f32.mrf.mxu0  ;;  %v6648_v40 = vadd.f32 %v12174_v29, %v6404_v9  ;;  %v12190_v17 = vld [vmem:[#allocation2 + $0x148] sm:$0xff] }
 0x7e6   : > { %v6407_v18 = vpop.f32.mrf.mxu1  ;;  %13159 = vst [vmem:[#allocation81_spill] sm:$0xff] %v12190_v17 }
 0x7e7   : > { %7029 = vst [vmem:[%s12057_s19 + $0x88] sm:$0xff] %v7551_v12  ;;  %v6649_v39 = vadd.f32 %v12176_v62, %v6406_v13  ;;  %v6408_v44 = vadd.f32 %v6407_v18, %v6124_v59  ;;  %v6132_v16 = vpop.f32.mrf.mxu0 }
 0x7e8   : > { %v6409_v27 = vpop.f32.mrf.mxu1 }
 0x7e9   : > { %v7552_v55 = vpack.c.bf16 %v6649_v39, %v6648_v40  ;;  %v6410_v21 = vadd.f32 %v6409_v27, %v6126_v34  ;;  %v6134_v33 = vpop.f32.mrf.mxu0  ;;  %v6650_v42 = vadd.f32 %v12181_v10, %v6408_v44  ;;  %v12195_v39 = vld [vmem:[#allocation2 + $0x150] sm:$0xff]  ;;  %v12197_v44 = vld [vmem:[#allocation2 + $0x158] sm:$0xff] }
 0x7ea   : > { %v6413_v24 = vpop.f32.mrf.mxu1  ;;  %13160 = vst [vmem:[#allocation82_spill] sm:$0xff] %v12195_v39  ;;  %13161 = vst [vmem:[#allocation85_spill] sm:$0xff] %v12197_v44 }
 0x7eb   : > { %7030 = vst [vmem:[%s12057_s19 + $0x90] sm:$0xff] %v7552_v55  ;;  %v6651_v1 = vadd.f32 %v12183_v14, %v6410_v21  ;;  %v6414_v7 = vadd.f32 %v6413_v24, %v6130_v6  ;;  %v6136_v28 = vpop.f32.mrf.mxu0 }
 0x7ec   : > { %v6415_v59 = vpop.f32.mrf.mxu1 }
 0x7ed   : > { %v7553_v50 = vpack.c.bf16 %v6651_v1, %v6650_v42  ;;  %v6416_v9 = vadd.f32 %v6415_v59, %v6132_v16  ;;  %v6140_v38 = vpop.f32.mrf.mxu0  ;;  %v6652_v34 = vadd.f32 %v12188_v61, %v6414_v7  ;;  %v12202_v59 = vld [vmem:[#allocation2 + $0x160] sm:$0xff] }
 0x7ee   : > { %v6417_v12 = vpop.f32.mrf.mxu1  ;;  %13162 = vst [vmem:[#allocation86_spill] sm:$0xff] %v12202_v59 }
 0x7ef   : > { %7031 = vst [vmem:[%s12057_s19 + $0x98] sm:$0xff] %v7553_v50  ;;  %v6653_v13 = vadd.f32 %v12190_v17, %v6416_v9  ;;  %v6418_v18 = vadd.f32 %v6417_v12, %v6134_v33  ;;  %v6142_v40 = vpop.f32.mrf.mxu0  ;;  %v12204_v50 = vld [vmem:[#allocation2 + $0x168] sm:$0xff] }
 0x7f0   : > { %v6419_v6 = vpop.f32.mrf.mxu1  ;;  %13163 = vst [vmem:[#allocation79_spill] sm:$0xff] %v12204_v50 }
 0x7f1   : > { %v7554_v27 = vpack.c.bf16 %v6653_v13, %v6652_v34  ;;  %v6420_v55 = vadd.f32 %v6419_v6, %v6136_v28  ;;  %v6144_v21 = vpop.f32.mrf.mxu0  ;;  %v6654_v16 = vadd.f32 %v12195_v39, %v6418_v18 }
 0x7f2   : > { %v6423_v24 = vpop.f32.mrf.mxu1 }
 0x7f3   : > { %7032 = vst [vmem:[%s12057_s19 + $0xa0] sm:$0xff] %v7554_v27  ;;  %v6655_v42 = vadd.f32 %v12197_v44, %v6420_v55  ;;  %v6424_v1 = vadd.f32 %v6423_v24, %v6140_v38  ;;  %v6146_v7 = vpop.f32.mrf.mxu0  ;;  %v12209_v55 = vld [vmem:[#allocation2 + $0x170] sm:$0xff]  ;;  %v12211_v24 = vld [vmem:[#allocation2 + $0x178] sm:$0xff] }
 0x7f4   : > { %v6425_v33 = vpop.f32.mrf.mxu1  ;;  %13164 = vst [vmem:[#allocation80_spill] sm:$0xff] %v12209_v55  ;;  %13165 = vst [vmem:[#allocation91_spill] sm:$0xff] %v12211_v24 }
 0x7f5   : > { %v7555_v9 = vpack.c.bf16 %v6655_v42, %v6654_v16  ;;  %v6426_v12 = vadd.f32 %v6425_v33, %v6142_v40  ;;  %v6150_v34 = vpop.f32.mrf.mxu0  ;;  %v6656_v28 = vadd.f32 %v12202_v59, %v6424_v1 }
 0x7f6   : > { %v6427_v13 = vpop.f32.mrf.mxu1 }
 0x7f7   : > { %7033 = vst [vmem:[%s12057_s19 + $0xa8] sm:$0xff] %v7555_v9  ;;  %v6657_v6 = vadd.f32 %v12204_v50, %v6426_v12  ;;  %v6428_v18 = vadd.f32 %v6427_v13, %v6144_v21  ;;  %v6152_v27 = vpop.f32.mrf.mxu0  ;;  %v12216_v12 = vld [vmem:[#allocation2 + $0x180] sm:$0xff]  ;;  %v12218_v13 = vld [vmem:[#allocation2 + $0x188] sm:$0xff] }
 0x7f8   : > { %v6429_v38 = vpop.f32.mrf.mxu1 }
 0x7f9   : > { %v7556_v44 = vpack.c.bf16 %v6657_v6, %v6656_v28  ;;  %v6430_v39 = vadd.f32 %v6429_v38, %v6146_v7  ;;  %v6154_v16 = vpop.f32.mrf.mxu0  ;;  %v6658_v40 = vadd.f32 %v12209_v55, %v6428_v18 }
 0x7fa   : > { %v6433_v42 = vpop.f32.mrf.mxu1 }
 0x7fb   : > { %7034 = vst [vmem:[%s12057_s19 + $0xb0] sm:$0xff] %v7556_v44  ;;  %v6659_v33 = vadd.f32 %v12211_v24, %v6430_v39  ;;  %v6434_v1 = vadd.f32 %v6433_v42, %v6150_v34  ;;  %v6156_v9 = vpop.f32.mrf.mxu0 }
 0x7fc   : > { %v6435_v21 = vpop.f32.mrf.mxu1 }
 0x7fd   : > { %v7557_v50 = vpack.c.bf16 %v6659_v33, %v6658_v40  ;;  %v6436_v59 = vadd.f32 %v6435_v21, %v6152_v27  ;;  %v6160_v28 = vpop.f32.mrf.mxu0  ;;  %v6660_v7 = vadd.f32 %v12216_v12, %v6434_v1 }
 0x7fe   : > { %v6437_v6 = vpop.f32.mrf.mxu1 }
 0x7ff   : > { %7035 = vst [vmem:[%s12057_s19 + $0xb8] sm:$0xff] %v7557_v50  ;;  %v6661_v44 = vadd.f32 %v12218_v13, %v6436_v59  ;;  %v6438_v18 = vadd.f32 %v6437_v6, %v6154_v16  ;;  %v6162_v38 = vpop.f32.mrf.mxu0 }
 0x800   : > { %v6439_v39 = vpop.f32.mrf.mxu1 }
 0x801   : > { %v7558_v34 = vpack.c.bf16 %v6661_v44, %v6660_v7  ;;  %v6440_v42 = vadd.f32 %v6439_v39, %v6156_v9  ;;  %v6164_v24 = vpop.f32.mrf.mxu0  ;;  %v6662_v17 = vadd.f32 %v12045_v41, %v6438_v18 }
 0x802   : > { %v6443_v55 = vpop.f32.mrf.mxu1 }
 0x803   : > { %7036 = vst [vmem:[%s12057_s19 + $0xc0] sm:$0xff] %v7558_v34  ;;  %v6663_v27 = vadd.f32 %v12049_v57, %v6440_v42  ;;  %v6444_v40 = vadd.f32 %v6443_v55, %v6160_v28  ;;  %v6166_v33 = vpop.f32.mrf.mxu0 }
 0x804   : > { %v6445_v50 = vpop.f32.mrf.mxu1 }
 0x805   : > { %v7559_v1 = vpack.c.bf16 %v6663_v27, %v6662_v17  ;;  %v6446_v21 = vadd.f32 %v6445_v50, %v6162_v38  ;;  %v6170_v59 = vpop.f32.mrf.mxu0  ;;  %v6664_v6 = vadd.f32 %v12053_v36, %v6444_v40 }
 0x806   : > { %v6447_v16 = vpop.f32.mrf.mxu1 }
 0x807   : > { %7037 = vst [vmem:[%s12057_s19 + $0xc8] sm:$0xff] %v7559_v1  ;;  %v6665_v9 = vadd.f32 %v12055_v37, %v6446_v21  ;;  %v6448_v7 = vadd.f32 %v6447_v16, %v6164_v24  ;;  %v6172_v44 = vpop.f32.mrf.mxu0 }
 0x808   : > { %v6449_v39 = vpop.f32.mrf.mxu1 }
 0x809   : > { %v7560_v41 = vpack.c.bf16 %v6665_v9, %v6664_v6  ;;  %v6450_v18 = vadd.f32 %v6449_v39, %v6166_v33  ;;  %v6174_v57 = vpop.f32.mrf.mxu0  ;;  %v6666_v28 = vadd.f32 %v12062_v49, %v6448_v7 }
 0x80a   : > { %v6453_v55 = vpop.f32.mrf.mxu1 }
 0x80b   : > { %7038 = vst [vmem:[%s12057_s19 + $0xd0] sm:$0xff] %v7560_v41  ;;  %v6667_v17 = vadd.f32 %v12064_v45, %v6450_v18  ;;  %v6454_v38 = vadd.f32 %v6453_v55, %v6170_v59  ;;  %v6176_v34 = vpop.f32.mrf.mxu0 }
 0x80c   : > { %v6455_v42 = vpop.f32.mrf.mxu1 }
 0x80d   : > { %v7561_v36 = vpack.c.bf16 %v6667_v17, %v6666_v28  ;;  %v6456_v27 = vadd.f32 %v6455_v42, %v6172_v44  ;;  %v6180_v37 = vpop.f32.mrf.mxu0  ;;  %v6668_v40 = vadd.f32 %v12069_v31, %v6454_v38 }
 0x80e   : > { %v6457_v24 = vpop.f32.mrf.mxu1 }
 0x80f   : > { %7039 = vst [vmem:[%s12057_s19 + $0xd8] sm:$0xff] %v7561_v36  ;;  %v6669_v33 = vadd.f32 %v12071_v4, %v6456_v27  ;;  %v6458_v50 = vadd.f32 %v6457_v24, %v6174_v57  ;;  %v6182_v1 = vpop.f32.mrf.mxu0 }
 0x810   : > { %v6459_v21 = vpop.f32.mrf.mxu1 }
 0x811   : > { %v7562_v49 = vpack.c.bf16 %v6669_v33, %v6668_v40  ;;  %v6460_v16 = vadd.f32 %v6459_v21, %v6176_v34  ;;  %v6184_v45 = vpop.f32.mrf.mxu0  ;;  %v6670_v6 = vadd.f32 %v12076_v11, %v6458_v50 }
 0x812   : > { %v6463_v59 = vpop.f32.mrf.mxu1 }
 0x813   : > { %7040 = vst [vmem:[%s12057_s19 + $0xe0] sm:$0xff] %v7562_v49  ;;  %v6671_v9 = vadd.f32 %v12078_v58, %v6460_v16  ;;  %v6464_v7 = vadd.f32 %v6463_v59, %v6180_v37  ;;  %v6186_v44 = vpop.f32.mrf.mxu0 }
 0x814   : > { %v6465_v39 = vpop.f32.mrf.mxu1 }
 0x815   : > { %v7563_v31 = vpack.c.bf16 %v6671_v9, %v6670_v6  ;;  %v6466_v41 = vadd.f32 %v6465_v39, %v6182_v1  ;;  %v6190_v4 = vpop.f32.mrf.mxu0  ;;  %v6672_v57 = vadd.f32 %v12083_v15, %v6464_v7 }
 0x816   : > { %v6467_v18 = vpop.f32.mrf.mxu1 }
 0x817   : > { %7041 = vst [vmem:[%s12057_s19 + $0xe8] sm:$0xff] %v7563_v31  ;;  %v6673_v55 = vadd.f32 %v12085_v51, %v6466_v41  ;;  %v6468_v28 = vadd.f32 %v6467_v18, %v6184_v45  ;;  %v6192_v17 = vpop.f32.mrf.mxu0 }
 0x818   : > { %v6469_v38 = vpop.f32.mrf.mxu1 }
 0x819   : > { %v7564_v11 = vpack.c.bf16 %v6673_v55, %v6672_v57  ;;  %v6470_v34 = vadd.f32 %v6469_v38, %v6186_v44  ;;  %v6194_v58 = vpop.f32.mrf.mxu0  ;;  %v6674_v36 = vadd.f32 %v12090_v32, %v6468_v28 }
 0x81a   : > { %v6473_v42 = vpop.f32.mrf.mxu1 }
 0x81b   : > { %7042 = vst [vmem:[%s12057_s19 + $0xf0] sm:$0xff] %v7564_v11  ;;  %v6675_v27 = vadd.f32 %v12092_v43, %v6470_v34  ;;  %v6474_v37 = vadd.f32 %v6473_v42, %v6190_v4  ;;  %v6196_v24 = vpop.f32.mrf.mxu0 }
 0x81c   : > { %v6475_v40 = vpop.f32.mrf.mxu1 }
 0x81d   : > { %v7565_v15 = vpack.c.bf16 %v6675_v27, %v6674_v36  ;;  %v6476_v33 = vadd.f32 %v6475_v40, %v6192_v17  ;;  %v6200_v51 = vpop.f32.mrf.mxu0  ;;  %v6676_v1 = vadd.f32 %v12097_v63, %v6474_v37 }
 0x81e   : > { %v6477_v50 = vpop.f32.mrf.mxu1 }
 0x81f   : > { %7043 = vst [vmem:[%s12057_s19 + $0xf8] sm:$0xff] %v7565_v15  ;;  %v6677_v21 = vadd.f32 %v12099_v22, %v6476_v33  ;;  %v6478_v49 = vadd.f32 %v6477_v50, %v6194_v58  ;;  %v6202_v16 = vpop.f32.mrf.mxu0 }
 0x820   : > { %v6479_v45 = vpop.f32.mrf.mxu1 }
 0x821   : > { %v7566_v32 = vpack.c.bf16 %v6677_v21, %v6676_v1  ;;  %v6480_v59 = vadd.f32 %v6479_v45, %v6196_v24  ;;  %v6204_v43 = vpop.f32.mrf.mxu0  ;;  %v6678_v9 = vadd.f32 %v12104_v53, %v6478_v49 }
 0x822   : > { %v6483_v6 = vpop.f32.mrf.mxu1 }
 0x823   : > { %7044 = vst [vmem:[%s12057_s19 + $0x100] sm:$0xff] %v7566_v32  ;;  %v6679_v7 = vadd.f32 %v12106_v52, %v6480_v59  ;;  %v6484_v44 = vadd.f32 %v6483_v6, %v6200_v51  ;;  %v6206_v39 = vpop.f32.mrf.mxu0 }
 0x824   : > { %v6485_v31 = vpop.f32.mrf.mxu1 }
 0x825   : > { %v7567_v63 = vpack.c.bf16 %v6679_v7, %v6678_v9  ;;  %v6486_v41 = vadd.f32 %v6485_v31, %v6202_v16  ;;  %v6210_v22 = vpop.f32.mrf.mxu0  ;;  %v6680_v18 = vadd.f32 %v12111_v3, %v6484_v44 }
 0x826   : > { %v6487_v4 = vpop.f32.mrf.mxu1 }
 0x827   : > { %7045 = vst [vmem:[%s12057_s19 + $0x108] sm:$0xff] %v7567_v63  ;;  %v6681_v57 = vadd.f32 %v12113_v26, %v6486_v41  ;;  %v6488_v55 = vadd.f32 %v6487_v4, %v6204_v43  ;;  %v6212_v28 = vpop.f32.mrf.mxu0 }
 0x828   : > { %v6489_v17 = vpop.f32.mrf.mxu1 }
 0x829   : > { %v7568_v53 = vpack.c.bf16 %v6681_v57, %v6680_v18  ;;  %v6490_v38 = vadd.f32 %v6489_v17, %v6206_v39  ;;  %v6214_v52 = vpop.f32.mrf.mxu0  ;;  %v6682_v34 = vadd.f32 %v12118_v19, %v6488_v55 }
 0x82a   : > { %v6493_v11 = vpop.f32.mrf.mxu1 }
 0x82b   : > { %7046 = vst [vmem:[%s12057_s19 + $0x110] sm:$0xff] %v7568_v53  ;;  %v6683_v58 = vadd.f32 %v12120_v8, %v6490_v38  ;;  %v6494_v42 = vadd.f32 %v6493_v11, %v6210_v22  ;;  %v6216_v36 = vpop.f32.mrf.mxu0 }
 0x82c   : > { %v6495_v27 = vpop.f32.mrf.mxu1 }
 0x82d   : > { %v7569_v3 = vpack.c.bf16 %v6683_v58, %v6682_v34  ;;  %v6496_v37 = vadd.f32 %v6495_v27, %v6212_v28  ;;  %v6220_v26 = vpop.f32.mrf.mxu0  ;;  %v6684_v40 = vadd.f32 %v12125_v54, %v6494_v42 }
 0x82e   : > { %v6497_v24 = vpop.f32.mrf.mxu1 }
 0x82f   : > { %7047 = vst [vmem:[%s12057_s19 + $0x118] sm:$0xff] %v7569_v3  ;;  %v6685_v15 = vadd.f32 %v12127_v35, %v6496_v37  ;;  %v6498_v33 = vadd.f32 %v6497_v24, %v6214_v52  ;;  %v6222_v51 = vpop.f32.mrf.mxu0 }
 0x830   : > { %v6499_v50 = vpop.f32.mrf.mxu1 }
 0x831   : > { %v7570_v19 = vpack.c.bf16 %v6685_v15, %v6684_v40  ;;  %v6500_v1 = vadd.f32 %v6499_v50, %v6216_v36  ;;  %v6224_v8 = vpop.f32.mrf.mxu0  ;;  %v6686_v49 = vadd.f32 %v12132_v0, %v6498_v33 }
 0x832   : > { %v6503_v21 = vpop.f32.mrf.mxu1 }
 0x833   : > { %7048 = vst [vmem:[%s12057_s19 + $0x120] sm:$0xff] %v7570_v19  ;;  %v6687_v16 = vadd.f32 %v12134_v2, %v6500_v1  ;;  %v6504_v45 = vadd.f32 %v6503_v21, %v6220_v26  ;;  %v6226_v32 = vpop.f32.mrf.mxu0 }
 0x834   : > { %v6505_v59 = vpop.f32.mrf.mxu1 }
 0x835   : > { %v7571_v54 = vpack.c.bf16 %v6687_v16, %v6686_v49  ;;  %v6506_v43 = vadd.f32 %v6505_v59, %v6222_v51  ;;  %v6230_v35 = vpop.f32.mrf.mxu0  ;;  %v6688_v9 = vadd.f32 %v12139_v20, %v6504_v45 }
 0x836   : > { %v6507_v6 = vpop.f32.mrf.mxu1 }
 0x837   : > { %7049 = vst [vmem:[%s12057_s19 + $0x128] sm:$0xff] %v7571_v54  ;;  %v6689_v7 = vadd.f32 %v12141_v47, %v6506_v43  ;;  %v6508_v44 = vadd.f32 %v6507_v6, %v6224_v8  ;;  %v6232_v39 = vpop.f32.mrf.mxu0 }
 0x838   : > { %v6509_v31 = vpop.f32.mrf.mxu1 }
 0x839   : > { %v7572_v0 = vpack.c.bf16 %v6689_v7, %v6688_v9  ;;  %v6510_v63 = vadd.f32 %v6509_v31, %v6226_v32  ;;  %v6234_v2 = vpop.f32.mrf.mxu0  ;;  %v6690_v22 = vadd.f32 %v12146_v25, %v6508_v44 }
 0x83a   : > { %v6513_v41 = vpop.f32.mrf.mxu1 }
 0x83b   : > { %7050 = vst [vmem:[%s12057_s19 + $0x130] sm:$0xff] %v7572_v0  ;;  %v6691_v4 = vadd.f32 %v12148_v56, %v6510_v63  ;;  %v6514_v18 = vadd.f32 %v6513_v41, %v6230_v35  ;;  %v6236_v57 = vpop.f32.mrf.mxu0  ;;  %v13166_v0 = vld [vmem:[#allocation81_spill] sm:$0xff] }
 0x83c   : > { %v6515_v55 = vpop.f32.mrf.mxu1 }
 0x83d   : > { %v7573_v20 = vpack.c.bf16 %v6691_v4, %v6690_v22  ;;  %v6516_v28 = vadd.f32 %v6515_v55, %v6232_v39  ;;  %v6240_v47 = vpop.f32.mrf.mxu0  ;;  %v6692_v53 = vadd.f32 %v12153_v30, %v6514_v18 }
 0x83e   : > { %v6517_v17 = vpop.f32.mrf.mxu1 }
 0x83f   : > { %7051 = vst [vmem:[%s12057_s19 + $0x138] sm:$0xff] %v7573_v20  ;;  %v6693_v38 = vadd.f32 %v12155_v23, %v6516_v28  ;;  %v6518_v52 = vadd.f32 %v6517_v17, %v6234_v2  ;;  %v6242_v11 = vpop.f32.mrf.mxu0  ;;  %v13168_v20 = vld [vmem:[#allocation85_spill] sm:$0xff] }
 0x840   : > { %v6519_v34 = vpop.f32.mrf.mxu1 }
 0x841   : > { %v7574_v25 = vpack.c.bf16 %v6693_v38, %v6692_v53  ;;  %v6520_v58 = vadd.f32 %v6519_v34, %v6236_v57  ;;  %v6244_v56 = vpop.f32.mrf.mxu0  ;;  %v6694_v36 = vadd.f32 %v12160_v46, %v6518_v52  ;;  %v13167_v57 = vld [vmem:[#allocation82_spill] sm:$0xff] }
 0x842   : > { %v6523_v42 = vpop.f32.mrf.mxu1 }
 0x843   : > { %7052 = vst [vmem:[%s12057_s19 + $0x140] sm:$0xff] %v7574_v25  ;;  %v6695_v27 = vadd.f32 %v12162_v48, %v6520_v58  ;;  %v6524_v3 = vadd.f32 %v6523_v42, %v6240_v47  ;;  %v6246_v37 = vpop.f32.mrf.mxu0  ;;  %v13170_v25 = vld [vmem:[#allocation79_spill] sm:$0xff] }
 0x844   : > { %v6525_v26 = vpop.f32.mrf.mxu1 }
 0x845   : > { %v7575_v30 = vpack.c.bf16 %v6695_v27, %v6694_v36  ;;  %v6526_v24 = vadd.f32 %v6525_v26, %v6242_v11  ;;  %v6250_v23 = vpop.f32.mrf.mxu0  ;;  %v6696_v15 = vadd.f32 %v12167_v5, %v6524_v3  ;;  %v13169_v11 = vld [vmem:[#allocation86_spill] sm:$0xff]  ;;  %v13171_v26 = vld [vmem:[#allocation80_spill] sm:$0xff] }
 0x846   : > { %v6527_v40 = vpop.f32.mrf.mxu1 }
 0x847   : > { %7053 = vst [vmem:[%s12057_s19 + $0x148] sm:$0xff] %v7575_v30  ;;  %v6697_v33 = vadd.f32 %v12169_v60, %v6526_v24  ;;  %v6528_v51 = vadd.f32 %v6527_v40, %v6244_v56  ;;  %v6252_v50 = vpop.f32.mrf.mxu0  ;;  %v13172_v24 = vld [vmem:[#allocation91_spill] sm:$0xff] }
 0x848   : > { %v6529_v19 = vpop.f32.mrf.mxu1 }
 0x849   : > { %v7576_v46 = vpack.c.bf16 %v6697_v33, %v6696_v15  ;;  %v6530_v1 = vadd.f32 %v6529_v19, %v6246_v37  ;;  %v6254_v48 = vpop.f32.mrf.mxu0  ;;  %v6698_v21 = vadd.f32 %v12174_v29, %v6528_v51 }
 0x84a   : > { %v6533_v8 = vpop.f32.mrf.mxu1 }
 0x84b   : > { %7054 = vst [vmem:[%s12057_s19 + $0x150] sm:$0xff] %v7576_v46  ;;  %v6699_v49 = vadd.f32 %v12176_v62, %v6530_v1  ;;  %v6534_v16 = vadd.f32 %v6533_v8, %v6250_v23  ;;  %v6256_v45 = vpop.f32.mrf.mxu0 }
 0x84c   : > { %v6535_v32 = vpop.f32.mrf.mxu1 }
 0x84d   : > { %v7577_v5 = vpack.c.bf16 %v6699_v49, %v6698_v21  ;;  %v6536_v59 = vadd.f32 %v6535_v32, %v6252_v50  ;;  %v6260_v60 = vpop.f32.mrf.mxu0  ;;  %v6700_v43 = vadd.f32 %v12181_v10, %v6534_v16 }
 0x84e   : > { %v6537_v54 = vpop.f32.mrf.mxu1 }
 0x84f   : > { %7055 = vst [vmem:[%s12057_s19 + $0x158] sm:$0xff] %v7577_v5  ;;  %v6701_v35 = vadd.f32 %v12183_v14, %v6536_v59  ;;  %v6538_v6 = vadd.f32 %v6537_v54, %v6254_v48  ;;  %v6262_v9 = vpop.f32.mrf.mxu0 }
 0x850   : > { %v6539_v7 = vpop.f32.mrf.mxu1 }
 0x851   : > { %v7578_v29 = vpack.c.bf16 %v6701_v35, %v6700_v43  ;;  %v6540_v44 = vadd.f32 %v6539_v7, %v6256_v45  ;;  %v6264_v62 = vpop.f32.mrf.mxu0  ;;  %v6702_v31 = vadd.f32 %v12188_v61, %v6538_v6 }
 0x852   : > { %v6543_v39 = vpop.f32.mrf.mxu1 }
 0x853   : > { %7056 = vst [vmem:[%s12057_s19 + $0x160] sm:$0xff] %v7578_v29  ;;  %v6703_v63 = vadd.f32 %v13166_v0, %v6540_v44  ;;  %v6544_v2 = vadd.f32 %v6543_v39, %v6260_v60  ;;  %v6266_v41 = vpop.f32.mrf.mxu0 }
 0x854   : > { %v6545_v22 = vpop.f32.mrf.mxu1 }
 0x855   : > { %v7579_v10 = vpack.c.bf16 %v6703_v63, %v6702_v31  ;;  %v6546_v4 = vadd.f32 %v6545_v22, %v6262_v9  ;;  %v6270_v14 = vpop.f32.mrf.mxu0  ;;  %v6704_v55 = vadd.f32 %v13167_v57, %v6544_v2 }
 0x856   : > { %v6547_v18 = vpop.f32.mrf.mxu1 }
 0x857   : > { %7057 = vst [vmem:[%s12057_s19 + $0x168] sm:$0xff] %v7579_v10  ;;  %v6705_v28 = vadd.f32 %v13168_v20, %v6546_v4  ;;  %v6548_v47 = vadd.f32 %v6547_v18, %v6264_v62  ;;  %v6272_v17 = vpop.f32.mrf.mxu0 }
 0x858   : > { %v6549_v53 = vpop.f32.mrf.mxu1 }
 0x859   : > { %v7580_v61 = vpack.c.bf16 %v6705_v28, %v6704_v55  ;;  %v6550_v38 = vadd.f32 %v6549_v53, %v6266_v41  ;;  %v6706_v34 = vadd.f32 %v13169_v11, %v6548_v47  ;;  %v6274_v42 = vpop.f32.mrf.mxu0 }
 0x85a   : > { %v6553_v52 = vpop.f32.mrf.mxu1 }
 0x85b   : > { %7058 = vst [vmem:[%s12057_s19 + $0x170] sm:$0xff] %v7580_v61  ;;  %v6707_v58 = vadd.f32 %v13170_v25, %v6550_v38  ;;  %v6554_v56 = vadd.f32 %v6553_v52, %v6270_v14  ;;  %v6276_v15 = vpop.f32.mrf.mxu0 }
 0x85c   : > { %v6555_v36 = vpop.f32.mrf.mxu1 }
 0x85d   : > { %v7581_v27 = vpack.c.bf16 %v6707_v58, %v6706_v34  ;;  %v6556_v3 = vadd.f32 %v6555_v36, %v6272_v17  ;;  %v6708_v30 = vadd.f32 %v13171_v26, %v6554_v56 }
 0x85e   : > { %v6557_v37 = vpop.f32.mrf.mxu1 }
 0x85f   : > { %7059 = vst [vmem:[%s12057_s19 + $0x178] sm:$0xff] %v7581_v27  ;;  %v6709_v23 = vadd.f32 %v13172_v24, %v6556_v3  ;;  %v6558_v40 = vadd.f32 %v6557_v37, %v6274_v42 }
 0x860   : > { %v6559_v33 = vpop.f32.mrf.mxu1 }
 0x861   : > { %v7582_v51 = vpack.c.bf16 %v6709_v23, %v6708_v30  ;;  %v6560_v50 = vadd.f32 %v6559_v33, %v6276_v15  ;;  %v6710_v19 = vadd.f32 %v12216_v12, %v6558_v40 }
 0x863   : > { %7060 = vst [vmem:[%s12057_s19 + $0x180] sm:$0xff] %v7582_v51  ;;  %v6711_v46 = vadd.f32 %v12218_v13, %v6560_v50 }
 0x865   : > { %v7583_v1 = vpack.c.bf16 %v6711_v46, %v6710_v19 }
 0x867   : > { %7061 = vst [vmem:[%s12057_s19 + $0x188] sm:$0xff] %v7583_v1 }
 0x868   : > { %8260 = shalt.err (!%p8257_p3)
}
 0x869   : > { %s8261_s20 = scalar_lea.hbm %s12303_s17, 6400  ;;  %s8265_s23 = scalar_lea.hbm %s12357_s7, 12800 }
 0x86a   : > { %p8262_p2 = scmp.ne.s32.totalorder %s12303_s17, %s8261_s20  ;;  %p8266_p6 = scmp.lt.s32.totalorder %s12303_s17, %s12357_s7 }
 0x86b   : > { %p8267_p9 = scmp.lt.s32.totalorder %s8265_s23, %s8261_s20 }
 0x86c   : > { %p8263_p4 = pnand %p8262_p2, %p8412_p5 }
 0x86d   : > { %p8268_p10 = por %p8267_p9, %p8266_p6 }
 0x86e   : > { %p8264_p13 = pneg %p8263_p4 }
 0x870   : > { %p8269_p12 = pnand %p8268_p10, %p8264_p13 }
 0x872   : > { %8272 = shalt.err (!%p8269_p12)
}
 0x873   : > { %s8332_s9 = smov 128   ;;  %s8333_s14 = smov 8  }
 0x874   : > { %7696 = dma.vmem_to_hbm [thread:$0]  (%p8412_p5), %s12305_s8, 6400, %s12303_s17, %s12310_s28, %s8332_s9, %s8332_s9, %s8333_s14  }
 0x875 PF: > { %p7713_p7 = scmp.ge.s32.totalorder %s8315_s27, 2  ;;  %s7092_s15 = sand.u32 1, %s8303_s24  }
 0x876   : > { %p13173_p8 = scmp.ne.s32.totalorder %s12493_s12, 0  ;;  %s7093_s13 = scalar_lea.sflag [#allocation4], %s7092_s15 }
 0x878   : > { %p7706_p11 = pnand %p7713_p7, %p13173_p8 }
 0x87a   : > { %p7707_p0 = pneg %p7706_p11 }
 0x87c   : > { %8298 = dma.done.wait (%p7707_p0), %s7093_s13, 6400  }
 0x87d   : > { %8300 = vsyncadd (%p7707_p0), %s7093_s13, 4294960896  ;;  %p19_p1 = scmp.ge.s32.totalorder %s8399_s30, 4   ;;  %s13174_s24 = smov %s8307_s25 }
 0x87e   : > { %s13175_s25 = smov %s8311_s26  ;;  %s13176_s26 = smov %s8410_s10 }
 0x87f   : > { %s13177_s27 = smov %s8399_s30  ;;  %21 = sbr.rel (!%p19_p1) target bundleno = 5 (0x5), region = 92 }
 0x884   :  { %7098 = vsyncpa [#allocation3], 1 }
 0x885   :  { %7100 = vsyncpa [#allocation3 + $0x1], 1 }
 0x886   :  { %7101 = vsyncpa [#allocation6], 1 }
 0x887   :  { %7102 = vsyncpa [#allocation4], 1 }
 0x888   :  { %7104 = vsyncpa [#allocation4 + $0x1], 1 }

</bundles_post_ra>
